<compile_context>
chip_gen: v7x
topology: tpu7x:2x2x1
jax: 0.10.0
libtpu: 0.0.40
codegen_flags: <defaults>
</compile_context>

<pallas_src>
import jax
import jax.numpy as jnp
from jax.experimental import pallas as pl
from jax.experimental.pallas import tpu as pltpu

D_IN = 784       # 28*28, kept unpadded (784 % 8 == 0; full-dim block is legal)
D_H_P = 896      # 800 padded to 7*128
D_OUT_P = 128    # 10 padded to 128 (lane-dense output store)
NEG = -1e30      # mask value for padded logit columns
TB_MAX = 512     # max batch tile; per-step overhead amortized, VMEM < 15 MiB


def _choose_tb(batch):
    """Batch tile: big enough to amortize per-grid-step overhead, small enough
    that the grid has >= 2 blocks (so v7x's 2 TensorCores both get work)."""
    if batch <= 128:
        return 128
    half = -(-batch // 2)              # cdiv(batch, 2)
    half = -(-half // 128) * 128       # round up to a multiple of 128
    return min(TB_MAX, half)


def _mlp_kernel(x_ref, w1_ref, b1_ref, w2_ref, b2_ref, w3_ref, b3_ref, o_ref):
    """One batch tile of the forward pass (all weights VMEM-resident).

    x_ref : (TB, 784)      f32  (cast to bf16 in-kernel)
    w1_ref: (784, 896)     bf16   b1_ref: (1, 896) f32
    w2_ref: (896, 896)     bf16   b2_ref: (1, 896) f32
    w3_ref: (896, 128)     bf16   b3_ref: (1, 128) f32 (cols >= 10 are -1e30)
    o_ref : (TB, 128)      f32    (log-probabilities; cols >= 10 are junk)
    """
    # In-kernel bf16 cast of the activations (saves a wrapper-side HBM pass).
    x = x_ref[...].astype(jnp.bfloat16)

    # fc1 + relu (bf16 MXU operands, f32 accumulation; relu+cast fused so the
    # f32 intermediate has the shortest possible live range)
    h1 = jnp.dot(x, w1_ref[...], preferred_element_type=jnp.float32) + b1_ref[...]
    h1 = jnp.maximum(h1, 0.0).astype(jnp.bfloat16)

    # dropout(p=0.5) -> identity (eval mode)

    # fc2 + relu
    h2 = jnp.dot(h1, w2_ref[...], preferred_element_type=jnp.float32) + b2_ref[...]
    h2 = jnp.maximum(h2, 0.0).astype(jnp.bfloat16)

    # fc3 (padded logit columns get bias -1e30 -> exp underflows to 0)
    logits = jnp.dot(h2, w3_ref[...], preferred_element_type=jnp.float32) + b3_ref[...]

    # log_softmax along the 128-wide lane-dense tile (exact for real columns)
    m = jnp.max(logits, axis=-1, keepdims=True)
    shifted = logits - m
    lse = jnp.log(jnp.sum(jnp.exp(shifted), axis=-1, keepdims=True))
    o_ref[...] = (shifted - lse).astype(o_ref.dtype)


def prepare_params(w1, b1, w2, b2, w3, b3):
    """One-time parameter prep: transpose, pad to lane multiples, cast to bf16.

    nn.Linear stores W as (out, in); kernel computes x @ W.T, so pre-transpose.
    The contraction dim of w1 stays 784 (matches the unpadded x block).
    """
    w1 = jnp.asarray(w1, jnp.float32)   # (800, 784)
    w2 = jnp.asarray(w2, jnp.float32)   # (800, 800)
    w3 = jnp.asarray(w3, jnp.float32)   # (10, 800)
    b1 = jnp.asarray(b1, jnp.float32).reshape(1, -1)
    b2 = jnp.asarray(b2, jnp.float32).reshape(1, -1)
    b3 = jnp.asarray(b3, jnp.float32).reshape(1, -1)

    w1t = jnp.pad(w1.T, ((0, 0), (0, D_H_P - 800))).astype(jnp.bfloat16)            # (784, 896)
    w2t = jnp.pad(w2.T, ((0, D_H_P - 800), (0, D_H_P - 800))).astype(jnp.bfloat16)  # (896, 896)
    w3t = jnp.pad(w3.T, ((0, D_H_P - 800), (0, D_OUT_P - 10))).astype(jnp.bfloat16) # (896, 128)

    b1p = jnp.pad(b1, ((0, 0), (0, D_H_P - 800)))
    b2p = jnp.pad(b2, ((0, 0), (0, D_H_P - 800)))
    b3p = jnp.pad(b3, ((0, 0), (0, D_OUT_P - 10)), constant_values=NEG)
    return w1t, b1p, w2t, b2p, w3t, b3p


@jax.jit
def network_forward(x, w1t, b1p, w2t, b2p, w3t, b3p):
    """x: (B, 1, 28, 28) (or any shape with 784 trailing elems per row)."""
    B = x.shape[0]
    x2d = x.reshape(B, D_IN).astype(jnp.float32)

    TB = _choose_tb(B)
    pad_rows = (-B) % TB
    if pad_rows:                         # only pad the batch dim, only if needed
        x2d = jnp.pad(x2d, ((0, pad_rows), (0, 0)))
    b_pad = B + pad_rows
    n_blocks = b_pad // TB

    cost = pl.CostEstimate(
        flops=2 * b_pad * (D_IN * D_H_P + D_H_P * D_H_P + D_H_P * D_OUT_P),
        transcendentals=b_pad * D_OUT_P,
        bytes_accessed=(b_pad * D_IN * 4
                        + (w1t.size + w2t.size + w3t.size) * 2
                        + (b1p.size + b2p.size + b3p.size) * 4
                        + b_pad * D_OUT_P * 4),
    )

    # Weights/biases: constant block index -> fetched once and kept VMEM-resident
    # across the whole grid (the pipeliner skips re-copies of unchanged blocks).
    const = lambda shape: pl.BlockSpec(shape, lambda i: (0, 0))

    out = pl.pallas_call(
        _mlp_kernel,
        out_shape=jax.ShapeDtypeStruct((b_pad, D_OUT_P), jnp.float32),
        grid=(n_blocks,),
        in_specs=[
            pl.BlockSpec((TB, D_IN), lambda i: (i, 0)),   # x tile (f32, unpadded K)
            const((D_IN, D_H_P)),                         # w1 (resident)
            const((1, D_H_P)),                            # b1
            const((D_H_P, D_H_P)),                        # w2 (resident)
            const((1, D_H_P)),                            # b2
            const((D_H_P, D_OUT_P)),                      # w3 (resident)
            const((1, D_OUT_P)),                          # b3
        ],
        out_specs=pl.BlockSpec((TB, D_OUT_P), lambda i: (i, 0)),
        compiler_params=pltpu.CompilerParams(
            dimension_semantics=("parallel",),
            vmem_limit_bytes=32 << 20,
        ),
        cost_estimate=cost,
    )(x2d, w1t, b1p, w2t, b2p, w3t, b3p)

    return out[:B, :10]


def _init_params(key):
    """Deterministic parameter init mimicking nn.Linear's U(-1/sqrt(in), 1/sqrt(in))."""
    ks = jax.random.split(key, 6)

    def linear(kw, kb, fan_in, fan_out):
        bound = 1.0 / jnp.sqrt(fan_in)
        w = jax.random.uniform(kw, (fan_out, fan_in), jnp.float32, -bound, bound)
        b = jax.random.uniform(kb, (fan_out,), jnp.float32, -bound, bound)
        return w, b

    w1, b1 = linear(ks[0], ks[1], 784, 800)
    w2, b2 = linear(ks[2], ks[3], 800, 800)
    w3, b3 = linear(ks[4], ks[5], 800, 10)
    return w1, b1, w2, b2, w3, b3


def _reference(x, w1, b1, w2, b2, w3, b3):
    """Pure-JAX f32 reference for a sanity check."""
    B = x.shape[0]
    x2d = x.reshape(B, 784).astype(jnp.float32)
    h1 = jnp.maximum(x2d @ w1.T + b1, 0.0)
    h2 = jnp.maximum(h1 @ w2.T + b2, 0.0)
    logits = h2 @ w3.T + b3
    return jax.nn.log_softmax(logits, axis=1)


if __name__ == "__main__":
    key = jax.random.PRNGKey(0)
    k_params, k_x1, k_x2 = jax.random.split(key, 3)

    raw_params = _init_params(k_params)
    params = prepare_params(*raw_params)   # one-time transpose/pad/cast

    # Small MNIST-like batch (PyTorch NCHW): (8, 1, 28, 28) -> TB=128, 1 block.
    x_small = jax.random.normal(k_x1, (8, 1, 28, 28), jnp.float32)
    out_small = jax.block_until_ready(network_forward(x_small, *params))
    ref_small = _reference(x_small, *raw_params)
    assert out_small.shape == (8, 10)
    # bf16 matmul operands (f32 accumulation) -> loose but meaningful tolerance.
    assert jnp.allclose(out_small, ref_small, atol=2e-2, rtol=2e-2), "mismatch (small batch)"

    # Larger batch exercising the multi-block "parallel" grid path and the
    # batch-dim padding (260 -> TB=256, 2 grid blocks).
    x_big = jax.random.normal(k_x2, (260, 1, 28, 28), jnp.float32)
    out_big = jax.block_until_ready(network_forward(x_big, *params))
    ref_big = _reference(x_big, *raw_params)
    assert out_big.shape == (260, 10)
    assert jnp.allclose(out_big, ref_big, atol=2e-2, rtol=2e-2), "mismatch (big batch)"

    print("KERNEL_OK")
</pallas_src>

<mosaic_0001>
module attributes {stable_mosaic.version = 11 : i64} {
  func.func @_mlp_kernel(%arg0: i32, %arg1: memref<128x784xf32, #tpu.memory_space<vmem>>, %arg2: memref<784x896xbf16, #tpu.memory_space<vmem>>, %arg3: memref<1x896xf32, #tpu.memory_space<vmem>>, %arg4: memref<896x896xbf16, #tpu.memory_space<vmem>>, %arg5: memref<1x896xf32, #tpu.memory_space<vmem>>, %arg6: memref<896x128xbf16, #tpu.memory_space<vmem>>, %arg7: memref<1x128xf32, #tpu.memory_space<vmem>>, %arg8: memref<128x128xf32, #tpu.memory_space<vmem>>) attributes {dimension_semantics = [#tpu.dimension_semantics<parallel>], iteration_bounds = array<i64: 1>, scalar_prefetch = 0 : i64, scratch_operands = 0 : i64, tpu.core_type = #tpu.core_type<tc>, window_params = [{transform_indices = @transform_0, window_bounds = array<i64: 128, 784>}, {pipeline_mode = #tpu.pipeline_mode<synchronous>, transform_indices = @transform_1, window_bounds = array<i64: 784, 896>}, {pipeline_mode = #tpu.pipeline_mode<synchronous>, transform_indices = @transform_2, window_bounds = array<i64: 1, 896>}, {pipeline_mode = #tpu.pipeline_mode<synchronous>, transform_indices = @transform_3, window_bounds = array<i64: 896, 896>}, {pipeline_mode = #tpu.pipeline_mode<synchronous>, transform_indices = @transform_4, window_bounds = array<i64: 1, 896>}, {pipeline_mode = #tpu.pipeline_mode<synchronous>, transform_indices = @transform_5, window_bounds = array<i64: 896, 128>}, {pipeline_mode = #tpu.pipeline_mode<synchronous>, transform_indices = @transform_6, window_bounds = array<i64: 1, 128>}, {transform_indices = @transform_7, window_bounds = array<i64: 128, 128>}]} {
    %c0 = arith.constant 0 : index
    %c0_0 = arith.constant 0 : index
    %0 = vector.load %arg1[%c0, %c0_0] : memref<128x784xf32, #tpu.memory_space<vmem>>, vector<128x784xf32>
    %1 = arith.truncf %0 : vector<128x784xf32> to vector<128x784xbf16>
    %c0_1 = arith.constant 0 : index
    %c0_2 = arith.constant 0 : index
    %2 = vector.load %arg2[%c0_1, %c0_2] : memref<784x896xbf16, #tpu.memory_space<vmem>>, vector<784x896xbf16>
    %cst = arith.constant dense<0.000000e+00> : vector<128x896xf32>
    %3 = tpu.matmul %1, %2, %cst {dimension_numbers = #tpu.dot_dimension_numbers<[1], [0], [0], [1], [0, 0, 1, 1], [], []>} : vector<128x784xbf16>, vector<784x896xbf16>, vector<128x896xf32> -> vector<128x896xf32>
    %c0_3 = arith.constant 0 : index
    %c0_4 = arith.constant 0 : index
    %4 = vector.load %arg3[%c0_3, %c0_4] : memref<1x896xf32, #tpu.memory_space<vmem>>, vector<1x896xf32>
    %5 = vector.broadcast %4 : vector<1x896xf32> to vector<128x896xf32>
    %6 = arith.addf %3, %5 : vector<128x896xf32>
    %cst_5 = arith.constant 0.000000e+00 : f32
    %7 = vector.broadcast %cst_5 : f32 to vector<128x896xf32>
    %8 = arith.maximumf %6, %7 : vector<128x896xf32>
    %9 = arith.truncf %8 : vector<128x896xf32> to vector<128x896xbf16>
    %c0_6 = arith.constant 0 : index
    %c0_7 = arith.constant 0 : index
    %10 = vector.load %arg4[%c0_6, %c0_7] : memref<896x896xbf16, #tpu.memory_space<vmem>>, vector<896x896xbf16>
    %cst_8 = arith.constant dense<0.000000e+00> : vector<128x896xf32>
    %11 = tpu.matmul %9, %10, %cst_8 {dimension_numbers = #tpu.dot_dimension_numbers<[1], [0], [0], [1], [0, 0, 1, 1], [], []>} : vector<128x896xbf16>, vector<896x896xbf16>, vector<128x896xf32> -> vector<128x896xf32>
    %c0_9 = arith.constant 0 : index
    %c0_10 = arith.constant 0 : index
    %12 = vector.load %arg5[%c0_9, %c0_10] : memref<1x896xf32, #tpu.memory_space<vmem>>, vector<1x896xf32>
    %13 = vector.broadcast %12 : vector<1x896xf32> to vector<128x896xf32>
    %14 = arith.addf %11, %13 : vector<128x896xf32>
    %cst_11 = arith.constant 0.000000e+00 : f32
    %15 = vector.broadcast %cst_11 : f32 to vector<128x896xf32>
    %16 = arith.maximumf %14, %15 : vector<128x896xf32>
    %17 = arith.truncf %16 : vector<128x896xf32> to vector<128x896xbf16>
    %c0_12 = arith.constant 0 : index
    %c0_13 = arith.constant 0 : index
    %18 = vector.load %arg6[%c0_12, %c0_13] : memref<896x128xbf16, #tpu.memory_space<vmem>>, vector<896x128xbf16>
    %cst_14 = arith.constant dense<0.000000e+00> : vector<128x128xf32>
    %19 = tpu.matmul %17, %18, %cst_14 {dimension_numbers = #tpu.dot_dimension_numbers<[1], [0], [0], [1], [0, 0, 1, 1], [], []>} : vector<128x896xbf16>, vector<896x128xbf16>, vector<128x128xf32> -> vector<128x128xf32>
    %c0_15 = arith.constant 0 : index
    %c0_16 = arith.constant 0 : index
    %20 = vector.load %arg7[%c0_15, %c0_16] : memref<1x128xf32, #tpu.memory_space<vmem>>, vector<1x128xf32>
    %21 = vector.broadcast %20 : vector<1x128xf32> to vector<128x128xf32>
    %22 = arith.addf %19, %21 : vector<128x128xf32>
    %cst_17 = arith.constant dense<0xFF800000> : vector<128xf32>
    %23 = vector.multi_reduction <maximumf>, %22, %cst_17 [1] : vector<128x128xf32> to vector<128xf32>
    %24 = vector.shape_cast %23 : vector<128xf32> to vector<128x1xf32>
    %25 = vector.broadcast %24 : vector<128x1xf32> to vector<128x128xf32>
    %26 = arith.subf %22, %25 : vector<128x128xf32>
    %27 = math.exp %26 : vector<128x128xf32>
    %cst_18 = arith.constant dense<0.000000e+00> : vector<128xf32>
    %28 = vector.multi_reduction <add>, %27, %cst_18 [1] : vector<128x128xf32> to vector<128xf32>
    %29 = vector.shape_cast %28 : vector<128xf32> to vector<128x1xf32>
    %30 = math.log %29 : vector<128x1xf32>
    %31 = vector.broadcast %30 : vector<128x1xf32> to vector<128x128xf32>
    %32 = arith.subf %26, %31 : vector<128x128xf32>
    %c0_19 = arith.constant 0 : index
    %c0_20 = arith.constant 0 : index
    %33 = vector.load %arg8[%c0_19, %c0_20] : memref<128x128xf32, #tpu.memory_space<vmem>>, vector<128x128xf32>
    tpu.vector_store %arg8[%c0_19, %c0_20], %32 {strides = array<i32>} : memref<128x128xf32, #tpu.memory_space<vmem>>, vector<128x128xf32>,
    return
  }
  func.func @transform_0(%arg0: i32) -> (i32, i32) {
    %c0_i32 = arith.constant 0 : i32
    %c0_i32_0 = arith.constant 0 : i32
    return %arg0, %c0_i32 : i32, i32
  }
  func.func @transform_1(%arg0: i32) -> (i32, i32) {
    %c0_i32 = arith.constant 0 : i32
    %c0_i32_0 = arith.constant 0 : i32
    %c0_i32_1 = arith.constant 0 : i32
    return %c0_i32, %c0_i32_0 : i32, i32
  }
  func.func @transform_2(%arg0: i32) -> (i32, i32) {
    %c0_i32 = arith.constant 0 : i32
    %c0_i32_0 = arith.constant 0 : i32
    %c0_i32_1 = arith.constant 0 : i32
    return %c0_i32, %c0_i32_0 : i32, i32
  }
  func.func @transform_3(%arg0: i32) -> (i32, i32) {
    %c0_i32 = arith.constant 0 : i32
    %c0_i32_0 = arith.constant 0 : i32
    %c0_i32_1 = arith.constant 0 : i32
    return %c0_i32, %c0_i32_0 : i32, i32
  }
  func.func @transform_4(%arg0: i32) -> (i32, i32) {
    %c0_i32 = arith.constant 0 : i32
    %c0_i32_0 = arith.constant 0 : i32
    %c0_i32_1 = arith.constant 0 : i32
    return %c0_i32, %c0_i32_0 : i32, i32
  }
  func.func @transform_5(%arg0: i32) -> (i32, i32) {
    %c0_i32 = arith.constant 0 : i32
    %c0_i32_0 = arith.constant 0 : i32
    %c0_i32_1 = arith.constant 0 : i32
    return %c0_i32, %c0_i32_0 : i32, i32
  }
  func.func @transform_6(%arg0: i32) -> (i32, i32) {
    %c0_i32 = arith.constant 0 : i32
    %c0_i32_0 = arith.constant 0 : i32
    %c0_i32_1 = arith.constant 0 : i32
    return %c0_i32, %c0_i32_0 : i32, i32
  }
  func.func @transform_7(%arg0: i32) -> (i32, i32) {
    %c0_i32 = arith.constant 0 : i32
    %c0_i32_0 = arith.constant 0 : i32
    return %arg0, %c0_i32 : i32, i32
  }
}

</mosaic_0001>

<bundles_post_ra>
// kernel: network_forward.1
= control target key start
LH: loop header
LB: loop body
LE: loop exit
PB: predicated region body
PF: predicated region fallthrough
CT: control target
= control target key end

     0   :  { %12 = vsyncpa [#allocation3], 0  ;;  %s15617_s0 = inlined_call_operand.vmem [shape: f32[128,784], index: 0, kind: input, shape index: {}]   ;;  %s15618_s1 = inlined_call_operand.hbm [shape: bf16[784,896], index: 1, kind: input, shape index: {}]   ;;  %s15619_s2 = inlined_call_operand.hbm [shape: f32[1,896], index: 2, kind: input, shape index: {}]   ;;  %s15620_s3 = inlined_call_operand.hbm [shape: bf16[896,896], index: 3, kind: input, shape index: {}]   ;;  %s15621_s4 = inlined_call_operand.hbm [shape: f32[1,896], index: 4, kind: input, shape index: {}]   ;;  %s15622_s5 = inlined_call_operand.hbm [shape: bf16[896,128], index: 5, kind: input, shape index: {}]   ;;  %s15623_s6 = inlined_call_operand.hbm [shape: f32[1,128], index: 6, kind: input, shape index: {}]   ;;  %s15624_s7 = inlined_call_operand.vmem [shape: f32[128,128], index: 7, kind: output, shape index: {}]  }
   0x1   :  { %13 = vsyncpa [#allocation5], 0 }
   0x2   :  { %14 = vsyncpa [#allocation8], 0 }
   0x3   :  { %15 = vsyncpa [#allocation11], 0  ;;  %s13455_s24 = smov [#allocation4]   ;;  %s13456_s26 = smov [#allocation7]  }
   0x4   :  { %s36_s25 = sshll.u32 %s13455_s24, 4  ;;  %s58_s27 = sshll.u32 %s13456_s26, 4  ;;  %s37_s25 = int_to_ptr.vmem [resolvable:$true] %s36_s25  ;;  %s59_s27 = int_to_ptr.vmem [resolvable:$true] %s58_s27 }
   0x5   :  { %s13315_s30 = scalar_lea.hbm %s15619_s2, 112 }
   0x6   :  { %p13316_p0 = scmp.ne.s32.totalorder %s15619_s2, %s13315_s30  ;;  %p13319_p1 = scmp.lt.u32.totalorder %s13315_s30, %s15619_s2 }
   0x8   :  { %p13321_p2 = pnand %p13319_p1, %p13316_p0 }
   0xa   :  { %13324 = shalt.err (!%p13321_p2)
}
   0xb   :  { %s13325_s12 = scalar_lea.vmem %s37_s25, 112  ;;  %s13329_s13 = scalar_lea.vmem %s37_s25, 128 }
   0xc   :  { %p13326_p3 = scmp.ne.s32.totalorder %s37_s25, %s13325_s12  ;;  %p13330_p4 = scmp.lt.s32.totalorder %s37_s25, %s37_s25 }
   0xd   :  { %p13331_p5 = scmp.lt.s32.totalorder %s13329_s13, %s13325_s12 }
   0xf   :  { %p13332_p6 = por %p13331_p5, %p13330_p4 }
  0x11   :  { %p13333_p7 = pnand %p13332_p6, %p13326_p3 }
  0x13   :  { %13336 = shalt.err (!%p13333_p7)
}
  0x14   :  { %39 = dma.hbm_to_vmem [thread:$0]  %s15619_s2, 112, %s37_s25, [#allocation5]  }
  0x15   :  { %s13337_s18 = scalar_lea.hbm %s15621_s4, 112 }
  0x16   :  { %p13338_p8 = scmp.ne.s32.totalorder %s15621_s4, %s13337_s18  ;;  %p13341_p9 = scmp.lt.u32.totalorder %s13337_s18, %s15621_s4 }
  0x18   :  { %p13343_p10 = pnand %p13341_p9, %p13338_p8 }
  0x1a   :  { %13346 = shalt.err (!%p13343_p10)
}
  0x1b   :  { %s13347_s23 = scalar_lea.vmem %s59_s27, 112  ;;  %s13351_s24 = scalar_lea.vmem %s59_s27, 128 }
  0x1c   :  { %p13348_p11 = scmp.ne.s32.totalorder %s59_s27, %s13347_s23  ;;  %p13352_p12 = scmp.lt.s32.totalorder %s59_s27, %s59_s27 }
  0x1d   :  { %p13353_p13 = scmp.lt.s32.totalorder %s13351_s24, %s13347_s23 }
  0x1f   :  { %p13354_p0 = por %p13353_p13, %p13352_p12 }
  0x21   :  { %p13355_p1 = pnand %p13354_p0, %p13348_p11 }
  0x23   :  { %13358 = shalt.err (!%p13355_p1)
}
  0x24   :  { %61 = dma.hbm_to_vmem [thread:$0]  %s15621_s4, 112, %s59_s27, [#allocation8]  }
  0x25   :  { %s13457_s26 = smov [#allocation2]   ;;  %s13359_s8 = scalar_lea.hbm %s15618_s1, 43904 }
  0x26   :  { %s23_s28 = sshll.u32 %s13457_s26, 4  ;;  %p13360_p2 = scmp.ne.s32.totalorder %s15618_s1, %s13359_s8  ;;  %s24_s28 = int_to_ptr.vmem [resolvable:$true] %s23_s28 }
  0x27   :  { %p13363_p3 = scmp.lt.u32.totalorder %s13359_s8, %s15618_s1 }
  0x29   :  { %p13365_p4 = pnand %p13363_p3, %p13360_p2 }
  0x2b   :  { %13368 = shalt.err (!%p13365_p4)
}
  0x2c   :  { %s13369_s13 = scalar_lea.vmem %s24_s28, 43904  ;;  %p13374_p6 = scmp.lt.s32.totalorder %s24_s28, %s24_s28 }
  0x2d   :  { %p13370_p5 = scmp.ne.s32.totalorder %s24_s28, %s13369_s13  ;;  %p13375_p7 = scmp.lt.s32.totalorder %s13369_s13, %s13369_s13 }
  0x2f   :  { %p13376_p8 = por %p13375_p7, %p13374_p6 }
  0x31   :  { %p13377_p9 = pnand %p13376_p8, %p13370_p5 }
  0x33   :  { %13380 = shalt.err (!%p13377_p9)
}
  0x34   :  { %s13458_s4 = smov 448   ;;  %s13459_s27 = smov 28  }
  0x35   :  { %29 = dma.hbm_to_vmem [thread:$0]  %s15618_s1, 43904, %s24_s28, [#allocation3], %s13458_s4, %s13458_s4, %s13459_s27  }
  0x36   :  { %s13460_s16 = smov [#allocation6]   ;;  %s13461_s18 = smov [#allocation9]  }
  0x37   :  { %s45_s17 = sshll.u32 %s13460_s16, 4  ;;  %s67_s19 = sshll.u32 %s13461_s18, 4  ;;  %s46_s17 = int_to_ptr.vmem [resolvable:$true] %s45_s17  ;;  %s68_s19 = int_to_ptr.vmem [resolvable:$true] %s67_s19 }
  0x38   :  { %s13381_s22 = scalar_lea.hbm %s15620_s3, 50176 }
  0x39   :  { %p13382_p10 = scmp.ne.s32.totalorder %s15620_s3, %s13381_s22  ;;  %p13385_p11 = scmp.lt.u32.totalorder %s13381_s22, %s15620_s3 }
  0x3b   :  { %p13387_p12 = pnand %p13385_p11, %p13382_p10 }
  0x3d   :  { %13390 = shalt.err (!%p13387_p12)
}
  0x3e   :  { %s13391_s1 = scalar_lea.vmem %s46_s17, 50176  ;;  %p13396_p0 = scmp.lt.s32.totalorder %s46_s17, %s46_s17 }
  0x3f   :  { %p13392_p13 = scmp.ne.s32.totalorder %s46_s17, %s13391_s1  ;;  %p13397_p1 = scmp.lt.s32.totalorder %s13391_s1, %s13391_s1 }
  0x41   :  { %p13398_p2 = por %p13397_p1, %p13396_p0 }
  0x43   :  { %p13399_p3 = pnand %p13398_p2, %p13392_p13 }
  0x45   :  { %13402 = shalt.err (!%p13399_p3)
}
  0x46   :  { %51 = dma.hbm_to_vmem [thread:$0]  %s15620_s3, 50176, %s46_s17, [#allocation5], %s13458_s4, %s13458_s4, %s13459_s27  }
  0x47   :  { %s13403_s8 = scalar_lea.hbm %s15622_s5, 7168 }
  0x48   :  { %p13404_p4 = scmp.ne.s32.totalorder %s15622_s5, %s13403_s8  ;;  %p13407_p5 = scmp.lt.u32.totalorder %s13403_s8, %s15622_s5 }
  0x4a   :  { %p13409_p6 = pnand %p13407_p5, %p13404_p4 }
  0x4c   :  { %13412 = shalt.err (!%p13409_p6)
}
  0x4d   :  { %s13413_s13 = scalar_lea.vmem %s68_s19, 7168  ;;  %p13418_p8 = scmp.lt.s32.totalorder %s68_s19, %s68_s19 }
  0x4e   :  { %p13414_p7 = scmp.ne.s32.totalorder %s68_s19, %s13413_s13  ;;  %p13419_p9 = scmp.lt.s32.totalorder %s13413_s13, %s13413_s13 }
  0x50   :  { %p13420_p10 = por %p13419_p9, %p13418_p8 }
  0x52   :  { %p13421_p11 = pnand %p13420_p10, %p13414_p7 }
  0x54   :  { %13424 = shalt.err (!%p13421_p11)
}
  0x55   :  { %s13462_s3 = smov 64   ;;  %s13463_s4 = smov 4  }
  0x56   :  { %73 = dma.hbm_to_vmem [thread:$0]  %s15622_s5, 7168, %s68_s19, [#allocation8], %s13462_s3, %s13462_s3, %s13463_s4  }
  0x57   :  { %s13464_s15 = smov [#allocation10]   ;;  %s13425_s20 = scalar_lea.hbm %s15623_s6, 16 }
  0x58   :  { %s80_s16 = sshll.u32 %s13464_s15, 4  ;;  %p13426_p12 = scmp.ne.s32.totalorder %s15623_s6, %s13425_s20  ;;  %s81_s16 = int_to_ptr.vmem [resolvable:$true] %s80_s16 }
  0x59   :  { %p13429_p13 = scmp.lt.u32.totalorder %s13425_s20, %s15623_s6 }
  0x5b   :  { %p13431_p0 = pnand %p13429_p13, %p13426_p12 }
  0x5d   :  { %13434 = shalt.err (!%p13431_p0)
}
  0x5e   :  { %s13435_s2 = scalar_lea.vmem %s81_s16, 16  ;;  %s13439_s5 = scalar_lea.vmem %s81_s16, 32 }
  0x5f   :  { %p13436_p1 = scmp.ne.s32.totalorder %s81_s16, %s13435_s2  ;;  %p13440_p2 = scmp.lt.s32.totalorder %s81_s16, %s81_s16 }
  0x60   :  { %p13441_p3 = scmp.lt.s32.totalorder %s13439_s5, %s13435_s2 }
  0x62   :  { %p13442_p4 = por %p13441_p3, %p13440_p2 }
  0x64   :  { %p13443_p5 = pnand %p13442_p4, %p13436_p1 }
  0x66   :  { %13446 = shalt.err (!%p13443_p5)
}
  0x67   :  { %83 = dma.hbm_to_vmem [thread:$0]  %s15623_s6, 16, %s81_s16, [#allocation11]  }
  0x68   :  { %13447 = dma.done.wait [#allocation3], 43904  }
  0x69   :  { %13448 = vsyncadd [#allocation3], 4294923392 }
  0x6a   :  { %13449 = dma.done.wait [#allocation5], 50288  }
  0x6b   :  { %13450 = vsyncadd [#allocation5], 4294917008 }
  0x6c   :  { %13451 = dma.done.wait [#allocation8], 7280  }
  0x6d   :  { %13452 = vsyncadd [#allocation8], 4294960016 }
  0x6e   :  { %13453 = dma.done.wait [#allocation11], 16  }
  0x6f   :  { %13454 = vsyncadd [#allocation11], 4294967280  ;;  %v12143_v0 = vld [vmem:[#allocation2 + $0x4] ss:$28 sps:$4 sm:$0xff]   ;;  %v12145_v1 = vld [vmem:[#allocation2 + $0xc] ss:$28 sps:$4 sm:$0xff]  }
  0x70   :  { %2489 = vmatprep.subr.bf16.mxu0 %v12143_v0  ;;  %v12147_v2 = vld [vmem:[#allocation2] ss:$28 sps:$4 sm:$0xff]   ;;  %v12148_v3 = vld [vmem:[#allocation2 + $0x8] ss:$28 sps:$4 sm:$0xff]   ;;  %2941 = vmatprep.subr.bf16.mxu1 %v12145_v1  ;;  %v12153_v6 = vld [vmem:[#allocation2 + $0x38] ss:$28 sps:$4 sm:$0xff]  }
  0x71   :  { %v12149_v4 = vld [vmem:[#allocation2 + $0x3c] ss:$28 sps:$4 sm:$0xff]   ;;  %2490 = vmatpush1.bf16.msra.mxu0 %v12147_v2  ;;  %2942 = vmatpush1.bf16.msra.mxu1 %v12148_v3  ;;  %v12151_v5 = vld [vmem:[#allocation2 + $0x44] ss:$28 sps:$4 sm:$0xff]   ;;  %v12155_v8 = vld [vmem:[#allocation2 + $0x74] ss:$28 sps:$4 sm:$0xff]  }
  0x72   :  { %2491 = vmatprep.subr.bf16.mxu0 %v12149_v4  ;;  %v12154_v7 = vld [vmem:[#allocation2 + $0x40] ss:$28 sps:$4 sm:$0xff]   ;;  %2943 = vmatprep.subr.bf16.mxu1 %v12151_v5  ;;  %v12159_v10 = vld [vmem:[#allocation2 + $0x70] ss:$28 sps:$4 sm:$0xff]   ;;  %v12160_v11 = vld [vmem:[#allocation2 + $0x78] ss:$28 sps:$4 sm:$0xff]  }
  0x73   :  { %v12157_v9 = vld [vmem:[#allocation2 + $0x7c] ss:$28 sps:$4 sm:$0xff]   ;;  %v12161_v12 = vld [vmem:[#allocation2 + $0xac] ss:$28 sps:$4 sm:$0xff]   ;;  %v12163_v13 = vld [vmem:[#allocation2 + $0xb4] ss:$28 sps:$4 sm:$0xff]  }
  0x74   :  { %v12165_v14 = vld [vmem:[#allocation2 + $0xa8] ss:$28 sps:$4 sm:$0xff]   ;;  %v12166_v15 = vld [vmem:[#allocation2 + $0xb0] ss:$28 sps:$4 sm:$0xff]   ;;  %v12171_v18 = vld [vmem:[#allocation2 + $0xe0] ss:$28 sps:$4 sm:$0xff]  }
  0x75   :  { %2492 = vmatpush1.bf16.msra.mxu0 %v12153_v6  ;;  %2944 = vmatpush1.bf16.msra.mxu1 %v12154_v7  ;;  %v12167_v16 = vld [vmem:[#allocation2 + $0xe4] ss:$28 sps:$4 sm:$0xff]   ;;  %v12169_v17 = vld [vmem:[#allocation2 + $0xec] ss:$28 sps:$4 sm:$0xff]   ;;  %v12173_v20 = vld [vmem:[#allocation2 + $0x11c] ss:$28 sps:$4 sm:$0xff]  }
  0x76   :  { %2493 = vmatprep.subr.bf16.mxu0 %v12155_v8  ;;  %2945 = vmatprep.subr.bf16.mxu1 %v12157_v9  ;;  %v12172_v19 = vld [vmem:[#allocation2 + $0xe8] ss:$28 sps:$4 sm:$0xff]   ;;  %v12177_v22 = vld [vmem:[#allocation2 + $0x118] ss:$28 sps:$4 sm:$0xff]   ;;  %v12178_v23 = vld [vmem:[#allocation2 + $0x120] ss:$28 sps:$4 sm:$0xff]  }
  0x77   :  { %v12175_v21 = vld [vmem:[#allocation2 + $0x124] ss:$28 sps:$4 sm:$0xff]   ;;  %v12179_v24 = vld [vmem:[#allocation2 + $0x154] ss:$28 sps:$4 sm:$0xff]   ;;  %v12181_v25 = vld [vmem:[#allocation2 + $0x15c] ss:$28 sps:$4 sm:$0xff]  }
  0x78   :  { %v12183_v26 = vld [vmem:[#allocation2 + $0x150] ss:$28 sps:$4 sm:$0xff]   ;;  %v12184_v27 = vld [vmem:[#allocation2 + $0x158] ss:$28 sps:$4 sm:$0xff]   ;;  %v12189_v30 = vld [vmem:[#allocation2 + $0x188] ss:$28 sps:$4 sm:$0xff]  }
  0x79   :  { %2494 = vmatpush1.bf16.msra.mxu0 %v12159_v10  ;;  %2946 = vmatpush1.bf16.msra.mxu1 %v12160_v11  ;;  %v12185_v28 = vld [vmem:[#allocation2 + $0x18c] ss:$28 sps:$4 sm:$0xff]   ;;  %v12187_v29 = vld [vmem:[#allocation2 + $0x194] ss:$28 sps:$4 sm:$0xff]   ;;  %v12191_v32 = vld [vmem:[#allocation2 + $0x1c4] ss:$28 sps:$4 sm:$0xff]  }
  0x7a   :  { %2495 = vmatprep.subr.bf16.mxu0 %v12161_v12  ;;  %2947 = vmatprep.subr.bf16.mxu1 %v12163_v13  ;;  %v12190_v31 = vld [vmem:[#allocation2 + $0x190] ss:$28 sps:$4 sm:$0xff]   ;;  %v12195_v34 = vld [vmem:[#allocation2 + $0x1c0] ss:$28 sps:$4 sm:$0xff]   ;;  %v12196_v35 = vld [vmem:[#allocation2 + $0x1c8] ss:$28 sps:$4 sm:$0xff]  }
  0x7b   :  { %v12193_v33 = vld [vmem:[#allocation2 + $0x1cc] ss:$28 sps:$4 sm:$0xff]   ;;  %v12197_v36 = vld [vmem:[#allocation2 + $0x1fc] ss:$28 sps:$4 sm:$0xff]   ;;  %v12199_v37 = vld [vmem:[#allocation2 + $0x204] ss:$28 sps:$4 sm:$0xff]  }
  0x7c   :  { %v12201_v38 = vld [vmem:[#allocation2 + $0x1f8] ss:$28 sps:$4 sm:$0xff]   ;;  %v12202_v39 = vld [vmem:[#allocation2 + $0x200] ss:$28 sps:$4 sm:$0xff]   ;;  %v12207_v42 = vld [vmem:[#allocation2 + $0x230] ss:$28 sps:$4 sm:$0xff]  }
  0x7d   :  { %2496 = vmatpush1.bf16.msra.mxu0 %v12165_v14  ;;  %2948 = vmatpush1.bf16.msra.mxu1 %v12166_v15  ;;  %v12203_v40 = vld [vmem:[#allocation2 + $0x234] ss:$28 sps:$4 sm:$0xff]   ;;  %v12205_v41 = vld [vmem:[#allocation2 + $0x23c] ss:$28 sps:$4 sm:$0xff]   ;;  %v12209_v44 = vld [vmem:[#allocation2 + $0x26c] ss:$28 sps:$4 sm:$0xff]  }
  0x7e   :  { %2497 = vmatprep.subr.bf16.mxu0 %v12167_v16  ;;  %2949 = vmatprep.subr.bf16.mxu1 %v12169_v17  ;;  %v12208_v43 = vld [vmem:[#allocation2 + $0x238] ss:$28 sps:$4 sm:$0xff]   ;;  %v104_v46 = vld [vmem:[%s15617_s0 + $0x8] sm:$0xff]  ;;  %v111_v49 = vld [vmem:[%s15617_s0 + $0x40] sm:$0xff]  ;;  %vm2464_vm0 = vcmask 130048  }
  0x7f   :  { %v12211_v45 = vld [vmem:[#allocation2 + $0x274] ss:$28 sps:$4 sm:$0xff]   ;;  %v12213_v47 = vld [vmem:[#allocation2 + $0x268] ss:$28 sps:$4 sm:$0xff]   ;;  %v13584_v51 = vpack.c.bf16 %v111_v49, %v104_v46  ;;  %v12219_v53 = vld [vmem:[#allocation2 + $0x2a0] ss:$28 sps:$4 sm:$0xff]  }
  0x80   :  { %v12214_v48 = vld [vmem:[#allocation2 + $0x270] ss:$28 sps:$4 sm:$0xff]   ;;  %v12215_v50 = vld [vmem:[#allocation2 + $0x2a4] ss:$28 sps:$4 sm:$0xff]   ;;  %v12221_v55 = vld [vmem:[#allocation2 + $0x2dc] ss:$28 sps:$4 sm:$0xff]  }
  0x81   :  { %2498 = vmatpush1.bf16.msra.mxu0 %v12171_v18  ;;  %2950 = vmatpush1.bf16.msra.mxu1 %v12172_v19  ;;  %v12217_v52 = vld [vmem:[#allocation2 + $0x2ac] ss:$28 sps:$4 sm:$0xff]   ;;  %v12223_v56 = vld [vmem:[#allocation2 + $0x2e4] ss:$28 sps:$4 sm:$0xff]   ;;  %v12225_v57 = vld [vmem:[#allocation2 + $0x2d8] ss:$28 sps:$4 sm:$0xff]  }
  0x82   :  { %2499 = vmatprep.subr.bf16.mxu0 %v12173_v20  ;;  %2951 = vmatprep.subr.bf16.mxu1 %v12175_v21  ;;  %v12220_v54 = vld [vmem:[#allocation2 + $0x2a8] ss:$28 sps:$4 sm:$0xff]   ;;  %v12226_v58 = vld [vmem:[#allocation2 + $0x2e0] ss:$28 sps:$4 sm:$0xff]   ;;  %v12227_v59 = vld [vmem:[#allocation2 + $0x314] ss:$28 sps:$4 sm:$0xff]  }
  0x83   :  { %2521 = vmatprep.mubr.bf16.mxu0 %v13584_v51  ;;  %2973 = vmatprep.mubr.bf16.mxu1 %v13584_v51  ;;  %v12229_v60 = vld [vmem:[#allocation2 + $0x31c] ss:$28 sps:$4 sm:$0xff]   ;;  %v12231_v61 = vld [vmem:[#allocation2 + $0x310] ss:$28 sps:$4 sm:$0xff]   ;;  %v12237_v1 = vld [vmem:[#allocation2 + $0x348] ss:$28 sps:$4 sm:$0xff]  }
  0x84   :  { %v12232_v62 = vld [vmem:[#allocation2 + $0x318] ss:$28 sps:$4 sm:$0xff]   ;;  %v12233_v63 = vld [vmem:[#allocation2 + $0x34c] ss:$28 sps:$4 sm:$0xff]   ;;  %v103_v3 = vld [vmem:[%s15617_s0] sm:$0xff] }
  0x85   :  { %2500 = vmatpush1.bf16.msra.mxu0 %v12177_v22  ;;  %2952 = vmatpush1.bf16.msra.mxu1 %v12178_v23  ;;  %v12235_v0 = vld [vmem:[#allocation2 + $0x354] ss:$28 sps:$4 sm:$0xff]   ;;  %v110_v4 = vld [vmem:[%s15617_s0 + $0x38] sm:$0xff]  ;;  %v12241_v5 = vld [vmem:[#allocation2 + $0x384] ss:$28 sps:$4 sm:$0xff]  }
  0x86   :  { %2501 = vmatprep.subr.bf16.mxu0 %v12179_v24  ;;  %2953 = vmatprep.subr.bf16.mxu1 %v12181_v25  ;;  %v12238_v2 = vld [vmem:[#allocation2 + $0x350] ss:$28 sps:$4 sm:$0xff]   ;;  %v12239_v7 = vld [vmem:[#allocation2 + $0x380] ss:$28 sps:$4 sm:$0xff]   ;;  %v13594_v8 = vpack.c.bf16 %v110_v4, %v103_v3  ;;  %v12242_v9 = vld [vmem:[#allocation2 + $0x388] ss:$28 sps:$4 sm:$0xff]  }
  0x87   :  { %v12244_v6 = vld [vmem:[#allocation2 + $0x38c] ss:$28 sps:$4 sm:$0xff]   ;;  %v118_v10 = vld [vmem:[%s15617_s0 + $0x78] sm:$0xff]  ;;  %v125_v11 = vld [vmem:[%s15617_s0 + $0xb0] sm:$0xff] }
  0x88   :  { %v12247_v12 = vld [vmem:[#allocation2 + $0x3bc] ss:$28 sps:$4 sm:$0xff]   ;;  %v12250_v13 = vld [vmem:[#allocation2 + $0x3c4] ss:$28 sps:$4 sm:$0xff]   ;;  %v13602_v15 = vpack.c.bf16 %v125_v11, %v118_v10  ;;  %v117_v17 = vld [vmem:[%s15617_s0 + $0x70] sm:$0xff] }
  0x89   :  { %2502 = vmatpush1.bf16.msra.mxu0 %v12183_v26  ;;  %2954 = vmatpush1.bf16.msra.mxu1 %v12184_v27  ;;  %v12245_v14 = vld [vmem:[#allocation2 + $0x3b8] ss:$28 sps:$4 sm:$0xff]   ;;  %v12248_v16 = vld [vmem:[#allocation2 + $0x3c0] ss:$28 sps:$4 sm:$0xff]   ;;  %v124_v18 = vld [vmem:[%s15617_s0 + $0xa8] sm:$0xff] }
  0x8a   :  { %2503 = vmatprep.subr.bf16.mxu0 %v12185_v28  ;;  %2955 = vmatprep.subr.bf16.mxu1 %v12187_v29  ;;  %v12253_v19 = vld [vmem:[#allocation2 + $0x3f4] ss:$28 sps:$4 sm:$0xff]   ;;  %v12256_v20 = vld [vmem:[#allocation2 + $0x3fc] ss:$28 sps:$4 sm:$0xff]   ;;  %v13614_v23 = vpack.c.bf16 %v124_v18, %v117_v17  ;;  %v132_v24 = vld [vmem:[%s15617_s0 + $0xe8] sm:$0xff] }
  0x8b   :  { %v12251_v21 = vld [vmem:[#allocation2 + $0x3f0] ss:$28 sps:$4 sm:$0xff]   ;;  %v12254_v22 = vld [vmem:[#allocation2 + $0x3f8] ss:$28 sps:$4 sm:$0xff]   ;;  %v139_v25 = vld [vmem:[%s15617_s0 + $0x120] sm:$0xff] }
  0x8c   :  { %v12259_v26 = vld [vmem:[#allocation2 + $0x42c] ss:$28 sps:$4 sm:$0xff]   ;;  %v12262_v27 = vld [vmem:[#allocation2 + $0x434] ss:$28 sps:$4 sm:$0xff]   ;;  %v13622_v28 = vpack.c.bf16 %v139_v25, %v132_v24  ;;  %v12287_v3 = vld [vmem:[#allocation2 + $0x540] ss:$28 sps:$4 sm:$0xff]  }
  0x8d   :  { %2504 = vmatpush1.bf16.msra.mxu0 %v12189_v30  ;;  %2956 = vmatpush1.bf16.msra.mxu1 %v12190_v31  ;;  %v12257_v29 = vld [vmem:[#allocation2 + $0x428] ss:$28 sps:$4 sm:$0xff]   ;;  %v12260_v30 = vld [vmem:[#allocation2 + $0x430] ss:$28 sps:$4 sm:$0xff]   ;;  %v12302_v18 = vld [vmem:[#allocation2 + $0x5b8] ss:$28 sps:$4 sm:$0xff]  }
  0x8e   :  { %2505 = vmatprep.subr.bf16.mxu0 %v12191_v32  ;;  %2957 = vmatprep.subr.bf16.mxu1 %v12193_v33  ;;  %v131_v31 = vld [vmem:[%s15617_s0 + $0xe0] sm:$0xff]  ;;  %v138_v32 = vld [vmem:[%s15617_s0 + $0x118] sm:$0xff]  ;;  %v152_v46 = vld [vmem:[%s15617_s0 + $0x188] sm:$0xff] }
  0x8f   :  { %v12265_v33 = vld [vmem:[#allocation2 + $0x464] ss:$28 sps:$4 sm:$0xff]   ;;  %v12275_v49 = vld [vmem:[#allocation2 + $0x4d0] ss:$28 sps:$4 sm:$0xff]  }
  0x90   :  { %v12290_v4 = vld [vmem:[#allocation2 + $0x548] ss:$28 sps:$4 sm:$0xff]   ;;  %v173_v11 = vld [vmem:[%s15617_s0 + $0x230] sm:$0xff] }
  0x91   :  { %2506 = vmatpush1.bf16.msra.mxu0 %v12195_v34  ;;  %2958 = vmatpush1.bf16.msra.mxu1 %v12196_v35  ;;  %v12268_v34 = vld [vmem:[#allocation2 + $0x46c] ss:$28 sps:$4 sm:$0xff]   ;;  %v12263_v35 = vld [vmem:[#allocation2 + $0x460] ss:$28 sps:$4 sm:$0xff]  }
  0x92   :  { %2507 = vmatprep.subr.bf16.mxu0 %v12197_v36  ;;  %2959 = vmatprep.subr.bf16.mxu1 %v12199_v37  ;;  %v12266_v36 = vld [vmem:[#allocation2 + $0x468] ss:$28 sps:$4 sm:$0xff]   ;;  %v13634_v37 = vpack.c.bf16 %v138_v32, %v131_v31  ;;  %v12311_v32 = vld [vmem:[#allocation2 + $0x620] ss:$28 sps:$4 sm:$0xff]  }
  0x93   :  { %v12305_v24 = vld [vmem:[#allocation2 + $0x5e8] ss:$28 sps:$4 sm:$0xff]  }
  0x94   :  { %v12316_v31 = vld [vmem:[#allocation2 + $0x62c] ss:$28 sps:$4 sm:$0xff]  }
  0x95   :  { %2508 = vmatpush1.bf16.msra.mxu0 %v12201_v38  ;;  %2960 = vmatpush1.bf16.msra.mxu1 %v12202_v39  ;;  %v146_v38 = vld [vmem:[%s15617_s0 + $0x158] sm:$0xff]  ;;  %v153_v39 = vld [vmem:[%s15617_s0 + $0x190] sm:$0xff] }
  0x96   :  { %2509 = vmatprep.subr.bf16.mxu0 %v12203_v40  ;;  %2961 = vmatprep.subr.bf16.mxu1 %v12205_v41  ;;  %v12271_v40 = vld [vmem:[#allocation2 + $0x49c] ss:$28 sps:$4 sm:$0xff]   ;;  %v12274_v41 = vld [vmem:[#allocation2 + $0x4a4] ss:$28 sps:$4 sm:$0xff]  }
  0x99   :  { %2510 = vmatpush1.bf16.msra.mxu0 %v12207_v42  ;;  %2962 = vmatpush1.bf16.msra.mxu1 %v12208_v43  ;;  %v12269_v42 = vld [vmem:[#allocation2 + $0x498] ss:$28 sps:$4 sm:$0xff]   ;;  %v13642_v43 = vpack.c.bf16 %v153_v39, %v146_v38  ;;  %v12322_v39 = vld [vmem:[#allocation2 + $0x664] ss:$28 sps:$4 sm:$0xff]  }
  0x9a   :  { %2511 = vmatprep.subr.bf16.mxu0 %v12209_v44  ;;  %2963 = vmatprep.subr.bf16.mxu1 %v12211_v45  ;;  %v12272_v44 = vld [vmem:[#allocation2 + $0x4a0] ss:$28 sps:$4 sm:$0xff]   ;;  %v145_v45 = vld [vmem:[%s15617_s0 + $0x150] sm:$0xff] }
  0x9b   :  { %v12319_v38 = vld [vmem:[#allocation2 + $0x65c] ss:$28 sps:$4 sm:$0xff]  }
  0x9d   :  { %2512 = vmatpush1.bf16.msra.mxu0 %v12213_v47  ;;  %2964 = vmatpush1.bf16.msra.mxu1 %v12214_v48  ;;  %v12277_v47 = vld [vmem:[#allocation2 + $0x4d4] ss:$28 sps:$4 sm:$0xff]   ;;  %v12280_v48 = vld [vmem:[#allocation2 + $0x4dc] ss:$28 sps:$4 sm:$0xff]  }
  0x9e   :  { %2513 = vmatprep.subr.bf16.mxu0 %v12215_v50  ;;  %2965 = vmatprep.subr.bf16.mxu1 %v12217_v52  ;;  %v13654_v50 = vpack.c.bf16 %v152_v46, %v145_v45  ;;  %v160_v52 = vld [vmem:[%s15617_s0 + $0x1c8] sm:$0xff]  ;;  %v12325_v46 = vld [vmem:[#allocation2 + $0x694] ss:$28 sps:$4 sm:$0xff]  }
  0x9f   :  { %v208_v45 = vld [vmem:[%s15617_s0 + $0x348] sm:$0xff] }
  0xa1   :  { %2514 = vmatpush1.bf16.msra.mxu0 %v12219_v53  ;;  %2966 = vmatpush1.bf16.msra.mxu1 %v12220_v54  ;;  %v167_v53 = vld [vmem:[%s15617_s0 + $0x200] sm:$0xff]  ;;  %v12278_v54 = vld [vmem:[#allocation2 + $0x4d8] ss:$28 sps:$4 sm:$0xff]  }
  0xa2   :  { %2515 = vmatprep.subr.bf16.mxu0 %v12221_v55  ;;  %2967 = vmatprep.subr.bf16.mxu1 %v12223_v56  ;;  %v12283_v55 = vld [vmem:[#allocation2 + $0x50c] ss:$28 sps:$4 sm:$0xff]   ;;  %v12286_v56 = vld [vmem:[#allocation2 + $0x514] ss:$28 sps:$4 sm:$0xff]  }
  0xa5   :  { %2516 = vmatpush1.bf16.msra.mxu0 %v12225_v57  ;;  %2968 = vmatpush1.bf16.msra.mxu1 %v12226_v58  ;;  %v12281_v57 = vld [vmem:[#allocation2 + $0x508] ss:$28 sps:$4 sm:$0xff]   ;;  %v12284_v58 = vld [vmem:[#allocation2 + $0x510] ss:$28 sps:$4 sm:$0xff]  }
  0xa6   :  { %2517 = vmatprep.subr.bf16.mxu0 %v12227_v59  ;;  %2969 = vmatprep.subr.bf16.mxu1 %v12229_v60  ;;  %v13662_v59 = vpack.c.bf16 %v167_v53, %v160_v52  ;;  %v159_v60 = vld [vmem:[%s15617_s0 + $0x1c0] sm:$0xff]  ;;  %v106_v53 = vld [vmem:[%s15617_s0 + $0x18] sm:$0xff] }
  0xa9   :  { %2518 = vmatpush1.bf16.msra.mxu0 %v12231_v61  ;;  %2970 = vmatpush1.bf16.msra.mxu1 %v12232_v62  ;;  %v166_v61 = vld [vmem:[%s15617_s0 + $0x1f8] sm:$0xff]  ;;  %v12289_v62 = vld [vmem:[#allocation2 + $0x544] ss:$28 sps:$4 sm:$0xff]  }
  0xaa   :  { %2519 = vmatprep.subr.bf16.mxu0 %v12233_v63  ;;  %2971 = vmatprep.subr.bf16.mxu1 %v12235_v0  ;;  %v12292_v63 = vld [vmem:[#allocation2 + $0x54c] ss:$28 sps:$4 sm:$0xff]   ;;  %v13674_v0 = vpack.c.bf16 %v166_v61, %v159_v60  ;;  %v105_v61 = vld [vmem:[%s15617_s0 + $0x10] sm:$0xff] }
  0xab   :  { %v12332_v60 = vld [vmem:[#allocation2 + $0x6d0] ss:$28 sps:$4 sm:$0xff]  }
  0xad   :  { %2520 = vmatpush1.bf16.msra.mxu0 %v12237_v1  ;;  %2972 = vmatpush1.bf16.msra.mxu1 %v12238_v2  ;;  %v174_v1 = vld [vmem:[%s15617_s0 + $0x238] sm:$0xff]  ;;  %v181_v2 = vld [vmem:[%s15617_s0 + $0x270] sm:$0xff] }
  0xae   :  { %2602 = vmatprep.subr.bf16.mxu0 %v12241_v5  ;;  %3054 = vmatprep.subr.bf16.mxu1 %v12244_v6  ;;  %v12295_v5 = vld [vmem:[#allocation2 + $0x57c] ss:$28 sps:$4 sm:$0xff]   ;;  %v12298_v6 = vld [vmem:[#allocation2 + $0x584] ss:$28 sps:$4 sm:$0xff]   ;;  %v13682_v10 = vpack.c.bf16 %v181_v2, %v174_v1  ;;  %v12340_v1 = vld [vmem:[#allocation2 + $0x70c] ss:$28 sps:$4 sm:$0xff]  }
  0xaf   :  { %v12335_v2 = vld [vmem:[#allocation2 + $0x700] ss:$28 sps:$4 sm:$0xff]  }
  0xb0   :  { %2522 = vmatmul.mubr.bf16.vlgmr.msra.gmra.mrb[0].mxu0 %v13594_v8  ;;  %2974 = vmatmul.mubr.bf16.vlgmr.msra.gmra.mrb[0].mxu1 %v13594_v8 }
  0xb1   :  { %2603 = vmatpush1.bf16.msra.mxu0 %v12239_v7  ;;  %3055 = vmatpush1.bf16.msra.mxu1 %v12242_v9  ;;  %v12293_v7 = vld [vmem:[#allocation2 + $0x578] ss:$28 sps:$4 sm:$0xff]   ;;  %v12296_v9 = vld [vmem:[#allocation2 + $0x580] ss:$28 sps:$4 sm:$0xff]  }
  0xb2   :  { %2604 = vmatprep.subr.bf16.mxu0 %v12247_v12  ;;  %3056 = vmatprep.subr.bf16.mxu1 %v12250_v13  ;;  %v180_v12 = vld [vmem:[%s15617_s0 + $0x268] sm:$0xff]  ;;  %v12301_v13 = vld [vmem:[#allocation2 + $0x5b4] ss:$28 sps:$4 sm:$0xff]  }
  0xb3   :  { %2531 = vmatprep.mubr.bf16.mxu0 %v13602_v15  ;;  %2983 = vmatprep.mubr.bf16.mxu1 %v13602_v15  ;;  %v13694_v17 = vpack.c.bf16 %v180_v12, %v173_v11  ;;  %v12341_v11 = vld [vmem:[#allocation2 + $0x738] ss:$28 sps:$4 sm:$0xff]   ;;  %v12344_v12 = vld [vmem:[#allocation2 + $0x740] ss:$28 sps:$4 sm:$0xff]  }
  0xb5   :  { %2605 = vmatpush1.bf16.msra.mxu0 %v12245_v14  ;;  %3057 = vmatpush1.bf16.msra.mxu1 %v12248_v16  ;;  %v12304_v14 = vld [vmem:[#allocation2 + $0x5bc] ss:$28 sps:$4 sm:$0xff]   ;;  %v12299_v16 = vld [vmem:[#allocation2 + $0x5b0] ss:$28 sps:$4 sm:$0xff]  }
  0xb6   :  { %2606 = vmatprep.subr.bf16.mxu0 %v12253_v19  ;;  %3058 = vmatprep.subr.bf16.mxu1 %v12256_v20  ;;  %v188_v19 = vld [vmem:[%s15617_s0 + $0x2a8] sm:$0xff]  ;;  %v195_v20 = vld [vmem:[%s15617_s0 + $0x2e0] sm:$0xff] }
  0xb7   :  { %v13702_v25 = vpack.c.bf16 %v195_v20, %v188_v19  ;;  %v12352_v19 = vld [vmem:[#allocation2 + $0x77c] ss:$28 sps:$4 sm:$0xff]  }
  0xb8   :  { %2532 = vmatmul.mubr.bf16.gmra.mrb[4].mxu0 %v13614_v23  ;;  %2984 = vmatmul.mubr.bf16.gmra.mrb[4].mxu1 %v13614_v23 }
  0xb9   :  { %2607 = vmatpush1.bf16.msra.mxu0 %v12251_v21  ;;  %3059 = vmatpush1.bf16.msra.mxu1 %v12254_v22  ;;  %v12307_v21 = vld [vmem:[#allocation2 + $0x5ec] ss:$28 sps:$4 sm:$0xff]   ;;  %v12310_v22 = vld [vmem:[#allocation2 + $0x5f4] ss:$28 sps:$4 sm:$0xff]  }
  0xba   :  { %2608 = vmatprep.subr.bf16.mxu0 %v12259_v26  ;;  %3060 = vmatprep.subr.bf16.mxu1 %v12262_v27  ;;  %v12308_v26 = vld [vmem:[#allocation2 + $0x5f0] ss:$28 sps:$4 sm:$0xff]   ;;  %v187_v27 = vld [vmem:[%s15617_s0 + $0x2a0] sm:$0xff] }
  0xbb   :  { %2541 = vmatprep.mubr.bf16.mxu0 %v13622_v28  ;;  %2993 = vmatprep.mubr.bf16.mxu1 %v13622_v28 }
  0xbd   :  { %2609 = vmatpush1.bf16.msra.mxu0 %v12257_v29  ;;  %3061 = vmatpush1.bf16.msra.mxu1 %v12260_v30  ;;  %v194_v29 = vld [vmem:[%s15617_s0 + $0x2d8] sm:$0xff]  ;;  %v12313_v30 = vld [vmem:[#allocation2 + $0x624] ss:$28 sps:$4 sm:$0xff]  }
  0xbe   :  { %2610 = vmatprep.subr.bf16.mxu0 %v12265_v33  ;;  %3062 = vmatprep.subr.bf16.mxu1 %v12268_v34  ;;  %v12314_v33 = vld [vmem:[#allocation2 + $0x628] ss:$28 sps:$4 sm:$0xff]   ;;  %v13714_v34 = vpack.c.bf16 %v194_v29, %v187_v27  ;;  %v12358_v29 = vld [vmem:[#allocation2 + $0x7b4] ss:$28 sps:$4 sm:$0xff]  }
  0xbf   :  { %v12355_v27 = vld [vmem:[#allocation2 + $0x7ac] ss:$28 sps:$4 sm:$0xff]  }
  0xc0   :  { %2542 = vmatmul.mubr.bf16.gmra.mrb[8].mxu0 %v13634_v37  ;;  %2994 = vmatmul.mubr.bf16.gmra.mrb[8].mxu1 %v13634_v37 }
  0xc1   :  { %2611 = vmatpush1.bf16.msra.mxu0 %v12263_v35  ;;  %3063 = vmatpush1.bf16.msra.mxu1 %v12266_v36  ;;  %v202_v35 = vld [vmem:[%s15617_s0 + $0x318] sm:$0xff]  ;;  %v209_v36 = vld [vmem:[%s15617_s0 + $0x350] sm:$0xff] }
  0xc2   :  { %2612 = vmatprep.subr.bf16.mxu0 %v12271_v40  ;;  %3064 = vmatprep.subr.bf16.mxu1 %v12274_v41  ;;  %v13722_v40 = vpack.c.bf16 %v209_v36, %v202_v35  ;;  %v12317_v41 = vld [vmem:[#allocation2 + $0x658] ss:$28 sps:$4 sm:$0xff]   ;;  %v140_v35 = vld [vmem:[%s15617_s0 + $0x128] sm:$0xff]  ;;  %v12361_v36 = vld [vmem:[#allocation2 + $0x7e4] ss:$28 sps:$4 sm:$0xff]  }
  0xc3   :  { %2551 = vmatprep.mubr.bf16.mxu0 %v13642_v43  ;;  %3003 = vmatprep.mubr.bf16.mxu1 %v13642_v43 }
  0xc5   :  { %2613 = vmatpush1.bf16.msra.mxu0 %v12269_v42  ;;  %3065 = vmatpush1.bf16.msra.mxu1 %v12272_v44  ;;  %v12320_v42 = vld [vmem:[#allocation2 + $0x660] ss:$28 sps:$4 sm:$0xff]   ;;  %v201_v44 = vld [vmem:[%s15617_s0 + $0x310] sm:$0xff] }
  0xc6   :  { %2614 = vmatprep.subr.bf16.mxu0 %v12277_v47  ;;  %3066 = vmatprep.subr.bf16.mxu1 %v12280_v48  ;;  %v12328_v47 = vld [vmem:[#allocation2 + $0x69c] ss:$28 sps:$4 sm:$0xff]   ;;  %v12323_v48 = vld [vmem:[#allocation2 + $0x690] ss:$28 sps:$4 sm:$0xff]   ;;  %v13734_v52 = vpack.c.bf16 %v208_v45, %v201_v44  ;;  %v155_v45 = vld [vmem:[%s15617_s0 + $0x1a0] sm:$0xff] }
  0xc7   :  { %v148_v44 = vld [vmem:[%s15617_s0 + $0x168] sm:$0xff] }
  0xc8   :  { %2552 = vmatmul.mubr.bf16.gmra.mrb[12].mxu0 %v13654_v50  ;;  %3004 = vmatmul.mubr.bf16.gmra.mrb[12].mxu1 %v13654_v50 }
  0xc9   :  { %2615 = vmatpush1.bf16.msra.mxu0 %v12275_v49  ;;  %3067 = vmatpush1.bf16.msra.mxu1 %v12278_v54  ;;  %v12326_v49 = vld [vmem:[#allocation2 + $0x698] ss:$28 sps:$4 sm:$0xff]  }
  0xca   :  { %2616 = vmatprep.subr.bf16.mxu0 %v12283_v55  ;;  %3068 = vmatprep.subr.bf16.mxu1 %v12286_v56  ;;  %v113_v54 = vld [vmem:[%s15617_s0 + $0x50] sm:$0xff]  ;;  %v12331_v55 = vld [vmem:[#allocation2 + $0x6cc] ss:$28 sps:$4 sm:$0xff]  }
  0xcb   :  { %2561 = vmatprep.mubr.bf16.mxu0 %v13662_v59  ;;  %3013 = vmatprep.mubr.bf16.mxu1 %v13662_v59  ;;  %v12334_v56 = vld [vmem:[#allocation2 + $0x6d4] ss:$28 sps:$4 sm:$0xff]  }
  0xcd   :  { %2617 = vmatpush1.bf16.msra.mxu0 %v12281_v57  ;;  %3069 = vmatpush1.bf16.msra.mxu1 %v12284_v58  ;;  %v12329_v57 = vld [vmem:[#allocation2 + $0x6c8] ss:$28 sps:$4 sm:$0xff]   ;;  %v13742_v58 = vpack.c.bf16 %v113_v54, %v106_v53  ;;  %v12368_v53 = vld [vmem:[#allocation2 + $0x820] ss:$28 sps:$4 sm:$0xff]  }
  0xce   :  { %2618 = vmatprep.subr.bf16.mxu0 %v12289_v62  ;;  %3070 = vmatprep.subr.bf16.mxu1 %v12292_v63  ;;  %v112_v62 = vld [vmem:[%s15617_s0 + $0x48] sm:$0xff]  ;;  %v12337_v63 = vld [vmem:[#allocation2 + $0x704] ss:$28 sps:$4 sm:$0xff]  }
  0xcf   :  { %v147_v54 = vld [vmem:[%s15617_s0 + $0x160] sm:$0xff] }
  0xd0   :  { %2562 = vmatmul.mubr.bf16.gmra.mrb[16].mxu0 %v13674_v0  ;;  %3014 = vmatmul.mubr.bf16.gmra.mrb[16].mxu1 %v13674_v0 }
  0xd1   :  { %2619 = vmatpush1.bf16.msra.mxu0 %v12287_v3  ;;  %3071 = vmatpush1.bf16.msra.mxu1 %v12290_v4  ;;  %v13754_v3 = vpack.c.bf16 %v112_v62, %v105_v61  ;;  %v120_v4 = vld [vmem:[%s15617_s0 + $0x88] sm:$0xff]  ;;  %v162_v61 = vld [vmem:[%s15617_s0 + $0x1d8] sm:$0xff]  ;;  %v169_v62 = vld [vmem:[%s15617_s0 + $0x210] sm:$0xff] }
  0xd2   :  { %2620 = vmatprep.subr.bf16.mxu0 %v12295_v5  ;;  %3072 = vmatprep.subr.bf16.mxu1 %v12298_v6  ;;  %v127_v5 = vld [vmem:[%s15617_s0 + $0xc0] sm:$0xff] }
  0xd3   :  { %2571 = vmatprep.mubr.bf16.mxu0 %v13682_v10  ;;  %3023 = vmatprep.mubr.bf16.mxu1 %v13682_v10  ;;  %v12338_v6 = vld [vmem:[#allocation2 + $0x708] ss:$28 sps:$4 sm:$0xff]  }
  0xd5   :  { %2621 = vmatpush1.bf16.msra.mxu0 %v12293_v7  ;;  %3073 = vmatpush1.bf16.msra.mxu1 %v12296_v9  ;;  %v12343_v7 = vld [vmem:[#allocation2 + $0x73c] ss:$28 sps:$4 sm:$0xff]   ;;  %v12346_v9 = vld [vmem:[#allocation2 + $0x744] ss:$28 sps:$4 sm:$0xff]  }
  0xd6   :  { %2622 = vmatprep.subr.bf16.mxu0 %v12301_v13  ;;  %3074 = vmatprep.subr.bf16.mxu1 %v12304_v14  ;;  %v13762_v13 = vpack.c.bf16 %v127_v5, %v120_v4  ;;  %v119_v14 = vld [vmem:[%s15617_s0 + $0x80] sm:$0xff]  ;;  %v12382_v4 = vld [vmem:[#allocation2 + $0x894] ss:$28 sps:$4 sm:$0xff]   ;;  %v13822_v5 = vpack.c.bf16 %v169_v62, %v162_v61  ;;  %v12412_v61 = vld [vmem:[#allocation2 + $0x9ac] ss:$28 sps:$4 sm:$0xff]  }
  0xd8   :  { %2572 = vmatmul.mubr.bf16.gmra.mrb[20].mxu0 %v13694_v17  ;;  %3024 = vmatmul.mubr.bf16.gmra.mrb[20].mxu1 %v13694_v17 }
  0xd9   :  { %2623 = vmatpush1.bf16.msra.mxu0 %v12299_v16  ;;  %3075 = vmatpush1.bf16.msra.mxu1 %v12302_v18  ;;  %v126_v16 = vld [vmem:[%s15617_s0 + $0xb8] sm:$0xff]  ;;  %v12349_v18 = vld [vmem:[#allocation2 + $0x774] ss:$28 sps:$4 sm:$0xff]  }
  0xda   :  { %2624 = vmatprep.subr.bf16.mxu0 %v12307_v21  ;;  %3076 = vmatprep.subr.bf16.mxu1 %v12310_v22  ;;  %v13774_v20 = vpack.c.bf16 %v126_v16, %v119_v14  ;;  %v134_v21 = vld [vmem:[%s15617_s0 + $0xf8] sm:$0xff]  ;;  %v141_v22 = vld [vmem:[%s15617_s0 + $0x130] sm:$0xff]  ;;  %v12388_v14 = vld [vmem:[#allocation2 + $0x8cc] ss:$28 sps:$4 sm:$0xff]  }
  0xdb   :  { %2581 = vmatprep.mubr.bf16.mxu0 %v13702_v25  ;;  %3033 = vmatprep.mubr.bf16.mxu1 %v13702_v25 }
  0xdd   :  { %2625 = vmatpush1.bf16.msra.mxu0 %v12305_v24  ;;  %3077 = vmatpush1.bf16.msra.mxu1 %v12308_v26  ;;  %v12347_v24 = vld [vmem:[#allocation2 + $0x770] ss:$28 sps:$4 sm:$0xff]   ;;  %v12350_v26 = vld [vmem:[#allocation2 + $0x778] ss:$28 sps:$4 sm:$0xff]  }
  0xde   :  { %2626 = vmatprep.subr.bf16.mxu0 %v12313_v30  ;;  %3078 = vmatprep.subr.bf16.mxu1 %v12316_v31  ;;  %v12353_v30 = vld [vmem:[#allocation2 + $0x7a8] ss:$28 sps:$4 sm:$0xff]   ;;  %v12356_v31 = vld [vmem:[#allocation2 + $0x7b0] ss:$28 sps:$4 sm:$0xff]  }
  0xe0   :  { %2582 = vmatmul.mubr.bf16.gmra.mrb[24].mxu0 %v13714_v34  ;;  %3034 = vmatmul.mubr.bf16.gmra.mrb[24].mxu1 %v13714_v34 }
  0xe1   :  { %2627 = vmatpush1.bf16.msra.mxu0 %v12311_v32  ;;  %3079 = vmatpush1.bf16.msra.mxu1 %v12314_v33  ;;  %v13782_v32 = vpack.c.bf16 %v141_v22, %v134_v21  ;;  %v133_v33 = vld [vmem:[%s15617_s0 + $0xf0] sm:$0xff]  ;;  %v12383_v21 = vld [vmem:[#allocation2 + $0x8c0] ss:$28 sps:$4 sm:$0xff]   ;;  %v12386_v22 = vld [vmem:[#allocation2 + $0x8c8] ss:$28 sps:$4 sm:$0xff]  }
  0xe2   :  { %2628 = vmatprep.subr.bf16.mxu0 %v12319_v38  ;;  %3080 = vmatprep.subr.bf16.mxu1 %v12322_v39  ;;  %v12364_v38 = vld [vmem:[#allocation2 + $0x7ec] ss:$28 sps:$4 sm:$0xff]   ;;  %v12359_v39 = vld [vmem:[#allocation2 + $0x7e0] ss:$28 sps:$4 sm:$0xff]  }
  0xe3   :  { %2591 = vmatprep.mubr.bf16.mxu0 %v13722_v40  ;;  %3043 = vmatprep.mubr.bf16.mxu1 %v13722_v40 }
  0xe5   :  { %2629 = vmatpush1.bf16.msra.mxu0 %v12317_v41  ;;  %3081 = vmatpush1.bf16.msra.mxu1 %v12320_v42  ;;  %v13794_v41 = vpack.c.bf16 %v140_v35, %v133_v33  ;;  %v12362_v42 = vld [vmem:[#allocation2 + $0x7e8] ss:$28 sps:$4 sm:$0xff]   ;;  %v182_v33 = vld [vmem:[%s15617_s0 + $0x278] sm:$0xff]  ;;  %v12397_v35 = vld [vmem:[#allocation2 + $0x934] ss:$28 sps:$4 sm:$0xff]  }
  0xe6   :  { %2630 = vmatprep.subr.bf16.mxu0 %v12325_v46  ;;  %3082 = vmatprep.subr.bf16.mxu1 %v12328_v47  ;;  %v12367_v46 = vld [vmem:[#allocation2 + $0x81c] ss:$28 sps:$4 sm:$0xff]   ;;  %v12370_v47 = vld [vmem:[#allocation2 + $0x824] ss:$28 sps:$4 sm:$0xff]  }
  0xe8   :  { %2592 = vmatmul.mubr.bf16.gmra.mrb[28].mxu0 %v13734_v52  ;;  %3044 = vmatmul.mubr.bf16.gmra.mrb[28].mxu1 %v13734_v52 }
  0xe9   :  { %2631 = vmatpush1.bf16.msra.mxu0 %v12323_v48  ;;  %3083 = vmatpush1.bf16.msra.mxu1 %v12326_v49  ;;  %v12365_v48 = vld [vmem:[#allocation2 + $0x818] ss:$28 sps:$4 sm:$0xff]   ;;  %v13802_v49 = vpack.c.bf16 %v155_v45, %v148_v44 }
  0xea   :  { %2632 = vmatprep.subr.bf16.mxu0 %v12331_v55  ;;  %3084 = vmatprep.subr.bf16.mxu1 %v12334_v56  ;;  %v154_v55 = vld [vmem:[%s15617_s0 + $0x198] sm:$0xff]  ;;  %v12373_v56 = vld [vmem:[#allocation2 + $0x854] ss:$28 sps:$4 sm:$0xff]  }
  0xeb   :  { %2634 = vmatprep.mubr.bf16.mxu0 %v13742_v58  ;;  %3086 = vmatprep.mubr.bf16.mxu1 %v13742_v58  ;;  %v197_v44 = vld [vmem:[%s15617_s0 + $0x2f0] sm:$0xff] }
  0xec   :  { %v12398_v45 = vld [vmem:[#allocation2 + $0x938] ss:$28 sps:$4 sm:$0xff]  }
  0xed   :  { %2633 = vmatpush1.bf16.msra.mxu0 %v12329_v57  ;;  %3085 = vmatpush1.bf16.msra.mxu1 %v12332_v60  ;;  %v12376_v57 = vld [vmem:[#allocation2 + $0x85c] ss:$28 sps:$4 sm:$0xff]   ;;  %v13814_v60 = vpack.c.bf16 %v154_v55, %v147_v54  ;;  %v12404_v54 = vld [vmem:[#allocation2 + $0x970] ss:$28 sps:$4 sm:$0xff]  }
  0xee   :  { %2715 = vmatprep.subr.bf16.mxu0 %v12337_v63  ;;  %3167 = vmatprep.subr.bf16.mxu1 %v12340_v1  ;;  %v12371_v63 = vld [vmem:[#allocation2 + $0x850] ss:$28 sps:$4 sm:$0xff]   ;;  %v12374_v1 = vld [vmem:[#allocation2 + $0x858] ss:$28 sps:$4 sm:$0xff]  }
  0xef   :  { %v189_v55 = vld [vmem:[%s15617_s0 + $0x2b0] sm:$0xff] }
  0xf0   :  { %2635 = vmatmul.mubr.bf16.vlgmr.msra.gmra.mrb[0].mxu0 %v13754_v3  ;;  %3087 = vmatmul.mubr.bf16.vlgmr.msra.gmra.mrb[0].mxu1 %v13754_v3 }
  0xf1   :  { %2716 = vmatpush1.bf16.msra.mxu0 %v12335_v2  ;;  %3168 = vmatpush1.bf16.msra.mxu1 %v12338_v6  ;;  %v12379_v2 = vld [vmem:[#allocation2 + $0x88c] ss:$28 sps:$4 sm:$0xff]  }
  0xf2   :  { %2717 = vmatprep.subr.bf16.mxu0 %v12343_v7  ;;  %3169 = vmatprep.subr.bf16.mxu1 %v12346_v9  ;;  %v12377_v6 = vld [vmem:[#allocation2 + $0x888] ss:$28 sps:$4 sm:$0xff]   ;;  %v12380_v7 = vld [vmem:[#allocation2 + $0x890] ss:$28 sps:$4 sm:$0xff]  }
  0xf3   :  { %2644 = vmatprep.mubr.bf16.mxu0 %v13762_v13  ;;  %3096 = vmatprep.mubr.bf16.mxu1 %v13762_v13  ;;  %v161_v9 = vld [vmem:[%s15617_s0 + $0x1d0] sm:$0xff] }
  0xf5   :  { %2718 = vmatpush1.bf16.msra.mxu0 %v12341_v11  ;;  %3170 = vmatpush1.bf16.msra.mxu1 %v12344_v12  ;;  %v168_v11 = vld [vmem:[%s15617_s0 + $0x208] sm:$0xff]  ;;  %v12385_v12 = vld [vmem:[#allocation2 + $0x8c4] ss:$28 sps:$4 sm:$0xff]  }
  0xf6   :  { %2719 = vmatprep.subr.bf16.mxu0 %v12349_v18  ;;  %3171 = vmatprep.subr.bf16.mxu1 %v12352_v19  ;;  %v13834_v16 = vpack.c.bf16 %v168_v11, %v161_v9  ;;  %v176_v18 = vld [vmem:[%s15617_s0 + $0x248] sm:$0xff]  ;;  %v183_v19 = vld [vmem:[%s15617_s0 + $0x280] sm:$0xff]  ;;  %v12413_v9 = vld [vmem:[#allocation2 + $0x9d8] ss:$28 sps:$4 sm:$0xff]  }
  0xf7   :  { %v12416_v11 = vld [vmem:[#allocation2 + $0x9e0] ss:$28 sps:$4 sm:$0xff]  }
  0xf8   :  { %2645 = vmatmul.mubr.bf16.gmra.mrb[4].mxu0 %v13774_v20  ;;  %3097 = vmatmul.mubr.bf16.gmra.mrb[4].mxu1 %v13774_v20 }
  0xf9   :  { %2720 = vmatpush1.bf16.msra.mxu0 %v12347_v24  ;;  %3172 = vmatpush1.bf16.msra.mxu1 %v12350_v26  ;;  %v12391_v24 = vld [vmem:[#allocation2 + $0x8fc] ss:$28 sps:$4 sm:$0xff]   ;;  %v12394_v26 = vld [vmem:[#allocation2 + $0x904] ss:$28 sps:$4 sm:$0xff]  }
  0xfa   :  { %2721 = vmatprep.subr.bf16.mxu0 %v12355_v27  ;;  %3173 = vmatprep.subr.bf16.mxu1 %v12358_v29  ;;  %v12389_v27 = vld [vmem:[#allocation2 + $0x8f8] ss:$28 sps:$4 sm:$0xff]   ;;  %v13842_v29 = vpack.c.bf16 %v183_v19, %v176_v18 }
  0xfb   :  { %2654 = vmatprep.mubr.bf16.mxu0 %v13782_v32  ;;  %3106 = vmatprep.mubr.bf16.mxu1 %v13782_v32  ;;  %v210_v18 = vld [vmem:[%s15617_s0 + $0x358] sm:$0xff]  ;;  %v12421_v19 = vld [vmem:[#allocation2 + $0xa14] ss:$28 sps:$4 sm:$0xff]  }
  0xfd   :  { %2722 = vmatpush1.bf16.msra.mxu0 %v12353_v30  ;;  %3174 = vmatpush1.bf16.msra.mxu1 %v12356_v31  ;;  %v12392_v30 = vld [vmem:[#allocation2 + $0x900] ss:$28 sps:$4 sm:$0xff]  }
  0xfe   :  { %2723 = vmatprep.subr.bf16.mxu0 %v12361_v36  ;;  %3175 = vmatprep.subr.bf16.mxu1 %v12364_v38  ;;  %v175_v31 = vld [vmem:[%s15617_s0 + $0x240] sm:$0xff]  ;;  %v12400_v36 = vld [vmem:[#allocation2 + $0x93c] ss:$28 sps:$4 sm:$0xff]   ;;  %v12395_v38 = vld [vmem:[#allocation2 + $0x930] ss:$28 sps:$4 sm:$0xff]  }
 0x100   :  { %2655 = vmatmul.mubr.bf16.gmra.mrb[8].mxu0 %v13794_v41  ;;  %3107 = vmatmul.mubr.bf16.gmra.mrb[8].mxu1 %v13794_v41 }
 0x101   :  { %2724 = vmatpush1.bf16.msra.mxu0 %v12359_v39  ;;  %3176 = vmatpush1.bf16.msra.mxu1 %v12362_v42  ;;  %v13854_v39 = vpack.c.bf16 %v182_v33, %v175_v31  ;;  %v190_v42 = vld [vmem:[%s15617_s0 + $0x2b8] sm:$0xff]  ;;  %v12427_v31 = vld [vmem:[#allocation2 + $0xa4c] ss:$28 sps:$4 sm:$0xff]   ;;  %v12430_v33 = vld [vmem:[#allocation2 + $0xa54] ss:$28 sps:$4 sm:$0xff]  }
 0x102   :  { %2725 = vmatprep.subr.bf16.mxu0 %v12367_v46  ;;  %3177 = vmatprep.subr.bf16.mxu1 %v12370_v47  ;;  %v12403_v46 = vld [vmem:[#allocation2 + $0x96c] ss:$28 sps:$4 sm:$0xff]   ;;  %v12406_v47 = vld [vmem:[#allocation2 + $0x974] ss:$28 sps:$4 sm:$0xff]  }
 0x103   :  { %2664 = vmatprep.mubr.bf16.mxu0 %v13802_v49  ;;  %3116 = vmatprep.mubr.bf16.mxu1 %v13802_v49 }
 0x105   :  { %2726 = vmatpush1.bf16.msra.mxu0 %v12365_v48  ;;  %3178 = vmatpush1.bf16.msra.mxu1 %v12368_v53  ;;  %v12401_v48 = vld [vmem:[#allocation2 + $0x968] ss:$28 sps:$4 sm:$0xff]   ;;  %v13862_v53 = vpack.c.bf16 %v197_v44, %v190_v42  ;;  %v114_v44 = vld [vmem:[%s15617_s0 + $0x58] sm:$0xff] }
 0x106   :  { %2727 = vmatprep.subr.bf16.mxu0 %v12373_v56  ;;  %3179 = vmatprep.subr.bf16.mxu1 %v12376_v57  ;;  %v196_v56 = vld [vmem:[%s15617_s0 + $0x2e8] sm:$0xff]  ;;  %v12409_v57 = vld [vmem:[#allocation2 + $0x9a4] ss:$28 sps:$4 sm:$0xff]  }
 0x107   :  { %v13874_v62 = vpack.c.bf16 %v196_v56, %v189_v55  ;;  %v107_v42 = vld [vmem:[%s15617_s0 + $0x20] sm:$0xff] }
 0x108   :  { %2665 = vmatmul.mubr.bf16.gmra.mrb[12].mxu0 %v13814_v60  ;;  %3117 = vmatmul.mubr.bf16.gmra.mrb[12].mxu1 %v13814_v60  ;;  %v12431_v55 = vld [vmem:[#allocation2 + $0xa80] ss:$28 sps:$4 sm:$0xff]  }
 0x109   :  { %2728 = vmatpush1.bf16.msra.mxu0 %v12371_v63  ;;  %3180 = vmatpush1.bf16.msra.mxu1 %v12374_v1  ;;  %v204_v63 = vld [vmem:[%s15617_s0 + $0x328] sm:$0xff]  ;;  %v211_v1 = vld [vmem:[%s15617_s0 + $0x360] sm:$0xff] }
 0x10a   :  { %2729 = vmatprep.subr.bf16.mxu0 %v12379_v2  ;;  %3181 = vmatprep.subr.bf16.mxu1 %v12382_v4  ;;  %v12407_v2 = vld [vmem:[#allocation2 + $0x9a0] ss:$28 sps:$4 sm:$0xff]   ;;  %v12410_v4 = vld [vmem:[#allocation2 + $0x9a8] ss:$28 sps:$4 sm:$0xff]  }
 0x10b   :  { %2674 = vmatprep.mubr.bf16.mxu0 %v13822_v5  ;;  %3126 = vmatprep.mubr.bf16.mxu1 %v13822_v5 }
 0x10d   :  { %2730 = vmatpush1.bf16.msra.mxu0 %v12377_v6  ;;  %3182 = vmatpush1.bf16.msra.mxu1 %v12380_v7  ;;  %v12415_v6 = vld [vmem:[#allocation2 + $0x9dc] ss:$28 sps:$4 sm:$0xff]   ;;  %v12418_v7 = vld [vmem:[#allocation2 + $0x9e4] ss:$28 sps:$4 sm:$0xff]  }
 0x10e   :  { %2731 = vmatprep.subr.bf16.mxu0 %v12385_v12  ;;  %3183 = vmatprep.subr.bf16.mxu1 %v12388_v14  ;;  %v13882_v12 = vpack.c.bf16 %v211_v1, %v204_v63  ;;  %v203_v14 = vld [vmem:[%s15617_s0 + $0x320] sm:$0xff]  ;;  %v12464_v63 = vld [vmem:[#allocation2 + $0x1d8] ss:$28 sps:$4 sm:$0xff]  }
 0x10f   :  { %v121_v1 = vld [vmem:[%s15617_s0 + $0x90] sm:$0xff] }
 0x110   :  { %2675 = vmatmul.mubr.bf16.gmra.mrb[16].mxu0 %v13834_v16  ;;  %3127 = vmatmul.mubr.bf16.gmra.mrb[16].mxu1 %v13834_v16 }
 0x111   :  { %2732 = vmatpush1.bf16.msra.mxu0 %v12383_v21  ;;  %3184 = vmatpush1.bf16.msra.mxu1 %v12386_v22  ;;  %v12424_v21 = vld [vmem:[#allocation2 + $0xa1c] ss:$28 sps:$4 sm:$0xff]   ;;  %v12419_v22 = vld [vmem:[#allocation2 + $0xa10] ss:$28 sps:$4 sm:$0xff]  }
 0x112   :  { %2733 = vmatprep.subr.bf16.mxu0 %v12391_v24  ;;  %3185 = vmatprep.subr.bf16.mxu1 %v12394_v26  ;;  %v13894_v24 = vpack.c.bf16 %v210_v18, %v203_v14  ;;  %v12422_v26 = vld [vmem:[#allocation2 + $0xa18] ss:$28 sps:$4 sm:$0xff]  }
 0x113   :  { %2684 = vmatprep.mubr.bf16.mxu0 %v13842_v29  ;;  %3136 = vmatprep.mubr.bf16.mxu1 %v13842_v29  ;;  %v142_v14 = vld [vmem:[%s15617_s0 + $0x138] sm:$0xff] }
 0x114   :  { %v150_v18 = vld [vmem:[%s15617_s0 + $0x178] sm:$0xff] }
 0x115   :  { %2734 = vmatpush1.bf16.msra.mxu0 %v12389_v27  ;;  %3186 = vmatpush1.bf16.msra.mxu1 %v12392_v30  ;;  %v108_v27 = vld [vmem:[%s15617_s0 + $0x28] sm:$0xff]  ;;  %v115_v30 = vld [vmem:[%s15617_s0 + $0x60] sm:$0xff] }
 0x116   :  { %2735 = vmatprep.subr.bf16.mxu0 %v12397_v35  ;;  %3187 = vmatprep.subr.bf16.mxu1 %v12400_v36  ;;  %v12425_v35 = vld [vmem:[#allocation2 + $0xa48] ss:$28 sps:$4 sm:$0xff]   ;;  %v12428_v36 = vld [vmem:[#allocation2 + $0xa50] ss:$28 sps:$4 sm:$0xff]  }
 0x118   :  { %2685 = vmatmul.mubr.bf16.gmra.mrb[20].mxu0 %v13854_v39  ;;  %3137 = vmatmul.mubr.bf16.gmra.mrb[20].mxu1 %v13854_v39 }
 0x119   :  { %2736 = vmatpush1.bf16.msra.mxu0 %v12395_v38  ;;  %3188 = vmatpush1.bf16.msra.mxu1 %v12398_v45  ;;  %v13902_v38 = vpack.c.bf16 %v115_v30, %v108_v27  ;;  %v12433_v45 = vld [vmem:[#allocation2 + $0xa84] ss:$28 sps:$4 sm:$0xff]   ;;  %v156_v27 = vld [vmem:[%s15617_s0 + $0x1a8] sm:$0xff] }
 0x11a   :  { %2737 = vmatprep.subr.bf16.mxu0 %v12403_v46  ;;  %3189 = vmatprep.subr.bf16.mxu1 %v12406_v47  ;;  %v122_v46 = vld [vmem:[%s15617_s0 + $0x98] sm:$0xff]  ;;  %v129_v47 = vld [vmem:[%s15617_s0 + $0xd0] sm:$0xff]  ;;  %v164_v30 = vld [vmem:[%s15617_s0 + $0x1e8] sm:$0xff] }
 0x11b   :  { %2694 = vmatprep.mubr.bf16.mxu0 %v13862_v53  ;;  %3146 = vmatprep.mubr.bf16.mxu1 %v13862_v53  ;;  %v13922_v56 = vpack.c.bf16 %v129_v47, %v122_v46 }
 0x11d   :  { %2738 = vmatpush1.bf16.msra.mxu0 %v12401_v48  ;;  %3190 = vmatpush1.bf16.msra.mxu1 %v12404_v54  ;;  %v12436_v48 = vld [vmem:[#allocation2 + $0xa8c] ss:$28 sps:$4 sm:$0xff]   ;;  %v13920_v54 = vpack.c.bf16 %v114_v44, %v107_v42  ;;  %v170_v42 = vld [vmem:[%s15617_s0 + $0x218] sm:$0xff] }
 0x11e   :  { %2739 = vmatprep.subr.bf16.mxu0 %v12409_v57  ;;  %3191 = vmatprep.subr.bf16.mxu1 %v12412_v61  ;;  %v12434_v57 = vld [vmem:[#allocation2 + $0xa88] ss:$28 sps:$4 sm:$0xff]   ;;  %v12439_v61 = vld [vmem:[#allocation2 + $0x14] ss:$28 sps:$4 sm:$0xff]   ;;  %v178_v44 = vld [vmem:[%s15617_s0 + $0x258] sm:$0xff] }
 0x120   :  { %2695 = vmatmul.mubr.bf16.gmra.mrb[24].mxu0 %v13874_v62  ;;  %3147 = vmatmul.mubr.bf16.gmra.mrb[24].mxu1 %v13874_v62 }
 0x121   :  { %2740 = vmatpush1.bf16.msra.mxu0 %v12407_v2  ;;  %3192 = vmatpush1.bf16.msra.mxu1 %v12410_v4  ;;  %v128_v2 = vld [vmem:[%s15617_s0 + $0xc8] sm:$0xff] }
 0x122   :  { %2741 = vmatprep.subr.bf16.mxu0 %v12415_v6  ;;  %3193 = vmatprep.subr.bf16.mxu1 %v12418_v7  ;;  %v136_v4 = vld [vmem:[%s15617_s0 + $0x108] sm:$0xff]  ;;  %v143_v6 = vld [vmem:[%s15617_s0 + $0x140] sm:$0xff]  ;;  %v13940_v7 = vpack.c.bf16 %v128_v2, %v121_v1 }
 0x123   :  { %2704 = vmatprep.mubr.bf16.mxu0 %v13882_v12  ;;  %3156 = vmatprep.mubr.bf16.mxu1 %v13882_v12  ;;  %v191_v2 = vld [vmem:[%s15617_s0 + $0x2c0] sm:$0xff] }
 0x125   :  { %2742 = vmatpush1.bf16.msra.mxu0 %v12413_v9  ;;  %3194 = vmatpush1.bf16.msra.mxu1 %v12416_v11  ;;  %v13942_v9 = vpack.c.bf16 %v143_v6, %v136_v4  ;;  %v135_v11 = vld [vmem:[%s15617_s0 + $0x100] sm:$0xff]  ;;  %v198_v4 = vld [vmem:[%s15617_s0 + $0x2f8] sm:$0xff] }
 0x126   :  { %2743 = vmatprep.subr.bf16.mxu0 %v12421_v19  ;;  %3195 = vmatprep.subr.bf16.mxu1 %v12424_v21  ;;  %v157_v19 = vld [vmem:[%s15617_s0 + $0x1b0] sm:$0xff]  ;;  %v13960_v21 = vpack.c.bf16 %v142_v14, %v135_v11  ;;  %v206_v6 = vld [vmem:[%s15617_s0 + $0x338] sm:$0xff]  ;;  %v14040_v14 = vpack.c.bf16 %v198_v4, %v191_v2  ;;  %v12445_v4 = vld [vmem:[#allocation2 + $0x84] ss:$28 sps:$4 sm:$0xff]  }
 0x127   :  { %v213_v11 = vld [vmem:[%s15617_s0 + $0x370] sm:$0xff] }
 0x128   :  { %2705 = vmatmul.mubr.bf16.gmra.mrb[28].mxu0 %v13894_v24  ;;  %3157 = vmatmul.mubr.bf16.gmra.mrb[28].mxu1 %v13894_v24  ;;  %v12469_v2 = vld [vmem:[#allocation2 + $0x210] ss:$28 sps:$4 sm:$0xff]  }
 0x129   :  { %2744 = vmatpush1.bf16.msra.mxu0 %v12419_v22  ;;  %3196 = vmatpush1.bf16.msra.mxu1 %v12422_v26  ;;  %v13962_v22 = vpack.c.bf16 %v157_v19, %v150_v18  ;;  %v149_v26 = vld [vmem:[%s15617_s0 + $0x170] sm:$0xff]  ;;  %v14042_v18 = vpack.c.bf16 %v213_v11, %v206_v6  ;;  %v12443_v11 = vld [vmem:[#allocation2 + $0x80] ss:$28 sps:$4 sm:$0xff]  }
 0x12a   :  { %2745 = vmatprep.subr.bf16.mxu0 %v12427_v31  ;;  %3197 = vmatprep.subr.bf16.mxu1 %v12430_v33  ;;  %v171_v31 = vld [vmem:[%s15617_s0 + $0x220] sm:$0xff]  ;;  %v13980_v33 = vpack.c.bf16 %v156_v27, %v149_v26  ;;  %v205_v19 = vld [vmem:[%s15617_s0 + $0x330] sm:$0xff]  ;;  %v212_v26 = vld [vmem:[%s15617_s0 + $0x368] sm:$0xff] }
 0x12b   :  { %2747 = vmatprep.mubr.bf16.mxu0 %v13902_v38  ;;  %3199 = vmatprep.mubr.bf16.mxu1 %v13902_v38  ;;  %v14054_v27 = vpack.c.bf16 %v212_v26, %v205_v19  ;;  %v12470_v6 = vld [vmem:[#allocation2 + $0x50] ss:$28 sps:$4 sm:$0xff]   ;;  %v12448_v26 = vld [vmem:[#allocation2 + $0xbc] ss:$28 sps:$4 sm:$0xff]  }
 0x12d   :  { %2746 = vmatpush1.bf16.msra.mxu0 %v12425_v35  ;;  %3198 = vmatpush1.bf16.msra.mxu1 %v12428_v36  ;;  %v13982_v35 = vpack.c.bf16 %v171_v31, %v164_v30  ;;  %v163_v36 = vld [vmem:[%s15617_s0 + $0x1e0] sm:$0xff]  ;;  %v15625_v30 = vmov 0   ;;  %v109_v31 = vld [vmem:[%s15617_s0 + $0x30] sm:$0xff] }
 0x12e   :  { %2828 = vmatprep.subr.bf16.mxu0 %v12433_v45  ;;  %3280 = vmatprep.subr.bf16.mxu1 %v12436_v48  ;;  %v185_v45 = vld [vmem:[%s15617_s0 + $0x290] sm:$0xff]  ;;  %v14000_v46 = vpack.c.bf16 %v170_v42, %v163_v36  ;;  %v116_v36 = vld [vmem:[%s15617_s0 + $0x68] sm:$0xff] }
 0x12f   :  { %v14002_v47 = vpack.c.bf16 %v185_v45, %v178_v44  ;;  %v177_v48 = vld [vmem:[%s15617_s0 + $0x250] sm:$0xff]  ;;  %v14066_v44 = vpack.c.bf16 %v116_v36, %v109_v31  ;;  %v12442_v45 = vld [vmem:[#allocation2 + $0x4c] ss:$28 sps:$4 sm:$0xff]  }
 0x130   :  { %2748 = vmatmul.mubr.bf16.vlgmr.msra.gmra.mrb[0].mxu0 %v13920_v54  ;;  %3200 = vmatmul.mubr.bf16.vlgmr.msra.gmra.mrb[0].mxu1 %v13920_v54  ;;  %v12437_v42 = vld [vmem:[#allocation2 + $0x10] ss:$28 sps:$4 sm:$0xff]   ;;  %v12474_v31 = vld [vmem:[#allocation2 + $0x248] ss:$28 sps:$4 sm:$0xff]   ;;  %v12446_v36 = vld [vmem:[#allocation2 + $0xb8] ss:$28 sps:$4 sm:$0xff]  }
 0x131   :  { %2829 = vmatpush1.bf16.msra.mxu0 %v12431_v55  ;;  %2757 = vmatprep.mubr.bf16.mxu0 %v13922_v56  ;;  %v184_v55 = vld [vmem:[%s15617_s0 + $0x288] sm:$0xff]  ;;  %15666 = vst [vmem:[#allocation16_spill] sm:$0xff] %v14066_v44 }
 0x132   :  { %3209 = vmatprep.mubr.bf16.mxu1 %v13922_v56  ;;  %3281 = vmatpush1.bf16.msra.mxu1 %v12434_v57  ;;  %v192_v57 = vld [vmem:[%s15617_s0 + $0x2c8] sm:$0xff] }
 0x133   :  { %3393 = vmatprep.subr.bf16.mxu0 %v12439_v61  ;;  %10665 = vmatprep.subr.bf16.mxu1 %v12464_v63  ;;  %v199_v61 = vld [vmem:[%s15617_s0 + $0x300] sm:$0xff]  ;;  %v14020_v63 = vpack.c.bf16 %v184_v55, %v177_v48  ;;  %v12465_v48 = vld [vmem:[#allocation2 + $0x18] ss:$28 sps:$4 sm:$0xff]  }
 0x134   :  { %v14022_v1 = vpack.c.bf16 %v199_v61, %v192_v57  ;;  %v12440_v55 = vld [vmem:[#allocation2 + $0x48] ss:$28 sps:$4 sm:$0xff]   ;;  %v130_v61 = vld [vmem:[%s15617_s0 + $0xd8] sm:$0xff] }
 0x135   :  { %v123_v57 = vld [vmem:[%s15617_s0 + $0xa0] sm:$0xff] }
 0x136   :  { %v14080_v19 = vpack.c.bf16 %v130_v61, %v123_v57  ;;  %v12479_v57 = vld [vmem:[#allocation2 + $0x280] ss:$28 sps:$4 sm:$0xff]   ;;  %v12449_v61 = vld [vmem:[#allocation2 + $0xf0] ss:$28 sps:$4 sm:$0xff]  }
 0x138   :  { %2758 = vmatmul.mubr.bf16.gmra.mrb[4].mxu0 %v13940_v7  ;;  %3210 = vmatmul.mubr.bf16.gmra.mrb[4].mxu1 %v13940_v7  ;;  %15667 = vst [vmem:[#allocation17_spill] sm:$0xff] %v14080_v19 }
 0x139   :  { %2767 = vmatprep.mubr.bf16.mxu0 %v13942_v9  ;;  %3219 = vmatprep.mubr.bf16.mxu1 %v13942_v9 }
 0x140   :  { %2768 = vmatmul.mubr.bf16.gmra.mrb[8].mxu0 %v13960_v21  ;;  %3220 = vmatmul.mubr.bf16.gmra.mrb[8].mxu1 %v13960_v21 }
 0x141   :  { %2777 = vmatprep.mubr.bf16.mxu0 %v13962_v22  ;;  %3229 = vmatprep.mubr.bf16.mxu1 %v13962_v22 }
 0x148   :  { %2778 = vmatmul.mubr.bf16.gmra.mrb[12].mxu0 %v13980_v33  ;;  %3230 = vmatmul.mubr.bf16.gmra.mrb[12].mxu1 %v13980_v33 }
 0x149   :  { %2787 = vmatprep.mubr.bf16.mxu0 %v13982_v35  ;;  %3239 = vmatprep.mubr.bf16.mxu1 %v13982_v35 }
 0x150   :  { %2788 = vmatmul.mubr.bf16.gmra.mrb[16].mxu0 %v14000_v46  ;;  %3240 = vmatmul.mubr.bf16.gmra.mrb[16].mxu1 %v14000_v46 }
 0x151   :  { %2797 = vmatprep.mubr.bf16.mxu0 %v14002_v47  ;;  %3249 = vmatprep.mubr.bf16.mxu1 %v14002_v47 }
 0x158   :  { %2798 = vmatmul.mubr.bf16.gmra.mrb[20].mxu0 %v14020_v63  ;;  %3250 = vmatmul.mubr.bf16.gmra.mrb[20].mxu1 %v14020_v63 }
 0x159   :  { %2807 = vmatprep.mubr.bf16.mxu0 %v14022_v1  ;;  %3259 = vmatprep.mubr.bf16.mxu1 %v14022_v1 }
 0x160   :  { %2808 = vmatmul.mubr.bf16.gmra.mrb[24].mxu0 %v14040_v14  ;;  %3260 = vmatmul.mubr.bf16.gmra.mrb[24].mxu1 %v14040_v14 }
 0x161   :  { %2817 = vmatprep.mubr.bf16.mxu0 %v14042_v18  ;;  %3269 = vmatprep.mubr.bf16.mxu1 %v14042_v18 }
 0x168   :  { %2818 = vmatmul.mubr.bf16.gmra.mrb[28].mxu0 %v14054_v27  ;;  %3270 = vmatmul.mubr.bf16.gmra.mrb[28].mxu1 %v14054_v27 }
 0x169   :  { %2860 = vmatprep.mubr.bf16.mxu0 %v15625_v30  ;;  %3312 = vmatprep.mubr.bf16.mxu1 %v15625_v30 }
 0x170   :  { %10184 = vmatmul.mubr.msk.bf16.vlgmr.msra.gmra.mrb[0].mxu0 %vm2464_vm0, %v14066_v44  ;;  %10192 = vmatmul.mubr.msk.bf16.vlgmr.msra.gmra.mrb[0].mxu1 %vm2464_vm0, %v14066_v44  ;;  %v12452_v44 = vld [vmem:[#allocation2 + $0x128] ss:$28 sps:$4 sm:$0xff]  }
 0x171   :  { %3394 = vmatpush1.bf16.msra.mxu0 %v12437_v42  ;;  %2870 = vmatprep.mubr.bf16.mxu0 %v15625_v30  ;;  %v137_v42 = vld [vmem:[%s15617_s0 + $0x110] sm:$0xff] }
 0x172   :  { %3395 = vmatprep.subr.bf16.mxu0 %v12442_v45  ;;  %3322 = vmatprep.mubr.bf16.mxu1 %v15625_v30  ;;  %v144_v45 = vld [vmem:[%s15617_s0 + $0x148] sm:$0xff] }
 0x173   :  { %10666 = vmatpush3.bf16.msra.mxu1 %v12465_v48  ;;  %v12475_v30 = vld [vmem:[#allocation2 + $0x88] ss:$28 sps:$4 sm:$0xff]   ;;  %v15668_v48 = vmov 0  }
 0x174   :  { %10667 = vmatprep.subr.bf16.mxu1 %v12469_v2  ;;  %v14094_v2 = vpack.c.bf16 %v144_v45, %v137_v42  ;;  %v12460_v45 = vld [vmem:[#allocation2 + $0x19c] ss:$28 sps:$4 sm:$0xff]  }
 0x175   :  { %3396 = vmatpush1.bf16.msra.mxu0 %v12440_v55  ;;  %v12451_v55 = vld [vmem:[#allocation2 + $0xf4] ss:$28 sps:$4 sm:$0xff]  }
 0x176   :  { %3397 = vmatprep.subr.bf16.mxu0 %v12445_v4  ;;  %15669 = vst [vmem:[#allocation18_spill] sm:$0xff] %v14094_v2  ;;  %v12454_v4 = vld [vmem:[#allocation2 + $0x12c] ss:$28 sps:$4 sm:$0xff]  }
 0x177   :  { %10668 = vmatpush3.bf16.msra.mxu1 %v12470_v6  ;;  %v12480_v6 = vld [vmem:[#allocation2 + $0xc0] ss:$28 sps:$4 sm:$0xff]  }
 0x178   :  { %10185 = vmatmul.mubr.msk.bf16.gmra.mrb[4].mxu0 %vm2464_vm0, %v14080_v19  ;;  %10193 = vmatmul.mubr.msk.bf16.gmra.mrb[4].mxu1 %vm2464_vm0, %v14080_v19  ;;  %v12484_v19 = vld [vmem:[#allocation2 + $0x2b8] ss:$28 sps:$4 sm:$0xff]  }
 0x179   :  { %3398 = vmatpush1.bf16.msra.mxu0 %v12443_v11  ;;  %2880 = vmatprep.mubr.bf16.mxu0 %v15668_v48  ;;  %v151_v11 = vld [vmem:[%s15617_s0 + $0x180] sm:$0xff] }
 0x17a   :  { %3399 = vmatprep.subr.bf16.mxu0 %v12448_v26  ;;  %3332 = vmatprep.mubr.bf16.mxu1 %v15668_v48  ;;  %v158_v26 = vld [vmem:[%s15617_s0 + $0x1b8] sm:$0xff] }
 0x17b   :  { %10669 = vmatprep.subr.bf16.mxu1 %v12474_v31  ;;  %v12485_v31 = vld [vmem:[#allocation2 + $0xf8] ss:$28 sps:$4 sm:$0xff]   ;;  %v14108_v42 = vpack.c.bf16 %v158_v26, %v151_v11  ;;  %v12468_v26 = vld [vmem:[#allocation2 + $0x20c] ss:$28 sps:$4 sm:$0xff]  }
 0x17c   :  { %10670 = vmatpush3.bf16.msra.mxu1 %v12475_v30  ;;  %v12457_v30 = vld [vmem:[#allocation2 + $0x164] ss:$28 sps:$4 sm:$0xff]  }
 0x17d   :  { %3400 = vmatpush1.bf16.msra.mxu0 %v12446_v36  ;;  %10671 = vmatprep.subr.bf16.mxu1 %v12479_v57  ;;  %v12455_v36 = vld [vmem:[#allocation2 + $0x160] ss:$28 sps:$4 sm:$0xff]   ;;  %15670 = vst [vmem:[#allocation19_spill] sm:$0xff] %v14108_v42  ;;  %v12458_v57 = vld [vmem:[#allocation2 + $0x198] ss:$28 sps:$4 sm:$0xff]  }
 0x17e   :  { %3401 = vmatprep.subr.bf16.mxu0 %v12451_v55  ;;  %v12489_v55 = vld [vmem:[#allocation2 + $0x2f0] ss:$28 sps:$4 sm:$0xff]  }
 0x180   :  { %10186 = vmatmul.mubr.msk.bf16.gmra.mrb[8].mxu0 %vm2464_vm0, %v14094_v2  ;;  %10194 = vmatmul.mubr.msk.bf16.gmra.mrb[8].mxu1 %vm2464_vm0, %v14094_v2  ;;  %v12490_v2 = vld [vmem:[#allocation2 + $0x130] ss:$28 sps:$4 sm:$0xff]  }
 0x181   :  { %3402 = vmatpush1.bf16.msra.mxu0 %v12449_v61  ;;  %2890 = vmatprep.mubr.bf16.mxu0 %v15668_v48  ;;  %v165_v61 = vld [vmem:[%s15617_s0 + $0x1f0] sm:$0xff] }
 0x182   :  { %3403 = vmatprep.subr.bf16.mxu0 %v12454_v4  ;;  %3342 = vmatprep.mubr.bf16.mxu1 %v15668_v48  ;;  %v172_v4 = vld [vmem:[%s15617_s0 + $0x228] sm:$0xff] }
 0x183   :  { %10672 = vmatpush3.bf16.msra.mxu1 %v12480_v6  ;;  %v12461_v6 = vld [vmem:[#allocation2 + $0x1d0] ss:$28 sps:$4 sm:$0xff]   ;;  %v14122_v11 = vpack.c.bf16 %v172_v4, %v165_v61  ;;  %v12478_v4 = vld [vmem:[#allocation2 + $0x27c] ss:$28 sps:$4 sm:$0xff]  }
 0x184   :  { %10673 = vmatprep.subr.bf16.mxu1 %v12484_v19  ;;  %v12494_v19 = vld [vmem:[#allocation2 + $0x328] ss:$28 sps:$4 sm:$0xff]  }
 0x185   :  { %3404 = vmatpush1.bf16.msra.mxu0 %v12452_v44  ;;  %v12463_v44 = vld [vmem:[#allocation2 + $0x1d4] ss:$28 sps:$4 sm:$0xff]  }
 0x186   :  { %3405 = vmatprep.subr.bf16.mxu0 %v12457_v30  ;;  %v12466_v30 = vld [vmem:[#allocation2 + $0x208] ss:$28 sps:$4 sm:$0xff]  }
 0x187   :  { %10674 = vmatpush3.bf16.msra.mxu1 %v12485_v31  ;;  %v12495_v31 = vld [vmem:[#allocation2 + $0x168] ss:$28 sps:$4 sm:$0xff]  }
 0x188   :  { %10187 = vmatmul.mubr.msk.bf16.gmra.mrb[12].mxu0 %vm2464_vm0, %v14108_v42  ;;  %10195 = vmatmul.mubr.msk.bf16.gmra.mrb[12].mxu1 %vm2464_vm0, %v14108_v42  ;;  %v12499_v42 = vld [vmem:[#allocation2 + $0x360] ss:$28 sps:$4 sm:$0xff]  }
 0x189   :  { %3406 = vmatpush1.bf16.msra.mxu0 %v12455_v36  ;;  %2900 = vmatprep.mubr.bf16.mxu0 %v15668_v48  ;;  %v186_v36 = vld [vmem:[%s15617_s0 + $0x298] sm:$0xff] }
 0x18a   :  { %3407 = vmatprep.subr.bf16.mxu0 %v12460_v45  ;;  %3352 = vmatprep.mubr.bf16.mxu1 %v15668_v48  ;;  %v12473_v45 = vld [vmem:[#allocation2 + $0x244] ss:$28 sps:$4 sm:$0xff]  }
 0x18b   :  { %10675 = vmatprep.subr.bf16.mxu1 %v12489_v55  ;;  %v12471_v55 = vld [vmem:[#allocation2 + $0x240] ss:$28 sps:$4 sm:$0xff]  }
 0x18c   :  { %10676 = vmatpush3.bf16.msra.mxu1 %v12490_v2  ;;  %v179_v2 = vld [vmem:[%s15617_s0 + $0x260] sm:$0xff] }
 0x18d   :  { %3408 = vmatpush1.bf16.msra.mxu0 %v12458_v57  ;;  %10677 = vmatprep.subr.bf16.mxu1 %v12494_v19  ;;  %v12500_v57 = vld [vmem:[#allocation2 + $0x1a0] ss:$28 sps:$4 sm:$0xff]   ;;  %v14136_v61 = vpack.c.bf16 %v186_v36, %v179_v2  ;;  %v12528_v19 = vld [vmem:[#allocation2 + $0x558] ss:$28 sps:$4 sm:$0xff]   ;;  %v12488_v2 = vld [vmem:[#allocation2 + $0x2ec] ss:$28 sps:$4 sm:$0xff]  }
 0x18e   :  { %3409 = vmatprep.subr.bf16.mxu0 %v12463_v44  ;;  %v12476_v44 = vld [vmem:[#allocation2 + $0x278] ss:$28 sps:$4 sm:$0xff]   ;;  %v12486_v36 = vld [vmem:[#allocation2 + $0x2e8] ss:$28 sps:$4 sm:$0xff]  }
 0x190   :  { %10188 = vmatmul.mubr.msk.bf16.gmra.mrb[16].mxu0 %vm2464_vm0, %v14122_v11  ;;  %10196 = vmatmul.mubr.msk.bf16.gmra.mrb[16].mxu1 %vm2464_vm0, %v14122_v11 }
 0x191   :  { %3410 = vmatpush1.bf16.msra.mxu0 %v12461_v6  ;;  %2910 = vmatprep.mubr.bf16.mxu0 %v15668_v48  ;;  %v193_v6 = vld [vmem:[%s15617_s0 + $0x2d0] sm:$0xff] }
 0x192   :  { %3411 = vmatprep.subr.bf16.mxu0 %v12468_v26  ;;  %3362 = vmatprep.mubr.bf16.mxu1 %v15668_v48  ;;  %v12483_v26 = vld [vmem:[#allocation2 + $0x2b4] ss:$28 sps:$4 sm:$0xff]  }
 0x193   :  { %10678 = vmatpush3.bf16.msra.mxu1 %v12495_v31 }
 0x194   :  { %10679 = vmatprep.subr.bf16.mxu1 %v12499_v42  ;;  %v200_v42 = vld [vmem:[%s15617_s0 + $0x308] sm:$0xff] }
 0x195   :  { %3412 = vmatpush1.bf16.msra.mxu0 %v12466_v30  ;;  %v12481_v30 = vld [vmem:[#allocation2 + $0x2b0] ss:$28 sps:$4 sm:$0xff]   ;;  %v14150_v31 = vpack.c.bf16 %v200_v42, %v193_v6  ;;  %v12496_v6 = vld [vmem:[#allocation2 + $0x358] ss:$28 sps:$4 sm:$0xff]  }
 0x196   :  { %3413 = vmatprep.subr.bf16.mxu0 %v12473_v45  ;;  %v207_v45 = vld [vmem:[%s15617_s0 + $0x340] sm:$0xff]  ;;  %v12503_v42 = vld [vmem:[#allocation2 + $0x394] ss:$28 sps:$4 sm:$0xff]  }
 0x197   :  { %10680 = vmatpush3.bf16.msra.mxu1 %v12500_v57  ;;  %v12493_v57 = vld [vmem:[#allocation2 + $0x324] ss:$28 sps:$4 sm:$0xff]  }
 0x198   :  { %10189 = vmatmul.mubr.msk.bf16.gmra.mrb[20].mxu0 %vm2464_vm0, %v14136_v61  ;;  %10197 = vmatmul.mubr.msk.bf16.gmra.mrb[20].mxu1 %vm2464_vm0, %v14136_v61 }
 0x199   :  { %3414 = vmatpush1.bf16.msra.mxu0 %v12471_v55  ;;  %2920 = vmatprep.mubr.bf16.mxu0 %v15668_v48  ;;  %v214_v55 = vld [vmem:[%s15617_s0 + $0x378] sm:$0xff] }
 0x19a   :  { %3415 = vmatprep.subr.bf16.mxu0 %v12478_v4  ;;  %3372 = vmatprep.mubr.bf16.mxu1 %v15668_v48  ;;  %v12491_v4 = vld [vmem:[#allocation2 + $0x320] ss:$28 sps:$4 sm:$0xff]  }
 0x19b   :  { %10729 = vmatprep.subr.bf16.mxu1 %v12528_v19  ;;  %v12498_v19 = vld [vmem:[#allocation2 + $0x35c] ss:$28 sps:$4 sm:$0xff]  }
 0x19d   :  { %3416 = vmatpush1.bf16.msra.mxu0 %v12476_v44  ;;  %v14164_v44 = vpack.c.bf16 %v214_v55, %v207_v45  ;;  %v12509_v45 = vld [vmem:[#allocation2 + $0x404] ss:$28 sps:$4 sm:$0xff]   ;;  %v12533_v55 = vld [vmem:[#allocation2 + $0x590] ss:$28 sps:$4 sm:$0xff]  }
 0x19e   :  { %3417 = vmatprep.subr.bf16.mxu0 %v12483_v26  ;;  %v12501_v26 = vld [vmem:[#allocation2 + $0x390] ss:$28 sps:$4 sm:$0xff]  }
 0x1a0   :  { %10190 = vmatmul.mubr.msk.bf16.gmra.mrb[24].mxu0 %vm2464_vm0, %v14150_v31  ;;  %10198 = vmatmul.mubr.msk.bf16.gmra.mrb[24].mxu1 %vm2464_vm0, %v14150_v31 }
 0x1a1   :  { %3418 = vmatpush1.bf16.msra.mxu0 %v12481_v30  ;;  %2930 = vmatprep.mubr.bf16.mxu0 %v15668_v48  ;;  %v12506_v30 = vld [vmem:[#allocation2 + $0x3cc] ss:$28 sps:$4 sm:$0xff]  }
 0x1a2   :  { %3419 = vmatprep.subr.bf16.mxu0 %v12488_v2  ;;  %3382 = vmatprep.mubr.bf16.mxu1 %v15668_v48  ;;  %v12529_v2 = vld [vmem:[#allocation2 + $0x398] ss:$28 sps:$4 sm:$0xff]  }
 0x1a5   :  { %3420 = vmatpush1.bf16.msra.mxu0 %v12486_v36  ;;  %v12504_v36 = vld [vmem:[#allocation2 + $0x3c8] ss:$28 sps:$4 sm:$0xff]  }
 0x1a6   :  { %3421 = vmatprep.subr.bf16.mxu0 %v12493_v57  ;;  %v12534_v57 = vld [vmem:[#allocation2 + $0x3d0] ss:$28 sps:$4 sm:$0xff]  }
 0x1a8   :  { %10191 = vmatmul.mubr.msk.bf16.gmra.mrb[28].mxu0 %vm2464_vm0, %v14164_v44  ;;  %10199 = vmatmul.mubr.msk.bf16.gmra.mrb[28].mxu1 %vm2464_vm0, %v14164_v44 }
 0x1a9   :  { %3422 = vmatpush1.bf16.msra.mxu0 %v12491_v4  ;;  %3425 = vmatprep.mubr.bf16.mxu0 %v13584_v51  ;;  %v12512_v4 = vld [vmem:[#allocation2 + $0x43c] ss:$28 sps:$4 sm:$0xff]  }
 0x1aa   :  { %3423 = vmatprep.subr.bf16.mxu0 %v12498_v19  ;;  %3877 = vmatprep.mubr.bf16.mxu1 %v13584_v51  ;;  %v12507_v51 = vld [vmem:[#allocation2 + $0x400] ss:$28 sps:$4 sm:$0xff]   ;;  %v12538_v19 = vld [vmem:[#allocation2 + $0x5c8] ss:$28 sps:$4 sm:$0xff]  }
 0x1ad   :  { %3424 = vmatpush1.bf16.msra.mxu0 %v12496_v6  ;;  %v12539_v6 = vld [vmem:[#allocation2 + $0x408] ss:$28 sps:$4 sm:$0xff]  }
 0x1ae   :  { %3506 = vmatprep.subr.bf16.mxu0 %v12503_v42  ;;  %v12510_v42 = vld [vmem:[#allocation2 + $0x438] ss:$28 sps:$4 sm:$0xff]  }
 0x1b0   :  { %3426 = vmatmul.mubr.bf16.vlgmr.msra.gmra.mrb[32].mxu0 %v13594_v8  ;;  %3878 = vmatmul.mubr.bf16.vlgmr.msra.gmra.mrb[32].mxu1 %v13594_v8  ;;  %v12543_v8 = vld [vmem:[#allocation2 + $0x600] ss:$28 sps:$4 sm:$0xff]  }
 0x1b1   :  { %3507 = vmatpush1.bf16.msra.mxu0 %v12501_v26  ;;  %3435 = vmatprep.mubr.bf16.mxu0 %v13602_v15  ;;  %v12515_v26 = vld [vmem:[#allocation2 + $0x474] ss:$28 sps:$4 sm:$0xff]  }
 0x1b2   :  { %3508 = vmatprep.subr.bf16.mxu0 %v12506_v30  ;;  %3885 = vmatprep.mubr.bf16.mxu1 %v13602_v15  ;;  %v12513_v15 = vld [vmem:[#allocation2 + $0x470] ss:$28 sps:$4 sm:$0xff]  }
 0x1b3   :  { %10730 = vmatpush3.bf16.msra.mxu1 %v12529_v2  ;;  %v12518_v30 = vld [vmem:[#allocation2 + $0x4ac] ss:$28 sps:$4 sm:$0xff]   ;;  %v12544_v2 = vld [vmem:[#allocation2 + $0x440] ss:$28 sps:$4 sm:$0xff]  }
 0x1b4   :  { %10731 = vmatprep.subr.bf16.mxu1 %v12533_v55  ;;  %v12549_v55 = vld [vmem:[#allocation2 + $0x478] ss:$28 sps:$4 sm:$0xff]  }
 0x1b5   :  { %3509 = vmatpush1.bf16.msra.mxu0 %v12504_v36  ;;  %v12516_v36 = vld [vmem:[#allocation2 + $0x4a8] ss:$28 sps:$4 sm:$0xff]  }
 0x1b6   :  { %3510 = vmatprep.subr.bf16.mxu0 %v12509_v45  ;;  %v12548_v45 = vld [vmem:[#allocation2 + $0x638] ss:$28 sps:$4 sm:$0xff]  }
 0x1b7   :  { %10732 = vmatpush3.bf16.msra.mxu1 %v12534_v57  ;;  %v12524_v57 = vld [vmem:[#allocation2 + $0x51c] ss:$28 sps:$4 sm:$0xff]  }
 0x1b8   :  { %3436 = vmatmul.mubr.bf16.gmra.mrb[36].mxu0 %v13614_v23  ;;  %3886 = vmatmul.mubr.bf16.gmra.mrb[36].mxu1 %v13614_v23  ;;  %v12521_v23 = vld [vmem:[#allocation2 + $0x4e4] ss:$28 sps:$4 sm:$0xff]  }
 0x1b9   :  { %3511 = vmatpush1.bf16.msra.mxu0 %v12507_v51  ;;  %3445 = vmatprep.mubr.bf16.mxu0 %v13622_v28  ;;  %v12553_v51 = vld [vmem:[#allocation2 + $0x670] ss:$28 sps:$4 sm:$0xff]  }
 0x1ba   :  { %3512 = vmatprep.subr.bf16.mxu0 %v12512_v4  ;;  %3893 = vmatprep.mubr.bf16.mxu1 %v13622_v28  ;;  %v12519_v28 = vld [vmem:[#allocation2 + $0x4e0] ss:$28 sps:$4 sm:$0xff]   ;;  %v12554_v4 = vld [vmem:[#allocation2 + $0x4b0] ss:$28 sps:$4 sm:$0xff]  }
 0x1bb   :  { %10733 = vmatprep.subr.bf16.mxu1 %v12538_v19  ;;  %v12522_v19 = vld [vmem:[#allocation2 + $0x518] ss:$28 sps:$4 sm:$0xff]  }
 0x1bc   :  { %10734 = vmatpush3.bf16.msra.mxu1 %v12539_v6  ;;  %v12527_v6 = vld [vmem:[#allocation2 + $0x554] ss:$28 sps:$4 sm:$0xff]  }
 0x1bd   :  { %3513 = vmatpush1.bf16.msra.mxu0 %v12510_v42  ;;  %10735 = vmatprep.subr.bf16.mxu1 %v12543_v8  ;;  %v12532_v42 = vld [vmem:[#allocation2 + $0x58c] ss:$28 sps:$4 sm:$0xff]  }
 0x1be   :  { %3514 = vmatprep.subr.bf16.mxu0 %v12515_v26  ;;  %v12559_v8 = vld [vmem:[#allocation2 + $0x4e8] ss:$28 sps:$4 sm:$0xff]   ;;  %v12563_v26 = vld [vmem:[#allocation2 + $0x6e0] ss:$28 sps:$4 sm:$0xff]  }
 0x1c0   :  { %3446 = vmatmul.mubr.bf16.gmra.mrb[40].mxu0 %v13634_v37  ;;  %3894 = vmatmul.mubr.bf16.gmra.mrb[40].mxu1 %v13634_v37  ;;  %v12558_v37 = vld [vmem:[#allocation2 + $0x6a8] ss:$28 sps:$4 sm:$0xff]  }
 0x1c1   :  { %3515 = vmatpush1.bf16.msra.mxu0 %v12513_v15  ;;  %3455 = vmatprep.mubr.bf16.mxu0 %v13642_v43  ;;  %v12530_v15 = vld [vmem:[#allocation2 + $0x588] ss:$28 sps:$4 sm:$0xff]  }
 0x1c2   :  { %3516 = vmatprep.subr.bf16.mxu0 %v12518_v30  ;;  %3901 = vmatprep.mubr.bf16.mxu1 %v13642_v43  ;;  %v12525_v43 = vld [vmem:[#allocation2 + $0x550] ss:$28 sps:$4 sm:$0xff]   ;;  %v12564_v30 = vld [vmem:[#allocation2 + $0x520] ss:$28 sps:$4 sm:$0xff]  }
 0x1c3   :  { %10736 = vmatpush3.bf16.msra.mxu1 %v12544_v2  ;;  %v12542_v2 = vld [vmem:[#allocation2 + $0x5fc] ss:$28 sps:$4 sm:$0xff]  }
 0x1c4   :  { %10737 = vmatprep.subr.bf16.mxu1 %v12548_v45  ;;  %v12552_v45 = vld [vmem:[#allocation2 + $0x66c] ss:$28 sps:$4 sm:$0xff]  }
 0x1c5   :  { %3517 = vmatpush1.bf16.msra.mxu0 %v12516_v36  ;;  %v12592_v36 = vld [vmem:[#allocation2 + $0x8d8] ss:$28 sps:$4 sm:$0xff]  }
 0x1c6   :  { %3518 = vmatprep.subr.bf16.mxu0 %v12521_v23  ;;  %v12540_v23 = vld [vmem:[#allocation2 + $0x5f8] ss:$28 sps:$4 sm:$0xff]  }
 0x1c7   :  { %10738 = vmatpush3.bf16.msra.mxu1 %v12549_v55  ;;  %v12550_v55 = vld [vmem:[#allocation2 + $0x668] ss:$28 sps:$4 sm:$0xff]  }
 0x1c8   :  { %3456 = vmatmul.mubr.bf16.gmra.mrb[44].mxu0 %v13654_v50  ;;  %3902 = vmatmul.mubr.bf16.gmra.mrb[44].mxu1 %v13654_v50  ;;  %v12537_v50 = vld [vmem:[#allocation2 + $0x5c4] ss:$28 sps:$4 sm:$0xff]  }
 0x1c9   :  { %3519 = vmatpush1.bf16.msra.mxu0 %v12519_v28  ;;  %3465 = vmatprep.mubr.bf16.mxu0 %v13662_v59  ;;  %v12557_v28 = vld [vmem:[#allocation2 + $0x6a4] ss:$28 sps:$4 sm:$0xff]  }
 0x1ca   :  { %3520 = vmatprep.subr.bf16.mxu0 %v12524_v57  ;;  %3909 = vmatprep.mubr.bf16.mxu1 %v13662_v59  ;;  %v12535_v59 = vld [vmem:[#allocation2 + $0x5c0] ss:$28 sps:$4 sm:$0xff]  }
 0x1cb   :  { %10739 = vmatprep.subr.bf16.mxu1 %v12553_v51  ;;  %v12562_v57 = vld [vmem:[#allocation2 + $0x6dc] ss:$28 sps:$4 sm:$0xff]   ;;  %v12565_v51 = vld [vmem:[#allocation2 + $0x710] ss:$28 sps:$4 sm:$0xff]  }
 0x1cc   :  { %10740 = vmatpush3.bf16.msra.mxu1 %v12554_v4  ;;  %v12593_v4 = vld [vmem:[#allocation2 + $0x718] ss:$28 sps:$4 sm:$0xff]  }
 0x1cd   :  { %3521 = vmatpush1.bf16.msra.mxu0 %v12522_v19  ;;  %10741 = vmatprep.subr.bf16.mxu1 %v12558_v37  ;;  %v12568_v19 = vld [vmem:[#allocation2 + $0x748] ss:$28 sps:$4 sm:$0xff]   ;;  %v12597_v37 = vld [vmem:[#allocation2 + $0x910] ss:$28 sps:$4 sm:$0xff]  }
 0x1ce   :  { %3522 = vmatprep.subr.bf16.mxu0 %v12527_v6  ;;  %v12571_v6 = vld [vmem:[#allocation2 + $0x780] ss:$28 sps:$4 sm:$0xff]  }
 0x1d0   :  { %3466 = vmatmul.mubr.bf16.gmra.mrb[48].mxu0 %v13674_v0  ;;  %3910 = vmatmul.mubr.bf16.gmra.mrb[48].mxu1 %v13674_v0  ;;  %v12547_v0 = vld [vmem:[#allocation2 + $0x634] ss:$28 sps:$4 sm:$0xff]  }
 0x1d1   :  { %3523 = vmatpush1.bf16.msra.mxu0 %v12525_v43  ;;  %3475 = vmatprep.mubr.bf16.mxu0 %v13682_v10  ;;  %v12576_v43 = vld [vmem:[#allocation2 + $0x7bc] ss:$28 sps:$4 sm:$0xff]  }
 0x1d2   :  { %3524 = vmatprep.subr.bf16.mxu0 %v12532_v42  ;;  %3917 = vmatprep.mubr.bf16.mxu1 %v13682_v10  ;;  %v12545_v10 = vld [vmem:[#allocation2 + $0x630] ss:$28 sps:$4 sm:$0xff]   ;;  %v12574_v42 = vld [vmem:[#allocation2 + $0x7b8] ss:$28 sps:$4 sm:$0xff]  }
 0x1d3   :  { %10742 = vmatpush3.bf16.msra.mxu1 %v12559_v8  ;;  %v12602_v8 = vld [vmem:[#allocation2 + $0x948] ss:$28 sps:$4 sm:$0xff]  }
 0x1d4   :  { %10743 = vmatprep.subr.bf16.mxu1 %v12563_v26  ;;  %v12603_v26 = vld [vmem:[#allocation2 + $0x788] ss:$28 sps:$4 sm:$0xff]  }
 0x1d5   :  { %3525 = vmatpush1.bf16.msra.mxu0 %v12530_v15  ;;  %v12577_v15 = vld [vmem:[#allocation2 + $0x7f0] ss:$28 sps:$4 sm:$0xff]  }
 0x1d6   :  { %3526 = vmatprep.subr.bf16.mxu0 %v12537_v50  ;;  %v12582_v50 = vld [vmem:[#allocation2 + $0x82c] ss:$28 sps:$4 sm:$0xff]  }
 0x1d7   :  { %10744 = vmatpush3.bf16.msra.mxu1 %v12564_v30  ;;  %v12580_v30 = vld [vmem:[#allocation2 + $0x828] ss:$28 sps:$4 sm:$0xff]  }
 0x1d8   :  { %3476 = vmatmul.mubr.bf16.gmra.mrb[52].mxu0 %v13694_v17  ;;  %3918 = vmatmul.mubr.bf16.gmra.mrb[52].mxu1 %v13694_v17  ;;  %v12555_v17 = vld [vmem:[#allocation2 + $0x6a0] ss:$28 sps:$4 sm:$0xff]  }
 0x1d9   :  { %3527 = vmatpush1.bf16.msra.mxu0 %v12535_v59  ;;  %3485 = vmatprep.mubr.bf16.mxu0 %v13702_v25  ;;  %v12608_v59 = vld [vmem:[#allocation2 + $0x7c0] ss:$28 sps:$4 sm:$0xff]  }
 0x1da   :  { %3528 = vmatprep.subr.bf16.mxu0 %v12542_v2  ;;  %3925 = vmatprep.mubr.bf16.mxu1 %v13702_v25  ;;  %v12560_v25 = vld [vmem:[#allocation2 + $0x6d8] ss:$28 sps:$4 sm:$0xff]   ;;  %v12583_v2 = vld [vmem:[#allocation2 + $0x860] ss:$28 sps:$4 sm:$0xff]  }
 0x1db   :  { %10793 = vmatprep.subr.bf16.mxu1 %v12592_v36  ;;  %v12613_v36 = vld [vmem:[#allocation2 + $0x7f8] ss:$28 sps:$4 sm:$0xff]  }
 0x1dd   :  { %3529 = vmatpush1.bf16.msra.mxu0 %v12540_v23  ;;  %v12588_v23 = vld [vmem:[#allocation2 + $0x89c] ss:$28 sps:$4 sm:$0xff]  }
 0x1de   :  { %3530 = vmatprep.subr.bf16.mxu0 %v12547_v0  ;;  %v12617_v0 = vld [vmem:[#allocation2 + $0x9f0] ss:$28 sps:$4 sm:$0xff]  }
 0x1e0   :  { %3486 = vmatmul.mubr.bf16.gmra.mrb[56].mxu0 %v13714_v34  ;;  %3926 = vmatmul.mubr.bf16.gmra.mrb[56].mxu1 %v13714_v34  ;;  %v12567_v34 = vld [vmem:[#allocation2 + $0x714] ss:$28 sps:$4 sm:$0xff]  }
 0x1e1   :  { %3531 = vmatpush1.bf16.msra.mxu0 %v12545_v10  ;;  %3495 = vmatprep.mubr.bf16.mxu0 %v13722_v40  ;;  %v12586_v10 = vld [vmem:[#allocation2 + $0x898] ss:$28 sps:$4 sm:$0xff]  }
 0x1e2   :  { %3532 = vmatprep.subr.bf16.mxu0 %v12552_v45  ;;  %3933 = vmatprep.mubr.bf16.mxu1 %v13722_v40  ;;  %v12570_v40 = vld [vmem:[#allocation2 + $0x74c] ss:$28 sps:$4 sm:$0xff]  }
 0x1e3   :  { %v12618_v45 = vld [vmem:[#allocation2 + $0x830] ss:$28 sps:$4 sm:$0xff]  }
 0x1e5   :  { %3533 = vmatpush1.bf16.msra.mxu0 %v12550_v55  ;;  %v12589_v55 = vld [vmem:[#allocation2 + $0x8d0] ss:$28 sps:$4 sm:$0xff]  }
 0x1e6   :  { %3534 = vmatprep.subr.bf16.mxu0 %v12557_v28  ;;  %v12596_v28 = vld [vmem:[#allocation2 + $0x90c] ss:$28 sps:$4 sm:$0xff]  }
 0x1e8   :  { %3496 = vmatmul.mubr.bf16.gmra.mrb[60].mxu0 %v13734_v52  ;;  %3934 = vmatmul.mubr.bf16.gmra.mrb[60].mxu1 %v13734_v52  ;;  %v12573_v52 = vld [vmem:[#allocation2 + $0x784] ss:$28 sps:$4 sm:$0xff]  }
 0x1e9   :  { %3535 = vmatpush1.bf16.msra.mxu0 %v12555_v17  ;;  %3538 = vmatprep.mubr.bf16.mxu0 %v13742_v58  ;;  %v12623_v17 = vld [vmem:[#allocation2 + $0x868] ss:$28 sps:$4 sm:$0xff]  }
 0x1ea   :  { %3536 = vmatprep.subr.bf16.mxu0 %v12562_v57  ;;  %3974 = vmatprep.mubr.bf16.mxu1 %v13742_v58  ;;  %v12598_v58 = vld [vmem:[#allocation2 + $0x750] ss:$28 sps:$4 sm:$0xff]   ;;  %v12594_v57 = vld [vmem:[#allocation2 + $0x908] ss:$28 sps:$4 sm:$0xff]  }
 0x1ed   :  { %3537 = vmatpush1.bf16.msra.mxu0 %v12560_v25  ;;  %v12628_v25 = vld [vmem:[#allocation2 + $0x8a0] ss:$28 sps:$4 sm:$0xff]  }
 0x1ee   :  { %3619 = vmatprep.subr.bf16.mxu0 %v12567_v34  ;;  %v12599_v34 = vld [vmem:[#allocation2 + $0x940] ss:$28 sps:$4 sm:$0xff]  }
 0x1f0   :  { %3539 = vmatmul.mubr.bf16.vlgmr.msra.gmra.mrb[32].mxu0 %v13754_v3  ;;  %3975 = vmatmul.mubr.bf16.vlgmr.msra.gmra.mrb[64].mxu1 %v13754_v3  ;;  %v12607_v3 = vld [vmem:[#allocation2 + $0x980] ss:$28 sps:$4 sm:$0xff]  }
 0x1f1   :  { %3620 = vmatpush1.bf16.msra.mxu0 %v12565_v51  ;;  %3548 = vmatprep.mubr.bf16.mxu0 %v13762_v13  ;;  %v12606_v51 = vld [vmem:[#allocation2 + $0x97c] ss:$28 sps:$4 sm:$0xff]  }
 0x1f2   :  { %3621 = vmatprep.subr.bf16.mxu0 %v12570_v40  ;;  %3982 = vmatprep.mubr.bf16.mxu1 %v13762_v13  ;;  %v12579_v13 = vld [vmem:[#allocation2 + $0x7f4] ss:$28 sps:$4 sm:$0xff]  }
 0x1f3   :  { %10794 = vmatpush3.bf16.msra.mxu1 %v12593_v4  ;;  %v12632_v40 = vld [vmem:[#allocation2 + $0xa98] ss:$28 sps:$4 sm:$0xff]   ;;  %v12609_v4 = vld [vmem:[#allocation2 + $0x9b0] ss:$28 sps:$4 sm:$0xff]  }
 0x1f4   :  { %10795 = vmatprep.subr.bf16.mxu1 %v12597_v37  ;;  %v12614_v37 = vld [vmem:[#allocation2 + $0x9e8] ss:$28 sps:$4 sm:$0xff]  }
 0x1f5   :  { %3622 = vmatpush1.bf16.msra.mxu0 %v12568_v19  ;;  %v12616_v19 = vld [vmem:[#allocation2 + $0x9ec] ss:$28 sps:$4 sm:$0xff]  }
 0x1f6   :  { %3623 = vmatprep.subr.bf16.mxu0 %v12573_v52  ;;  %v12626_v52 = vld [vmem:[#allocation2 + $0xa5c] ss:$28 sps:$4 sm:$0xff]  }
 0x1f7   :  { %10796 = vmatpush3.bf16.msra.mxu1 %v12598_v58  ;;  %v12624_v58 = vld [vmem:[#allocation2 + $0xa58] ss:$28 sps:$4 sm:$0xff]  }
 0x1f8   :  { %3549 = vmatmul.mubr.bf16.gmra.mrb[36].mxu0 %v13774_v20  ;;  %3983 = vmatmul.mubr.bf16.gmra.mrb[68].mxu1 %v13774_v20  ;;  %v12612_v20 = vld [vmem:[#allocation2 + $0x9b8] ss:$28 sps:$4 sm:$0xff]  }
 0x1f9   :  { %3624 = vmatpush1.bf16.msra.mxu0 %v12571_v6  ;;  %3558 = vmatprep.mubr.bf16.mxu0 %v13782_v32  ;;  %v12629_v6 = vld [vmem:[#allocation2 + $0xa90] ss:$28 sps:$4 sm:$0xff]  }
 0x1fa   :  { %3625 = vmatprep.subr.bf16.mxu0 %v12576_v43  ;;  %3990 = vmatprep.mubr.bf16.mxu1 %v13782_v32  ;;  %v12585_v32 = vld [vmem:[#allocation2 + $0x864] ss:$28 sps:$4 sm:$0xff]  }
 0x1fb   :  { %10797 = vmatprep.subr.bf16.mxu1 %v12602_v8  ;;  %v12638_v43 = vld [vmem:[#allocation6 + $0x4] ss:$28 sps:$4 sm:$0xff]  }
 0x1fc   :  { %10798 = vmatpush3.bf16.msra.mxu1 %v12603_v26 }
 0x1fd   :  { %3626 = vmatpush1.bf16.msra.mxu0 %v12574_v42  ;;  %10799 = vmatprep.subr.bf16.mxu1 %v12607_v3 }
 0x1fe   :  { %3627 = vmatprep.subr.bf16.mxu0 %v12579_v13 }
 0x200   :  { %3559 = vmatmul.mubr.bf16.gmra.mrb[40].mxu0 %v13794_v41  ;;  %3991 = vmatmul.mubr.bf16.gmra.mrb[72].mxu1 %v13794_v41  ;;  %v12622_v41 = vld [vmem:[#allocation2 + $0xa28] ss:$28 sps:$4 sm:$0xff]  }
 0x201   :  { %3628 = vmatpush1.bf16.msra.mxu0 %v12577_v15  ;;  %3568 = vmatprep.mubr.bf16.mxu0 %v13802_v49 }
 0x202   :  { %3629 = vmatprep.subr.bf16.mxu0 %v12582_v50  ;;  %3998 = vmatprep.mubr.bf16.mxu1 %v13802_v49  ;;  %v12591_v49 = vld [vmem:[#allocation2 + $0x8d4] ss:$28 sps:$4 sm:$0xff]  }
 0x203   :  { %10800 = vmatpush3.bf16.msra.mxu1 %v12608_v59 }
 0x204   :  { %10801 = vmatprep.subr.bf16.mxu1 %v12612_v20 }
 0x205   :  { %3630 = vmatpush1.bf16.msra.mxu0 %v12580_v30 }
 0x206   :  { %3631 = vmatprep.subr.bf16.mxu0 %v12585_v32 }
 0x207   :  { %10802 = vmatpush3.bf16.msra.mxu1 %v12613_v36 }
 0x208   :  { %3569 = vmatmul.mubr.bf16.gmra.mrb[44].mxu0 %v13814_v60  ;;  %3999 = vmatmul.mubr.bf16.gmra.mrb[76].mxu1 %v13814_v60  ;;  %v12627_v60 = vld [vmem:[#allocation2 + $0xa60] ss:$28 sps:$4 sm:$0xff]  }
 0x209   :  { %3632 = vmatpush1.bf16.msra.mxu0 %v12583_v2  ;;  %3578 = vmatprep.mubr.bf16.mxu0 %v13822_v5 }
 0x20a   :  { %3633 = vmatprep.subr.bf16.mxu0 %v12588_v23  ;;  %4006 = vmatprep.mubr.bf16.mxu1 %v13822_v5  ;;  %v12601_v5 = vld [vmem:[#allocation2 + $0x944] ss:$28 sps:$4 sm:$0xff]  }
 0x20b   :  { %10803 = vmatprep.subr.bf16.mxu1 %v12617_v0 }
 0x20c   :  { %10804 = vmatpush3.bf16.msra.mxu1 %v12618_v45 }
 0x20d   :  { %3634 = vmatpush1.bf16.msra.mxu0 %v12586_v10  ;;  %10805 = vmatprep.subr.bf16.mxu1 %v12622_v41 }
 0x20e   :  { %3635 = vmatprep.subr.bf16.mxu0 %v12591_v49 }
 0x210   :  { %3579 = vmatmul.mubr.bf16.gmra.mrb[48].mxu0 %v13834_v16  ;;  %4007 = vmatmul.mubr.bf16.gmra.mrb[80].mxu1 %v13834_v16  ;;  %v12604_v16 = vld [vmem:[#allocation2 + $0x978] ss:$28 sps:$4 sm:$0xff]  }
 0x211   :  { %3636 = vmatpush1.bf16.msra.mxu0 %v12589_v55  ;;  %3588 = vmatprep.mubr.bf16.mxu0 %v13842_v29 }
 0x212   :  { %3637 = vmatprep.subr.bf16.mxu0 %v12596_v28  ;;  %4014 = vmatprep.mubr.bf16.mxu1 %v13842_v29  ;;  %v12611_v29 = vld [vmem:[#allocation2 + $0x9b4] ss:$28 sps:$4 sm:$0xff]  }
 0x213   :  { %10806 = vmatpush3.bf16.msra.mxu1 %v12623_v17 }
 0x214   :  { %10807 = vmatprep.subr.bf16.mxu1 %v12627_v60 }
 0x215   :  { %3638 = vmatpush1.bf16.msra.mxu0 %v12594_v57 }
 0x216   :  { %3639 = vmatprep.subr.bf16.mxu0 %v12601_v5 }
 0x217   :  { %10808 = vmatpush3.bf16.msra.mxu1 %v12628_v25 }
 0x218   :  { %3589 = vmatmul.mubr.bf16.gmra.mrb[52].mxu0 %v13854_v39  ;;  %4015 = vmatmul.mubr.bf16.gmra.mrb[84].mxu1 %v13854_v39  ;;  %v12621_v39 = vld [vmem:[#allocation2 + $0xa24] ss:$28 sps:$4 sm:$0xff]  }
 0x219   :  { %3640 = vmatpush1.bf16.msra.mxu0 %v12599_v34  ;;  %3598 = vmatprep.mubr.bf16.mxu0 %v13862_v53 }
 0x21a   :  { %3641 = vmatprep.subr.bf16.mxu0 %v12606_v51  ;;  %4022 = vmatprep.mubr.bf16.mxu1 %v13862_v53  ;;  %v12619_v53 = vld [vmem:[#allocation2 + $0xa20] ss:$28 sps:$4 sm:$0xff]  }
 0x21b   :  { %11282 = vmatprep.subr.bf16.mxu1 %v12632_v40 }
 0x21d   :  { %3642 = vmatpush1.bf16.msra.mxu0 %v12604_v16 }
 0x21e   :  { %3643 = vmatprep.subr.bf16.mxu0 %v12611_v29 }
 0x220   :  { %3599 = vmatmul.mubr.bf16.gmra.mrb[56].mxu0 %v13874_v62  ;;  %4023 = vmatmul.mubr.bf16.gmra.mrb[88].mxu1 %v13874_v62  ;;  %v12631_v62 = vld [vmem:[#allocation2 + $0xa94] ss:$28 sps:$4 sm:$0xff]  }
 0x221   :  { %3644 = vmatpush1.bf16.msra.mxu0 %v12609_v4  ;;  %3608 = vmatprep.mubr.bf16.mxu0 %v13882_v12 }
 0x222   :  { %3645 = vmatprep.subr.bf16.mxu0 %v12616_v19  ;;  %4030 = vmatprep.mubr.bf16.mxu1 %v13882_v12  ;;  %v12635_v12 = vld [vmem:[#allocation6 + $0xc] ss:$28 sps:$4 sm:$0xff]  }
 0x225   :  { %3646 = vmatpush1.bf16.msra.mxu0 %v12614_v37 }
 0x226   :  { %3647 = vmatprep.subr.bf16.mxu0 %v12621_v39 }
 0x228   :  { %3609 = vmatmul.mubr.bf16.gmra.mrb[60].mxu0 %v13894_v24  ;;  %4031 = vmatmul.mubr.bf16.gmra.mrb[92].mxu1 %v13894_v24  ;;  %v665_v24 = vlaneseq }
 0x229   :  { %3648 = vmatpush1.bf16.msra.mxu0 %v12619_v53  ;;  %3651 = vmatprep.mubr.bf16.mxu0 %v13902_v38 }
 0x22a   :  { %3649 = vmatprep.subr.bf16.mxu0 %v12626_v52  ;;  %4071 = vmatprep.mubr.bf16.mxu1 %v13902_v38  ;;  %v14240_v38 = vshrl.u32 %v665_v24, 7 }
 0x22c   :  { %15671 = vst [vmem:[#allocation20_spill] sm:$0xff] %v14240_v38  ;;  %v15638_v42 = vsub.s32 0, %v14240_v38  ;;  %v15637_v8 = vsub.s32 2, %v14240_v38  ;;  %v15635_v26 = vsub.s32 3, %v14240_v38 }
 0x22d   :  { %3650 = vmatpush1.bf16.msra.mxu0 %v12624_v58 }
 0x22e   :  { %3732 = vmatprep.subr.bf16.mxu0 %v12631_v62 }
 0x230   :  { %3652 = vmatmul.mubr.bf16.vlgmr.msra.gmra.mrb[32].mxu0 %v13920_v54  ;;  %4072 = vmatmul.mubr.bf16.vlgmr.msra.gmra.mrb[96].mxu1 %v13920_v54  ;;  %v663_v54 = vld [vmem:[#allocation4] sm:$0xff] }
 0x231   :  { %3733 = vmatpush1.bf16.msra.mxu0 %v12629_v6  ;;  %3661 = vmatprep.mubr.bf16.mxu0 %v13922_v56  ;;  %v14266_v13 = vrot.slane %v663_v54, %v15635_v26  ;;  %v12654_v26 = vld [vmem:[#allocation6 + $0xa8] ss:$28 sps:$4 sm:$0xff]  }
 0x232   :  { %4079 = vmatprep.mubr.bf16.mxu1 %v13922_v56  ;;  %11283 = vmatpush3.bf16.msra.mxu1 %v12632_v40  ;;  %v15636_v56 = vsub.s32 1, %v14240_v38 }
 0x233   :  { %7354 = vmatprep.subr.bf16.mxu1 %v12635_v12  ;;  %6902 = vmatprep.subr.bf16.mxu0 %v12638_v43 }
 0x234   :  { %v14262_v3 = vrot.slane %v663_v54, %v15636_v56 }
 0x238   :  { %3662 = vmatmul.mubr.bf16.gmra.mrb[36].mxu0 %v13940_v7  ;;  %4080 = vmatmul.mubr.bf16.gmra.mrb[100].mxu1 %v13940_v7  ;;  %v14254_v7 = vrot.slane %v663_v54, %v15638_v42 }
 0x239   :  { %3671 = vmatprep.mubr.bf16.mxu0 %v13942_v9  ;;  %4087 = vmatprep.mubr.bf16.mxu1 %v13942_v9  ;;  %v14258_v9 = vrot.slane %v663_v54, %v15637_v8 }
 0x240   :  { %3672 = vmatmul.mubr.bf16.gmra.mrb[40].mxu0 %v13960_v21  ;;  %4088 = vmatmul.mubr.bf16.gmra.mrb[104].mxu1 %v13960_v21 }
 0x241   :  { %3681 = vmatprep.mubr.bf16.mxu0 %v13962_v22  ;;  %4095 = vmatprep.mubr.bf16.mxu1 %v13962_v22 }
 0x243   :  { %v2862_v21 = vpop.f32.mrb[0].mxu0  ;;  %v3314_v15 = vpop.f32.mrb[0].mxu1 }
 0x244   :  { %v11364_v50 = vadd.f32 %v2862_v21, %v14254_v7  ;;  %v11396_v30 = vadd.f32 %v3314_v15, %v14258_v9  ;;  %v2864_v59 = vpop.f32.mrb[1].mxu0  ;;  %v3316_v20 = vpop.f32.mrb[1].mxu1 }
 0x245   :  { %v11365_v32 = vadd.f32 %v2864_v59, %v14262_v3  ;;  %v11397_v2 = vadd.f32 %v3316_v20, %v14266_v13  ;;  %v2866_v36 = vpop.f32.mrb[2].mxu0  ;;  %v3318_v23 = vpop.f32.mrb[2].mxu1 }
 0x246   :  { %v11366_v0 = vadd.f32 %v2866_v36, %v14254_v7  ;;  %v11398_v10 = vadd.f32 %v3318_v23, %v14258_v9  ;;  %v2868_v45 = vpop.f32.mrb[3].mxu0  ;;  %v3320_v22 = vpop.f32.mrb[3].mxu1  ;;  %v4233_v41 = vmax.f32 %v11364_v50, 0.0  ;;  %v4235_v49 = vmax.f32 %v11396_v30, 0.0 }
 0x247   :  { %v11367_v55 = vadd.f32 %v2868_v45, %v14262_v3  ;;  %v11399_v28 = vadd.f32 %v3320_v22, %v14266_v13  ;;  %v4234_v17 = vmax.f32 %v11365_v32, 0.0  ;;  %v4236_v60 = vmax.f32 %v11397_v2, 0.0 }
 0x248   :  { %v4240_v57 = vmax.f32 %v11366_v0, 0.0  ;;  %v4242_v5 = vmax.f32 %v11398_v10, 0.0  ;;  %3682 = vmatmul.mubr.bf16.gmra.mrb[44].mxu0 %v13980_v33  ;;  %4096 = vmatmul.mubr.bf16.gmra.mrb[108].mxu1 %v13980_v33 }
 0x249   :  { %v4241_v25 = vmax.f32 %v11367_v55, 0.0  ;;  %v4243_v34 = vmax.f32 %v11399_v28, 0.0  ;;  %3691 = vmatprep.mubr.bf16.mxu0 %v13982_v35  ;;  %4103 = vmatprep.mubr.bf16.mxu1 %v13982_v35 }
 0x24a   :  { %v14282_v51 = vpack.c.bf16 %v4240_v57, %v4233_v41  ;;  %v14284_v40 = vpack.c.bf16 %v4242_v5, %v4235_v49 }
 0x24b   :  { %v14286_v16 = vpack.c.bf16 %v4241_v25, %v4234_v17  ;;  %v14288_v29 = vpack.c.bf16 %v4243_v34, %v4236_v60  ;;  %v2872_v4 = vpop.f32.mrb[4].mxu0  ;;  %v3324_v19 = vpop.f32.mrb[4].mxu1 }
 0x24c   :  { %v11368_v37 = vadd.f32 %v2872_v4, %v14254_v7  ;;  %v11400_v33 = vadd.f32 %v3324_v19, %v14258_v9  ;;  %v2874_v39 = vpop.f32.mrb[5].mxu0  ;;  %v3326_v53 = vpop.f32.mrb[5].mxu1 }
 0x24d   :  { %v11369_v52 = vadd.f32 %v2874_v39, %v14262_v3  ;;  %v11401_v35 = vadd.f32 %v3326_v53, %v14266_v13  ;;  %v2876_v58 = vpop.f32.mrb[6].mxu0  ;;  %v3328_v62 = vpop.f32.mrb[6].mxu1 }
 0x24e   :  { %v11370_v6 = vadd.f32 %v2876_v58, %v14254_v7  ;;  %v11402_v12 = vadd.f32 %v3328_v62, %v14258_v9  ;;  %v2878_v43 = vpop.f32.mrb[7].mxu0  ;;  %v3330_v24 = vpop.f32.mrb[7].mxu1  ;;  %v4247_v54 = vmax.f32 %v11368_v37, 0.0  ;;  %v4249_v21 = vmax.f32 %v11400_v33, 0.0 }
 0x24f   :  { %v11371_v15 = vadd.f32 %v2878_v43, %v14262_v3  ;;  %v11403_v50 = vadd.f32 %v3330_v24, %v14266_v13  ;;  %v4248_v30 = vmax.f32 %v11369_v52, 0.0  ;;  %v4250_v59 = vmax.f32 %v11401_v35, 0.0 }
 0x250   :  { %v4254_v20 = vmax.f32 %v11370_v6, 0.0  ;;  %v4256_v32 = vmax.f32 %v11402_v12, 0.0  ;;  %3692 = vmatmul.mubr.bf16.gmra.mrb[48].mxu0 %v14000_v46  ;;  %4104 = vmatmul.mubr.bf16.gmra.mrb[112].mxu1 %v14000_v46 }
 0x251   :  { %v4255_v2 = vmax.f32 %v11371_v15, 0.0  ;;  %v4257_v36 = vmax.f32 %v11403_v50, 0.0  ;;  %3701 = vmatprep.mubr.bf16.mxu0 %v14002_v47  ;;  %4111 = vmatprep.mubr.bf16.mxu1 %v14002_v47 }
 0x252   :  { %v14302_v23 = vpack.c.bf16 %v4254_v20, %v4247_v54  ;;  %v14304_v0 = vpack.c.bf16 %v4256_v32, %v4249_v21 }
 0x253   :  { %v14306_v10 = vpack.c.bf16 %v4255_v2, %v4248_v30  ;;  %v14308_v45 = vpack.c.bf16 %v4257_v36, %v4250_v59  ;;  %v2882_v22 = vpop.f32.mrb[8].mxu0  ;;  %v3334_v41 = vpop.f32.mrb[8].mxu1 }
 0x254   :  { %v11372_v49 = vadd.f32 %v2882_v22, %v14254_v7  ;;  %v11404_v46 = vadd.f32 %v3334_v41, %v14258_v9  ;;  %v2884_v55 = vpop.f32.mrb[9].mxu0  ;;  %v3336_v28 = vpop.f32.mrb[9].mxu1 }
 0x255   :  { %v11373_v17 = vadd.f32 %v2884_v55, %v14262_v3  ;;  %v11405_v47 = vadd.f32 %v3336_v28, %v14266_v13  ;;  %v2886_v60 = vpop.f32.mrb[10].mxu0  ;;  %v3338_v57 = vpop.f32.mrb[10].mxu1 }
 0x256   :  { %v11374_v5 = vadd.f32 %v2886_v60, %v14254_v7  ;;  %v11406_v25 = vadd.f32 %v3338_v57, %v14258_v9  ;;  %v2888_v34 = vpop.f32.mrb[11].mxu0  ;;  %v3340_v4 = vpop.f32.mrb[11].mxu1  ;;  %v4261_v19 = vmax.f32 %v11372_v49, 0.0  ;;  %v4263_v37 = vmax.f32 %v11404_v46, 0.0 }
 0x257   :  { %v11375_v33 = vadd.f32 %v2888_v34, %v14262_v3  ;;  %v11407_v39 = vadd.f32 %v3340_v4, %v14266_v13  ;;  %v4262_v53 = vmax.f32 %v11373_v17, 0.0  ;;  %v4264_v52 = vmax.f32 %v11405_v47, 0.0 }
 0x258   :  { %v4268_v35 = vmax.f32 %v11374_v5, 0.0  ;;  %v4270_v58 = vmax.f32 %v11406_v25, 0.0  ;;  %3702 = vmatmul.mubr.bf16.gmra.mrb[52].mxu0 %v14020_v63  ;;  %4112 = vmatmul.mubr.bf16.gmra.mrb[116].mxu1 %v14020_v63 }
 0x259   :  { %v4269_v62 = vmax.f32 %v11375_v33, 0.0  ;;  %v4271_v6 = vmax.f32 %v11407_v39, 0.0  ;;  %3711 = vmatprep.mubr.bf16.mxu0 %v14022_v1  ;;  %4119 = vmatprep.mubr.bf16.mxu1 %v14022_v1 }
 0x25a   :  { %v14322_v12 = vpack.c.bf16 %v4268_v35, %v4261_v19  ;;  %v14324_v43 = vpack.c.bf16 %v4270_v58, %v4263_v37 }
 0x25b   :  { %v14326_v24 = vpack.c.bf16 %v4269_v62, %v4262_v53  ;;  %v14328_v54 = vpack.c.bf16 %v4271_v6, %v4264_v52  ;;  %v2892_v21 = vpop.f32.mrb[12].mxu0  ;;  %v3344_v15 = vpop.f32.mrb[12].mxu1 }
 0x25c   :  { %15672 = vst [vmem:[#allocation21_spill] sm:$0xff] %v14322_v12  ;;  %v11376_v50 = vadd.f32 %v2892_v21, %v14254_v7  ;;  %v11408_v63 = vadd.f32 %v3344_v15, %v14258_v9  ;;  %v2894_v30 = vpop.f32.mrb[13].mxu0  ;;  %v3346_v59 = vpop.f32.mrb[13].mxu1 }
 0x25d   :  { %15673 = vst [vmem:[#allocation22_spill] sm:$0xff] %v14326_v24  ;;  %v11377_v20 = vadd.f32 %v2894_v30, %v14262_v3  ;;  %v11409_v1 = vadd.f32 %v3346_v59, %v14266_v13  ;;  %v2896_v32 = vpop.f32.mrb[14].mxu0  ;;  %v3348_v2 = vpop.f32.mrb[14].mxu1 }
 0x25e   :  { %v11378_v36 = vadd.f32 %v2896_v32, %v14254_v7  ;;  %v11410_v22 = vadd.f32 %v3348_v2, %v14258_v9  ;;  %v2898_v41 = vpop.f32.mrb[15].mxu0  ;;  %v3350_v49 = vpop.f32.mrb[15].mxu1  ;;  %v4275_v46 = vmax.f32 %v11376_v50, 0.0  ;;  %v4277_v55 = vmax.f32 %v11408_v63, 0.0 }
 0x25f   :  { %v11379_v28 = vadd.f32 %v2898_v41, %v14262_v3  ;;  %v11411_v17 = vadd.f32 %v3350_v49, %v14266_v13  ;;  %v4276_v47 = vmax.f32 %v11377_v20, 0.0  ;;  %v4278_v60 = vmax.f32 %v11409_v1, 0.0 }
 0x260   :  { %v4282_v57 = vmax.f32 %v11378_v36, 0.0  ;;  %v4284_v5 = vmax.f32 %v11410_v22, 0.0  ;;  %3712 = vmatmul.mubr.bf16.gmra.mrb[56].mxu0 %v14040_v14  ;;  %4120 = vmatmul.mubr.bf16.gmra.mrb[120].mxu1 %v14040_v14 }
 0x261   :  { %v4283_v25 = vmax.f32 %v11379_v28, 0.0  ;;  %v4285_v34 = vmax.f32 %v11411_v17, 0.0  ;;  %3721 = vmatprep.mubr.bf16.mxu0 %v14042_v18  ;;  %4127 = vmatprep.mubr.bf16.mxu1 %v14042_v18 }
 0x262   :  { %v14342_v4 = vpack.c.bf16 %v4282_v57, %v4275_v46  ;;  %v14344_v19 = vpack.c.bf16 %v4284_v5, %v4277_v55  ;;  %v15675_v55 = vld [vmem:[#allocation16_spill] sm:$0xff] }
 0x263   :  { %v14346_v37 = vpack.c.bf16 %v4283_v25, %v4276_v47  ;;  %v14348_v33 = vpack.c.bf16 %v4285_v34, %v4278_v60  ;;  %v2902_v39 = vpop.f32.mrb[16].mxu0  ;;  %v3354_v53 = vpop.f32.mrb[16].mxu1  ;;  %v12633_v25 = vld [vmem:[#allocation6 + $0x8] ss:$28 sps:$4 sm:$0xff]   ;;  %v12636_v34 = vld [vmem:[#allocation6] ss:$28 sps:$4 sm:$0xff]  }
 0x264   :  { %v11380_v52 = vadd.f32 %v2902_v39, %v14254_v7  ;;  %v11412_v14 = vadd.f32 %v3354_v53, %v14258_v9  ;;  %v2904_v35 = vpop.f32.mrb[17].mxu0  ;;  %v3356_v58 = vpop.f32.mrb[17].mxu1 }
 0x265   :  { %15674 = vst [vmem:[#allocation23_spill] sm:$0xff] %v14346_v37  ;;  %v11381_v62 = vadd.f32 %v2904_v35, %v14262_v3  ;;  %v11413_v18 = vadd.f32 %v3356_v58, %v14266_v13  ;;  %v2906_v6 = vpop.f32.mrb[18].mxu0  ;;  %v3358_v21 = vpop.f32.mrb[18].mxu1  ;;  %v12644_v35 = vld [vmem:[#allocation6 + $0x3c] ss:$28 sps:$4 sm:$0xff]  }
 0x266   :  { %v11382_v15 = vadd.f32 %v2906_v6, %v14254_v7  ;;  %v11414_v50 = vadd.f32 %v3358_v21, %v14258_v9  ;;  %v2908_v63 = vpop.f32.mrb[19].mxu0  ;;  %v3360_v30 = vpop.f32.mrb[19].mxu1  ;;  %v4289_v59 = vmax.f32 %v11380_v52, 0.0  ;;  %v4291_v20 = vmax.f32 %v11412_v14, 0.0  ;;  %v12641_v14 = vld [vmem:[#allocation6 + $0x44] ss:$28 sps:$4 sm:$0xff]  }
 0x267   :  { %v11383_v1 = vadd.f32 %v2908_v63, %v14262_v3  ;;  %v11415_v32 = vadd.f32 %v3360_v30, %v14266_v13  ;;  %v4290_v2 = vmax.f32 %v11381_v62, 0.0  ;;  %v4292_v36 = vmax.f32 %v11413_v18, 0.0 }
 0x268   :  { %v4296_v22 = vmax.f32 %v11382_v15, 0.0  ;;  %v4298_v41 = vmax.f32 %v11414_v50, 0.0  ;;  %3722 = vmatmul.mubr.bf16.gmra.mrb[60].mxu0 %v14054_v27  ;;  %4128 = vmatmul.mubr.bf16.gmra.mrb[124].mxu1 %v14054_v27 }
 0x269   :  { %v4297_v49 = vmax.f32 %v11383_v1, 0.0  ;;  %v4299_v46 = vmax.f32 %v11415_v32, 0.0  ;;  %3764 = vmatprep.mubr.bf16.mxu0 %v15668_v48  ;;  %11284 = vmatprep.mubr.msk.bf16.mxu1 %vm2464_vm0, %v15675_v55 }
 0x26a   :  { %v14363_v28 = vpack.c.bf16 %v4296_v22, %v4289_v59  ;;  %v14365_v17 = vpack.c.bf16 %v4298_v41, %v4291_v20  ;;  %v12642_v22 = vld [vmem:[#allocation6 + $0x38] ss:$28 sps:$4 sm:$0xff]  }
 0x26b   :  { %v14367_v47 = vpack.c.bf16 %v4297_v49, %v4290_v2  ;;  %v14369_v60 = vpack.c.bf16 %v4299_v46, %v4292_v36  ;;  %v2912_v57 = vpop.f32.mrb[20].mxu0  ;;  %v3364_v5 = vpop.f32.mrb[20].mxu1  ;;  %v12639_v36 = vld [vmem:[#allocation6 + $0x40] ss:$28 sps:$4 sm:$0xff]   ;;  %v15676_v46 = vld [vmem:[#allocation17_spill] sm:$0xff] }
 0x26c   :  { %v11384_v27 = vadd.f32 %v2912_v57, %v14254_v7  ;;  %v11416_v39 = vadd.f32 %v3364_v5, %v14258_v9  ;;  %v2914_v53 = vpop.f32.mrb[21].mxu0  ;;  %v3366_v52 = vpop.f32.mrb[21].mxu1  ;;  %v12647_v57 = vld [vmem:[#allocation6 + $0x7c] ss:$28 sps:$4 sm:$0xff]   ;;  %v12650_v5 = vld [vmem:[#allocation6 + $0x74] ss:$28 sps:$4 sm:$0xff]  }
 0x26d   :  { %v11385_v58 = vadd.f32 %v2914_v53, %v14262_v3  ;;  %v11417_v62 = vadd.f32 %v3366_v52, %v14266_v13  ;;  %v2916_v18 = vpop.f32.mrb[22].mxu0  ;;  %v3368_v6 = vpop.f32.mrb[22].mxu1 }
 0x26e   :  { %v4303_v21 = vmax.f32 %v11384_v27, 0.0  ;;  %v4305_v15 = vmax.f32 %v11416_v39, 0.0  ;;  %v11386_v50 = vadd.f32 %v2916_v18, %v14254_v7  ;;  %v11418_v63 = vadd.f32 %v3368_v6, %v14258_v9  ;;  %v2918_v30 = vpop.f32.mrb[23].mxu0  ;;  %v3370_v59 = vpop.f32.mrb[23].mxu1  ;;  %v15679_v6 = vld [vmem:[#allocation18_spill] sm:$0xff] }
 0x26f   :  { %v4304_v20 = vmax.f32 %v11385_v58, 0.0  ;;  %v4306_v1 = vmax.f32 %v11417_v62, 0.0  ;;  %v11387_v32 = vadd.f32 %v2918_v30, %v14262_v3  ;;  %v11419_v2 = vadd.f32 %v3370_v59, %v14266_v13 }
 0x270   :  { %v4310_v41 = vmax.f32 %v11386_v50, 0.0  ;;  %v4312_v49 = vmax.f32 %v11418_v63, 0.0  ;;  %10200 = vmatmul.mubr.msk.bf16.vlgmr.msra.gmra.mrb[32].mxu0 %vm2464_vm0, %v15675_v55  ;;  %11285 = vmatmul.mubr.msk.bf16.vlgmr.msra.gmra.mrb[128].mxu1 %vm2464_vm0, %v15676_v46  ;;  %v12645_v50 = vld [vmem:[#allocation6 + $0x78] ss:$28 sps:$4 sm:$0xff]   ;;  %v12656_v63 = vld [vmem:[#allocation6 + $0xac] ss:$28 sps:$4 sm:$0xff]  }
 0x271   :  { %v4311_v27 = vmax.f32 %v11387_v32, 0.0  ;;  %v4313_v39 = vmax.f32 %v11419_v2, 0.0  ;;  %7355 = vmatpush1.bf16.msra.mxu1 %v12633_v25  ;;  %6903 = vmatpush1.bf16.msra.mxu0 %v12636_v34  ;;  %v12648_v25 = vld [vmem:[#allocation6 + $0x70] ss:$28 sps:$4 sm:$0xff]  }
 0x272   :  { %v14383_v53 = vpack.c.bf16 %v4310_v41, %v4303_v21  ;;  %v14385_v52 = vpack.c.bf16 %v4312_v49, %v4305_v15  ;;  %7356 = vmatprep.subr.bf16.mxu1 %v12641_v14  ;;  %6904 = vmatprep.subr.bf16.mxu0 %v12644_v35  ;;  %v12653_v35 = vld [vmem:[#allocation6 + $0xb4] ss:$28 sps:$4 sm:$0xff]  }
 0x273   :  { %v14387_v58 = vpack.c.bf16 %v4311_v27, %v4304_v20  ;;  %v14389_v62 = vpack.c.bf16 %v4313_v39, %v4306_v1  ;;  %v2922_v55 = vpop.f32.mrb[24].mxu0  ;;  %v3374_v18 = vpop.f32.mrb[24].mxu1  ;;  %3774 = vmatprep.mubr.bf16.mxu0 %v15668_v48  ;;  %11288 = vmatprep.mubr.msk.bf16.mxu1 %vm2464_vm0, %v15679_v6 }
 0x274   :  { %15677 = vst [vmem:[#allocation16_spill] sm:$0xff] %v14385_v52  ;;  %v11388_v34 = vadd.f32 %v2922_v55, %v14254_v7  ;;  %v11420_v21 = vadd.f32 %v3374_v18, %v14258_v9  ;;  %v2924_v15 = vpop.f32.mrb[25].mxu0  ;;  %v3376_v14 = vpop.f32.mrb[25].mxu1 }
 0x275   :  { %15678 = vst [vmem:[#allocation17_spill] sm:$0xff] %v14389_v62  ;;  %v11389_v30 = vadd.f32 %v2924_v15, %v14262_v3  ;;  %v11421_v59 = vadd.f32 %v3376_v14, %v14266_v13  ;;  %7357 = vmatpush1.bf16.msra.mxu1 %v12639_v36  ;;  %v2926_v20 = vpop.f32.mrb[26].mxu0  ;;  %v3378_v1 = vpop.f32.mrb[26].mxu1  ;;  %6905 = vmatpush1.bf16.msra.mxu0 %v12642_v22  ;;  %v12651_v36 = vld [vmem:[#allocation6 + $0xb0] ss:$28 sps:$4 sm:$0xff]  }
 0x276   :  { %v4317_v32 = vmax.f32 %v11388_v34, 0.0  ;;  %v4319_v2 = vmax.f32 %v11420_v21, 0.0  ;;  %v11390_v41 = vadd.f32 %v2926_v20, %v14254_v7  ;;  %v11422_v49 = vadd.f32 %v3378_v1, %v14258_v9  ;;  %v2928_v27 = vpop.f32.mrb[27].mxu0  ;;  %v3380_v39 = vpop.f32.mrb[27].mxu1  ;;  %7358 = vmatprep.subr.bf16.mxu1 %v12647_v57  ;;  %6906 = vmatprep.subr.bf16.mxu0 %v12650_v5  ;;  %v15680_v34 = vld [vmem:[#allocation19_spill] sm:$0xff] }
 0x277   :  { %v4318_v55 = vmax.f32 %v11389_v30, 0.0  ;;  %v4320_v18 = vmax.f32 %v11421_v59, 0.0  ;;  %v11391_v15 = vadd.f32 %v2928_v27, %v14262_v3  ;;  %v11423_v14 = vadd.f32 %v3380_v39, %v14266_v13  ;;  %v12659_v21 = vld [vmem:[#allocation6 + $0xec] ss:$28 sps:$4 sm:$0xff]   ;;  %v12662_v20 = vld [vmem:[#allocation6 + $0xe4] ss:$28 sps:$4 sm:$0xff]  }
 0x278   :  { %v4324_v56 = vmax.f32 %v11390_v41, 0.0  ;;  %v4326_v22 = vmax.f32 %v11422_v49, 0.0  ;;  %10201 = vmatmul.mubr.msk.bf16.gmra.mrb[36].mxu0 %vm2464_vm0, %v15676_v46  ;;  %11289 = vmatmul.mubr.msk.bf16.gmra.mrb[132].mxu1 %vm2464_vm0, %v15680_v34  ;;  %v12657_v27 = vld [vmem:[#allocation6 + $0xe8] ss:$28 sps:$4 sm:$0xff]  }
 0x279   :  { %v4325_v57 = vmax.f32 %v11391_v15, 0.0  ;;  %v4327_v5 = vmax.f32 %v11423_v14, 0.0  ;;  %7359 = vmatpush1.bf16.msra.mxu1 %v12645_v50  ;;  %6907 = vmatpush1.bf16.msra.mxu0 %v12648_v25  ;;  %v12660_v50 = vld [vmem:[#allocation6 + $0xe0] ss:$28 sps:$4 sm:$0xff]  }
 0x27a   :  { %v14406_v30 = vpack.c.bf16 %v4324_v56, %v4317_v32  ;;  %v14408_v59 = vpack.c.bf16 %v4326_v22, %v4319_v2  ;;  %7360 = vmatprep.subr.bf16.mxu1 %v12653_v35  ;;  %6908 = vmatprep.subr.bf16.mxu0 %v12656_v63  ;;  %v12665_v63 = vld [vmem:[#allocation6 + $0x124] ss:$28 sps:$4 sm:$0xff]   ;;  %v12668_v2 = vld [vmem:[#allocation6 + $0x11c] ss:$28 sps:$4 sm:$0xff]  }
 0x27b   :  { %v14410_v1 = vpack.c.bf16 %v4325_v57, %v4318_v55  ;;  %v14412_v41 = vpack.c.bf16 %v4327_v5, %v4320_v18  ;;  %v2932_v46 = vpop.f32.mrb[28].mxu0  ;;  %v3384_v49 = vpop.f32.mrb[28].mxu1  ;;  %3784 = vmatprep.mubr.bf16.mxu0 %v15668_v48  ;;  %11292 = vmatprep.mubr.msk.bf16.mxu1 %vm2464_vm0, %v14122_v11 }
 0x27c   :  { %15681 = vst [vmem:[#allocation18_spill] sm:$0xff] %v14408_v59  ;;  %v11392_v56 = vadd.f32 %v2932_v46, %v14254_v7  ;;  %v11424_v25 = vadd.f32 %v3384_v49, %v14258_v9  ;;  %v2934_v32 = vpop.f32.mrb[29].mxu0  ;;  %v3386_v35 = vpop.f32.mrb[29].mxu1  ;;  %v12666_v59 = vld [vmem:[#allocation6 + $0x118] ss:$28 sps:$4 sm:$0xff]  }
 0x27d   :  { %15682 = vst [vmem:[#allocation19_spill] sm:$0xff] %v14412_v41  ;;  %v11393_v39 = vadd.f32 %v2934_v32, %v14262_v3  ;;  %v11425_v55 = vadd.f32 %v3386_v35, %v14266_v13  ;;  %7361 = vmatpush1.bf16.msra.mxu1 %v12651_v36  ;;  %v2936_v18 = vpop.f32.mrb[30].mxu0  ;;  %v3388_v15 = vpop.f32.mrb[30].mxu1  ;;  %6909 = vmatpush1.bf16.msra.mxu0 %v12654_v26  ;;  %v12663_v36 = vld [vmem:[#allocation6 + $0x120] ss:$28 sps:$4 sm:$0xff]  }
 0x27e   :  { %v4331_v14 = vmax.f32 %v11392_v56, 0.0  ;;  %v4333_v22 = vmax.f32 %v11424_v25, 0.0  ;;  %v11394_v57 = vadd.f32 %v2936_v18, %v14254_v7  ;;  %v11426_v5 = vadd.f32 %v3388_v15, %v14258_v9  ;;  %v2938_v46 = vpop.f32.mrb[31].mxu0  ;;  %v3390_v49 = vpop.f32.mrb[31].mxu1  ;;  %7362 = vmatprep.subr.bf16.mxu1 %v12659_v21  ;;  %6910 = vmatprep.subr.bf16.mxu0 %v12662_v20  ;;  %v12678_v18 = vld [vmem:[#allocation6 + $0x188] ss:$28 sps:$4 sm:$0xff]  }
 0x27f   :  { %v4332_v8 = vmax.f32 %v11393_v39, 0.0  ;;  %v4334_v42 = vmax.f32 %v11425_v55, 0.0  ;;  %v11395_v32 = vadd.f32 %v2938_v46, %v14262_v3  ;;  %v11427_v35 = vadd.f32 %v3390_v49, %v14266_v13  ;;  %v12671_v3 = vld [vmem:[#allocation6 + $0x15c] ss:$28 sps:$4 sm:$0xff]   ;;  %v12674_v13 = vld [vmem:[#allocation6 + $0x154] ss:$28 sps:$4 sm:$0xff]  }
 0x280   :  { %v4338_v41 = vmax.f32 %v11394_v57, 0.0  ;;  %v4340_v26 = vmax.f32 %v11426_v5, 0.0  ;;  %10202 = vmatmul.mubr.msk.bf16.gmra.mrb[40].mxu0 %vm2464_vm0, %v15679_v6  ;;  %11293 = vmatmul.mubr.msk.bf16.gmra.mrb[136].mxu1 %vm2464_vm0, %v14136_v61  ;;  %v12683_v15 = vld [vmem:[#allocation6 + $0x1cc] ss:$28 sps:$4 sm:$0xff]   ;;  %v12684_v5 = vld [vmem:[#allocation6 + $0x1c0] ss:$28 sps:$4 sm:$0xff]  }
 0x281   :  { %v4339_v7 = vmax.f32 %v11395_v32, 0.0  ;;  %v4341_v9 = vmax.f32 %v11427_v35, 0.0  ;;  %7363 = vmatpush1.bf16.msra.mxu1 %v12657_v27  ;;  %6911 = vmatpush1.bf16.msra.mxu0 %v12660_v50  ;;  %v12672_v50 = vld [vmem:[#allocation6 + $0x150] ss:$28 sps:$4 sm:$0xff]   ;;  %v12689_v32 = vld [vmem:[#allocation6 + $0x204] ss:$28 sps:$4 sm:$0xff]  }
 0x282   :  { %v14429_v21 = vpack.c.bf16 %v4338_v41, %v4331_v14  ;;  %v14431_v20 = vpack.c.bf16 %v4340_v26, %v4333_v22  ;;  %7364 = vmatprep.subr.bf16.mxu1 %v12665_v63  ;;  %6912 = vmatprep.subr.bf16.mxu0 %v12668_v2  ;;  %v12669_v41 = vld [vmem:[#allocation6 + $0x158] ss:$28 sps:$4 sm:$0xff]   ;;  %v12686_v14 = vld [vmem:[#allocation6 + $0x1c4] ss:$28 sps:$4 sm:$0xff]  }
 0x283   :  { %v14433_v56 = vpack.c.bf16 %v4339_v7, %v4332_v8  ;;  %v14435_v25 = vpack.c.bf16 %v4341_v9, %v4334_v42  ;;  %3794 = vmatprep.mubr.bf16.mxu0 %v15668_v48  ;;  %11296 = vmatprep.mubr.msk.bf16.mxu1 %vm2464_vm0, %v14150_v31  ;;  %v10681_v6 = vpop.f32.mrb[32].mxu1  ;;  %v12677_v8 = vld [vmem:[#allocation6 + $0x194] ss:$28 sps:$4 sm:$0xff]   ;;  %v12680_v42 = vld [vmem:[#allocation6 + $0x18c] ss:$28 sps:$4 sm:$0xff]  }
 0x284   :  { %15683 = vst [vmem:[#allocation24_spill] sm:$0xff] %v14431_v20  ;;  %v10682_v27 = vpop.f32.mrb[33].mxu1  ;;  %v12692_v35 = vld [vmem:[#allocation6 + $0x1fc] ss:$28 sps:$4 sm:$0xff]  }
 0x285   :  { %15684 = vst [vmem:[#allocation25_spill] sm:$0xff] %v14435_v25  ;;  %7365 = vmatpush1.bf16.msra.mxu1 %v12663_v36  ;;  %6913 = vmatpush1.bf16.msra.mxu0 %v12666_v59  ;;  %v14440_v39 = vadd.f32 %v10682_v27, %v10681_v6  ;;  %v10684_v63 = vpop.f32.mrb[34].mxu1  ;;  %v12675_v59 = vld [vmem:[#allocation6 + $0x190] ss:$28 sps:$4 sm:$0xff]   ;;  %v12687_v7 = vld [vmem:[#allocation6 + $0x200] ss:$28 sps:$4 sm:$0xff]  }
 0x286   :  { %7366 = vmatprep.subr.bf16.mxu1 %v12671_v3  ;;  %6914 = vmatprep.subr.bf16.mxu0 %v12674_v13  ;;  %v10685_v2 = vpop.f32.mrb[35].mxu1  ;;  %v12690_v9 = vld [vmem:[#allocation6 + $0x1f8] ss:$28 sps:$4 sm:$0xff]  }
 0x287   :  { %v14442_v55 = vadd.f32 %v10685_v2, %v10684_v63  ;;  %v12695_v3 = vld [vmem:[#allocation6 + $0x23c] ss:$28 sps:$4 sm:$0xff]   ;;  %v12698_v13 = vld [vmem:[#allocation6 + $0x234] ss:$28 sps:$4 sm:$0xff]   ;;  %v12704_v2 = vld [vmem:[#allocation6 + $0x26c] ss:$28 sps:$4 sm:$0xff]  }
 0x288   :  { %10203 = vmatmul.mubr.msk.bf16.gmra.mrb[44].mxu0 %vm2464_vm0, %v15680_v34  ;;  %11297 = vmatmul.mubr.msk.bf16.gmra.mrb[140].mxu1 %vm2464_vm0, %v14164_v44  ;;  %v12681_v34 = vld [vmem:[#allocation6 + $0x1c8] ss:$28 sps:$4 sm:$0xff]  }
 0x289   :  { %7367 = vmatpush1.bf16.msra.mxu1 %v12669_v41  ;;  %6915 = vmatpush1.bf16.msra.mxu0 %v12672_v50  ;;  %v12693_v41 = vld [vmem:[#allocation6 + $0x238] ss:$28 sps:$4 sm:$0xff]   ;;  %v12696_v50 = vld [vmem:[#allocation6 + $0x230] ss:$28 sps:$4 sm:$0xff]  }
 0x28a   :  { %7386 = vmatprep.mubr.bf16.mxu1 %v14286_v16  ;;  %7368 = vmatprep.subr.bf16.mxu1 %v12677_v8 }
 0x28b   :  { %6916 = vmatprep.subr.bf16.mxu0 %v12680_v42  ;;  %3804 = vmatprep.mubr.bf16.mxu0 %v15668_v48  ;;  %v10687_v22 = vpop.f32.mrb[36].mxu1 }
 0x28c   :  { %v10688_v57 = vpop.f32.mrb[37].mxu1 }
 0x28d   :  { %7369 = vmatpush1.bf16.msra.mxu1 %v12675_v59  ;;  %6917 = vmatpush1.bf16.msra.mxu0 %v12678_v18  ;;  %v14450_v46 = vadd.f32 %v10688_v57, %v10687_v22  ;;  %v10690_v49 = vpop.f32.mrb[38].mxu1  ;;  %v12699_v18 = vld [vmem:[#allocation6 + $0x270] ss:$28 sps:$4 sm:$0xff]   ;;  %v12710_v22 = vld [vmem:[#allocation6 + $0x2a4] ss:$28 sps:$4 sm:$0xff]  }
 0x28e   :  { %7370 = vmatprep.subr.bf16.mxu1 %v12683_v15  ;;  %6918 = vmatprep.subr.bf16.mxu0 %v12686_v14  ;;  %v10691_v36 = vpop.f32.mrb[39].mxu1  ;;  %v12702_v15 = vld [vmem:[#allocation6 + $0x268] ss:$28 sps:$4 sm:$0xff]  }
 0x28f   :  { %v14452_v26 = vadd.f32 %v10691_v36, %v10690_v49  ;;  %v12707_v14 = vld [vmem:[#allocation6 + $0x2ac] ss:$28 sps:$4 sm:$0xff]   ;;  %v12708_v49 = vld [vmem:[#allocation6 + $0x2a0] ss:$28 sps:$4 sm:$0xff]  }
 0x290   :  { %10204 = vmatmul.mubr.msk.bf16.gmra.mrb[48].mxu0 %vm2464_vm0, %v14122_v11  ;;  %v12701_v11 = vld [vmem:[#allocation6 + $0x274] ss:$28 sps:$4 sm:$0xff]   ;;  %v12716_v36 = vld [vmem:[#allocation6 + $0x2dc] ss:$28 sps:$4 sm:$0xff]  }
 0x291   :  { %7371 = vmatpush1.bf16.msra.mxu1 %v12681_v34  ;;  %6919 = vmatpush1.bf16.msra.mxu0 %v12684_v5  ;;  %v12705_v5 = vld [vmem:[#allocation6 + $0x2a8] ss:$28 sps:$4 sm:$0xff]  }
 0x292   :  { %7372 = vmatprep.subr.bf16.mxu1 %v12689_v32  ;;  %6920 = vmatprep.subr.bf16.mxu0 %v12692_v35 }
 0x293   :  { %3814 = vmatprep.mubr.bf16.mxu0 %v15668_v48  ;;  %v10693_v6 = vpop.f32.mrb[40].mxu1 }
 0x294   :  { %v10694_v27 = vpop.f32.mrb[41].mxu1 }
 0x295   :  { %7373 = vmatpush1.bf16.msra.mxu1 %v12687_v7  ;;  %6921 = vmatpush1.bf16.msra.mxu0 %v12690_v9  ;;  %v14457_v63 = vadd.f32 %v10694_v27, %v10693_v6  ;;  %v10696_v8 = vpop.f32.mrb[42].mxu1  ;;  %v12719_v6 = vld [vmem:[#allocation6 + $0x31c] ss:$28 sps:$4 sm:$0xff]   ;;  %v12722_v27 = vld [vmem:[#allocation6 + $0x314] ss:$28 sps:$4 sm:$0xff]  }
 0x296   :  { %7374 = vmatprep.subr.bf16.mxu1 %v12695_v3  ;;  %6922 = vmatprep.subr.bf16.mxu0 %v12698_v13  ;;  %v10697_v42 = vpop.f32.mrb[43].mxu1  ;;  %v12711_v3 = vld [vmem:[#allocation6 + $0x2e0] ss:$28 sps:$4 sm:$0xff]   ;;  %v12714_v13 = vld [vmem:[#allocation6 + $0x2d8] ss:$28 sps:$4 sm:$0xff]  }
 0x297   :  { %v14459_v59 = vadd.f32 %v10697_v42, %v10696_v8  ;;  %v12717_v8 = vld [vmem:[#allocation6 + $0x318] ss:$28 sps:$4 sm:$0xff]  }
 0x298   :  { %10205 = vmatmul.mubr.msk.bf16.gmra.mrb[52].mxu0 %vm2464_vm0, %v14136_v61  ;;  %v12713_v61 = vld [vmem:[#allocation6 + $0x2e4] ss:$28 sps:$4 sm:$0xff]  }
 0x299   :  { %7375 = vmatpush1.bf16.msra.mxu1 %v12693_v41  ;;  %6923 = vmatpush1.bf16.msra.mxu0 %v12696_v50 }
 0x29a   :  { %7376 = vmatprep.subr.bf16.mxu1 %v12701_v11  ;;  %6924 = vmatprep.subr.bf16.mxu0 %v12704_v2  ;;  %v12720_v11 = vld [vmem:[#allocation6 + $0x310] ss:$28 sps:$4 sm:$0xff]  }
 0x29b   :  { %3824 = vmatprep.mubr.bf16.mxu0 %v15668_v48  ;;  %v10699_v57 = vpop.f32.mrb[44].mxu1 }
 0x29c   :  { %v10700_v34 = vpop.f32.mrb[45].mxu1 }
 0x29d   :  { %7377 = vmatpush1.bf16.msra.mxu1 %v12699_v18  ;;  %6925 = vmatpush1.bf16.msra.mxu0 %v12702_v15  ;;  %v14464_v32 = vadd.f32 %v10700_v34, %v10699_v57  ;;  %v10702_v35 = vpop.f32.mrb[46].mxu1  ;;  %v12728_v15 = vld [vmem:[#allocation6 + $0x34c] ss:$28 sps:$4 sm:$0xff]  }
 0x29e   :  { %7378 = vmatprep.subr.bf16.mxu1 %v12707_v14  ;;  %6926 = vmatprep.subr.bf16.mxu0 %v12710_v22  ;;  %v10703_v7 = vpop.f32.mrb[47].mxu1  ;;  %v12723_v22 = vld [vmem:[#allocation6 + $0x350] ss:$28 sps:$4 sm:$0xff]   ;;  %v12726_v57 = vld [vmem:[#allocation6 + $0x348] ss:$28 sps:$4 sm:$0xff]  }
 0x29f   :  { %v14466_v9 = vadd.f32 %v10703_v7, %v10702_v35  ;;  %v12731_v34 = vld [vmem:[#allocation6 + $0x38c] ss:$28 sps:$4 sm:$0xff]  }
 0x2a0   :  { %10206 = vmatmul.mubr.msk.bf16.gmra.mrb[56].mxu0 %vm2464_vm0, %v14150_v31  ;;  %v12725_v31 = vld [vmem:[#allocation6 + $0x354] ss:$28 sps:$4 sm:$0xff]  }
 0x2a1   :  { %7379 = vmatpush1.bf16.msra.mxu1 %v12705_v5  ;;  %6927 = vmatpush1.bf16.msra.mxu0 %v12708_v49  ;;  %v12734_v5 = vld [vmem:[#allocation6 + $0x384] ss:$28 sps:$4 sm:$0xff]  }
 0x2a2   :  { %7380 = vmatprep.subr.bf16.mxu1 %v12713_v61  ;;  %6928 = vmatprep.subr.bf16.mxu0 %v12716_v36  ;;  %v12729_v61 = vld [vmem:[#allocation6 + $0x388] ss:$28 sps:$4 sm:$0xff]  }
 0x2a3   :  { %3834 = vmatprep.mubr.bf16.mxu0 %v15668_v48  ;;  %v10705_v41 = vpop.f32.mrb[48].mxu1 }
 0x2a4   :  { %v10706_v50 = vpop.f32.mrb[49].mxu1 }
 0x2a5   :  { %7381 = vmatpush1.bf16.msra.mxu1 %v12711_v3  ;;  %6929 = vmatpush1.bf16.msra.mxu0 %v12714_v13  ;;  %v14471_v2 = vadd.f32 %v10706_v50, %v10705_v41  ;;  %v10708_v42 = vpop.f32.mrb[50].mxu1  ;;  %v12737_v13 = vld [vmem:[#allocation6 + $0x3c4] ss:$28 sps:$4 sm:$0xff]   ;;  %v12738_v50 = vld [vmem:[#allocation6 + $0x3b8] ss:$28 sps:$4 sm:$0xff]  }
 0x2a6   :  { %7382 = vmatprep.subr.bf16.mxu1 %v12719_v6  ;;  %6930 = vmatprep.subr.bf16.mxu0 %v12722_v27  ;;  %v10709_v18 = vpop.f32.mrb[51].mxu1  ;;  %v12740_v6 = vld [vmem:[#allocation6 + $0x3bc] ss:$28 sps:$4 sm:$0xff]  }
 0x2a7   :  { %v14473_v14 = vadd.f32 %v10709_v18, %v10708_v42  ;;  %v12735_v41 = vld [vmem:[#allocation6 + $0x3c0] ss:$28 sps:$4 sm:$0xff]   ;;  %v12741_v18 = vld [vmem:[#allocation6 + $0x3f8] ss:$28 sps:$4 sm:$0xff]  }
 0x2a8   :  { %10207 = vmatmul.mubr.msk.bf16.gmra.mrb[60].mxu0 %vm2464_vm0, %v14164_v44  ;;  %v12732_v44 = vld [vmem:[#allocation6 + $0x380] ss:$28 sps:$4 sm:$0xff]  }
 0x2a9   :  { %7383 = vmatpush1.bf16.msra.mxu1 %v12717_v8  ;;  %6931 = vmatpush1.bf16.msra.mxu0 %v12720_v11  ;;  %v12743_v8 = vld [vmem:[#allocation6 + $0x3fc] ss:$28 sps:$4 sm:$0xff]   ;;  %v12746_v11 = vld [vmem:[#allocation6 + $0x3f4] ss:$28 sps:$4 sm:$0xff]  }
 0x2aa   :  { %6934 = vmatprep.mubr.bf16.mxu0 %v14286_v16  ;;  %7384 = vmatprep.subr.bf16.mxu1 %v12725_v31 }
 0x2ab   :  { %6932 = vmatprep.subr.bf16.mxu0 %v12728_v15  ;;  %v10711_v49 = vpop.f32.mrb[52].mxu1 }
 0x2ac   :  { %v10712_v35 = vpop.f32.mrb[53].mxu1 }
 0x2ad   :  { %7385 = vmatpush1.bf16.msra.mxu1 %v12723_v22  ;;  %6933 = vmatpush1.bf16.msra.mxu0 %v12726_v57  ;;  %v14478_v36 = vadd.f32 %v10712_v35, %v10711_v49  ;;  %v10714_v7 = vpop.f32.mrb[54].mxu1  ;;  %v12744_v57 = vld [vmem:[#allocation6 + $0x3f0] ss:$28 sps:$4 sm:$0xff]  }
 0x2ae   :  { %7467 = vmatprep.subr.bf16.mxu1 %v12731_v34  ;;  %7015 = vmatprep.subr.bf16.mxu0 %v12734_v5  ;;  %v10715_v3 = vpop.f32.mrb[55].mxu1  ;;  %v12749_v5 = vld [vmem:[#allocation6 + $0x434] ss:$28 sps:$4 sm:$0xff]   ;;  %v12752_v49 = vld [vmem:[#allocation6 + $0x42c] ss:$28 sps:$4 sm:$0xff]  }
 0x2af   :  { %v14480_v27 = vadd.f32 %v10715_v3, %v10714_v7  ;;  %v12750_v7 = vld [vmem:[#allocation6 + $0x428] ss:$28 sps:$4 sm:$0xff]  }
 0x2b0   :  { %7387 = vmatmul.mubr.bf16.vlgmr.msra.gmra.mrb[144].mxu1 %v14282_v51  ;;  %6935 = vmatmul.mubr.bf16.vlgmr.msra.gmra.mrb[64].mxu0 %v14282_v51 }
 0x2b1   :  { %7396 = vmatprep.mubr.bf16.mxu1 %v14306_v10  ;;  %7468 = vmatpush1.bf16.msra.mxu1 %v12729_v61  ;;  %v12747_v61 = vld [vmem:[#allocation6 + $0x430] ss:$28 sps:$4 sm:$0xff]  }
 0x2b2   :  { %6944 = vmatprep.mubr.bf16.mxu0 %v14306_v10  ;;  %7016 = vmatpush1.bf16.msra.mxu0 %v12732_v44  ;;  %v12755_v44 = vld [vmem:[#allocation6 + $0x46c] ss:$28 sps:$4 sm:$0xff]  }
 0x2b3   :  { %7469 = vmatprep.subr.bf16.mxu1 %v12737_v13  ;;  %7017 = vmatprep.subr.bf16.mxu0 %v12740_v6  ;;  %v10717_v42 = vpop.f32.mrb[56].mxu1  ;;  %v12758_v13 = vld [vmem:[#allocation6 + $0x464] ss:$28 sps:$4 sm:$0xff]  }
 0x2b4   :  { %v10718_v31 = vpop.f32.mrb[57].mxu1 }
 0x2b5   :  { %7470 = vmatpush1.bf16.msra.mxu1 %v12735_v41  ;;  %v14486_v15 = vadd.f32 %v10718_v31, %v10717_v42  ;;  %v10720_v22 = vpop.f32.mrb[58].mxu1  ;;  %v15641_v41 = vsub.s32 6, %v14240_v38  ;;  %v12756_v42 = vld [vmem:[#allocation6 + $0x460] ss:$28 sps:$4 sm:$0xff]  }
 0x2b6   :  { %7018 = vmatpush1.bf16.msra.mxu0 %v12738_v50  ;;  %7471 = vmatprep.subr.bf16.mxu1 %v12743_v8  ;;  %v10721_v34 = vpop.f32.mrb[59].mxu1  ;;  %v12753_v50 = vld [vmem:[#allocation6 + $0x468] ss:$28 sps:$4 sm:$0xff]  }
 0x2b7   :  { %7019 = vmatprep.subr.bf16.mxu0 %v12746_v11  ;;  %v14488_v35 = vadd.f32 %v10721_v34, %v10720_v22  ;;  %v12761_v22 = vld [vmem:[#allocation6 + $0x4a4] ss:$28 sps:$4 sm:$0xff]   ;;  %v14501_v34 = vld [vmem:[#allocation4] sm:$0xff] }
 0x2b8   :  { %7397 = vmatmul.mubr.bf16.gmra.mrb[148].mxu1 %v14302_v23  ;;  %6945 = vmatmul.mubr.bf16.gmra.mrb[68].mxu0 %v14302_v23 }
 0x2b9   :  { %7406 = vmatprep.mubr.bf16.mxu1 %v14326_v24  ;;  %7472 = vmatpush1.bf16.msra.mxu1 %v12741_v18 }
 0x2ba   :  { %6954 = vmatprep.mubr.bf16.mxu0 %v14326_v24  ;;  %7020 = vmatpush1.bf16.msra.mxu0 %v12744_v57  ;;  %v12764_v57 = vld [vmem:[#allocation6 + $0x49c] ss:$28 sps:$4 sm:$0xff]  }
 0x2bb   :  { %7473 = vmatprep.subr.bf16.mxu1 %v12749_v5  ;;  %7021 = vmatprep.subr.bf16.mxu0 %v12752_v49  ;;  %v10723_v3 = vpop.f32.mrb[60].mxu1  ;;  %v14506_v5 = vrot.slane %v14501_v34, %v15641_v41  ;;  %v12759_v49 = vld [vmem:[#allocation6 + $0x4a0] ss:$28 sps:$4 sm:$0xff]   ;;  %v12765_v41 = vld [vmem:[#allocation6 + $0x4d8] ss:$28 sps:$4 sm:$0xff]  }
 0x2bc   :  { %v10724_v6 = vpop.f32.mrb[61].mxu1 }
 0x2bd   :  { %7474 = vmatpush1.bf16.msra.mxu1 %v12747_v61  ;;  %v14495_v8 = vadd.f32 %v10724_v6, %v10723_v3  ;;  %v10726_v11 = vpop.f32.mrb[62].mxu1  ;;  %v12762_v61 = vld [vmem:[#allocation6 + $0x498] ss:$28 sps:$4 sm:$0xff]   ;;  %v3880_v6 = vadd.f32 %v14440_v39, %v14506_v5  ;;  %v12771_v39 = vld [vmem:[#allocation6 + $0x510] ss:$28 sps:$4 sm:$0xff]  }
 0x2be   :  { %7022 = vmatpush1.bf16.msra.mxu0 %v12750_v7  ;;  %7475 = vmatprep.subr.bf16.mxu1 %v12755_v44  ;;  %v10727_v31 = vpop.f32.mrb[63].mxu1  ;;  %v12767_v7 = vld [vmem:[#allocation6 + $0x4dc] ss:$28 sps:$4 sm:$0xff]   ;;  %v12770_v3 = vld [vmem:[#allocation6 + $0x4d4] ss:$28 sps:$4 sm:$0xff]  }
 0x2bf   :  { %7023 = vmatprep.subr.bf16.mxu0 %v12758_v13  ;;  %v14497_v18 = vadd.f32 %v10727_v31, %v10726_v11 }
 0x2c0   :  { %7407 = vmatmul.mubr.bf16.gmra.mrb[152].mxu1 %v14322_v12  ;;  %6955 = vmatmul.mubr.bf16.gmra.mrb[72].mxu0 %v14322_v12  ;;  %v12768_v12 = vld [vmem:[#allocation6 + $0x4d0] ss:$28 sps:$4 sm:$0xff]  }
 0x2c1   :  { %7416 = vmatprep.mubr.bf16.mxu1 %v14346_v37  ;;  %7476 = vmatpush1.bf16.msra.mxu1 %v12753_v50 }
 0x2c2   :  { %6964 = vmatprep.mubr.bf16.mxu0 %v14346_v37  ;;  %7024 = vmatpush1.bf16.msra.mxu0 %v12756_v42  ;;  %v3883_v42 = vadd.f32 %v14442_v55, %v14506_v5  ;;  %v12774_v55 = vld [vmem:[#allocation6 + $0x508] ss:$28 sps:$4 sm:$0xff]  }
 0x2c3   :  { %v10745_v44 = vpop.f32.mrb[64].mxu1  ;;  %7477 = vmatprep.subr.bf16.mxu1 %v12761_v22  ;;  %7025 = vmatprep.subr.bf16.mxu0 %v12764_v57  ;;  %v12773_v22 = vld [vmem:[#allocation6 + $0x514] ss:$28 sps:$4 sm:$0xff]   ;;  %v12776_v57 = vld [vmem:[#allocation6 + $0x50c] ss:$28 sps:$4 sm:$0xff]  }
 0x2c4   :  { %v10746_v13 = vpop.f32.mrb[65].mxu1 }
 0x2c5   :  { %v10747_v11 = vadd.f32 %v10746_v13, %v10745_v44  ;;  %7478 = vmatpush1.bf16.msra.mxu1 %v12759_v49  ;;  %v10748_v31 = vpop.f32.mrb[66].mxu1  ;;  %v12782_v44 = vld [vmem:[#allocation6 + $0x544] ss:$28 sps:$4 sm:$0xff]   ;;  %v3888_v13 = vadd.f32 %v14450_v46, %v14506_v5 }
 0x2c6   :  { %7026 = vmatpush1.bf16.msra.mxu0 %v12762_v61  ;;  %v10749_v50 = vpop.f32.mrb[67].mxu1  ;;  %7479 = vmatprep.subr.bf16.mxu1 %v12767_v7  ;;  %v12779_v61 = vld [vmem:[#allocation6 + $0x54c] ss:$28 sps:$4 sm:$0xff]   ;;  %v12783_v46 = vld [vmem:[#allocation6 + $0x580] ss:$28 sps:$4 sm:$0xff]  }
 0x2c7   :  { %v10750_v37 = vadd.f32 %v10749_v50, %v10748_v31  ;;  %7027 = vmatprep.subr.bf16.mxu0 %v12770_v3  ;;  %v14514_v24 = vadd.f32 %v10747_v11, %v3880_v6  ;;  %v12780_v31 = vld [vmem:[#allocation6 + $0x540] ss:$28 sps:$4 sm:$0xff]  }
 0x2c8   :  { %7417 = vmatmul.mubr.bf16.gmra.mrb[156].mxu1 %v14342_v4  ;;  %6965 = vmatmul.mubr.bf16.gmra.mrb[76].mxu0 %v14342_v4 }
 0x2c9   :  { %7426 = vmatprep.mubr.bf16.mxu1 %v14367_v47  ;;  %7480 = vmatpush1.bf16.msra.mxu1 %v12765_v41  ;;  %v14519_v49 = vadd.f32 %v10750_v37, %v3883_v42  ;;  %v12777_v41 = vld [vmem:[#allocation6 + $0x548] ss:$28 sps:$4 sm:$0xff]  }
 0x2ca   :  { %6974 = vmatprep.mubr.bf16.mxu0 %v14367_v47  ;;  %7028 = vmatpush1.bf16.msra.mxu0 %v12768_v12  ;;  %v3891_v12 = vadd.f32 %v14452_v26, %v14506_v5  ;;  %v12785_v42 = vld [vmem:[#allocation6 + $0x584] ss:$28 sps:$4 sm:$0xff]   ;;  %v12786_v26 = vld [vmem:[#allocation6 + $0x578] ss:$28 sps:$4 sm:$0xff]  }
 0x2cb   :  { %v10751_v7 = vpop.f32.mrb[68].mxu1  ;;  %7481 = vmatprep.subr.bf16.mxu1 %v12773_v22  ;;  %7029 = vmatprep.subr.bf16.mxu0 %v12776_v57  ;;  %v12788_v22 = vld [vmem:[#allocation6 + $0x57c] ss:$28 sps:$4 sm:$0xff]  }
 0x2cc   :  { %v10752_v3 = vpop.f32.mrb[69].mxu1 }
 0x2cd   :  { %v10753_v6 = vadd.f32 %v10752_v3, %v10751_v7  ;;  %7482 = vmatpush1.bf16.msra.mxu1 %v12771_v39  ;;  %v10754_v11 = vpop.f32.mrb[70].mxu1  ;;  %v12794_v7 = vld [vmem:[#allocation6 + $0x5b4] ss:$28 sps:$4 sm:$0xff]   ;;  %v3896_v3 = vadd.f32 %v14457_v63, %v14506_v5 }
 0x2ce   :  { %7030 = vmatpush1.bf16.msra.mxu0 %v12774_v55  ;;  %v10755_v37 = vpop.f32.mrb[71].mxu1  ;;  %7483 = vmatprep.subr.bf16.mxu1 %v12779_v61  ;;  %v12791_v55 = vld [vmem:[#allocation6 + $0x5bc] ss:$28 sps:$4 sm:$0xff]   ;;  %v12795_v63 = vld [vmem:[#allocation6 + $0x5f0] ss:$28 sps:$4 sm:$0xff]  }
 0x2cf   :  { %v10756_v50 = vadd.f32 %v10755_v37, %v10754_v11  ;;  %7031 = vmatprep.subr.bf16.mxu0 %v12782_v44  ;;  %v14526_v57 = vadd.f32 %v10753_v6, %v3888_v13  ;;  %v12789_v11 = vld [vmem:[#allocation6 + $0x5b8] ss:$28 sps:$4 sm:$0xff]   ;;  %v12792_v37 = vld [vmem:[#allocation6 + $0x5b0] ss:$28 sps:$4 sm:$0xff]  }
 0x2d0   :  { %7427 = vmatmul.mubr.bf16.gmra.mrb[160].mxu1 %v14363_v28  ;;  %6975 = vmatmul.mubr.bf16.gmra.mrb[80].mxu0 %v14363_v28 }
 0x2d1   :  { %7436 = vmatprep.mubr.bf16.mxu1 %v14387_v58  ;;  %7484 = vmatpush1.bf16.msra.mxu1 %v12777_v41  ;;  %v14531_v39 = vadd.f32 %v10756_v50, %v3891_v12  ;;  %v12797_v50 = vld [vmem:[#allocation6 + $0x5f4] ss:$28 sps:$4 sm:$0xff]  }
 0x2d2   :  { %6984 = vmatprep.mubr.bf16.mxu0 %v14387_v58  ;;  %7032 = vmatpush1.bf16.msra.mxu0 %v12780_v31  ;;  %v3899_v31 = vadd.f32 %v14459_v59, %v14506_v5  ;;  %v12798_v59 = vld [vmem:[#allocation6 + $0x5e8] ss:$28 sps:$4 sm:$0xff]  }
 0x2d3   :  { %v10757_v61 = vpop.f32.mrb[72].mxu1  ;;  %7485 = vmatprep.subr.bf16.mxu1 %v12785_v42  ;;  %7033 = vmatprep.subr.bf16.mxu0 %v12788_v22  ;;  %v12800_v42 = vld [vmem:[#allocation6 + $0x5ec] ss:$28 sps:$4 sm:$0xff]  }
 0x2d4   :  { %v10758_v44 = vpop.f32.mrb[73].mxu1 }
 0x2d5   :  { %v10759_v13 = vadd.f32 %v10758_v44, %v10757_v61  ;;  %7486 = vmatpush1.bf16.msra.mxu1 %v12783_v46  ;;  %v10760_v6 = vpop.f32.mrb[74].mxu1  ;;  %v12806_v61 = vld [vmem:[#allocation6 + $0x624] ss:$28 sps:$4 sm:$0xff]   ;;  %v3904_v44 = vadd.f32 %v14464_v32, %v14506_v5 }
 0x2d6   :  { %7034 = vmatpush1.bf16.msra.mxu0 %v12786_v26  ;;  %v10761_v41 = vpop.f32.mrb[75].mxu1  ;;  %7487 = vmatprep.subr.bf16.mxu1 %v12791_v55  ;;  %v12803_v26 = vld [vmem:[#allocation6 + $0x62c] ss:$28 sps:$4 sm:$0xff]   ;;  %v12807_v32 = vld [vmem:[#allocation6 + $0x660] ss:$28 sps:$4 sm:$0xff]  }
 0x2d7   :  { %v10762_v12 = vadd.f32 %v10761_v41, %v10760_v6  ;;  %7035 = vmatprep.subr.bf16.mxu0 %v12794_v7  ;;  %v14538_v22 = vadd.f32 %v10759_v13, %v3896_v3  ;;  %v12801_v6 = vld [vmem:[#allocation6 + $0x628] ss:$28 sps:$4 sm:$0xff]   ;;  %v12804_v41 = vld [vmem:[#allocation6 + $0x620] ss:$28 sps:$4 sm:$0xff]  }
 0x2d8   :  { %7437 = vmatmul.mubr.bf16.gmra.mrb[164].mxu1 %v14383_v53  ;;  %6985 = vmatmul.mubr.bf16.gmra.mrb[84].mxu0 %v14383_v53 }
 0x2d9   :  { %7446 = vmatprep.mubr.bf16.mxu1 %v14410_v1  ;;  %7488 = vmatpush1.bf16.msra.mxu1 %v12789_v11  ;;  %v14543_v46 = vadd.f32 %v10762_v12, %v3899_v31  ;;  %v12809_v12 = vld [vmem:[#allocation6 + $0x664] ss:$28 sps:$4 sm:$0xff]  }
 0x2da   :  { %6994 = vmatprep.mubr.bf16.mxu0 %v14410_v1  ;;  %7036 = vmatpush1.bf16.msra.mxu0 %v12792_v37  ;;  %v3907_v37 = vadd.f32 %v14466_v9, %v14506_v5  ;;  %v12810_v9 = vld [vmem:[#allocation6 + $0x658] ss:$28 sps:$4 sm:$0xff]  }
 0x2db   :  { %v10763_v55 = vpop.f32.mrb[76].mxu1  ;;  %7489 = vmatprep.subr.bf16.mxu1 %v12797_v50  ;;  %7037 = vmatprep.subr.bf16.mxu0 %v12800_v42  ;;  %v12812_v50 = vld [vmem:[#allocation6 + $0x65c] ss:$28 sps:$4 sm:$0xff]  }
 0x2dc   :  { %v10764_v7 = vpop.f32.mrb[77].mxu1 }
 0x2dd   :  { %v10765_v3 = vadd.f32 %v10764_v7, %v10763_v55  ;;  %7490 = vmatpush1.bf16.msra.mxu1 %v12795_v63  ;;  %v10766_v13 = vpop.f32.mrb[78].mxu1  ;;  %v12818_v55 = vld [vmem:[#allocation6 + $0x694] ss:$28 sps:$4 sm:$0xff]   ;;  %v3912_v7 = vadd.f32 %v14471_v2, %v14506_v5 }
 0x2de   :  { %7038 = vmatpush1.bf16.msra.mxu0 %v12798_v59  ;;  %v10767_v11 = vpop.f32.mrb[79].mxu1  ;;  %7491 = vmatprep.subr.bf16.mxu1 %v12803_v26  ;;  %v12815_v59 = vld [vmem:[#allocation6 + $0x69c] ss:$28 sps:$4 sm:$0xff]   ;;  %v12819_v2 = vld [vmem:[#allocation6 + $0x6d0] ss:$28 sps:$4 sm:$0xff]  }
 0x2df   :  { %v10768_v31 = vadd.f32 %v10767_v11, %v10766_v13  ;;  %7039 = vmatprep.subr.bf16.mxu0 %v12806_v61  ;;  %v14550_v42 = vadd.f32 %v10765_v3, %v3904_v44  ;;  %v12813_v13 = vld [vmem:[#allocation6 + $0x698] ss:$28 sps:$4 sm:$0xff]   ;;  %v12816_v11 = vld [vmem:[#allocation6 + $0x690] ss:$28 sps:$4 sm:$0xff]  }
 0x2e0   :  { %7447 = vmatmul.mubr.bf16.gmra.mrb[168].mxu1 %v14406_v30  ;;  %6995 = vmatmul.mubr.bf16.gmra.mrb[88].mxu0 %v14406_v30 }
 0x2e1   :  { %7456 = vmatprep.mubr.bf16.mxu1 %v14433_v56  ;;  %7492 = vmatpush1.bf16.msra.mxu1 %v12801_v6  ;;  %v14555_v63 = vadd.f32 %v10768_v31, %v3907_v37  ;;  %v12821_v31 = vld [vmem:[#allocation6 + $0x6d4] ss:$28 sps:$4 sm:$0xff]  }
 0x2e2   :  { %7004 = vmatprep.mubr.bf16.mxu0 %v14433_v56  ;;  %7040 = vmatpush1.bf16.msra.mxu0 %v12804_v41  ;;  %v3915_v41 = vadd.f32 %v14473_v14, %v14506_v5  ;;  %v12822_v14 = vld [vmem:[#allocation6 + $0x6c8] ss:$28 sps:$4 sm:$0xff]  }
 0x2e3   :  { %v10769_v26 = vpop.f32.mrb[80].mxu1  ;;  %7493 = vmatprep.subr.bf16.mxu1 %v12809_v12  ;;  %7041 = vmatprep.subr.bf16.mxu0 %v12812_v50  ;;  %v12824_v12 = vld [vmem:[#allocation6 + $0x6cc] ss:$28 sps:$4 sm:$0xff]  }
 0x2e4   :  { %v10770_v61 = vpop.f32.mrb[81].mxu1 }
 0x2e5   :  { %v10771_v44 = vadd.f32 %v10770_v61, %v10769_v26  ;;  %7494 = vmatpush1.bf16.msra.mxu1 %v12807_v32  ;;  %v10772_v3 = vpop.f32.mrb[82].mxu1  ;;  %v12827_v26 = vld [vmem:[#allocation6 + $0x704] ss:$28 sps:$4 sm:$0xff]   ;;  %v3920_v61 = vadd.f32 %v14478_v36, %v14506_v5 }
 0x2e6   :  { %7042 = vmatpush1.bf16.msra.mxu0 %v12810_v9  ;;  %v10773_v6 = vpop.f32.mrb[83].mxu1  ;;  %7495 = vmatprep.subr.bf16.mxu1 %v12815_v59  ;;  %v12830_v9 = vld [vmem:[#allocation6 + $0x70c] ss:$28 sps:$4 sm:$0xff]  }
 0x2e7   :  { %v10774_v37 = vadd.f32 %v10773_v6, %v10772_v3  ;;  %7043 = vmatprep.subr.bf16.mxu0 %v12818_v55  ;;  %v14562_v50 = vadd.f32 %v10771_v44, %v3912_v7  ;;  %v3923_v6 = vadd.f32 %v14480_v27, %v14506_v5 }
 0x2e8   :  { %7457 = vmatmul.mubr.bf16.gmra.mrb[172].mxu1 %v14429_v21  ;;  %7005 = vmatmul.mubr.bf16.gmra.mrb[92].mxu0 %v14429_v21 }
 0x2e9   :  { %7496 = vmatpush1.bf16.msra.mxu1 %v12813_v13  ;;  %7499 = vmatprep.mubr.bf16.mxu1 %v14288_v29  ;;  %v14567_v32 = vadd.f32 %v10774_v37, %v3915_v41  ;;  %v12825_v13 = vld [vmem:[#allocation6 + $0x700] ss:$28 sps:$4 sm:$0xff]   ;;  %v12828_v41 = vld [vmem:[#allocation6 + $0x708] ss:$28 sps:$4 sm:$0xff]  }
 0x2ea   :  { %7044 = vmatpush1.bf16.msra.mxu0 %v12816_v11  ;;  %7047 = vmatprep.mubr.bf16.mxu0 %v14288_v29  ;;  %v12833_v37 = vld [vmem:[#allocation6 + $0x73c] ss:$28 sps:$4 sm:$0xff]  }
 0x2eb   :  { %v10775_v59 = vpop.f32.mrb[84].mxu1  ;;  %7497 = vmatprep.subr.bf16.mxu1 %v12821_v31  ;;  %7045 = vmatprep.subr.bf16.mxu0 %v12824_v12  ;;  %v12836_v12 = vld [vmem:[#allocation6 + $0x744] ss:$28 sps:$4 sm:$0xff]  }
 0x2ec   :  { %v10776_v55 = vpop.f32.mrb[85].mxu1 }
 0x2ed   :  { %v10777_v7 = vadd.f32 %v10776_v55, %v10775_v59  ;;  %7498 = vmatpush1.bf16.msra.mxu1 %v12819_v2  ;;  %v10778_v44 = vpop.f32.mrb[86].mxu1  ;;  %v12831_v2 = vld [vmem:[#allocation6 + $0x738] ss:$28 sps:$4 sm:$0xff]   ;;  %v3928_v55 = vadd.f32 %v14486_v15, %v14506_v5 }
 0x2ee   :  { %7046 = vmatpush1.bf16.msra.mxu0 %v12822_v14  ;;  %v10779_v3 = vpop.f32.mrb[87].mxu1  ;;  %7580 = vmatprep.subr.bf16.mxu1 %v12830_v9  ;;  %v12834_v14 = vld [vmem:[#allocation6 + $0x740] ss:$28 sps:$4 sm:$0xff]   ;;  %v12839_v9 = vld [vmem:[#allocation6 + $0x774] ss:$28 sps:$4 sm:$0xff]  }
 0x2ef   :  { %v10780_v11 = vadd.f32 %v10779_v3, %v10778_v44  ;;  %7128 = vmatprep.subr.bf16.mxu0 %v12827_v26  ;;  %v14574_v31 = vadd.f32 %v10777_v7, %v3920_v61  ;;  %v12842_v26 = vld [vmem:[#allocation6 + $0x77c] ss:$28 sps:$4 sm:$0xff]   ;;  %v12837_v3 = vld [vmem:[#allocation6 + $0x770] ss:$28 sps:$4 sm:$0xff]  }
 0x2f0   :  { %7500 = vmatmul.mubr.bf16.vlgmr.msra.gmra.mrb[144].mxu1 %v14284_v40 }
 0x2f1   :  { %7048 = vmatmul.mubr.bf16.vlgmr.msra.gmra.mrb[64].mxu0 %v14284_v40  ;;  %7509 = vmatprep.mubr.bf16.mxu1 %v14308_v45  ;;  %v14579_v36 = vadd.f32 %v10780_v11, %v3923_v6  ;;  %v12840_v11 = vld [vmem:[#allocation6 + $0x778] ss:$28 sps:$4 sm:$0xff]  }
 0x2f2   :  { %7057 = vmatprep.mubr.bf16.mxu0 %v14308_v45  ;;  %7129 = vmatpush1.bf16.msra.mxu0 %v12825_v13  ;;  %v3931_v13 = vadd.f32 %v14488_v35, %v14506_v5  ;;  %v12843_v35 = vld [vmem:[#allocation6 + $0x7a8] ss:$28 sps:$4 sm:$0xff]  }
 0x2f3   :  { %v10781_v27 = vpop.f32.mrb[88].mxu1  ;;  %7581 = vmatpush1.bf16.msra.mxu1 %v12828_v41  ;;  %7130 = vmatprep.subr.bf16.mxu0 %v12833_v37  ;;  %v12845_v41 = vld [vmem:[#allocation6 + $0x7ac] ss:$28 sps:$4 sm:$0xff]  }
 0x2f4   :  { %v10782_v59 = vpop.f32.mrb[89].mxu1  ;;  %7582 = vmatprep.subr.bf16.mxu1 %v12836_v12  ;;  %v12848_v12 = vld [vmem:[#allocation6 + $0x7b4] ss:$28 sps:$4 sm:$0xff]  }
 0x2f5   :  { %v10783_v61 = vadd.f32 %v10782_v59, %v10781_v27  ;;  %v10784_v7 = vpop.f32.mrb[90].mxu1  ;;  %v12846_v27 = vld [vmem:[#allocation6 + $0x7b0] ss:$28 sps:$4 sm:$0xff]  }
 0x2f6   :  { %v10785_v44 = vpop.f32.mrb[91].mxu1  ;;  %7131 = vmatpush1.bf16.msra.mxu0 %v12831_v2  ;;  %v12854_v59 = vld [vmem:[#allocation6 + $0x7ec] ss:$28 sps:$4 sm:$0xff]  }
 0x2f7   :  { %v10786_v6 = vadd.f32 %v10785_v44, %v10784_v7  ;;  %7583 = vmatpush1.bf16.msra.mxu1 %v12834_v14  ;;  %7132 = vmatprep.subr.bf16.mxu0 %v12839_v9  ;;  %v14586_v37 = vadd.f32 %v10783_v61, %v3928_v55  ;;  %v12851_v14 = vld [vmem:[#allocation6 + $0x7e4] ss:$28 sps:$4 sm:$0xff]  }
 0x2f8   :  { %7510 = vmatmul.mubr.bf16.gmra.mrb[148].mxu1 %v14304_v0  ;;  %7584 = vmatprep.subr.bf16.mxu1 %v12842_v26  ;;  %v3936_v26 = vadd.f32 %v14495_v8, %v14506_v5  ;;  %v12849_v44 = vld [vmem:[#allocation6 + $0x7e0] ss:$28 sps:$4 sm:$0xff]  }
 0x2f9   :  { %7058 = vmatmul.mubr.bf16.gmra.mrb[68].mxu0 %v14304_v0  ;;  %7519 = vmatprep.mubr.bf16.mxu1 %v14328_v54  ;;  %v14591_v15 = vadd.f32 %v10786_v6, %v3931_v13  ;;  %v12852_v6 = vld [vmem:[#allocation6 + $0x7e8] ss:$28 sps:$4 sm:$0xff]  }
 0x2fa   :  { %7067 = vmatprep.mubr.bf16.mxu0 %v14328_v54  ;;  %7133 = vmatpush1.bf16.msra.mxu0 %v12837_v3  ;;  %v3939_v3 = vadd.f32 %v14497_v18, %v14506_v5  ;;  %v12855_v18 = vld [vmem:[#allocation6 + $0x818] ss:$28 sps:$4 sm:$0xff]  }
 0x2fb   :  { %v10787_v2 = vpop.f32.mrb[92].mxu1  ;;  %7585 = vmatpush1.bf16.msra.mxu1 %v12840_v11  ;;  %7134 = vmatprep.subr.bf16.mxu0 %v12845_v41  ;;  %v12857_v11 = vld [vmem:[#allocation6 + $0x81c] ss:$28 sps:$4 sm:$0xff]  }
 0x2fc   :  { %v10788_v9 = vpop.f32.mrb[93].mxu1  ;;  %7586 = vmatprep.subr.bf16.mxu1 %v12848_v12  ;;  %v12860_v12 = vld [vmem:[#allocation6 + $0x824] ss:$28 sps:$4 sm:$0xff]  }
 0x2fd   :  { %v10789_v55 = vadd.f32 %v10788_v9, %v10787_v2  ;;  %v10790_v61 = vpop.f32.mrb[94].mxu1  ;;  %v12863_v2 = vld [vmem:[#allocation6 + $0x854] ss:$28 sps:$4 sm:$0xff]  }
 0x2fe   :  { %v10791_v7 = vpop.f32.mrb[95].mxu1  ;;  %7135 = vmatpush1.bf16.msra.mxu0 %v12843_v35  ;;  %v12858_v35 = vld [vmem:[#allocation6 + $0x820] ss:$28 sps:$4 sm:$0xff]  }
 0x2ff   :  { %v10792_v13 = vadd.f32 %v10791_v7, %v10790_v61  ;;  %7587 = vmatpush1.bf16.msra.mxu1 %v12846_v27  ;;  %7136 = vmatprep.subr.bf16.mxu0 %v12851_v14  ;;  %v14598_v41 = vadd.f32 %v10789_v55, %v3936_v26  ;;  %v12866_v14 = vld [vmem:[#allocation6 + $0x85c] ss:$28 sps:$4 sm:$0xff]   ;;  %v12861_v55 = vld [vmem:[#allocation6 + $0x850] ss:$28 sps:$4 sm:$0xff]  }
 0x300   :  { %7520 = vmatmul.mubr.bf16.gmra.mrb[152].mxu1 %v14324_v43  ;;  %7588 = vmatprep.subr.bf16.mxu1 %v12854_v59  ;;  %v12864_v7 = vld [vmem:[#allocation6 + $0x858] ss:$28 sps:$4 sm:$0xff]  }
 0x301   :  { %7068 = vmatmul.mubr.bf16.gmra.mrb[72].mxu0 %v14324_v43  ;;  %7529 = vmatprep.mubr.bf16.mxu1 %v14348_v33  ;;  %v14603_v8 = vadd.f32 %v10792_v13, %v3939_v3  ;;  %v12869_v3 = vld [vmem:[#allocation6 + $0x88c] ss:$28 sps:$4 sm:$0xff]   ;;  %v12872_v13 = vld [vmem:[#allocation6 + $0x894] ss:$28 sps:$4 sm:$0xff]  }
 0x302   :  { %7077 = vmatprep.mubr.bf16.mxu0 %v14348_v33  ;;  %7137 = vmatpush1.bf16.msra.mxu0 %v12849_v44 }
 0x303   :  { %v10809_v5 = vpop.f32.mrb[96].mxu1  ;;  %7589 = vmatpush1.bf16.msra.mxu1 %v12852_v6  ;;  %7138 = vmatprep.subr.bf16.mxu0 %v12857_v11  ;;  %v12867_v11 = vld [vmem:[#allocation6 + $0x888] ss:$28 sps:$4 sm:$0xff]  }
 0x304   :  { %v10810_v27 = vpop.f32.mrb[97].mxu1  ;;  %7590 = vmatprep.subr.bf16.mxu1 %v12860_v12 }
 0x305   :  { %v10811_v9 = vadd.f32 %v10810_v27, %v10809_v5  ;;  %v10812_v59 = vpop.f32.mrb[98].mxu1 }
 0x306   :  { %v10813_v26 = vpop.f32.mrb[99].mxu1  ;;  %7139 = vmatpush1.bf16.msra.mxu0 %v12855_v18  ;;  %v12875_v18 = vld [vmem:[#allocation6 + $0x8c4] ss:$28 sps:$4 sm:$0xff]  }
 0x307   :  { %v10814_v61 = vadd.f32 %v10813_v26, %v10812_v59  ;;  %7591 = vmatpush1.bf16.msra.mxu1 %v12858_v35  ;;  %7140 = vmatprep.subr.bf16.mxu0 %v12863_v2  ;;  %v14607_v44 = vadd.f32 %v10811_v9, %v14514_v24  ;;  %v12870_v24 = vld [vmem:[#allocation6 + $0x890] ss:$28 sps:$4 sm:$0xff]   ;;  %v12873_v9 = vld [vmem:[#allocation6 + $0x8c0] ss:$28 sps:$4 sm:$0xff]  }
 0x308   :  { %7530 = vmatmul.mubr.bf16.gmra.mrb[156].mxu1 %v14344_v19  ;;  %7592 = vmatprep.subr.bf16.mxu1 %v12866_v14  ;;  %v12878_v35 = vld [vmem:[#allocation6 + $0x8cc] ss:$28 sps:$4 sm:$0xff]   ;;  %v12881_v26 = vld [vmem:[#allocation6 + $0x8fc] ss:$28 sps:$4 sm:$0xff]  }
 0x309   :  { %7078 = vmatmul.mubr.bf16.gmra.mrb[76].mxu0 %v14344_v19  ;;  %7539 = vmatprep.mubr.bf16.mxu1 %v14369_v60  ;;  %v14613_v6 = vadd.f32 %v10814_v61, %v14519_v49  ;;  %v12876_v49 = vld [vmem:[#allocation6 + $0x8c8] ss:$28 sps:$4 sm:$0xff]  }
 0x30a   :  { %7087 = vmatprep.mubr.bf16.mxu0 %v14369_v60  ;;  %7141 = vmatpush1.bf16.msra.mxu0 %v12861_v55  ;;  %v12884_v61 = vld [vmem:[#allocation6 + $0x904] ss:$28 sps:$4 sm:$0xff]  }
 0x30b   :  { %v10815_v12 = vpop.f32.mrb[100].mxu1  ;;  %7593 = vmatpush1.bf16.msra.mxu1 %v12864_v7  ;;  %7142 = vmatprep.subr.bf16.mxu0 %v12869_v3  ;;  %v12879_v3 = vld [vmem:[#allocation6 + $0x8f8] ss:$28 sps:$4 sm:$0xff]  }
 0x30c   :  { %v10816_v5 = vpop.f32.mrb[101].mxu1  ;;  %7594 = vmatprep.subr.bf16.mxu1 %v12872_v13 }
 0x30d   :  { %v10817_v2 = vadd.f32 %v10816_v5, %v10815_v12  ;;  %v10818_v27 = vpop.f32.mrb[102].mxu1 }
 0x30e   :  { %v10819_v14 = vpop.f32.mrb[103].mxu1  ;;  %7143 = vmatpush1.bf16.msra.mxu0 %v12867_v11  ;;  %v12887_v11 = vld [vmem:[#allocation6 + $0x934] ss:$28 sps:$4 sm:$0xff]  }
 0x30f   :  { %v10820_v59 = vadd.f32 %v10819_v14, %v10818_v27  ;;  %7595 = vmatpush1.bf16.msra.mxu1 %v12870_v24  ;;  %7144 = vmatprep.subr.bf16.mxu0 %v12875_v18  ;;  %v14617_v55 = vadd.f32 %v10817_v2, %v14526_v57  ;;  %v12882_v57 = vld [vmem:[#allocation6 + $0x900] ss:$28 sps:$4 sm:$0xff]   ;;  %v12885_v2 = vld [vmem:[#allocation6 + $0x930] ss:$28 sps:$4 sm:$0xff]  }
 0x310   :  { %7540 = vmatmul.mubr.bf16.gmra.mrb[160].mxu1 %v14365_v17  ;;  %7596 = vmatprep.subr.bf16.mxu1 %v12878_v35  ;;  %v12890_v24 = vld [vmem:[#allocation6 + $0x93c] ss:$28 sps:$4 sm:$0xff]   ;;  %v12893_v14 = vld [vmem:[#allocation6 + $0x96c] ss:$28 sps:$4 sm:$0xff]  }
 0x311   :  { %7088 = vmatmul.mubr.bf16.gmra.mrb[80].mxu0 %v14365_v17  ;;  %7549 = vmatprep.mubr.bf16.mxu1 %v14389_v62  ;;  %v14623_v7 = vadd.f32 %v10820_v59, %v14531_v39  ;;  %v12888_v39 = vld [vmem:[#allocation6 + $0x938] ss:$28 sps:$4 sm:$0xff]  }
 0x312   :  { %7097 = vmatprep.mubr.bf16.mxu0 %v14389_v62  ;;  %7145 = vmatpush1.bf16.msra.mxu0 %v12873_v9  ;;  %v12896_v59 = vld [vmem:[#allocation6 + $0x974] ss:$28 sps:$4 sm:$0xff]  }
 0x313   :  { %v10821_v13 = vpop.f32.mrb[104].mxu1  ;;  %7597 = vmatpush1.bf16.msra.mxu1 %v12876_v49  ;;  %7146 = vmatprep.subr.bf16.mxu0 %v12881_v26  ;;  %v15685_v49 = vld [vmem:[#allocation19_spill] sm:$0xff] }
 0x314   :  { %v10822_v12 = vpop.f32.mrb[105].mxu1  ;;  %7598 = vmatprep.subr.bf16.mxu1 %v12884_v61  ;;  %v12891_v61 = vld [vmem:[#allocation6 + $0x968] ss:$28 sps:$4 sm:$0xff]  }
 0x315   :  { %v10823_v18 = vadd.f32 %v10822_v12, %v10821_v13  ;;  %v10824_v5 = vpop.f32.mrb[106].mxu1  ;;  %v12899_v13 = vld [vmem:[#allocation6 + $0x9a4] ss:$28 sps:$4 sm:$0xff]  }
 0x316   :  { %v10825_v35 = vpop.f32.mrb[107].mxu1  ;;  %7147 = vmatpush1.bf16.msra.mxu0 %v12879_v3 }
 0x317   :  { %v10826_v27 = vadd.f32 %v10825_v35, %v10824_v5  ;;  %7599 = vmatpush1.bf16.msra.mxu1 %v12882_v57  ;;  %7148 = vmatprep.subr.bf16.mxu0 %v12887_v11  ;;  %v14627_v9 = vadd.f32 %v10823_v18, %v14538_v22  ;;  %v12894_v22 = vld [vmem:[#allocation6 + $0x970] ss:$28 sps:$4 sm:$0xff]   ;;  %v12897_v5 = vld [vmem:[#allocation6 + $0x9a0] ss:$28 sps:$4 sm:$0xff]  }
 0x318   :  { %7550 = vmatmul.mubr.bf16.gmra.mrb[164].mxu1 %v14385_v52  ;;  %7600 = vmatprep.subr.bf16.mxu1 %v12890_v24  ;;  %v12902_v11 = vld [vmem:[#allocation6 + $0x9ac] ss:$28 sps:$4 sm:$0xff]  }
 0x319   :  { %7098 = vmatmul.mubr.bf16.gmra.mrb[84].mxu0 %v14385_v52  ;;  %7559 = vmatprep.mubr.bf16.mxu1 %v15685_v49  ;;  %v14633_v26 = vadd.f32 %v10826_v27, %v14543_v46  ;;  %v12900_v46 = vld [vmem:[#allocation6 + $0x9a8] ss:$28 sps:$4 sm:$0xff]   ;;  %v12905_v27 = vld [vmem:[#allocation6 + $0x9dc] ss:$28 sps:$4 sm:$0xff]  }
 0x31a   :  { %7107 = vmatprep.mubr.bf16.mxu0 %v15685_v49  ;;  %7149 = vmatpush1.bf16.msra.mxu0 %v12885_v2  ;;  %v12921_v52 = vld [vmem:[#allocation6 + $0xa80] ss:$28 sps:$4 sm:$0xff]  }
 0x31b   :  { %v10827_v3 = vpop.f32.mrb[108].mxu1  ;;  %7601 = vmatpush1.bf16.msra.mxu1 %v12888_v39  ;;  %7150 = vmatprep.subr.bf16.mxu0 %v12893_v14  ;;  %v15686_v39 = vld [vmem:[#allocation18_spill] sm:$0xff] }
 0x31c   :  { %v10828_v57 = vpop.f32.mrb[109].mxu1  ;;  %7602 = vmatprep.subr.bf16.mxu1 %v12896_v59  ;;  %v12908_v14 = vld [vmem:[#allocation6 + $0x9e4] ss:$28 sps:$4 sm:$0xff]  }
 0x31d   :  { %v10829_v12 = vadd.f32 %v10828_v57, %v10827_v3  ;;  %v10830_v24 = vpop.f32.mrb[110].mxu1  ;;  %v12914_v57 = vld [vmem:[#allocation6 + $0xa1c] ss:$28 sps:$4 sm:$0xff]  }
 0x31e   :  { %v10831_v18 = vpop.f32.mrb[111].mxu1  ;;  %7151 = vmatpush1.bf16.msra.mxu0 %v12891_v61  ;;  %v12903_v61 = vld [vmem:[#allocation6 + $0x9d8] ss:$28 sps:$4 sm:$0xff]  }
 0x31f   :  { %v10832_v35 = vadd.f32 %v10831_v18, %v10830_v24  ;;  %7603 = vmatpush1.bf16.msra.mxu1 %v12894_v22  ;;  %7152 = vmatprep.subr.bf16.mxu0 %v12899_v13  ;;  %v14637_v2 = vadd.f32 %v10829_v12, %v14550_v42  ;;  %v12906_v42 = vld [vmem:[#allocation6 + $0x9e0] ss:$28 sps:$4 sm:$0xff]   ;;  %v12911_v22 = vld [vmem:[#allocation6 + $0xa14] ss:$28 sps:$4 sm:$0xff]  }
 0x320   :  { %7560 = vmatmul.mubr.bf16.gmra.mrb[168].mxu1 %v15686_v39  ;;  %7604 = vmatprep.subr.bf16.mxu1 %v12902_v11  ;;  %v12909_v18 = vld [vmem:[#allocation6 + $0xa10] ss:$28 sps:$4 sm:$0xff]  }
 0x321   :  { %7108 = vmatmul.mubr.bf16.gmra.mrb[88].mxu0 %v15686_v39  ;;  %7569 = vmatprep.mubr.bf16.mxu1 %v14435_v25  ;;  %v14643_v59 = vadd.f32 %v10832_v35, %v14555_v63  ;;  %v12912_v63 = vld [vmem:[#allocation6 + $0xa18] ss:$28 sps:$4 sm:$0xff]   ;;  %v12917_v35 = vld [vmem:[#allocation6 + $0xa4c] ss:$28 sps:$4 sm:$0xff]  }
 0x322   :  { %7117 = vmatprep.mubr.bf16.mxu0 %v14435_v25  ;;  %7153 = vmatpush1.bf16.msra.mxu0 %v12897_v5 }
 0x323   :  { %v10833_v3 = vpop.f32.mrb[112].mxu1  ;;  %7605 = vmatpush1.bf16.msra.mxu1 %v12900_v46  ;;  %7154 = vmatprep.subr.bf16.mxu0 %v12905_v27  ;;  %v12920_v46 = vld [vmem:[#allocation6 + $0xa54] ss:$28 sps:$4 sm:$0xff]  }
 0x324   :  { %v10834_v13 = vpop.f32.mrb[113].mxu1  ;;  %7606 = vmatprep.subr.bf16.mxu1 %v12908_v14  ;;  %v12915_v14 = vld [vmem:[#allocation6 + $0xa48] ss:$28 sps:$4 sm:$0xff]  }
 0x325   :  { %v10835_v11 = vadd.f32 %v10834_v13, %v10833_v3  ;;  %v10836_v12 = vpop.f32.mrb[114].mxu1  ;;  %v12918_v3 = vld [vmem:[#allocation6 + $0xa50] ss:$28 sps:$4 sm:$0xff]  }
 0x326   :  { %v10837_v24 = vpop.f32.mrb[115].mxu1  ;;  %7155 = vmatpush1.bf16.msra.mxu0 %v12903_v61 }
 0x327   :  { %v10838_v39 = vadd.f32 %v10837_v24, %v10836_v12  ;;  %7607 = vmatpush1.bf16.msra.mxu1 %v12906_v42  ;;  %7156 = vmatprep.subr.bf16.mxu0 %v12911_v22  ;;  %v14647_v5 = vadd.f32 %v10835_v11, %v14562_v50  ;;  %v12923_v42 = vld [vmem:[#allocation6 + $0xa84] ss:$28 sps:$4 sm:$0xff]   ;;  %v12935_v50 = vld [vmem:[#allocation6 + $0xa8c] ss:$28 sps:$4 sm:$0xff]  }
 0x328   :  { %7570 = vmatmul.mubr.bf16.gmra.mrb[172].mxu1 %v14431_v20  ;;  %7608 = vmatprep.subr.bf16.mxu1 %v12914_v57 }
 0x329   :  { %7118 = vmatmul.mubr.bf16.gmra.mrb[92].mxu0 %v14431_v20  ;;  %v14652_v27 = vadd.f32 %v10838_v39, %v14567_v32 }
 0x32a   :  { %7157 = vmatpush1.bf16.msra.mxu0 %v12909_v18 }
 0x32b   :  { %v10839_v61 = vpop.f32.mrb[116].mxu1  ;;  %7609 = vmatpush1.bf16.msra.mxu1 %v12912_v63  ;;  %7158 = vmatprep.subr.bf16.mxu0 %v12917_v35 }
 0x32c   :  { %v10840_v22 = vpop.f32.mrb[117].mxu1  ;;  %7610 = vmatprep.subr.bf16.mxu1 %v12920_v46 }
 0x32d   :  { %v10841_v13 = vadd.f32 %v10840_v22, %v10839_v61  ;;  %v10842_v11 = vpop.f32.mrb[118].mxu1 }
 0x32e   :  { %v10843_v12 = vpop.f32.mrb[119].mxu1  ;;  %7159 = vmatpush1.bf16.msra.mxu0 %v12915_v14 }
 0x32f   :  { %v10844_v57 = vadd.f32 %v10843_v12, %v10842_v11  ;;  %7611 = vmatpush1.bf16.msra.mxu1 %v12918_v3  ;;  %7241 = vmatprep.subr.bf16.mxu0 %v12923_v42  ;;  %v14655_v32 = vadd.f32 %v10841_v13, %v14574_v31  ;;  %v15652_v31 = vsub.s32 4, %v14240_v38 }
 0x330   :  { %7693 = vmatprep.subr.bf16.mxu1 %v12935_v50 }
 0x331   :  { %v14658_v39 = vadd.f32 %v10844_v57, %v14579_v36  ;;  %v15651_v36 = vsub.s32 5, %v14240_v38 }
 0x333   :  { %v10845_v24 = vpop.f32.mrb[120].mxu1 }
 0x334   :  { %v10846_v18 = vpop.f32.mrb[121].mxu1 }
 0x335   :  { %v10847_v63 = vadd.f32 %v10846_v18, %v10845_v24  ;;  %v10848_v35 = vpop.f32.mrb[122].mxu1 }
 0x336   :  { %v10849_v46 = vpop.f32.mrb[123].mxu1 }
 0x337   :  { %v10850_v20 = vadd.f32 %v10849_v46, %v10848_v35  ;;  %v14661_v61 = vadd.f32 %v10847_v63, %v14586_v37  ;;  %v14674_v37 = vrot.slane %v14501_v34, %v15652_v31 }
 0x339   :  { %v14664_v14 = vadd.f32 %v10850_v20, %v14591_v15  ;;  %v14679_v20 = vrot.slane %v14501_v34, %v15651_v36 }
 0x33b   :  { %v10851_v3 = vpop.f32.mrb[124].mxu1 }
 0x33c   :  { %v10852_v42 = vpop.f32.mrb[125].mxu1 }
 0x33d   :  { %v10853_v22 = vadd.f32 %v10852_v42, %v10851_v3  ;;  %v10854_v50 = vpop.f32.mrb[126].mxu1 }
 0x33e   :  { %v10855_v13 = vpop.f32.mrb[127].mxu1 }
 0x33f   :  { %v10856_v11 = vadd.f32 %v10855_v13, %v10854_v50  ;;  %v14669_v12 = vadd.f32 %v10853_v22, %v14598_v41 }
 0x341   :  { %v14682_v15 = vadd.f32 %v10856_v11, %v14603_v8 }
 0x343   :  { %v3766_v57 = vpop.f32.mrb[32].mxu0  ;;  %v11286_v24 = vpop.f32.mrb[128].mxu1 }
 0x344   :  { %v11428_v18 = vadd.f32 %v3766_v57, %v14674_v37  ;;  %v4179_v41 = vadd.f32 %v11286_v24, %v14617_v55  ;;  %v3768_v63 = vpop.f32.mrb[33].mxu0  ;;  %v4170_v35 = vpop.f32.mrb[129].mxu1 }
 0x345   :  { %v11429_v46 = vadd.f32 %v3768_v63, %v14679_v20  ;;  %v4171_v3 = vadd.f32 %v4170_v35, %v14607_v44  ;;  %v3770_v42 = vpop.f32.mrb[34].mxu0  ;;  %v11287_v22 = vpop.f32.mrb[130].mxu1 }
 0x346   :  { %v11430_v34 = vadd.f32 %v3770_v42, %v14674_v37  ;;  %v4182_v50 = vadd.f32 %v11287_v22, %v14623_v7  ;;  %v3772_v8 = vpop.f32.mrb[35].mxu0  ;;  %v4173_v13 = vpop.f32.mrb[131].mxu1  ;;  %v4237_v36 = vmax.f32 %v11428_v18, 0.0  ;;  %v4253_v55 = vmax.f32 %v4179_v41, 0.0 }
 0x347   :  { %v11431_v11 = vadd.f32 %v3772_v8, %v14679_v20  ;;  %v4174_v57 = vadd.f32 %v4173_v13, %v14613_v6  ;;  %v4238_v38 = vmax.f32 %v11429_v46, 0.0  ;;  %v4239_v63 = vmax.f32 %v4171_v3, 0.0  ;;  %v12933_v6 = vld [vmem:[#allocation6 + $0xa88] ss:$28 sps:$4 sm:$0xff]  }
 0x348   :  { %v4244_v24 = vmax.f32 %v11430_v34, 0.0  ;;  %v4260_v31 = vmax.f32 %v4182_v50, 0.0  ;;  %v12926_v34 = vld [vmem:[#allocation6 + $0xabc] ss:$28 sps:$4 sm:$0xff]   ;;  %v12941_v50 = vld [vmem:[#allocation6 + $0xac4] ss:$28 sps:$4 sm:$0xff]  }
 0x349   :  { %v4245_v25 = vmax.f32 %v11431_v11, 0.0  ;;  %v4246_v44 = vmax.f32 %v4174_v57, 0.0 }
 0x34a   :  { %v14692_v35 = vpack.c.bf16 %v4244_v24, %v4237_v36  ;;  %v14694_v49 = vpack.c.bf16 %v4260_v31, %v4253_v55  ;;  %v12924_v24 = vld [vmem:[#allocation6 + $0xab8] ss:$28 sps:$4 sm:$0xff]  }
 0x34b   :  { %v14696_v42 = vpack.c.bf16 %v4245_v25, %v4238_v38  ;;  %v14698_v7 = vpack.c.bf16 %v4246_v44, %v4239_v63  ;;  %v3776_v22 = vpop.f32.mrb[36].mxu0  ;;  %v11290_v8 = vpop.f32.mrb[132].mxu1  ;;  %v12929_v63 = vld [vmem:[#allocation6 + $0xaf4] ss:$28 sps:$4 sm:$0xff]   ;;  %v12939_v44 = vld [vmem:[#allocation6 + $0xac0] ss:$28 sps:$4 sm:$0xff]  }
 0x34c   :  { %15687 = vst [vmem:[#allocation26_spill] sm:$0xff] %v14692_v35  ;;  %v11432_v18 = vadd.f32 %v3776_v22, %v14674_v37  ;;  %v4195_v41 = vadd.f32 %v11290_v8, %v14637_v2  ;;  %v3778_v46 = vpop.f32.mrb[37].mxu0  ;;  %v4186_v3 = vpop.f32.mrb[133].mxu1 }
 0x34d   :  { %15688 = vst [vmem:[#allocation27_spill] sm:$0xff] %v14696_v42  ;;  %v11433_v36 = vadd.f32 %v3778_v46, %v14679_v20  ;;  %v4187_v31 = vadd.f32 %v4186_v3, %v14627_v9  ;;  %v3780_v38 = vpop.f32.mrb[38].mxu0  ;;  %v11291_v25 = vpop.f32.mrb[134].mxu1  ;;  %7160 = vmatprep.mubr.bf16.mxu0 %v14696_v42  ;;  %7612 = vmatprep.mubr.bf16.mxu1 %v14696_v42 }
 0x34e   :  { %v11434_v13 = vadd.f32 %v3780_v38, %v14674_v37  ;;  %v4198_v11 = vadd.f32 %v11291_v25, %v14643_v59  ;;  %v3782_v57 = vpop.f32.mrb[39].mxu0  ;;  %v4189_v2 = vpop.f32.mrb[135].mxu1  ;;  %7161 = vmatmul.mubr.bf16.vlgmr.msra.gmra.mrb[64].mxu0 %v14692_v35  ;;  %7613 = vmatmul.mubr.bf16.vlgmr.msra.gmra.mrb[144].mxu1 %v14692_v35  ;;  %v4251_v22 = vmax.f32 %v11432_v18, 0.0  ;;  %v4281_v8 = vmax.f32 %v4195_v41, 0.0  ;;  %v12947_v59 = vld [vmem:[#allocation6 + $0xafc] ss:$28 sps:$4 sm:$0xff]  }
 0x34f   :  { %v11435_v55 = vadd.f32 %v3782_v57, %v14679_v20  ;;  %v4190_v9 = vadd.f32 %v4189_v2, %v14633_v26  ;;  %7242 = vmatpush1.bf16.msra.mxu0 %v12921_v52  ;;  %7694 = vmatpush1.bf16.msra.mxu1 %v12933_v6  ;;  %v4252_v38 = vmax.f32 %v11433_v36, 0.0  ;;  %v4267_v25 = vmax.f32 %v4187_v31, 0.0  ;;  %v12927_v41 = vld [vmem:[#allocation6 + $0xaf0] ss:$28 sps:$4 sm:$0xff]  }
 0x350   :  { %v4258_v46 = vmax.f32 %v11434_v13, 0.0  ;;  %v4288_v3 = vmax.f32 %v4198_v11, 0.0  ;;  %7243 = vmatprep.subr.bf16.mxu0 %v12926_v34  ;;  %7695 = vmatprep.subr.bf16.mxu1 %v12941_v50  ;;  %v12945_v34 = vld [vmem:[#allocation6 + $0xaf8] ss:$28 sps:$4 sm:$0xff]   ;;  %v12932_v11 = vld [vmem:[#allocation6 + $0xb2c] ss:$28 sps:$4 sm:$0xff]  }
 0x351   :  { %v4259_v42 = vmax.f32 %v11435_v55, 0.0  ;;  %v4274_v35 = vmax.f32 %v4190_v9, 0.0  ;;  %v12950_v2 = vld [vmem:[#allocation6 + $0xb34] ss:$28 sps:$4 sm:$0xff]  }
 0x352   :  { %v14712_v62 = vpack.c.bf16 %v4258_v46, %v4251_v22  ;;  %v14714_v57 = vpack.c.bf16 %v4288_v3, %v4281_v8  ;;  %v12930_v8 = vld [vmem:[#allocation6 + $0xb28] ss:$28 sps:$4 sm:$0xff]   ;;  %v12948_v3 = vld [vmem:[#allocation6 + $0xb30] ss:$28 sps:$4 sm:$0xff]  }
 0x353   :  { %v14716_v52 = vpack.c.bf16 %v4259_v42, %v4252_v38  ;;  %v14718_v26 = vpack.c.bf16 %v4274_v35, %v4267_v25  ;;  %v3786_v6 = vpop.f32.mrb[40].mxu0  ;;  %v11294_v18 = vpop.f32.mrb[136].mxu1  ;;  %7244 = vmatpush1.bf16.msra.mxu0 %v12924_v24  ;;  %7696 = vmatpush1.bf16.msra.mxu1 %v12939_v44  ;;  %v12938_v46 = vld [vmem:[#allocation6 + $0xb64] ss:$28 sps:$4 sm:$0xff]  }
 0x354   :  { %v11436_v50 = vadd.f32 %v3786_v6, %v14674_v37  ;;  %v4211_v36 = vadd.f32 %v11294_v18, %v14655_v32  ;;  %v3788_v31 = vpop.f32.mrb[41].mxu0  ;;  %v4202_v13 = vpop.f32.mrb[137].mxu1  ;;  %7245 = vmatprep.subr.bf16.mxu0 %v12929_v63  ;;  %7697 = vmatprep.subr.bf16.mxu1 %v12947_v59 }
 0x355   :  { %v11437_v42 = vadd.f32 %v3788_v31, %v14679_v20  ;;  %v4203_v35 = vadd.f32 %v4202_v13, %v14647_v5  ;;  %v3790_v55 = vpop.f32.mrb[42].mxu0  ;;  %v11295_v9 = vpop.f32.mrb[138].mxu1  ;;  %7170 = vmatprep.mubr.bf16.mxu0 %v14716_v52  ;;  %7622 = vmatprep.mubr.bf16.mxu1 %v14716_v52 }
 0x356   :  { %v11438_v24 = vadd.f32 %v3790_v55, %v14674_v37  ;;  %v4214_v32 = vadd.f32 %v11295_v9, %v14658_v39  ;;  %v3792_v44 = vpop.f32.mrb[43].mxu0  ;;  %v4205_v22 = vpop.f32.mrb[139].mxu1  ;;  %7171 = vmatmul.mubr.bf16.gmra.mrb[68].mxu0 %v14712_v62  ;;  %7623 = vmatmul.mubr.bf16.gmra.mrb[148].mxu1 %v14712_v62  ;;  %v4265_v59 = vmax.f32 %v11436_v50, 0.0  ;;  %v4309_v38 = vmax.f32 %v4211_v36, 0.0  ;;  %v12956_v39 = vld [vmem:[#allocation6 + $0xb6c] ss:$28 sps:$4 sm:$0xff]  }
 0x357   :  { %v11439_v63 = vadd.f32 %v3792_v44, %v14679_v20  ;;  %v4206_v5 = vadd.f32 %v4205_v22, %v14652_v27  ;;  %7246 = vmatpush1.bf16.msra.mxu0 %v12927_v41  ;;  %7698 = vmatpush1.bf16.msra.mxu1 %v12945_v34  ;;  %v4266_v18 = vmax.f32 %v11437_v42, 0.0  ;;  %v4295_v31 = vmax.f32 %v4203_v35, 0.0  ;;  %v12936_v36 = vld [vmem:[#allocation6 + $0xb60] ss:$28 sps:$4 sm:$0xff]  }
 0x358   :  { %v4272_v25 = vmax.f32 %v11438_v24, 0.0  ;;  %v4316_v6 = vmax.f32 %v4214_v32, 0.0  ;;  %7247 = vmatprep.subr.bf16.mxu0 %v12932_v11  ;;  %7699 = vmatprep.subr.bf16.mxu1 %v12950_v2  ;;  %v12954_v11 = vld [vmem:[#allocation6 + $0xb68] ss:$28 sps:$4 sm:$0xff]   ;;  %v12944_v32 = vld [vmem:[#allocation6 + $0xb9c] ss:$28 sps:$4 sm:$0xff]  }
 0x359   :  { %v4273_v13 = vmax.f32 %v11439_v63, 0.0  ;;  %v4302_v55 = vmax.f32 %v4206_v5, 0.0  ;;  %v12959_v22 = vld [vmem:[#allocation6 + $0xba4] ss:$28 sps:$4 sm:$0xff]  }
 0x35a   :  { %v14732_v9 = vpack.c.bf16 %v4272_v25, %v4265_v59  ;;  %v14734_v44 = vpack.c.bf16 %v4316_v6, %v4309_v38  ;;  %v12942_v6 = vld [vmem:[#allocation6 + $0xb98] ss:$28 sps:$4 sm:$0xff]  }
 0x35b   :  { %v14736_v27 = vpack.c.bf16 %v4273_v13, %v4266_v18  ;;  %v14738_v41 = vpack.c.bf16 %v4302_v55, %v4295_v31  ;;  %v3796_v34 = vpop.f32.mrb[44].mxu0  ;;  %v11298_v50 = vpop.f32.mrb[140].mxu1  ;;  %7248 = vmatpush1.bf16.msra.mxu0 %v12930_v8  ;;  %7700 = vmatpush1.bf16.msra.mxu1 %v12948_v3  ;;  %v12957_v18 = vld [vmem:[#allocation6 + $0xba0] ss:$28 sps:$4 sm:$0xff]  }
 0x35c   :  { %v11440_v2 = vadd.f32 %v3796_v34, %v14674_v37  ;;  %v4227_v42 = vadd.f32 %v11298_v50, %v14669_v12  ;;  %v3798_v35 = vpop.f32.mrb[45].mxu0  ;;  %v4218_v24 = vpop.f32.mrb[141].mxu1  ;;  %7249 = vmatprep.subr.bf16.mxu0 %v12938_v46  ;;  %7701 = vmatprep.subr.bf16.mxu1 %v12956_v39  ;;  %v12953_v39 = vld [vmem:[#allocation6 + $0xbd4] ss:$28 sps:$4 sm:$0xff]  }
 0x35d   :  { %v11441_v63 = vadd.f32 %v3798_v35, %v14679_v20  ;;  %v4219_v5 = vadd.f32 %v4218_v24, %v14661_v61  ;;  %v3800_v59 = vpop.f32.mrb[46].mxu0  ;;  %v11299_v38 = vpop.f32.mrb[142].mxu1  ;;  %7180 = vmatprep.mubr.bf16.mxu0 %v14736_v27  ;;  %7632 = vmatprep.mubr.bf16.mxu1 %v14736_v27 }
 0x35e   :  { %v11442_v8 = vadd.f32 %v3800_v59, %v14674_v37  ;;  %v4230_v12 = vadd.f32 %v11299_v38, %v14682_v15  ;;  %v3802_v3 = vpop.f32.mrb[47].mxu0  ;;  %v4221_v25 = vpop.f32.mrb[143].mxu1  ;;  %7181 = vmatmul.mubr.bf16.gmra.mrb[72].mxu0 %v14732_v9  ;;  %7633 = vmatmul.mubr.bf16.gmra.mrb[152].mxu1 %v14732_v9  ;;  %v4279_v31 = vmax.f32 %v11440_v2, 0.0  ;;  %v4337_v13 = vmax.f32 %v4227_v42, 0.0  ;;  %v12965_v15 = vld [vmem:[#allocation6 + $0xbdc] ss:$28 sps:$4 sm:$0xff]  }
 0x35f   :  { %v11443_v46 = vadd.f32 %v3802_v3, %v14679_v20  ;;  %v4222_v61 = vadd.f32 %v4221_v25, %v14664_v14  ;;  %7250 = vmatpush1.bf16.msra.mxu0 %v12936_v36  ;;  %7702 = vmatpush1.bf16.msra.mxu1 %v12954_v11  ;;  %v4280_v50 = vmax.f32 %v11441_v63, 0.0  ;;  %v4323_v35 = vmax.f32 %v4219_v5, 0.0  ;;  %v12951_v2 = vld [vmem:[#allocation6 + $0xbd0] ss:$28 sps:$4 sm:$0xff]   ;;  %v12963_v42 = vld [vmem:[#allocation6 + $0xbd8] ss:$28 sps:$4 sm:$0xff]  }
 0x360   :  { %v4286_v55 = vmax.f32 %v11442_v8, 0.0  ;;  %v4344_v34 = vmax.f32 %v4230_v12, 0.0  ;;  %7251 = vmatprep.subr.bf16.mxu0 %v12944_v32  ;;  %7703 = vmatprep.subr.bf16.mxu1 %v12959_v22  ;;  %v12962_v63 = vld [vmem:[#allocation6 + $0xc0c] ss:$28 sps:$4 sm:$0xff]   ;;  %v12968_v5 = vld [vmem:[#allocation6 + $0xc14] ss:$28 sps:$4 sm:$0xff]  }
 0x361   :  { %v4287_v24 = vmax.f32 %v11443_v46, 0.0  ;;  %v4330_v59 = vmax.f32 %v4222_v61, 0.0 }
 0x362   :  { %v14752_v38 = vpack.c.bf16 %v4286_v55, %v4279_v31  ;;  %v14754_v3 = vpack.c.bf16 %v4344_v34, %v4337_v13  ;;  %v12971_v13 = vld [vmem:[#allocation6 + $0x14] ss:$28 sps:$4 sm:$0xff]  }
 0x363   :  { %v14756_v14 = vpack.c.bf16 %v4287_v24, %v4280_v50  ;;  %v14758_v36 = vpack.c.bf16 %v4330_v59, %v4323_v35  ;;  %v3806_v11 = vpop.f32.mrb[48].mxu0  ;;  %7252 = vmatpush1.bf16.msra.mxu0 %v12942_v6  ;;  %7704 = vmatpush1.bf16.msra.mxu1 %v12957_v18  ;;  %v12960_v6 = vld [vmem:[#allocation6 + $0xc08] ss:$28 sps:$4 sm:$0xff]   ;;  %v12993_v55 = vld [vmem:[#allocation6 + $0x1d8] ss:$28 sps:$4 sm:$0xff]  }
 0x364   :  { %v11444_v32 = vadd.f32 %v3806_v11, %v14674_v37  ;;  %v3808_v22 = vpop.f32.mrb[49].mxu0  ;;  %7253 = vmatprep.subr.bf16.mxu0 %v12953_v39  ;;  %7705 = vmatprep.subr.bf16.mxu1 %v12965_v15  ;;  %v12966_v39 = vld [vmem:[#allocation6 + $0xc10] ss:$28 sps:$4 sm:$0xff]  }
 0x365   :  { %v11445_v8 = vadd.f32 %v3808_v22, %v14679_v20  ;;  %v3810_v12 = vpop.f32.mrb[50].mxu0  ;;  %7190 = vmatprep.mubr.bf16.mxu0 %v14756_v14  ;;  %7642 = vmatprep.mubr.bf16.mxu1 %v14756_v14 }
 0x366   :  { %v11446_v25 = vadd.f32 %v3810_v12, %v14674_v37  ;;  %v3812_v46 = vpop.f32.mrb[51].mxu0  ;;  %7191 = vmatmul.mubr.bf16.gmra.mrb[76].mxu0 %v14752_v38  ;;  %7643 = vmatmul.mubr.bf16.gmra.mrb[156].mxu1 %v14752_v38  ;;  %v4293_v18 = vmax.f32 %v11444_v32, 0.0 }
 0x367   :  { %v11447_v61 = vadd.f32 %v3812_v46, %v14679_v20  ;;  %7254 = vmatpush1.bf16.msra.mxu0 %v12951_v2  ;;  %7706 = vmatpush1.bf16.msra.mxu1 %v12963_v42  ;;  %v4294_v34 = vmax.f32 %v11445_v8, 0.0 }
 0x368   :  { %v4300_v31 = vmax.f32 %v11446_v25, 0.0  ;;  %7255 = vmatprep.subr.bf16.mxu0 %v12962_v63  ;;  %7707 = vmatprep.subr.bf16.mxu1 %v12968_v5 }
 0x369   :  { %v4301_v15 = vmax.f32 %v11447_v61, 0.0 }
 0x36a   :  { %v14768_v50 = vpack.c.bf16 %v4300_v31, %v4293_v18 }
 0x36b   :  { %v14770_v35 = vpack.c.bf16 %v4301_v15, %v4294_v34  ;;  %v3816_v24 = vpop.f32.mrb[52].mxu0  ;;  %7256 = vmatpush1.bf16.msra.mxu0 %v12960_v6  ;;  %7708 = vmatpush1.bf16.msra.mxu1 %v12966_v39 }
 0x36c   :  { %v11448_v59 = vadd.f32 %v3816_v24, %v14674_v37  ;;  %v3818_v11 = vpop.f32.mrb[53].mxu0  ;;  %7806 = vmatprep.subr.bf16.mxu0 %v12971_v13  ;;  %10866 = vmatprep.subr.bf16.mxu1 %v12993_v55 }
 0x36d   :  { %v11449_v2 = vadd.f32 %v3818_v11, %v14679_v20  ;;  %v3820_v42 = vpop.f32.mrb[54].mxu0  ;;  %7200 = vmatprep.mubr.bf16.mxu0 %v14770_v35  ;;  %7652 = vmatprep.mubr.bf16.mxu1 %v14770_v35 }
 0x36e   :  { %v11450_v32 = vadd.f32 %v3820_v42, %v14674_v37  ;;  %v3822_v22 = vpop.f32.mrb[55].mxu0  ;;  %7201 = vmatmul.mubr.bf16.gmra.mrb[80].mxu0 %v14768_v50  ;;  %7653 = vmatmul.mubr.bf16.gmra.mrb[160].mxu1 %v14768_v50  ;;  %v4307_v5 = vmax.f32 %v11448_v59, 0.0 }
 0x36f   :  { %v11451_v63 = vadd.f32 %v3822_v22, %v14679_v20  ;;  %v4308_v12 = vmax.f32 %v11449_v2, 0.0 }
 0x370   :  { %v4314_v8 = vmax.f32 %v11450_v32, 0.0 }
 0x371   :  { %v4315_v25 = vmax.f32 %v11451_v63, 0.0 }
 0x372   :  { %v14780_v46 = vpack.c.bf16 %v4314_v8, %v4307_v5 }
 0x373   :  { %v14782_v61 = vpack.c.bf16 %v4315_v25, %v4308_v12  ;;  %v3826_v6 = vpop.f32.mrb[56].mxu0 }
 0x374   :  { %v11452_v39 = vadd.f32 %v3826_v6, %v14674_v37  ;;  %v3828_v18 = vpop.f32.mrb[57].mxu0 }
 0x375   :  { %v11453_v31 = vadd.f32 %v3828_v18, %v14679_v20  ;;  %v3830_v13 = vpop.f32.mrb[58].mxu0  ;;  %7210 = vmatprep.mubr.bf16.mxu0 %v14782_v61  ;;  %7662 = vmatprep.mubr.bf16.mxu1 %v14782_v61 }
 0x376   :  { %v11454_v55 = vadd.f32 %v3830_v13, %v14674_v37  ;;  %v3832_v34 = vpop.f32.mrb[59].mxu0  ;;  %7211 = vmatmul.mubr.bf16.gmra.mrb[84].mxu0 %v14780_v46  ;;  %7663 = vmatmul.mubr.bf16.gmra.mrb[164].mxu1 %v14780_v46  ;;  %v4321_v24 = vmax.f32 %v11452_v39, 0.0 }
 0x377   :  { %v11455_v15 = vadd.f32 %v3832_v34, %v14679_v20  ;;  %v4322_v11 = vmax.f32 %v11453_v31, 0.0 }
 0x378   :  { %v4328_v59 = vmax.f32 %v11454_v55, 0.0 }
 0x379   :  { %v4329_v2 = vmax.f32 %v11455_v15, 0.0 }
 0x37a   :  { %v14792_v42 = vpack.c.bf16 %v4328_v59, %v4321_v24  ;;  %v12994_v24 = vld [vmem:[#allocation6 + $0x18] ss:$28 sps:$4 sm:$0xff]   ;;  %v13001_v59 = vld [vmem:[#allocation6 + $0x210] ss:$28 sps:$4 sm:$0xff]  }
 0x37b   :  { %v14794_v32 = vpack.c.bf16 %v4329_v2, %v4322_v11  ;;  %v3836_v22 = vpop.f32.mrb[60].mxu0  ;;  %v12972_v11 = vld [vmem:[#allocation6 + $0x48] ss:$28 sps:$4 sm:$0xff]  }
 0x37c   :  { %v11456_v63 = vadd.f32 %v3836_v22, %v14674_v37  ;;  %v3838_v5 = vpop.f32.mrb[61].mxu0  ;;  %v12977_v2 = vld [vmem:[#allocation6 + $0x84] ss:$28 sps:$4 sm:$0xff]   ;;  %v13002_v22 = vld [vmem:[#allocation6 + $0x50] ss:$28 sps:$4 sm:$0xff]  }
 0x37d   :  { %v11457_v8 = vadd.f32 %v3838_v5, %v14679_v20  ;;  %v3840_v12 = vpop.f32.mrb[62].mxu0  ;;  %7220 = vmatprep.mubr.bf16.mxu0 %v14794_v32  ;;  %7672 = vmatprep.mubr.bf16.mxu1 %v14794_v32  ;;  %v12980_v5 = vld [vmem:[#allocation6 + $0xbc] ss:$28 sps:$4 sm:$0xff]  }
 0x37e   :  { %v11458_v25 = vadd.f32 %v3840_v12, %v14674_v37  ;;  %v3842_v6 = vpop.f32.mrb[63].mxu0  ;;  %7221 = vmatmul.mubr.bf16.gmra.mrb[88].mxu0 %v14792_v42  ;;  %7673 = vmatmul.mubr.bf16.gmra.mrb[168].mxu1 %v14792_v42  ;;  %v4335_v18 = vmax.f32 %v11456_v63, 0.0  ;;  %v12969_v37 = vld [vmem:[#allocation6 + $0x10] ss:$28 sps:$4 sm:$0xff]   ;;  %v12975_v63 = vld [vmem:[#allocation6 + $0x80] ss:$28 sps:$4 sm:$0xff]  }
 0x37f   :  { %v11459_v39 = vadd.f32 %v3842_v6, %v14679_v20  ;;  %v4336_v13 = vmax.f32 %v11457_v8, 0.0  ;;  %v12974_v20 = vld [vmem:[#allocation6 + $0x4c] ss:$28 sps:$4 sm:$0xff]   ;;  %v13011_v6 = vld [vmem:[#allocation6 + $0x280] ss:$28 sps:$4 sm:$0xff]  }
 0x380   :  { %v4342_v31 = vmax.f32 %v11458_v25, 0.0  ;;  %v13006_v8 = vld [vmem:[#allocation6 + $0x248] ss:$28 sps:$4 sm:$0xff]   ;;  %v12978_v25 = vld [vmem:[#allocation6 + $0xb8] ss:$28 sps:$4 sm:$0xff]  }
 0x381   :  { %v4343_v55 = vmax.f32 %v11459_v39, 0.0  ;;  %v13007_v12 = vld [vmem:[#allocation6 + $0x88] ss:$28 sps:$4 sm:$0xff]   ;;  %v12983_v39 = vld [vmem:[#allocation6 + $0xf4] ss:$28 sps:$4 sm:$0xff]  }
 0x382   :  { %v14804_v34 = vpack.c.bf16 %v4342_v31, %v4335_v18  ;;  %v12981_v18 = vld [vmem:[#allocation6 + $0xf0] ss:$28 sps:$4 sm:$0xff]  }
 0x383   :  { %v14806_v15 = vpack.c.bf16 %v4343_v55, %v4336_v13  ;;  %v12986_v31 = vld [vmem:[#allocation6 + $0x12c] ss:$28 sps:$4 sm:$0xff]   ;;  %v13012_v13 = vld [vmem:[#allocation6 + $0xc0] ss:$28 sps:$4 sm:$0xff]   ;;  %v13016_v55 = vld [vmem:[#allocation6 + $0x2b8] ss:$28 sps:$4 sm:$0xff]  }
 0x385   :  { %7230 = vmatprep.mubr.bf16.mxu0 %v14806_v15  ;;  %7682 = vmatprep.mubr.bf16.mxu1 %v14806_v15 }
 0x386   :  { %7231 = vmatmul.mubr.bf16.gmra.mrb[92].mxu0 %v14804_v34  ;;  %7683 = vmatmul.mubr.bf16.gmra.mrb[172].mxu1 %v14804_v34 }
 0x387   :  { %7273 = vmatprep.mubr.bf16.mxu0 %v15668_v48  ;;  %7725 = vmatprep.mubr.bf16.mxu1 %v15668_v48 }
 0x38e   :  { %7274 = vmatmul.mubr.bf16.vlgmr.msra.gmra.mrb[64].mxu0 %v14698_v7  ;;  %7726 = vmatmul.mubr.bf16.vlgmr.msra.gmra.mrb[144].mxu1 %v14698_v7 }
 0x38f   :  { %7807 = vmatpush1.bf16.msra.mxu0 %v12969_v37  ;;  %7283 = vmatprep.mubr.bf16.mxu0 %v15668_v48  ;;  %v12984_v37 = vld [vmem:[#allocation6 + $0x128] ss:$28 sps:$4 sm:$0xff]  }
 0x390   :  { %7808 = vmatprep.subr.bf16.mxu0 %v12974_v20  ;;  %7735 = vmatprep.mubr.bf16.mxu1 %v15668_v48  ;;  %v12989_v20 = vld [vmem:[#allocation6 + $0x164] ss:$28 sps:$4 sm:$0xff]  }
 0x391   :  { %10867 = vmatpush3.bf16.msra.mxu1 %v12994_v24  ;;  %v13017_v24 = vld [vmem:[#allocation6 + $0xf8] ss:$28 sps:$4 sm:$0xff]  }
 0x392   :  { %10868 = vmatprep.subr.bf16.mxu1 %v13001_v59  ;;  %v12987_v59 = vld [vmem:[#allocation6 + $0x160] ss:$28 sps:$4 sm:$0xff]  }
 0x393   :  { %7809 = vmatpush1.bf16.msra.mxu0 %v12972_v11  ;;  %v12992_v11 = vld [vmem:[#allocation6 + $0x19c] ss:$28 sps:$4 sm:$0xff]  }
 0x394   :  { %7810 = vmatprep.subr.bf16.mxu0 %v12977_v2  ;;  %v13021_v2 = vld [vmem:[#allocation6 + $0x2f0] ss:$28 sps:$4 sm:$0xff]  }
 0x395   :  { %10869 = vmatpush3.bf16.msra.mxu1 %v13002_v22  ;;  %v13022_v22 = vld [vmem:[#allocation6 + $0x130] ss:$28 sps:$4 sm:$0xff]  }
 0x396   :  { %7284 = vmatmul.mubr.bf16.gmra.mrb[68].mxu0 %v14694_v49  ;;  %7736 = vmatmul.mubr.bf16.gmra.mrb[148].mxu1 %v14694_v49 }
 0x397   :  { %7811 = vmatpush1.bf16.msra.mxu0 %v12975_v63  ;;  %7293 = vmatprep.mubr.bf16.mxu0 %v15668_v48  ;;  %v12990_v63 = vld [vmem:[#allocation6 + $0x198] ss:$28 sps:$4 sm:$0xff]  }
 0x398   :  { %7812 = vmatprep.subr.bf16.mxu0 %v12980_v5  ;;  %7745 = vmatprep.mubr.bf16.mxu1 %v15668_v48  ;;  %v13026_v5 = vld [vmem:[#allocation6 + $0x328] ss:$28 sps:$4 sm:$0xff]  }
 0x399   :  { %10870 = vmatprep.subr.bf16.mxu1 %v13006_v8  ;;  %v12997_v8 = vld [vmem:[#allocation6 + $0x1d4] ss:$28 sps:$4 sm:$0xff]  }
 0x39a   :  { %10871 = vmatpush3.bf16.msra.mxu1 %v13007_v12  ;;  %v12995_v12 = vld [vmem:[#allocation6 + $0x1d0] ss:$28 sps:$4 sm:$0xff]  }
 0x39b   :  { %7813 = vmatpush1.bf16.msra.mxu0 %v12978_v25  ;;  %10872 = vmatprep.subr.bf16.mxu1 %v13011_v6  ;;  %v13000_v25 = vld [vmem:[#allocation6 + $0x20c] ss:$28 sps:$4 sm:$0xff]  }
 0x39c   :  { %7814 = vmatprep.subr.bf16.mxu0 %v12983_v39  ;;  %v13027_v6 = vld [vmem:[#allocation6 + $0x168] ss:$28 sps:$4 sm:$0xff]   ;;  %v13031_v39 = vld [vmem:[#allocation6 + $0x360] ss:$28 sps:$4 sm:$0xff]  }
 0x39e   :  { %7294 = vmatmul.mubr.bf16.gmra.mrb[72].mxu0 %v14718_v26  ;;  %7746 = vmatmul.mubr.bf16.gmra.mrb[152].mxu1 %v14718_v26 }
 0x39f   :  { %7815 = vmatpush1.bf16.msra.mxu0 %v12981_v18  ;;  %7303 = vmatprep.mubr.bf16.mxu0 %v15668_v48  ;;  %v12998_v18 = vld [vmem:[#allocation6 + $0x208] ss:$28 sps:$4 sm:$0xff]  }
 0x3a0   :  { %7816 = vmatprep.subr.bf16.mxu0 %v12986_v31  ;;  %7755 = vmatprep.mubr.bf16.mxu1 %v15668_v48  ;;  %v13005_v31 = vld [vmem:[#allocation6 + $0x244] ss:$28 sps:$4 sm:$0xff]  }
 0x3a1   :  { %10873 = vmatpush3.bf16.msra.mxu1 %v13012_v13  ;;  %v13032_v13 = vld [vmem:[#allocation6 + $0x1a0] ss:$28 sps:$4 sm:$0xff]  }
 0x3a2   :  { %10874 = vmatprep.subr.bf16.mxu1 %v13016_v55  ;;  %v13003_v55 = vld [vmem:[#allocation6 + $0x240] ss:$28 sps:$4 sm:$0xff]  }
 0x3a3   :  { %7817 = vmatpush1.bf16.msra.mxu0 %v12984_v37  ;;  %v13010_v37 = vld [vmem:[#allocation6 + $0x27c] ss:$28 sps:$4 sm:$0xff]  }
 0x3a4   :  { %7818 = vmatprep.subr.bf16.mxu0 %v12989_v20  ;;  %v13057_v20 = vld [vmem:[#allocation6 + $0x558] ss:$28 sps:$4 sm:$0xff]  }
 0x3a5   :  { %10875 = vmatpush3.bf16.msra.mxu1 %v13017_v24  ;;  %v13008_v24 = vld [vmem:[#allocation6 + $0x278] ss:$28 sps:$4 sm:$0xff]  }
 0x3a6   :  { %7304 = vmatmul.mubr.bf16.gmra.mrb[76].mxu0 %v14714_v57  ;;  %7756 = vmatmul.mubr.bf16.gmra.mrb[156].mxu1 %v14714_v57 }
 0x3a7   :  { %7819 = vmatpush1.bf16.msra.mxu0 %v12987_v59  ;;  %7313 = vmatprep.mubr.bf16.mxu0 %v15668_v48  ;;  %v13015_v59 = vld [vmem:[#allocation6 + $0x2b4] ss:$28 sps:$4 sm:$0xff]  }
 0x3a8   :  { %7820 = vmatprep.subr.bf16.mxu0 %v12992_v11  ;;  %7765 = vmatprep.mubr.bf16.mxu1 %v15668_v48  ;;  %v13013_v11 = vld [vmem:[#allocation6 + $0x2b0] ss:$28 sps:$4 sm:$0xff]  }
 0x3a9   :  { %10876 = vmatprep.subr.bf16.mxu1 %v13021_v2  ;;  %v13020_v2 = vld [vmem:[#allocation6 + $0x2ec] ss:$28 sps:$4 sm:$0xff]  }
 0x3aa   :  { %10877 = vmatpush3.bf16.msra.mxu1 %v13022_v22  ;;  %v13018_v22 = vld [vmem:[#allocation6 + $0x2e8] ss:$28 sps:$4 sm:$0xff]  }
 0x3ab   :  { %7821 = vmatpush1.bf16.msra.mxu0 %v12990_v63  ;;  %10878 = vmatprep.subr.bf16.mxu1 %v13026_v5  ;;  %v13025_v63 = vld [vmem:[#allocation6 + $0x324] ss:$28 sps:$4 sm:$0xff]  }
 0x3ac   :  { %7822 = vmatprep.subr.bf16.mxu0 %v12997_v8  ;;  %v13023_v5 = vld [vmem:[#allocation6 + $0x320] ss:$28 sps:$4 sm:$0xff]  }
 0x3ad   :  { %v13030_v8 = vld [vmem:[#allocation6 + $0x35c] ss:$28 sps:$4 sm:$0xff]  }
 0x3ae   :  { %7314 = vmatmul.mubr.bf16.gmra.mrb[80].mxu0 %v14738_v41  ;;  %7766 = vmatmul.mubr.bf16.gmra.mrb[160].mxu1 %v14738_v41 }
 0x3af   :  { %7823 = vmatpush1.bf16.msra.mxu0 %v12995_v12  ;;  %7323 = vmatprep.mubr.bf16.mxu0 %v15668_v48  ;;  %v13028_v12 = vld [vmem:[#allocation6 + $0x358] ss:$28 sps:$4 sm:$0xff]  }
 0x3b0   :  { %7824 = vmatprep.subr.bf16.mxu0 %v13000_v25  ;;  %7775 = vmatprep.mubr.bf16.mxu1 %v15668_v48  ;;  %v13035_v25 = vld [vmem:[#allocation6 + $0x394] ss:$28 sps:$4 sm:$0xff]  }
 0x3b1   :  { %10879 = vmatpush3.bf16.msra.mxu1 %v13027_v6  ;;  %v13033_v6 = vld [vmem:[#allocation6 + $0x390] ss:$28 sps:$4 sm:$0xff]  }
 0x3b2   :  { %10880 = vmatprep.subr.bf16.mxu1 %v13031_v39  ;;  %v13038_v39 = vld [vmem:[#allocation6 + $0x3cc] ss:$28 sps:$4 sm:$0xff]  }
 0x3b3   :  { %7825 = vmatpush1.bf16.msra.mxu0 %v12998_v18  ;;  %v13058_v18 = vld [vmem:[#allocation6 + $0x398] ss:$28 sps:$4 sm:$0xff]  }
 0x3b4   :  { %7826 = vmatprep.subr.bf16.mxu0 %v13005_v31  ;;  %v13065_v31 = vld [vmem:[#allocation6 + $0x590] ss:$28 sps:$4 sm:$0xff]  }
 0x3b5   :  { %10881 = vmatpush3.bf16.msra.mxu1 %v13032_v13  ;;  %v13036_v13 = vld [vmem:[#allocation6 + $0x3c8] ss:$28 sps:$4 sm:$0xff]  }
 0x3b6   :  { %7324 = vmatmul.mubr.bf16.gmra.mrb[84].mxu0 %v14734_v44  ;;  %7776 = vmatmul.mubr.bf16.gmra.mrb[164].mxu1 %v14734_v44 }
 0x3b7   :  { %7827 = vmatpush1.bf16.msra.mxu0 %v13003_v55  ;;  %7333 = vmatprep.mubr.bf16.mxu0 %v15668_v48  ;;  %v13066_v55 = vld [vmem:[#allocation6 + $0x3d0] ss:$28 sps:$4 sm:$0xff]  }
 0x3b8   :  { %7828 = vmatprep.subr.bf16.mxu0 %v13010_v37  ;;  %7785 = vmatprep.mubr.bf16.mxu1 %v15668_v48  ;;  %v13039_v37 = vld [vmem:[#allocation6 + $0x400] ss:$28 sps:$4 sm:$0xff]  }
 0x3b9   :  { %10930 = vmatprep.subr.bf16.mxu1 %v13057_v20  ;;  %v13044_v20 = vld [vmem:[#allocation6 + $0x43c] ss:$28 sps:$4 sm:$0xff]  }
 0x3bb   :  { %7829 = vmatpush1.bf16.msra.mxu0 %v13008_v24  ;;  %v13070_v24 = vld [vmem:[#allocation6 + $0x5c8] ss:$28 sps:$4 sm:$0xff]  }
 0x3bc   :  { %7830 = vmatprep.subr.bf16.mxu0 %v13015_v59  ;;  %v15689_v59 = vld [vmem:[#allocation22_spill] sm:$0xff] }
 0x3be   :  { %7334 = vmatmul.mubr.bf16.gmra.mrb[88].mxu0 %v14758_v36  ;;  %7786 = vmatmul.mubr.bf16.gmra.mrb[168].mxu1 %v14758_v36 }
 0x3bf   :  { %7831 = vmatpush1.bf16.msra.mxu0 %v13013_v11  ;;  %7343 = vmatprep.mubr.bf16.mxu0 %v15668_v48  ;;  %v13075_v11 = vld [vmem:[#allocation6 + $0x600] ss:$28 sps:$4 sm:$0xff]  }
 0x3c0   :  { %7832 = vmatprep.subr.bf16.mxu0 %v13020_v2  ;;  %7795 = vmatprep.mubr.bf16.mxu1 %v15668_v48  ;;  %v13047_v2 = vld [vmem:[#allocation6 + $0x474] ss:$28 sps:$4 sm:$0xff]  }
 0x3c3   :  { %7833 = vmatpush1.bf16.msra.mxu0 %v13018_v22  ;;  %v13045_v22 = vld [vmem:[#allocation6 + $0x470] ss:$28 sps:$4 sm:$0xff]  }
 0x3c4   :  { %7834 = vmatprep.subr.bf16.mxu0 %v13025_v63  ;;  %v13050_v63 = vld [vmem:[#allocation6 + $0x4ac] ss:$28 sps:$4 sm:$0xff]  }
 0x3c6   :  { %7344 = vmatmul.mubr.bf16.gmra.mrb[92].mxu0 %v14754_v3  ;;  %7796 = vmatmul.mubr.bf16.gmra.mrb[172].mxu1 %v14754_v3 }
 0x3c7   :  { %7835 = vmatpush1.bf16.msra.mxu0 %v13023_v5  ;;  %7838 = vmatprep.mubr.bf16.mxu0 %v14286_v16  ;;  %v13076_v5 = vld [vmem:[#allocation6 + $0x440] ss:$28 sps:$4 sm:$0xff]  }
 0x3c8   :  { %8290 = vmatprep.mubr.bf16.mxu1 %v14286_v16  ;;  %7836 = vmatprep.subr.bf16.mxu0 %v13030_v8  ;;  %v13041_v16 = vld [vmem:[#allocation6 + $0x404] ss:$28 sps:$4 sm:$0xff]   ;;  %v15690_v8 = vld [vmem:[#allocation21_spill] sm:$0xff] }
 0x3cb   :  { %7837 = vmatpush1.bf16.msra.mxu0 %v13028_v12  ;;  %v15691_v12 = vld [vmem:[#allocation23_spill] sm:$0xff] }
 0x3cc   :  { %7919 = vmatprep.subr.bf16.mxu0 %v13035_v25  ;;  %v13048_v25 = vld [vmem:[#allocation6 + $0x4a8] ss:$28 sps:$4 sm:$0xff]  }
 0x3ce   :  { %7839 = vmatmul.mubr.bf16.vlgmr.msra.gmra.mrb[96].mxu0 %v14282_v51  ;;  %8291 = vmatmul.mubr.bf16.vlgmr.msra.gmra.mrb[176].mxu1 %v14282_v51  ;;  %v13071_v51 = vld [vmem:[#allocation6 + $0x408] ss:$28 sps:$4 sm:$0xff]  }
 0x3cf   :  { %7848 = vmatprep.mubr.bf16.mxu0 %v14306_v10  ;;  %7920 = vmatpush1.bf16.msra.mxu0 %v13033_v6  ;;  %v13053_v6 = vld [vmem:[#allocation6 + $0x4e4] ss:$28 sps:$4 sm:$0xff]  }
 0x3d0   :  { %8298 = vmatprep.mubr.bf16.mxu1 %v14306_v10  ;;  %7921 = vmatprep.subr.bf16.mxu0 %v13038_v39  ;;  %v13042_v10 = vld [vmem:[#allocation6 + $0x438] ss:$28 sps:$4 sm:$0xff]  }
 0x3d1   :  { %10931 = vmatpush3.bf16.msra.mxu1 %v13058_v18  ;;  %v13081_v39 = vld [vmem:[#allocation6 + $0x478] ss:$28 sps:$4 sm:$0xff]   ;;  %v13051_v18 = vld [vmem:[#allocation6 + $0x4e0] ss:$28 sps:$4 sm:$0xff]  }
 0x3d2   :  { %10932 = vmatprep.subr.bf16.mxu1 %v13065_v31  ;;  %v13056_v31 = vld [vmem:[#allocation6 + $0x51c] ss:$28 sps:$4 sm:$0xff]  }
 0x3d3   :  { %7922 = vmatpush1.bf16.msra.mxu0 %v13036_v13  ;;  %v13085_v13 = vld [vmem:[#allocation6 + $0x670] ss:$28 sps:$4 sm:$0xff]  }
 0x3d4   :  { %7923 = vmatprep.subr.bf16.mxu0 %v13041_v16  ;;  %v13086_v16 = vld [vmem:[#allocation6 + $0x4b0] ss:$28 sps:$4 sm:$0xff]  }
 0x3d5   :  { %10933 = vmatpush3.bf16.msra.mxu1 %v13066_v55  ;;  %v13054_v55 = vld [vmem:[#allocation6 + $0x518] ss:$28 sps:$4 sm:$0xff]  }
 0x3d6   :  { %7849 = vmatmul.mubr.bf16.gmra.mrb[100].mxu0 %v14302_v23  ;;  %8299 = vmatmul.mubr.bf16.gmra.mrb[180].mxu1 %v14302_v23  ;;  %v13080_v23 = vld [vmem:[#allocation6 + $0x638] ss:$28 sps:$4 sm:$0xff]  }
 0x3d7   :  { %7858 = vmatprep.mubr.bf16.mxu0 %v15689_v59  ;;  %7924 = vmatpush1.bf16.msra.mxu0 %v13039_v37  ;;  %v13090_v37 = vld [vmem:[#allocation6 + $0x6a8] ss:$28 sps:$4 sm:$0xff]  }
 0x3d8   :  { %8306 = vmatprep.mubr.bf16.mxu1 %v15689_v59  ;;  %7925 = vmatprep.subr.bf16.mxu0 %v13044_v20  ;;  %v13061_v20 = vld [vmem:[#allocation6 + $0x554] ss:$28 sps:$4 sm:$0xff]   ;;  %v13091_v59 = vld [vmem:[#allocation6 + $0x4e8] ss:$28 sps:$4 sm:$0xff]  }
 0x3d9   :  { %10934 = vmatprep.subr.bf16.mxu1 %v13070_v24  ;;  %v13059_v24 = vld [vmem:[#allocation6 + $0x550] ss:$28 sps:$4 sm:$0xff]  }
 0x3da   :  { %10935 = vmatpush3.bf16.msra.mxu1 %v13071_v51  ;;  %v13064_v51 = vld [vmem:[#allocation6 + $0x58c] ss:$28 sps:$4 sm:$0xff]  }
 0x3db   :  { %7926 = vmatpush1.bf16.msra.mxu0 %v13042_v10  ;;  %10936 = vmatprep.subr.bf16.mxu1 %v13075_v11  ;;  %v13062_v10 = vld [vmem:[#allocation6 + $0x588] ss:$28 sps:$4 sm:$0xff]   ;;  %v13096_v11 = vld [vmem:[#allocation6 + $0x520] ss:$28 sps:$4 sm:$0xff]  }
 0x3dc   :  { %7927 = vmatprep.subr.bf16.mxu0 %v13047_v2  ;;  %v13067_v2 = vld [vmem:[#allocation6 + $0x5c0] ss:$28 sps:$4 sm:$0xff]  }
 0x3de   :  { %7859 = vmatmul.mubr.bf16.gmra.mrb[104].mxu0 %v15690_v8  ;;  %8307 = vmatmul.mubr.bf16.gmra.mrb[184].mxu1 %v15690_v8  ;;  %v13084_v8 = vld [vmem:[#allocation6 + $0x66c] ss:$28 sps:$4 sm:$0xff]  }
 0x3df   :  { %7868 = vmatprep.mubr.bf16.mxu0 %v15691_v12  ;;  %7928 = vmatpush1.bf16.msra.mxu0 %v13045_v22  ;;  %v13074_v22 = vld [vmem:[#allocation6 + $0x5fc] ss:$28 sps:$4 sm:$0xff]  }
 0x3e0   :  { %8314 = vmatprep.mubr.bf16.mxu1 %v15691_v12  ;;  %7929 = vmatprep.subr.bf16.mxu0 %v13050_v63  ;;  %v13121_v63 = vld [vmem:[#allocation6 + $0x8d8] ss:$28 sps:$4 sm:$0xff]  }
 0x3e1   :  { %10937 = vmatpush3.bf16.msra.mxu1 %v13076_v5  ;;  %v13077_v5 = vld [vmem:[#allocation6 + $0x630] ss:$28 sps:$4 sm:$0xff]   ;;  %v13094_v12 = vld [vmem:[#allocation6 + $0x6dc] ss:$28 sps:$4 sm:$0xff]  }
 0x3e2   :  { %10938 = vmatprep.subr.bf16.mxu1 %v13080_v23  ;;  %v13089_v23 = vld [vmem:[#allocation6 + $0x6a4] ss:$28 sps:$4 sm:$0xff]  }
 0x3e3   :  { %7930 = vmatpush1.bf16.msra.mxu0 %v13048_v25  ;;  %v13099_v25 = vld [vmem:[#allocation6 + $0x714] ss:$28 sps:$4 sm:$0xff]  }
 0x3e4   :  { %7931 = vmatprep.subr.bf16.mxu0 %v13053_v6  ;;  %v13102_v6 = vld [vmem:[#allocation6 + $0x74c] ss:$28 sps:$4 sm:$0xff]  }
 0x3e5   :  { %10939 = vmatpush3.bf16.msra.mxu1 %v13081_v39  ;;  %v13122_v39 = vld [vmem:[#allocation6 + $0x718] ss:$28 sps:$4 sm:$0xff]  }
 0x3e6   :  { %7869 = vmatmul.mubr.bf16.gmra.mrb[108].mxu0 %v14342_v4  ;;  %8315 = vmatmul.mubr.bf16.gmra.mrb[188].mxu1 %v14342_v4  ;;  %v13095_v4 = vld [vmem:[#allocation6 + $0x6e0] ss:$28 sps:$4 sm:$0xff]  }
 0x3e7   :  { %7878 = vmatprep.mubr.bf16.mxu0 %v14367_v47  ;;  %7932 = vmatpush1.bf16.msra.mxu0 %v13051_v18  ;;  %v13129_v18 = vld [vmem:[#allocation6 + $0x910] ss:$28 sps:$4 sm:$0xff]  }
 0x3e8   :  { %8322 = vmatprep.mubr.bf16.mxu1 %v14367_v47  ;;  %7933 = vmatprep.subr.bf16.mxu0 %v13056_v31  ;;  %v13069_v47 = vld [vmem:[#allocation6 + $0x5c4] ss:$28 sps:$4 sm:$0xff]   ;;  %v13130_v31 = vld [vmem:[#allocation6 + $0x750] ss:$28 sps:$4 sm:$0xff]  }
 0x3e9   :  { %10940 = vmatprep.subr.bf16.mxu1 %v13085_v13  ;;  %v13103_v13 = vld [vmem:[#allocation6 + $0x780] ss:$28 sps:$4 sm:$0xff]  }
 0x3ea   :  { %10941 = vmatpush3.bf16.msra.mxu1 %v13086_v16  ;;  %v13108_v16 = vld [vmem:[#allocation6 + $0x7bc] ss:$28 sps:$4 sm:$0xff]  }
 0x3eb   :  { %7934 = vmatpush1.bf16.msra.mxu0 %v13054_v55  ;;  %10942 = vmatprep.subr.bf16.mxu1 %v13090_v37  ;;  %v13134_v55 = vld [vmem:[#allocation6 + $0x948] ss:$28 sps:$4 sm:$0xff]   ;;  %v13139_v37 = vld [vmem:[#allocation6 + $0x980] ss:$28 sps:$4 sm:$0xff]  }
 0x3ec   :  { %7935 = vmatprep.subr.bf16.mxu0 %v13061_v20  ;;  %v13111_v20 = vld [vmem:[#allocation6 + $0x7f4] ss:$28 sps:$4 sm:$0xff]  }
 0x3ee   :  { %7879 = vmatmul.mubr.bf16.gmra.mrb[112].mxu0 %v14363_v28  ;;  %8323 = vmatmul.mubr.bf16.gmra.mrb[192].mxu1 %v14363_v28  ;;  %v13072_v28 = vld [vmem:[#allocation6 + $0x5f8] ss:$28 sps:$4 sm:$0xff]  }
 0x3ef   :  { %7888 = vmatprep.mubr.bf16.mxu0 %v14387_v58  ;;  %7936 = vmatpush1.bf16.msra.mxu0 %v13059_v24  ;;  %v13109_v24 = vld [vmem:[#allocation6 + $0x7f0] ss:$28 sps:$4 sm:$0xff]  }
 0x3f0   :  { %8330 = vmatprep.mubr.bf16.mxu1 %v14387_v58  ;;  %7937 = vmatprep.subr.bf16.mxu0 %v13064_v51  ;;  %v13079_v58 = vld [vmem:[#allocation6 + $0x634] ss:$28 sps:$4 sm:$0xff]   ;;  %v13114_v51 = vld [vmem:[#allocation6 + $0x82c] ss:$28 sps:$4 sm:$0xff]  }
 0x3f1   :  { %10943 = vmatpush3.bf16.msra.mxu1 %v13091_v59  ;;  %v13140_v59 = vld [vmem:[#allocation6 + $0x7c0] ss:$28 sps:$4 sm:$0xff]  }
 0x3f2   :  { %10944 = vmatprep.subr.bf16.mxu1 %v13095_v4  ;;  %v13112_v4 = vld [vmem:[#allocation6 + $0x828] ss:$28 sps:$4 sm:$0xff]  }
 0x3f3   :  { %7938 = vmatpush1.bf16.msra.mxu0 %v13062_v10  ;;  %v13145_v10 = vld [vmem:[#allocation6 + $0x7f8] ss:$28 sps:$4 sm:$0xff]  }
 0x3f4   :  { %7939 = vmatprep.subr.bf16.mxu0 %v13069_v47  ;;  %v13115_v47 = vld [vmem:[#allocation6 + $0x860] ss:$28 sps:$4 sm:$0xff]  }
 0x3f5   :  { %10945 = vmatpush3.bf16.msra.mxu1 %v13096_v11  ;;  %v13120_v11 = vld [vmem:[#allocation6 + $0x89c] ss:$28 sps:$4 sm:$0xff]  }
 0x3f6   :  { %7889 = vmatmul.mubr.bf16.gmra.mrb[116].mxu0 %v14383_v53  ;;  %8331 = vmatmul.mubr.bf16.gmra.mrb[196].mxu1 %v14383_v53  ;;  %v13082_v53 = vld [vmem:[#allocation6 + $0x668] ss:$28 sps:$4 sm:$0xff]  }
 0x3f7   :  { %7898 = vmatprep.mubr.bf16.mxu0 %v14410_v1  ;;  %7940 = vmatpush1.bf16.msra.mxu0 %v13067_v2  ;;  %v13149_v2 = vld [vmem:[#allocation6 + $0x9f0] ss:$28 sps:$4 sm:$0xff]  }
 0x3f8   :  { %8338 = vmatprep.mubr.bf16.mxu1 %v14410_v1  ;;  %7941 = vmatprep.subr.bf16.mxu0 %v13074_v22  ;;  %v13087_v1 = vld [vmem:[#allocation6 + $0x6a0] ss:$28 sps:$4 sm:$0xff]   ;;  %v13154_v22 = vld [vmem:[#allocation6 + $0xa28] ss:$28 sps:$4 sm:$0xff]  }
 0x3f9   :  { %10994 = vmatprep.subr.bf16.mxu1 %v13121_v63  ;;  %v13125_v63 = vld [vmem:[#allocation6 + $0x8d4] ss:$28 sps:$4 sm:$0xff]  }
 0x3fb   :  { %7942 = vmatpush1.bf16.msra.mxu0 %v13072_v28  ;;  %v13123_v28 = vld [vmem:[#allocation6 + $0x8d0] ss:$28 sps:$4 sm:$0xff]  }
 0x3fc   :  { %7943 = vmatprep.subr.bf16.mxu0 %v13079_v58  ;;  %v13128_v58 = vld [vmem:[#allocation6 + $0x90c] ss:$28 sps:$4 sm:$0xff]  }
 0x3fe   :  { %7899 = vmatmul.mubr.bf16.gmra.mrb[120].mxu0 %v14406_v30  ;;  %8339 = vmatmul.mubr.bf16.gmra.mrb[200].mxu1 %v14406_v30  ;;  %v13092_v30 = vld [vmem:[#allocation6 + $0x6d8] ss:$28 sps:$4 sm:$0xff]  }
 0x3ff   :  { %7908 = vmatprep.mubr.bf16.mxu0 %v14433_v56  ;;  %7944 = vmatpush1.bf16.msra.mxu0 %v13077_v5  ;;  %v13155_v5 = vld [vmem:[#allocation6 + $0x868] ss:$28 sps:$4 sm:$0xff]  }
 0x400   :  { %8346 = vmatprep.mubr.bf16.mxu1 %v14433_v56  ;;  %7945 = vmatprep.subr.bf16.mxu0 %v13084_v8  ;;  %v13097_v56 = vld [vmem:[#allocation6 + $0x710] ss:$28 sps:$4 sm:$0xff]  }
 0x401   :  { %v15692_v8 = vld [vmem:[#allocation17_spill] sm:$0xff] }
 0x403   :  { %7946 = vmatpush1.bf16.msra.mxu0 %v13082_v53  ;;  %v13126_v53 = vld [vmem:[#allocation6 + $0x908] ss:$28 sps:$4 sm:$0xff]  }
 0x404   :  { %7947 = vmatprep.subr.bf16.mxu0 %v13089_v23  ;;  %v13160_v23 = vld [vmem:[#allocation6 + $0x8a0] ss:$28 sps:$4 sm:$0xff]  }
 0x406   :  { %7909 = vmatmul.mubr.bf16.gmra.mrb[124].mxu0 %v14429_v21  ;;  %8347 = vmatmul.mubr.bf16.gmra.mrb[204].mxu1 %v14429_v21  ;;  %v13100_v21 = vld [vmem:[#allocation6 + $0x748] ss:$28 sps:$4 sm:$0xff]  }
 0x407   :  { %7948 = vmatpush1.bf16.msra.mxu0 %v13087_v1  ;;  %7951 = vmatprep.mubr.bf16.mxu0 %v14288_v29  ;;  %v13131_v1 = vld [vmem:[#allocation6 + $0x940] ss:$28 sps:$4 sm:$0xff]  }
 0x408   :  { %8387 = vmatprep.mubr.bf16.mxu1 %v14288_v29  ;;  %7949 = vmatprep.subr.bf16.mxu0 %v13094_v12  ;;  %v13105_v29 = vld [vmem:[#allocation6 + $0x784] ss:$28 sps:$4 sm:$0xff]   ;;  %v13138_v12 = vld [vmem:[#allocation6 + $0x97c] ss:$28 sps:$4 sm:$0xff]  }
 0x40b   :  { %7950 = vmatpush1.bf16.msra.mxu0 %v13092_v30  ;;  %v13173_v30 = vld [vmem:[#allocation6 + $0xa98] ss:$28 sps:$4 sm:$0xff]  }
 0x40c   :  { %8032 = vmatprep.subr.bf16.mxu0 %v13099_v25  ;;  %v15693_v25 = vld [vmem:[#allocation16_spill] sm:$0xff] }
 0x40e   :  { %7952 = vmatmul.mubr.bf16.vlgmr.msra.gmra.mrb[96].mxu0 %v14284_v40  ;;  %8388 = vmatmul.mubr.bf16.vlgmr.msra.gmra.mrb[208].mxu1 %v14284_v40  ;;  %v13135_v40 = vld [vmem:[#allocation6 + $0x788] ss:$28 sps:$4 sm:$0xff]  }
 0x40f   :  { %7961 = vmatprep.mubr.bf16.mxu0 %v14308_v45  ;;  %8033 = vmatpush1.bf16.msra.mxu0 %v13097_v56  ;;  %v13136_v56 = vld [vmem:[#allocation6 + $0x978] ss:$28 sps:$4 sm:$0xff]  }
 0x410   :  { %8395 = vmatprep.mubr.bf16.mxu1 %v14308_v45  ;;  %8034 = vmatprep.subr.bf16.mxu0 %v13102_v6  ;;  %v13106_v45 = vld [vmem:[#allocation6 + $0x7b8] ss:$28 sps:$4 sm:$0xff]  }
 0x411   :  { %10995 = vmatpush3.bf16.msra.mxu1 %v13122_v39  ;;  %v13143_v6 = vld [vmem:[#allocation6 + $0x9b4] ss:$28 sps:$4 sm:$0xff]  }
 0x412   :  { %10996 = vmatprep.subr.bf16.mxu1 %v13129_v18  ;;  %v13141_v39 = vld [vmem:[#allocation6 + $0x9b0] ss:$28 sps:$4 sm:$0xff]  }
 0x413   :  { %8035 = vmatpush1.bf16.msra.mxu0 %v13100_v21  ;;  %v13148_v18 = vld [vmem:[#allocation6 + $0x9ec] ss:$28 sps:$4 sm:$0xff]   ;;  %v15695_v21 = vld [vmem:[#allocation18_spill] sm:$0xff] }
 0x414   :  { %8036 = vmatprep.subr.bf16.mxu0 %v13105_v29  ;;  %v15696_v29 = vld [vmem:[#allocation25_spill] sm:$0xff] }
 0x415   :  { %10997 = vmatpush3.bf16.msra.mxu1 %v13130_v31  ;;  %v13146_v31 = vld [vmem:[#allocation6 + $0x9e8] ss:$28 sps:$4 sm:$0xff]  }
 0x416   :  { %7962 = vmatmul.mubr.bf16.gmra.mrb[100].mxu0 %v14304_v0  ;;  %8396 = vmatmul.mubr.bf16.gmra.mrb[212].mxu1 %v14304_v0  ;;  %v13144_v0 = vld [vmem:[#allocation6 + $0x9b8] ss:$28 sps:$4 sm:$0xff]  }
 0x417   :  { %7971 = vmatprep.mubr.bf16.mxu0 %v14328_v54  ;;  %8037 = vmatpush1.bf16.msra.mxu0 %v13103_v13  ;;  %v13153_v13 = vld [vmem:[#allocation6 + $0xa24] ss:$28 sps:$4 sm:$0xff]  }
 0x418   :  { %8403 = vmatprep.mubr.bf16.mxu1 %v14328_v54  ;;  %8038 = vmatprep.subr.bf16.mxu0 %v13108_v16  ;;  %v13117_v54 = vld [vmem:[#allocation6 + $0x864] ss:$28 sps:$4 sm:$0xff]  }
 0x419   :  { %10998 = vmatprep.subr.bf16.mxu1 %v13134_v55  ;;  %v13151_v16 = vld [vmem:[#allocation6 + $0xa20] ss:$28 sps:$4 sm:$0xff]  }
 0x41a   :  { %10999 = vmatpush3.bf16.msra.mxu1 %v13135_v40  ;;  %v13158_v55 = vld [vmem:[#allocation6 + $0xa5c] ss:$28 sps:$4 sm:$0xff]   ;;  %v15697_v40 = vld [vmem:[#allocation24_spill] sm:$0xff] }
 0x41b   :  { %8039 = vmatpush1.bf16.msra.mxu0 %v13106_v45  ;;  %11000 = vmatprep.subr.bf16.mxu1 %v13139_v37  ;;  %v15698_v45 = vld [vmem:[#allocation27_spill] sm:$0xff]  ;;  %v13156_v37 = vld [vmem:[#allocation6 + $0xa58] ss:$28 sps:$4 sm:$0xff]  }
 0x41c   :  { %8040 = vmatprep.subr.bf16.mxu0 %v13111_v20  ;;  %v13163_v20 = vld [vmem:[#allocation6 + $0xa94] ss:$28 sps:$4 sm:$0xff]  }
 0x41e   :  { %7972 = vmatmul.mubr.bf16.gmra.mrb[104].mxu0 %v14324_v43  ;;  %8404 = vmatmul.mubr.bf16.gmra.mrb[216].mxu1 %v14324_v43  ;;  %v13150_v43 = vld [vmem:[#allocation6 + $0x830] ss:$28 sps:$4 sm:$0xff]  }
 0x41f   :  { %7981 = vmatprep.mubr.bf16.mxu0 %v14348_v33  ;;  %8041 = vmatpush1.bf16.msra.mxu0 %v13109_v24  ;;  %v13161_v24 = vld [vmem:[#allocation6 + $0xa90] ss:$28 sps:$4 sm:$0xff]  }
 0x420   :  { %8411 = vmatprep.mubr.bf16.mxu1 %v14348_v33  ;;  %8042 = vmatprep.subr.bf16.mxu0 %v13114_v51  ;;  %v13118_v33 = vld [vmem:[#allocation6 + $0x898] ss:$28 sps:$4 sm:$0xff]   ;;  %v13166_v51 = vld [vmem:[#allocation6 + $0xacc] ss:$28 sps:$4 sm:$0xff]  }
 0x421   :  { %11001 = vmatpush3.bf16.msra.mxu1 %v13140_v59  ;;  %v15699_v59 = vld [vmem:[#allocation26_spill] sm:$0xff] }
 0x422   :  { %11002 = vmatprep.subr.bf16.mxu1 %v13144_v0  ;;  %v13177_v0 = vld [vmem:[#allocation6 + $0xad0] ss:$28 sps:$4 sm:$0xff]  }
 0x423   :  { %8043 = vmatpush1.bf16.msra.mxu0 %v13112_v4  ;;  %v13164_v4 = vld [vmem:[#allocation6 + $0xac8] ss:$28 sps:$4 sm:$0xff]  }
 0x424   :  { %8044 = vmatprep.subr.bf16.mxu0 %v13117_v54  ;;  %v13169_v54 = vld [vmem:[#allocation6 + $0xb04] ss:$28 sps:$4 sm:$0xff]  }
 0x425   :  { %11003 = vmatpush3.bf16.msra.mxu1 %v13145_v10  ;;  %v13167_v10 = vld [vmem:[#allocation6 + $0xb00] ss:$28 sps:$4 sm:$0xff]  }
 0x426   :  { %7982 = vmatmul.mubr.bf16.gmra.mrb[108].mxu0 %v14344_v19  ;;  %8412 = vmatmul.mubr.bf16.gmra.mrb[220].mxu1 %v14344_v19  ;;  %v13159_v19 = vld [vmem:[#allocation6 + $0xa60] ss:$28 sps:$4 sm:$0xff]  }
 0x427   :  { %7991 = vmatprep.mubr.bf16.mxu0 %v14369_v60  ;;  %8045 = vmatpush1.bf16.msra.mxu0 %v13115_v47  ;;  %v13181_v47 = vld [vmem:[#allocation6 + $0xb08] ss:$28 sps:$4 sm:$0xff]  }
 0x428   :  { %8419 = vmatprep.mubr.bf16.mxu1 %v14369_v60  ;;  %8046 = vmatprep.subr.bf16.mxu0 %v13120_v11  ;;  %v13133_v60 = vld [vmem:[#allocation6 + $0x944] ss:$28 sps:$4 sm:$0xff]   ;;  %v13172_v11 = vld [vmem:[#allocation6 + $0xb3c] ss:$28 sps:$4 sm:$0xff]  }
 0x429   :  { %11004 = vmatprep.subr.bf16.mxu1 %v13149_v2  ;;  %v13182_v2 = vld [vmem:[#allocation6 + $0xb40] ss:$28 sps:$4 sm:$0xff]  }
 0x42a   :  { %11005 = vmatpush3.bf16.msra.mxu1 %v13150_v43  ;;  %v13176_v43 = vld [vmem:[#allocation6 + $0xb74] ss:$28 sps:$4 sm:$0xff]  }
 0x42b   :  { %8047 = vmatpush1.bf16.msra.mxu0 %v13118_v33  ;;  %11006 = vmatprep.subr.bf16.mxu1 %v13154_v22  ;;  %v14918_v33 = vld [vmem:[#allocation7] sm:$0xff]  ;;  %v13174_v22 = vld [vmem:[#allocation6 + $0xb70] ss:$28 sps:$4 sm:$0xff]  }
 0x42c   :  { %8048 = vmatprep.subr.bf16.mxu0 %v13125_v63  ;;  %v13186_v63 = vld [vmem:[#allocation6 + $0xb78] ss:$28 sps:$4 sm:$0xff]  }
 0x42e   :  { %7992 = vmatmul.mubr.bf16.gmra.mrb[112].mxu0 %v14365_v17  ;;  %8420 = vmatmul.mubr.bf16.gmra.mrb[224].mxu1 %v14365_v17  ;;  %v15694_v17 = vld [vmem:[#allocation19_spill] sm:$0xff] }
 0x42f   :  { %8001 = vmatprep.mubr.bf16.mxu0 %v15692_v8  ;;  %8049 = vmatpush1.bf16.msra.mxu0 %v13123_v28  ;;  %v13180_v28 = vld [vmem:[#allocation6 + $0xbac] ss:$28 sps:$4 sm:$0xff]  }
 0x430   :  { %8427 = vmatprep.mubr.bf16.mxu1 %v15692_v8  ;;  %8050 = vmatprep.subr.bf16.mxu0 %v13128_v58  ;;  %v13187_v8 = vld [vmem:[#allocation6 + $0xbb0] ss:$28 sps:$4 sm:$0xff]  }
 0x431   :  { %11007 = vmatpush3.bf16.msra.mxu1 %v13155_v5 }
 0x432   :  { %11008 = vmatprep.subr.bf16.mxu1 %v13159_v19 }
 0x433   :  { %8051 = vmatpush1.bf16.msra.mxu0 %v13126_v53 }
 0x434   :  { %8052 = vmatprep.subr.bf16.mxu0 %v13133_v60 }
 0x435   :  { %11009 = vmatpush3.bf16.msra.mxu1 %v13160_v23 }
 0x436   :  { %8002 = vmatmul.mubr.bf16.gmra.mrb[116].mxu0 %v15693_v25  ;;  %8428 = vmatmul.mubr.bf16.gmra.mrb[228].mxu1 %v15693_v25  ;;  %v13185_v25 = vld [vmem:[#allocation6 + $0xbe4] ss:$28 sps:$4 sm:$0xff]  }
 0x437   :  { %8011 = vmatprep.mubr.bf16.mxu0 %v15694_v17  ;;  %8053 = vmatpush1.bf16.msra.mxu0 %v13131_v1  ;;  %v13178_v1 = vld [vmem:[#allocation6 + $0xba8] ss:$28 sps:$4 sm:$0xff]  }
 0x438   :  { %8435 = vmatprep.mubr.bf16.mxu1 %v15694_v17  ;;  %8054 = vmatprep.subr.bf16.mxu0 %v13138_v12 }
 0x439   :  { %11300 = vmatprep.subr.bf16.mxu1 %v13173_v30 }
 0x43b   :  { %8055 = vmatpush1.bf16.msra.mxu0 %v13136_v56 }
 0x43c   :  { %8056 = vmatprep.subr.bf16.mxu0 %v13143_v6 }
 0x43e   :  { %8012 = vmatmul.mubr.bf16.gmra.mrb[120].mxu0 %v15695_v21  ;;  %8436 = vmatmul.mubr.bf16.gmra.mrb[232].mxu1 %v15695_v21 }
 0x43f   :  { %8021 = vmatprep.mubr.bf16.mxu0 %v15696_v29  ;;  %8057 = vmatpush1.bf16.msra.mxu0 %v13141_v39 }
 0x440   :  { %8443 = vmatprep.mubr.bf16.mxu1 %v15696_v29  ;;  %8058 = vmatprep.subr.bf16.mxu0 %v13148_v18 }
 0x443   :  { %8059 = vmatpush1.bf16.msra.mxu0 %v13146_v31 }
 0x444   :  { %8060 = vmatprep.subr.bf16.mxu0 %v13153_v13 }
 0x446   :  { %8022 = vmatmul.mubr.bf16.gmra.mrb[124].mxu0 %v15697_v40  ;;  %8444 = vmatmul.mubr.bf16.gmra.mrb[236].mxu1 %v15697_v40  ;;  %v13183_v40 = vld [vmem:[#allocation6 + $0xbe0] ss:$28 sps:$4 sm:$0xff]  }
 0x447   :  { %8061 = vmatpush1.bf16.msra.mxu0 %v13151_v16  ;;  %8064 = vmatprep.mubr.bf16.mxu0 %v15698_v45 }
 0x448   :  { %8484 = vmatprep.mubr.bf16.mxu1 %v15698_v45  ;;  %8062 = vmatprep.subr.bf16.mxu0 %v13158_v55  ;;  %v13191_v45 = vld [vmem:[#allocation6 + $0xbe8] ss:$28 sps:$4 sm:$0xff]  }
 0x44b   :  { %8063 = vmatpush1.bf16.msra.mxu0 %v13156_v37 }
 0x44c   :  { %8145 = vmatprep.subr.bf16.mxu0 %v13163_v20 }
 0x44e   :  { %8065 = vmatmul.mubr.bf16.vlgmr.msra.gmra.mrb[96].mxu0 %v15699_v59  ;;  %8485 = vmatmul.mubr.bf16.vlgmr.msra.gmra.mrb[240].mxu1 %v15699_v59 }
 0x44f   :  { %8074 = vmatprep.mubr.bf16.mxu0 %v14716_v52  ;;  %8146 = vmatpush1.bf16.msra.mxu0 %v13161_v24  ;;  %v13190_v24 = vld [vmem:[#allocation6 + $0xc1c] ss:$28 sps:$4 sm:$0xff]  }
 0x450   :  { %8492 = vmatprep.mubr.bf16.mxu1 %v14716_v52  ;;  %8147 = vmatprep.subr.bf16.mxu0 %v13166_v51  ;;  %v13170_v52 = vld [vmem:[#allocation6 + $0xb38] ss:$28 sps:$4 sm:$0xff]  }
 0x451   :  { %11301 = vmatpush3.bf16.msra.mxu1 %v13173_v30 }
 0x452   :  { %11302 = vmatprep.subr.bf16.mxu1 %v13177_v0 }
 0x453   :  { %8148 = vmatpush1.bf16.msra.mxu0 %v13164_v4 }
 0x454   :  { %8149 = vmatprep.subr.bf16.mxu0 %v13169_v54  ;;  %v13192_v54 = vld [vmem:[#allocation6 + $0xc20] ss:$28 sps:$4 sm:$0xff]  }
 0x455   :  { %11303 = vmatpush3.bf16.msra.mxu1 %v13177_v0 }
 0x456   :  { %8075 = vmatmul.mubr.bf16.gmra.mrb[100].mxu0 %v14712_v62  ;;  %8493 = vmatmul.mubr.bf16.gmra.mrb[244].mxu1 %v14712_v62  ;;  %v15700_v62 = vld [vmem:[#allocation20_spill] sm:$0xff] }
 0x457   :  { %8084 = vmatprep.mubr.bf16.mxu0 %v14736_v27  ;;  %8500 = vmatprep.mubr.bf16.mxu1 %v14736_v27  ;;  %v15701_v27 = vsub.s32 0, %v15700_v62  ;;  %v15702_v5 = vsub.s32 2, %v15700_v62  ;;  %v15703_v53 = vsub.s32 1, %v15700_v62 }
 0x458   :  { %8150 = vmatpush1.bf16.msra.mxu0 %v13167_v10  ;;  %11304 = vmatprep.subr.bf16.mxu1 %v13181_v47 }
 0x459   :  { %8151 = vmatprep.subr.bf16.mxu0 %v13172_v11  ;;  %11305 = vmatpush3.bf16.msra.mxu1 %v13181_v47  ;;  %v14925_v58 = vrot.slane %v14918_v33, %v15701_v27  ;;  %v14930_v19 = vrot.slane %v14918_v33, %v15702_v5  ;;  %v14937_v60 = vrot.slane %v14918_v33, %v15703_v53  ;;  %v13209_v5 = vld [vmem:[#allocation9 + $0xc0] sm:$0xff]  }
 0x45a   :  { %11306 = vmatprep.subr.bf16.mxu1 %v13182_v2 }
 0x45c   :  { %8152 = vmatpush1.bf16.msra.mxu0 %v13170_v52 }
 0x45d   :  { %8153 = vmatprep.subr.bf16.mxu0 %v13176_v43  ;;  %11307 = vmatpush3.bf16.msra.mxu1 %v13182_v2 }
 0x45e   :  { %8085 = vmatmul.mubr.bf16.gmra.mrb[104].mxu0 %v14732_v9  ;;  %8501 = vmatmul.mubr.bf16.gmra.mrb[248].mxu1 %v14732_v9  ;;  %v15704_v9 = vsub.s32 3, %v15700_v62 }
 0x45f   :  { %8094 = vmatprep.mubr.bf16.mxu0 %v14756_v14  ;;  %8508 = vmatprep.mubr.bf16.mxu1 %v14756_v14 }
 0x460   :  { %v14942_v23 = vrot.slane %v14918_v33, %v15704_v9  ;;  %8154 = vmatpush1.bf16.msra.mxu0 %v13174_v22  ;;  %11308 = vmatprep.subr.bf16.mxu1 %v13186_v63  ;;  %v13188_v22 = vld [vmem:[#allocation6 + $0xc18] ss:$28 sps:$4 sm:$0xff]  }
 0x461   :  { %v7275_v12 = vpop.f32.mrb[64].mxu0  ;;  %v7727_v30 = vpop.f32.mrb[144].mxu1  ;;  %8155 = vmatprep.subr.bf16.mxu0 %v13180_v28  ;;  %11309 = vmatpush3.bf16.msra.mxu1 %v13186_v63 }
 0x462   :  { %v11460_v14 = vadd.f32 %v7275_v12, %v14925_v58  ;;  %v11492_v17 = vadd.f32 %v7727_v30, %v14930_v19  ;;  %v7277_v56 = vpop.f32.mrb[65].mxu0  ;;  %v7729_v6 = vpop.f32.mrb[145].mxu1  ;;  %11310 = vmatprep.subr.bf16.mxu1 %v13187_v8 }
 0x463   :  { %v11461_v39 = vadd.f32 %v7277_v56, %v14937_v60  ;;  %v11493_v18 = vadd.f32 %v7729_v6, %v14942_v23  ;;  %v7279_v21 = vpop.f32.mrb[66].mxu0  ;;  %v7731_v29 = vpop.f32.mrb[146].mxu1 }
 0x464   :  { %v11462_v31 = vadd.f32 %v7279_v21, %v14925_v58  ;;  %v11494_v13 = vadd.f32 %v7731_v29, %v14930_v19  ;;  %v7281_v16 = vpop.f32.mrb[67].mxu0  ;;  %v7733_v55 = vpop.f32.mrb[147].mxu1  ;;  %8156 = vmatpush1.bf16.msra.mxu0 %v13178_v1  ;;  %v8646_v51 = vmax.f32 %v11460_v14, 0.0  ;;  %v8648_v59 = vmax.f32 %v11492_v17, 0.0 }
 0x465   :  { %v11463_v37 = vadd.f32 %v7281_v16, %v14937_v60  ;;  %v11495_v20 = vadd.f32 %v7733_v55, %v14942_v23  ;;  %8157 = vmatprep.subr.bf16.mxu0 %v13185_v25  ;;  %11311 = vmatpush3.bf16.msra.mxu1 %v13187_v8  ;;  %v8647_v10 = vmax.f32 %v11461_v39, 0.0  ;;  %v8649_v47 = vmax.f32 %v11493_v18, 0.0  ;;  %v13193_v39 = vld [vmem:[#allocation9 + $0x40] sm:$0xff]  }
 0x466   :  { %v8653_v0 = vmax.f32 %v11462_v31, 0.0  ;;  %v8655_v4 = vmax.f32 %v11494_v13, 0.0  ;;  %8095 = vmatmul.mubr.bf16.gmra.mrb[108].mxu0 %v14752_v38  ;;  %8509 = vmatmul.mubr.bf16.gmra.mrb[252].mxu1 %v14752_v38 }
 0x467   :  { %v8654_v11 = vmax.f32 %v11463_v37, 0.0  ;;  %v8656_v2 = vmax.f32 %v11495_v20, 0.0  ;;  %8104 = vmatprep.mubr.bf16.mxu0 %v14770_v35  ;;  %8516 = vmatprep.mubr.bf16.mxu1 %v14770_v35 }
 0x468   :  { %v14956_v52 = vpack.c.bf16 %v8653_v0, %v8646_v51  ;;  %v14958_v43 = vpack.c.bf16 %v8655_v4, %v8648_v59  ;;  %8158 = vmatpush1.bf16.msra.mxu0 %v13183_v40  ;;  %11312 = vmatprep.subr.bf16.mxu1 %v13191_v45 }
 0x469   :  { %v14960_v63 = vpack.c.bf16 %v8654_v11, %v8647_v10  ;;  %v14962_v28 = vpack.c.bf16 %v8656_v2, %v8649_v47  ;;  %v7285_v38 = vpop.f32.mrb[68].mxu0  ;;  %v7737_v27 = vpop.f32.mrb[148].mxu1  ;;  %8159 = vmatprep.subr.bf16.mxu0 %v13190_v24  ;;  %11313 = vmatpush3.bf16.msra.mxu1 %v13191_v45 }
 0x46a   :  { %v11464_v8 = vadd.f32 %v7285_v38, %v14925_v58  ;;  %v11496_v35 = vadd.f32 %v7737_v27, %v14930_v19  ;;  %v7287_v53 = vpop.f32.mrb[69].mxu0  ;;  %v7739_v9 = vpop.f32.mrb[149].mxu1  ;;  %11314 = vmatprep.subr.bf16.mxu1 %v13192_v54 }
 0x46b   :  { %v11465_v1 = vadd.f32 %v7287_v53, %v14937_v60  ;;  %v11497_v12 = vadd.f32 %v7739_v9, %v14942_v23  ;;  %v7289_v30 = vpop.f32.mrb[70].mxu0  ;;  %v7741_v25 = vpop.f32.mrb[150].mxu1 }
 0x46c   :  { %v11466_v14 = vadd.f32 %v7289_v30, %v14925_v58  ;;  %v11498_v17 = vadd.f32 %v7741_v25, %v14930_v19  ;;  %v7291_v56 = vpop.f32.mrb[71].mxu0  ;;  %v7743_v6 = vpop.f32.mrb[151].mxu1  ;;  %8160 = vmatpush1.bf16.msra.mxu0 %v13188_v22  ;;  %v8660_v29 = vmax.f32 %v11464_v8, 0.0  ;;  %v8662_v31 = vmax.f32 %v11496_v35, 0.0 }
 0x46d   :  { %v11467_v18 = vadd.f32 %v7291_v56, %v14937_v60  ;;  %v11499_v21 = vadd.f32 %v7743_v6, %v14942_v23  ;;  %11315 = vmatpush3.bf16.msra.mxu1 %v13192_v54  ;;  %11138 = vmatprep.subr.bf16.mxu0 %v13209_v5  ;;  %v8661_v55 = vmax.f32 %v11465_v1, 0.0  ;;  %v8663_v40 = vmax.f32 %v11497_v12, 0.0 }
 0x46e   :  { %v8667_v13 = vmax.f32 %v11466_v14, 0.0  ;;  %v8669_v16 = vmax.f32 %v11498_v17, 0.0  ;;  %8105 = vmatmul.mubr.bf16.gmra.mrb[112].mxu0 %v14768_v50  ;;  %8517 = vmatmul.mubr.bf16.gmra.mrb[0].mxu1 %v14768_v50 }
 0x46f   :  { %v8668_v45 = vmax.f32 %v11467_v18, 0.0  ;;  %v8670_v37 = vmax.f32 %v11499_v21, 0.0  ;;  %8114 = vmatprep.mubr.bf16.mxu0 %v14782_v61  ;;  %8524 = vmatprep.mubr.bf16.mxu1 %v14782_v61 }
 0x470   :  { %v14976_v20 = vpack.c.bf16 %v8667_v13, %v8660_v29  ;;  %v14978_v24 = vpack.c.bf16 %v8669_v16, %v8662_v31  ;;  %11074 = vmatprep.subr.bf16.mxu1 %v13193_v39 }
 0x471   :  { %v14980_v51 = vpack.c.bf16 %v8668_v45, %v8661_v55  ;;  %v14982_v59 = vpack.c.bf16 %v8670_v37, %v8663_v40  ;;  %v7295_v0 = vpop.f32.mrb[72].mxu0  ;;  %v7747_v4 = vpop.f32.mrb[152].mxu1 }
 0x472   :  { %v11468_v50 = vadd.f32 %v7295_v0, %v14925_v58  ;;  %v11500_v54 = vadd.f32 %v7747_v4, %v14930_v19  ;;  %v7297_v10 = vpop.f32.mrb[73].mxu0  ;;  %v7749_v47 = vpop.f32.mrb[153].mxu1 }
 0x473   :  { %v11469_v11 = vadd.f32 %v7297_v10, %v14937_v60  ;;  %v11501_v61 = vadd.f32 %v7749_v47, %v14942_v23  ;;  %v7299_v2 = vpop.f32.mrb[74].mxu0  ;;  %v7751_v22 = vpop.f32.mrb[154].mxu1 }
 0x474   :  { %v11470_v38 = vadd.f32 %v7299_v2, %v14925_v58  ;;  %v11502_v27 = vadd.f32 %v7751_v22, %v14930_v19  ;;  %v7301_v5 = vpop.f32.mrb[75].mxu0  ;;  %v7753_v8 = vpop.f32.mrb[155].mxu1  ;;  %v8674_v9 = vmax.f32 %v11468_v50, 0.0  ;;  %v8676_v1 = vmax.f32 %v11500_v54, 0.0 }
 0x475   :  { %v11471_v35 = vadd.f32 %v7301_v5, %v14937_v60  ;;  %v11503_v53 = vadd.f32 %v7753_v8, %v14942_v23  ;;  %v8675_v25 = vmax.f32 %v11469_v11, 0.0  ;;  %v8677_v14 = vmax.f32 %v11501_v61, 0.0 }
 0x476   :  { %v8681_v12 = vmax.f32 %v11470_v38, 0.0  ;;  %v8683_v30 = vmax.f32 %v11502_v27, 0.0  ;;  %8115 = vmatmul.mubr.bf16.gmra.mrb[116].mxu0 %v14780_v46  ;;  %8525 = vmatmul.mubr.bf16.gmra.mrb[4].mxu1 %v14780_v46 }
 0x477   :  { %v8682_v17 = vmax.f32 %v11471_v35, 0.0  ;;  %v8684_v56 = vmax.f32 %v11503_v53, 0.0  ;;  %8124 = vmatprep.mubr.bf16.mxu0 %v14794_v32  ;;  %8532 = vmatprep.mubr.bf16.mxu1 %v14794_v32 }
 0x478   :  { %v14996_v6 = vpack.c.bf16 %v8681_v12, %v8674_v9  ;;  %v14998_v39 = vpack.c.bf16 %v8683_v30, %v8676_v1 }
 0x479   :  { %v15000_v18 = vpack.c.bf16 %v8682_v17, %v8675_v25  ;;  %v15002_v21 = vpack.c.bf16 %v8684_v56, %v8677_v14  ;;  %v7305_v29 = vpop.f32.mrb[76].mxu0  ;;  %v7757_v31 = vpop.f32.mrb[156].mxu1 }
 0x47a   :  { %v11472_v46 = vadd.f32 %v7305_v29, %v14925_v58  ;;  %v11504_v13 = vadd.f32 %v7757_v31, %v14930_v19  ;;  %v7307_v16 = vpop.f32.mrb[77].mxu0  ;;  %v7759_v55 = vpop.f32.mrb[157].mxu1 }
 0x47b   :  { %v11473_v40 = vadd.f32 %v7307_v16, %v14937_v60  ;;  %v11505_v32 = vadd.f32 %v7759_v55, %v14942_v23  ;;  %v7309_v45 = vpop.f32.mrb[78].mxu0  ;;  %v7761_v37 = vpop.f32.mrb[158].mxu1 }
 0x47c   :  { %v11474_v0 = vadd.f32 %v7309_v45, %v14925_v58  ;;  %v11506_v4 = vadd.f32 %v7761_v37, %v14930_v19  ;;  %v7311_v50 = vpop.f32.mrb[79].mxu0  ;;  %v7763_v54 = vpop.f32.mrb[159].mxu1  ;;  %v8688_v11 = vmax.f32 %v11472_v46, 0.0  ;;  %v8690_v61 = vmax.f32 %v11504_v13, 0.0 }
 0x47d   :  { %v11475_v10 = vadd.f32 %v7311_v50, %v14937_v60  ;;  %v11507_v47 = vadd.f32 %v7763_v54, %v14942_v23  ;;  %v8689_v38 = vmax.f32 %v11473_v40, 0.0  ;;  %v8691_v27 = vmax.f32 %v11505_v32, 0.0 }
 0x47e   :  { %v8695_v2 = vmax.f32 %v11474_v0, 0.0  ;;  %v8697_v22 = vmax.f32 %v11506_v4, 0.0  ;;  %8125 = vmatmul.mubr.bf16.gmra.mrb[120].mxu0 %v14792_v42  ;;  %8533 = vmatmul.mubr.bf16.gmra.mrb[8].mxu1 %v14792_v42 }
 0x47f   :  { %v8696_v5 = vmax.f32 %v11475_v10, 0.0  ;;  %v8698_v8 = vmax.f32 %v11507_v47, 0.0  ;;  %8134 = vmatprep.mubr.bf16.mxu0 %v14806_v15  ;;  %8540 = vmatprep.mubr.bf16.mxu1 %v14806_v15 }
 0x480   :  { %v15016_v35 = vpack.c.bf16 %v8695_v2, %v8688_v11  ;;  %v15018_v53 = vpack.c.bf16 %v8697_v22, %v8690_v61 }
 0x481   :  { %v15020_v9 = vpack.c.bf16 %v8696_v5, %v8689_v38  ;;  %v15022_v1 = vpack.c.bf16 %v8698_v8, %v8691_v27  ;;  %v7315_v12 = vpop.f32.mrb[80].mxu0  ;;  %v7767_v30 = vpop.f32.mrb[160].mxu1 }
 0x482   :  { %v11476_v42 = vadd.f32 %v7315_v12, %v14925_v58  ;;  %v11508_v25 = vadd.f32 %v7767_v30, %v14930_v19  ;;  %v7317_v14 = vpop.f32.mrb[81].mxu0  ;;  %v7769_v17 = vpop.f32.mrb[161].mxu1 }
 0x483   :  { %v11477_v56 = vadd.f32 %v7317_v14, %v14937_v60  ;;  %v11509_v15 = vadd.f32 %v7769_v17, %v14942_v23  ;;  %v7319_v29 = vpop.f32.mrb[82].mxu0  ;;  %v7771_v31 = vpop.f32.mrb[162].mxu1  ;;  %v13194_v17 = vld [vmem:[#allocation9] sm:$0xff]  }
 0x484   :  { %v11478_v46 = vadd.f32 %v7319_v29, %v14925_v58  ;;  %v11510_v13 = vadd.f32 %v7771_v31, %v14930_v19  ;;  %v7321_v16 = vpop.f32.mrb[83].mxu0  ;;  %v7773_v55 = vpop.f32.mrb[163].mxu1  ;;  %v8702_v45 = vmax.f32 %v11476_v42, 0.0  ;;  %v8704_v37 = vmax.f32 %v11508_v25, 0.0 }
 0x485   :  { %v11479_v40 = vadd.f32 %v7321_v16, %v14937_v60  ;;  %v11511_v32 = vadd.f32 %v7773_v55, %v14942_v23  ;;  %v8703_v50 = vmax.f32 %v11477_v56, 0.0  ;;  %v8705_v54 = vmax.f32 %v11509_v15, 0.0  ;;  %v13210_v55 = vld [vmem:[#allocation9 + $0x80] sm:$0xff]  }
 0x486   :  { %v8709_v0 = vmax.f32 %v11478_v46, 0.0  ;;  %v8711_v4 = vmax.f32 %v11510_v13, 0.0  ;;  %8135 = vmatmul.mubr.bf16.gmra.mrb[124].mxu0 %v14804_v34  ;;  %8541 = vmatmul.mubr.bf16.gmra.mrb[12].mxu1 %v14804_v34  ;;  %v13195_v46 = vld [vmem:[#allocation9 + $0x48] sm:$0xff]  }
 0x487   :  { %v8710_v10 = vmax.f32 %v11479_v40, 0.0  ;;  %v8712_v47 = vmax.f32 %v11511_v32, 0.0  ;;  %11316 = vmatprep.mubr.bf16.mxu1 %v14698_v7  ;;  %8177 = vmatprep.mubr.bf16.mxu0 %v15668_v48 }
 0x488   :  { %v15036_v11 = vpack.c.bf16 %v8709_v0, %v8702_v45  ;;  %v15038_v61 = vpack.c.bf16 %v8711_v4, %v8704_v37  ;;  %v13211_v0 = vld [vmem:[#allocation9 + $0xc8] sm:$0xff]  }
 0x489   :  { %v15040_v2 = vpack.c.bf16 %v8710_v10, %v8703_v50  ;;  %v15042_v22 = vpack.c.bf16 %v8712_v47, %v8705_v54  ;;  %v7325_v38 = vpop.f32.mrb[84].mxu0  ;;  %v7777_v27 = vpop.f32.mrb[164].mxu1  ;;  %v13196_v47 = vld [vmem:[#allocation9 + $0x8] sm:$0xff]  }
 0x48a   :  { %v11480_v34 = vadd.f32 %v7325_v38, %v14925_v58  ;;  %v11512_v5 = vadd.f32 %v7777_v27, %v14930_v19  ;;  %v7327_v8 = vpop.f32.mrb[85].mxu0  ;;  %v7779_v12 = vpop.f32.mrb[165].mxu1 }
 0x48b   :  { %v11481_v30 = vadd.f32 %v7327_v8, %v14937_v60  ;;  %v11513_v42 = vadd.f32 %v7779_v12, %v14942_v23  ;;  %v7329_v25 = vpop.f32.mrb[86].mxu0  ;;  %v7781_v14 = vpop.f32.mrb[166].mxu1 }
 0x48c   :  { %v11482_v56 = vadd.f32 %v7329_v25, %v14925_v58  ;;  %v11514_v15 = vadd.f32 %v7781_v14, %v14930_v19  ;;  %v7331_v29 = vpop.f32.mrb[87].mxu0  ;;  %v7783_v31 = vpop.f32.mrb[167].mxu1  ;;  %v8716_v40 = vmax.f32 %v11480_v34, 0.0  ;;  %v8718_v32 = vmax.f32 %v11512_v5, 0.0  ;;  %v13197_v34 = vld [vmem:[#allocation9 + $0x50] sm:$0xff]  }
 0x48d   :  { %v11483_v13 = vadd.f32 %v7331_v29, %v14937_v60  ;;  %v11515_v16 = vadd.f32 %v7783_v31, %v14942_v23  ;;  %v8717_v4 = vmax.f32 %v11481_v30, 0.0  ;;  %v8719_v50 = vmax.f32 %v11513_v42, 0.0  ;;  %v13212_v30 = vld [vmem:[#allocation9 + $0x88] sm:$0xff]  }
 0x48e   :  { %v8723_v45 = vmax.f32 %v11482_v56, 0.0  ;;  %v8725_v37 = vmax.f32 %v11514_v15, 0.0  ;;  %8178 = vmatmul.mubr.bf16.vlgmr.msra.gmra.mrb[96].mxu0 %v14698_v7  ;;  %11317 = vmatmul.mubr.bf16.vlgmr.msra.gmra.mrb[16].mxu1 %v14694_v49 }
 0x48f   :  { %v8724_v54 = vmax.f32 %v11483_v13, 0.0  ;;  %v8726_v10 = vmax.f32 %v11515_v16, 0.0  ;;  %11320 = vmatprep.mubr.bf16.mxu1 %v14718_v26  ;;  %11075 = vmatpush3.bf16.msra.mxu1 %v13194_v17 }
 0x490   :  { %v15055_v38 = vpack.c.bf16 %v8723_v45, %v8716_v40  ;;  %v15057_v27 = vpack.c.bf16 %v8725_v37, %v8718_v32  ;;  %11076 = vmatprep.subr.bf16.mxu1 %v13195_v46  ;;  %8187 = vmatprep.mubr.bf16.mxu0 %v15668_v48  ;;  %v13198_v46 = vld [vmem:[#allocation9 + $0x10] sm:$0xff]   ;;  %v13199_v32 = vld [vmem:[#allocation9 + $0x58] sm:$0xff]  }
 0x491   :  { %v15060_v7 = vpack.c.bf16 %v8724_v54, %v8717_v4  ;;  %v15062_v5 = vpack.c.bf16 %v8726_v10, %v8719_v50  ;;  %v7335_v8 = vpop.f32.mrb[88].mxu0  ;;  %v7787_v12 = vpop.f32.mrb[168].mxu1  ;;  %11139 = vmatpush3.bf16.msra.mxu0 %v13210_v55 }
 0x492   :  { %v11484_v42 = vadd.f32 %v7335_v8, %v14925_v58  ;;  %v11516_v25 = vadd.f32 %v7787_v12, %v14930_v19  ;;  %v7337_v14 = vpop.f32.mrb[89].mxu0  ;;  %v7789_v17 = vpop.f32.mrb[169].mxu1  ;;  %11140 = vmatprep.subr.bf16.mxu0 %v13211_v0  ;;  %v13213_v0 = vld [vmem:[#allocation9 + $0xd0] sm:$0xff]  }
 0x493   :  { %v11485_v56 = vadd.f32 %v7337_v14, %v14937_v60  ;;  %v11517_v15 = vadd.f32 %v7789_v17, %v14942_v23  ;;  %v7339_v29 = vpop.f32.mrb[90].mxu0  ;;  %v7791_v31 = vpop.f32.mrb[170].mxu1  ;;  %11077 = vmatpush3.bf16.msra.mxu1 %v13196_v47  ;;  %v13214_v47 = vld [vmem:[#allocation9 + $0x90] sm:$0xff]   ;;  %v13200_v17 = vld [vmem:[#allocation9 + $0x18] sm:$0xff]  }
 0x494   :  { %v11486_v13 = vadd.f32 %v7339_v29, %v14925_v58  ;;  %v11518_v16 = vadd.f32 %v7791_v31, %v14930_v19  ;;  %v7341_v55 = vpop.f32.mrb[91].mxu0  ;;  %v7793_v40 = vpop.f32.mrb[171].mxu1  ;;  %11078 = vmatprep.subr.bf16.mxu1 %v13197_v34  ;;  %v8730_v4 = vmax.f32 %v11484_v42, 0.0  ;;  %v8732_v50 = vmax.f32 %v11516_v25, 0.0  ;;  %v13215_v29 = vld [vmem:[#allocation9 + $0xd8] sm:$0xff]  }
 0x495   :  { %v11487_v45 = vadd.f32 %v7341_v55, %v14937_v60  ;;  %v11519_v37 = vadd.f32 %v7793_v40, %v14942_v23  ;;  %11141 = vmatpush3.bf16.msra.mxu0 %v13212_v30  ;;  %v8731_v8 = vmax.f32 %v11485_v56, 0.0  ;;  %v8733_v12 = vmax.f32 %v11517_v15, 0.0 }
 0x496   :  { %v8737_v54 = vmax.f32 %v11486_v13, 0.0  ;;  %v8739_v10 = vmax.f32 %v11518_v16, 0.0  ;;  %8188 = vmatmul.mubr.bf16.gmra.mrb[100].mxu0 %v14694_v49  ;;  %11321 = vmatmul.mubr.bf16.gmra.mrb[20].mxu1 %v14714_v57  ;;  %v13201_v49 = vld [vmem:[#allocation9 + $0x60] sm:$0xff]  }
 0x497   :  { %v8738_v14 = vmax.f32 %v11487_v45, 0.0  ;;  %v8740_v34 = vmax.f32 %v11519_v37, 0.0  ;;  %11324 = vmatprep.mubr.bf16.mxu1 %v14738_v41  ;;  %11079 = vmatpush3.bf16.msra.mxu1 %v13198_v46 }
 0x498   :  { %v15075_v30 = vpack.c.bf16 %v8737_v54, %v8730_v4  ;;  %v15077_v42 = vpack.c.bf16 %v8739_v10, %v8732_v50  ;;  %11080 = vmatprep.subr.bf16.mxu1 %v13199_v32  ;;  %8197 = vmatprep.mubr.bf16.mxu0 %v15668_v48  ;;  %v13202_v4 = vld [vmem:[#allocation9 + $0x20] sm:$0xff]  }
 0x499   :  { %v15080_v25 = vpack.c.bf16 %v8738_v14, %v8731_v8  ;;  %v15082_v31 = vpack.c.bf16 %v8740_v34, %v8733_v12  ;;  %v7345_v56 = vpop.f32.mrb[92].mxu0  ;;  %v7797_v15 = vpop.f32.mrb[172].mxu1  ;;  %11142 = vmatprep.subr.bf16.mxu0 %v13213_v0  ;;  %v13203_v8 = vld [vmem:[#allocation9 + $0x68] sm:$0xff]   ;;  %v13216_v14 = vld [vmem:[#allocation9 + $0x98] sm:$0xff]  }
 0x49a   :  { %v11488_v13 = vadd.f32 %v7345_v56, %v14925_v58  ;;  %v11520_v46 = vadd.f32 %v7797_v15, %v14930_v19  ;;  %v7347_v16 = vpop.f32.mrb[93].mxu0  ;;  %v7799_v55 = vpop.f32.mrb[173].mxu1  ;;  %11143 = vmatpush3.bf16.msra.mxu0 %v13214_v47 }
 0x49b   :  { %v11489_v40 = vadd.f32 %v7347_v16, %v14937_v60  ;;  %v11521_v32 = vadd.f32 %v7799_v55, %v14942_v23  ;;  %v7349_v45 = vpop.f32.mrb[94].mxu0  ;;  %v7801_v37 = vpop.f32.mrb[174].mxu1  ;;  %11081 = vmatpush3.bf16.msra.mxu1 %v13200_v17  ;;  %11144 = vmatprep.subr.bf16.mxu0 %v13215_v29 }
 0x49c   :  { %v11490_v50 = vadd.f32 %v7349_v45, %v14925_v58  ;;  %v11522_v0 = vadd.f32 %v7801_v37, %v14930_v19  ;;  %v7351_v54 = vpop.f32.mrb[95].mxu0  ;;  %v7803_v10 = vpop.f32.mrb[175].mxu1  ;;  %11082 = vmatprep.subr.bf16.mxu1 %v13201_v49  ;;  %v8744_v34 = vmax.f32 %v11488_v13, 0.0  ;;  %v8746_v56 = vmax.f32 %v11520_v46, 0.0  ;;  %v13217_v58 = vld [vmem:[#allocation9 + $0xe0] sm:$0xff]   ;;  %v13205_v13 = vld [vmem:[#allocation9 + $0x70] sm:$0xff]  }
 0x49d   :  { %v11491_v12 = vadd.f32 %v7351_v54, %v14937_v60  ;;  %v11523_v47 = vadd.f32 %v7803_v10, %v14942_v23  ;;  %v8745_v17 = vmax.f32 %v11489_v40, 0.0  ;;  %v8747_v19 = vmax.f32 %v11521_v32, 0.0  ;;  %v13204_v60 = vld [vmem:[#allocation9 + $0x28] sm:$0xff]   ;;  %v13218_v32 = vld [vmem:[#allocation9 + $0xa0] sm:$0xff]   ;;  %v13207_v54 = vld [vmem:[#allocation9 + $0x78] sm:$0xff]  }
 0x49e   :  { %v8751_v15 = vmax.f32 %v11490_v50, 0.0  ;;  %v8753_v16 = vmax.f32 %v11522_v0, 0.0  ;;  %8198 = vmatmul.mubr.bf16.gmra.mrb[104].mxu0 %v14718_v26  ;;  %11325 = vmatmul.mubr.bf16.gmra.mrb[24].mxu1 %v14734_v44  ;;  %v13206_v50 = vld [vmem:[#allocation9 + $0x30] sm:$0xff]  }
 0x49f   :  { %v8752_v29 = vmax.f32 %v11491_v12, 0.0  ;;  %v8754_v55 = vmax.f32 %v11523_v47, 0.0  ;;  %11328 = vmatprep.mubr.bf16.mxu1 %v14758_v36  ;;  %11083 = vmatpush3.bf16.msra.mxu1 %v13202_v4  ;;  %v13220_v12 = vld [vmem:[#allocation9 + $0xa8] sm:$0xff]   ;;  %v13208_v47 = vld [vmem:[#allocation9 + $0x38] sm:$0xff]  }
 0x4a0   :  { %v15095_v49 = vpack.c.bf16 %v8751_v15, %v8744_v34  ;;  %v15097_v23 = vpack.c.bf16 %v8753_v16, %v8746_v56  ;;  %11084 = vmatprep.subr.bf16.mxu1 %v13203_v8  ;;  %8207 = vmatprep.mubr.bf16.mxu0 %v15668_v48  ;;  %v13219_v8 = vld [vmem:[#allocation9 + $0xe8] sm:$0xff]  }
 0x4a1   :  { %v15100_v26 = vpack.c.bf16 %v8752_v29, %v8745_v17  ;;  %v15102_v46 = vpack.c.bf16 %v8754_v55, %v8747_v19  ;;  %v10882_v40 = vpop.f32.mrb[176].mxu1  ;;  %11145 = vmatpush3.bf16.msra.mxu0 %v13216_v14  ;;  %v13221_v14 = vld [vmem:[#allocation9 + $0xf0] sm:$0xff]   ;;  %v13223_v19 = vld [vmem:[#allocation9 + $0xf8] sm:$0xff]   ;;  %v13226_v29 = vld [vmem:[#allocation9 + $0x100] sm:$0xff]  }
 0x4a2   :  { %v10883_v45 = vpop.f32.mrb[177].mxu1  ;;  %11146 = vmatprep.subr.bf16.mxu0 %v13217_v58  ;;  %v13222_v58 = vld [vmem:[#allocation9 + $0xb0] sm:$0xff]   ;;  %v13224_v55 = vld [vmem:[#allocation9 + $0xb8] sm:$0xff]  }
 0x4a3   :  { %v15104_v37 = vadd.f32 %v10883_v45, %v10882_v40  ;;  %v10885_v4 = vpop.f32.mrb[178].mxu1  ;;  %11085 = vmatpush3.bf16.msra.mxu1 %v13204_v60 }
 0x4a4   :  { %v10886_v0 = vpop.f32.mrb[179].mxu1  ;;  %11086 = vmatprep.subr.bf16.mxu1 %v13205_v13 }
 0x4a5   :  { %v15106_v10 = vadd.f32 %v10886_v0, %v10885_v4  ;;  %11147 = vmatpush3.bf16.msra.mxu0 %v13218_v32 }
 0x4a6   :  { %8208 = vmatmul.mubr.bf16.gmra.mrb[108].mxu0 %v14714_v57  ;;  %11329 = vmatmul.mubr.bf16.gmra.mrb[28].mxu1 %v14754_v3 }
 0x4a7   :  { %11087 = vmatpush3.bf16.msra.mxu1 %v13206_v50  ;;  %9301 = vmatprep.mubr.bf16.mxu1 %v14960_v63  ;;  %v13225_v63 = vld [vmem:[#allocation9 + $0x140] sm:$0xff]  }
 0x4a8   :  { %11088 = vmatprep.subr.bf16.mxu1 %v13207_v54  ;;  %8217 = vmatprep.mubr.bf16.mxu0 %v15668_v48 }
 0x4a9   :  { %v10888_v34 = vpop.f32.mrb[180].mxu1  ;;  %11148 = vmatprep.subr.bf16.mxu0 %v13219_v8 }
 0x4aa   :  { %v10889_v56 = vpop.f32.mrb[181].mxu1  ;;  %11149 = vmatpush3.bf16.msra.mxu0 %v13220_v12 }
 0x4ab   :  { %v15112_v15 = vadd.f32 %v10889_v56, %v10888_v34  ;;  %v10891_v16 = vpop.f32.mrb[182].mxu1  ;;  %11089 = vmatpush3.bf16.msra.mxu1 %v13208_v47  ;;  %11150 = vmatprep.subr.bf16.mxu0 %v13221_v14  ;;  %v13229_v47 = vld [vmem:[#allocation9 + $0x150] sm:$0xff]  }
 0x4ac   :  { %v10892_v57 = vpop.f32.mrb[183].mxu1  ;;  %11202 = vmatprep.subr.bf16.mxu1 %v13225_v63  ;;  %v13230_v14 = vld [vmem:[#allocation9 + $0x110] sm:$0xff]  }
 0x4ad   :  { %v15114_v17 = vadd.f32 %v10892_v57, %v10891_v16  ;;  %v13231_v57 = vld [vmem:[#allocation9 + $0x158] sm:$0xff]  }
 0x4ae   :  { %8218 = vmatmul.mubr.bf16.gmra.mrb[112].mxu0 %v14738_v41  ;;  %9302 = vmatmul.mubr.bf16.vlgmr.msra.gmra.mrb[32].mxu1 %v14956_v52  ;;  %v13227_v41 = vld [vmem:[#allocation9 + $0x148] sm:$0xff]  }
 0x4af   :  { %9309 = vmatprep.mubr.bf16.mxu1 %v14980_v51  ;;  %8227 = vmatprep.mubr.bf16.mxu0 %v15668_v48  ;;  %v13228_v52 = vld [vmem:[#allocation9 + $0x108] sm:$0xff]  }
 0x4b0   :  { %11151 = vmatpush3.bf16.msra.mxu0 %v13222_v58  ;;  %11203 = vmatpush3.bf16.msra.mxu1 %v13226_v29  ;;  %v13232_v58 = vld [vmem:[#allocation9 + $0x118] sm:$0xff]  }
 0x4b1   :  { %v10894_v60 = vpop.f32.mrb[184].mxu1  ;;  %11152 = vmatprep.subr.bf16.mxu0 %v13223_v19  ;;  %11204 = vmatprep.subr.bf16.mxu1 %v13227_v41  ;;  %v13233_v19 = vld [vmem:[#allocation9 + $0x180] sm:$0xff]  }
 0x4b2   :  { %v10895_v13 = vpop.f32.mrb[185].mxu1 }
 0x4b3   :  { %v15120_v40 = vadd.f32 %v10895_v13, %v10894_v60  ;;  %v10897_v32 = vpop.f32.mrb[186].mxu1  ;;  %v13236_v60 = vld [vmem:[#allocation9 + $0x188] sm:$0xff]  }
 0x4b4   :  { %v10898_v45 = vpop.f32.mrb[187].mxu1  ;;  %11153 = vmatpush3.bf16.msra.mxu0 %v13224_v55  ;;  %11205 = vmatpush3.bf16.msra.mxu1 %v13228_v52  ;;  %v13234_v55 = vld [vmem:[#allocation9 + $0x160] sm:$0xff]  }
 0x4b5   :  { %v15122_v4 = vadd.f32 %v10898_v45, %v10897_v32  ;;  %11206 = vmatprep.subr.bf16.mxu1 %v13229_v47  ;;  %11332 = vmatprep.subr.bf16.mxu0 %v13233_v19  ;;  %v13238_v32 = vld [vmem:[#allocation9 + $0x190] sm:$0xff]  }
 0x4b6   :  { %8228 = vmatmul.mubr.bf16.gmra.mrb[116].mxu0 %v14734_v44  ;;  %9310 = vmatmul.mubr.bf16.gmra.mrb[36].mxu1 %v14976_v20 }
 0x4b7   :  { %9317 = vmatprep.mubr.bf16.mxu1 %v15000_v18  ;;  %8237 = vmatprep.mubr.bf16.mxu0 %v15668_v48 }
 0x4b8   :  { %11207 = vmatpush3.bf16.msra.mxu1 %v13230_v14 }
 0x4b9   :  { %v10900_v51 = vpop.f32.mrb[188].mxu1  ;;  %11208 = vmatprep.subr.bf16.mxu1 %v13231_v57 }
 0x4ba   :  { %v10901_v50 = vpop.f32.mrb[189].mxu1 }
 0x4bb   :  { %v15128_v0 = vadd.f32 %v10901_v50, %v10900_v51  ;;  %v10903_v54 = vpop.f32.mrb[190].mxu1 }
 0x4bc   :  { %v10904_v8 = vpop.f32.mrb[191].mxu1  ;;  %11209 = vmatpush3.bf16.msra.mxu1 %v13232_v58 }
 0x4bd   :  { %v15130_v12 = vadd.f32 %v10904_v8, %v10903_v54  ;;  %11210 = vmatprep.subr.bf16.mxu1 %v13234_v55  ;;  %v13242_v54 = vld [vmem:[#allocation9 + $0x1a0] sm:$0xff]  }
 0x4be   :  { %8238 = vmatmul.mubr.bf16.gmra.mrb[120].mxu0 %v14758_v36  ;;  %9318 = vmatmul.mubr.bf16.gmra.mrb[40].mxu1 %v14996_v6 }
 0x4bf   :  { %9325 = vmatprep.mubr.bf16.mxu1 %v15020_v9  ;;  %8247 = vmatprep.mubr.bf16.mxu0 %v15668_v48 }
 0x4c1   :  { %v10906_v44 = vpop.f32.mrb[192].mxu1 }
 0x4c2   :  { %v10907_v20 = vpop.f32.mrb[193].mxu1 }
 0x4c3   :  { %v15136_v18 = vadd.f32 %v10907_v20, %v10906_v44  ;;  %v10909_v34 = vpop.f32.mrb[194].mxu1 }
 0x4c4   :  { %v10910_v56 = vpop.f32.mrb[195].mxu1 }
 0x4c5   :  { %v15138_v16 = vadd.f32 %v10910_v56, %v10909_v34  ;;  %v13246_v56 = vld [vmem:[#allocation9 + $0x1b0] sm:$0xff]  }
 0x4c6   :  { %8248 = vmatmul.mubr.bf16.gmra.mrb[124].mxu0 %v14754_v3  ;;  %9326 = vmatmul.mubr.bf16.gmra.mrb[44].mxu1 %v15016_v35  ;;  %v13235_v3 = vld [vmem:[#allocation9 + $0x120] sm:$0xff]  }
 0x4c7   :  { %9333 = vmatprep.mubr.bf16.mxu1 %v15040_v2  ;;  %9398 = vmatprep.mubr.bf16.mxu0 %v14962_v28 }
 0x4c8   :  { %11211 = vmatpush3.bf16.msra.mxu1 %v13235_v3 }
 0x4c9   :  { %v10912_v48 = vpop.f32.mrb[196].mxu1 }
 0x4ca   :  { %v10913_v36 = vpop.f32.mrb[197].mxu1 }
 0x4cb   :  { %v15144_v6 = vadd.f32 %v10913_v36, %v10912_v48  ;;  %v10915_v9 = vpop.f32.mrb[198].mxu1  ;;  %v13248_v48 = vld [vmem:[#allocation9 + $0x1b8] sm:$0xff]  }
 0x4cc   :  { %v10916_v63 = vpop.f32.mrb[199].mxu1  ;;  %v13247_v36 = vld [vmem:[#allocation9 + $0x138] sm:$0xff]  }
 0x4cd   :  { %v15146_v29 = vadd.f32 %v10916_v63, %v10915_v9 }
 0x4ce   :  { %9334 = vmatmul.mubr.bf16.gmra.mrb[48].mxu1 %v15036_v11  ;;  %9399 = vmatmul.mubr.bf16.vlgmr.msra.gmra.mrb[128].mxu0 %v14958_v43  ;;  %v13237_v11 = vld [vmem:[#allocation9 + $0x168] sm:$0xff]  }
 0x4cf   :  { %9341 = vmatprep.mubr.bf16.mxu1 %v15060_v7  ;;  %9406 = vmatprep.mubr.bf16.mxu0 %v14982_v59  ;;  %v13239_v43 = vld [vmem:[#allocation9 + $0x128] sm:$0xff]   ;;  %v13240_v7 = vld [vmem:[#allocation9 + $0x198] sm:$0xff]  }
 0x4d0   :  { %11333 = vmatpush3.bf16.msra.mxu0 %v13233_v19  ;;  %11212 = vmatprep.subr.bf16.mxu1 %v13237_v11 }
 0x4d1   :  { %v10918_v28 = vpop.f32.mrb[200].mxu1  ;;  %11334 = vmatprep.subr.bf16.mxu0 %v13236_v60  ;;  %11213 = vmatpush3.bf16.msra.mxu1 %v13239_v43 }
 0x4d2   :  { %v10919_v35 = vpop.f32.mrb[201].mxu1 }
 0x4d3   :  { %v15152_v2 = vadd.f32 %v10919_v35, %v10918_v28  ;;  %v10921_v13 = vpop.f32.mrb[202].mxu1 }
 0x4d4   :  { %v10922_v45 = vpop.f32.mrb[203].mxu1  ;;  %11335 = vmatpush3.bf16.msra.mxu0 %v13236_v60 }
 0x4d5   :  { %v15154_v41 = vadd.f32 %v10922_v45, %v10921_v13  ;;  %11336 = vmatprep.subr.bf16.mxu0 %v13238_v32 }
 0x4d6   :  { %9342 = vmatmul.mubr.bf16.gmra.mrb[52].mxu1 %v15055_v38  ;;  %9407 = vmatmul.mubr.bf16.gmra.mrb[132].mxu0 %v14978_v24  ;;  %v13241_v38 = vld [vmem:[#allocation9 + $0x170] sm:$0xff]  }
 0x4d7   :  { %9349 = vmatprep.mubr.bf16.mxu1 %v15080_v25  ;;  %9414 = vmatprep.mubr.bf16.mxu0 %v15002_v21  ;;  %v13243_v24 = vld [vmem:[#allocation9 + $0x130] sm:$0xff]   ;;  %v13244_v25 = vld [vmem:[#allocation9 + $0x1a8] sm:$0xff]   ;;  %v15705_v21 = vsub.s32 6, %v15700_v62 }
 0x4d8   :  { %11337 = vmatpush3.bf16.msra.mxu0 %v13238_v32  ;;  %11214 = vmatprep.subr.bf16.mxu1 %v13241_v38 }
 0x4d9   :  { %v10924_v59 = vpop.f32.mrb[204].mxu1  ;;  %11338 = vmatprep.subr.bf16.mxu0 %v13240_v7  ;;  %v15169_v14 = vrot.slane %v14918_v33, %v15705_v21  ;;  %11215 = vmatpush3.bf16.msra.mxu1 %v13243_v24 }
 0x4da   :  { %v10925_v52 = vpop.f32.mrb[205].mxu1 }
 0x4db   :  { %v15160_v51 = vadd.f32 %v10925_v52, %v10924_v59  ;;  %v10927_v50 = vpop.f32.mrb[206].mxu1  ;;  %v8296_v33 = vadd.f32 %v15106_v10, %v15169_v14  ;;  %v8301_v19 = vadd.f32 %v15112_v15, %v15169_v14  ;;  %v8309_v15 = vadd.f32 %v15120_v40, %v15169_v14 }
 0x4dc   :  { %v10928_v8 = vpop.f32.mrb[207].mxu1  ;;  %11339 = vmatpush3.bf16.msra.mxu0 %v13240_v7  ;;  %v8317_v40 = vadd.f32 %v15128_v0, %v15169_v14  ;;  %v8325_v0 = vadd.f32 %v15136_v18, %v15169_v14 }
 0x4dd   :  { %v15162_v47 = vadd.f32 %v10928_v8, %v10927_v50  ;;  %11340 = vmatprep.subr.bf16.mxu0 %v13242_v54 }
 0x4de   :  { %9350 = vmatmul.mubr.bf16.gmra.mrb[56].mxu1 %v15075_v30  ;;  %9415 = vmatmul.mubr.bf16.gmra.mrb[136].mxu0 %v14998_v39  ;;  %v8293_v30 = vadd.f32 %v15104_v37, %v15169_v14  ;;  %v13245_v37 = vld [vmem:[#allocation9 + $0x178] sm:$0xff]  }
 0x4df   :  { %9357 = vmatprep.mubr.bf16.mxu1 %v15100_v26  ;;  %9422 = vmatprep.mubr.bf16.mxu0 %v15022_v1 }
 0x4e0   :  { %11341 = vmatpush3.bf16.msra.mxu0 %v13242_v54  ;;  %11216 = vmatprep.subr.bf16.mxu1 %v13245_v37 }
 0x4e1   :  { %v10946_v44 = vpop.f32.mrb[208].mxu1  ;;  %11342 = vmatprep.subr.bf16.mxu0 %v13244_v25  ;;  %11217 = vmatpush3.bf16.msra.mxu1 %v13247_v36 }
 0x4e2   :  { %v10947_v20 = vpop.f32.mrb[209].mxu1 }
 0x4e3   :  { %v10948_v34 = vadd.f32 %v10947_v20, %v10946_v44  ;;  %v10949_v39 = vpop.f32.mrb[210].mxu1 }
 0x4e4   :  { %v10950_v57 = vpop.f32.mrb[211].mxu1  ;;  %11343 = vmatpush3.bf16.msra.mxu0 %v13244_v25 }
 0x4e5   :  { %v15177_v26 = vadd.f32 %v10948_v34, %v8293_v30  ;;  %v10951_v1 = vadd.f32 %v10950_v57, %v10949_v39  ;;  %11344 = vmatprep.subr.bf16.mxu0 %v13246_v56  ;;  %v8333_v34 = vadd.f32 %v15144_v6, %v15169_v14  ;;  %v8336_v57 = vadd.f32 %v15146_v29, %v15169_v14 }
 0x4e6   :  { %9358 = vmatmul.mubr.bf16.gmra.mrb[60].mxu1 %v15095_v49  ;;  %9423 = vmatmul.mubr.bf16.gmra.mrb[140].mxu0 %v15018_v53  ;;  %v8304_v53 = vadd.f32 %v15114_v17, %v15169_v14  ;;  %v8312_v17 = vadd.f32 %v15122_v4, %v15169_v14  ;;  %v8320_v4 = vadd.f32 %v15130_v12, %v15169_v14 }
 0x4e7   :  { %v15181_v58 = vadd.f32 %v10951_v1, %v8296_v33  ;;  %9430 = vmatprep.mubr.bf16.mxu0 %v15042_v22  ;;  %v8328_v12 = vadd.f32 %v15138_v16, %v15169_v14  ;;  %v8344_v6 = vadd.f32 %v15154_v41, %v15169_v14 }
 0x4e8   :  { %11345 = vmatpush3.bf16.msra.mxu0 %v13246_v56 }
 0x4e9   :  { %v10952_v9 = vpop.f32.mrb[212].mxu1  ;;  %11346 = vmatprep.subr.bf16.mxu0 %v13248_v48 }
 0x4ea   :  { %v10953_v10 = vpop.f32.mrb[213].mxu1 }
 0x4eb   :  { %v10954_v63 = vadd.f32 %v10953_v10, %v10952_v9  ;;  %v10955_v49 = vpop.f32.mrb[214].mxu1 }
 0x4ec   :  { %v10956_v55 = vpop.f32.mrb[215].mxu1  ;;  %11347 = vmatpush3.bf16.msra.mxu0 %v13248_v48  ;;  %v8341_v48 = vadd.f32 %v15152_v2, %v15169_v14  ;;  %v8352_v2 = vadd.f32 %v15162_v47, %v15169_v14 }
 0x4ed   :  { %v15188_v22 = vadd.f32 %v10954_v63, %v8301_v19  ;;  %v10957_v3 = vadd.f32 %v10956_v55, %v10955_v49 }
 0x4ee   :  { %9431 = vmatmul.mubr.bf16.gmra.mrb[144].mxu0 %v15038_v61 }
 0x4ef   :  { %v15191_v60 = vadd.f32 %v10957_v3, %v8304_v53  ;;  %9438 = vmatprep.mubr.bf16.mxu0 %v15062_v5  ;;  %v8349_v53 = vadd.f32 %v15160_v51, %v15169_v14 }
 0x4f1   :  { %v10958_v28 = vpop.f32.mrb[216].mxu1 }
 0x4f2   :  { %v10959_v35 = vpop.f32.mrb[217].mxu1 }
 0x4f3   :  { %v10960_v13 = vadd.f32 %v10959_v35, %v10958_v28  ;;  %v10961_v32 = vpop.f32.mrb[218].mxu1 }
 0x4f4   :  { %v10962_v45 = vpop.f32.mrb[219].mxu1 }
 0x4f5   :  { %v15198_v11 = vadd.f32 %v10960_v13, %v8309_v15  ;;  %v10963_v43 = vadd.f32 %v10962_v45, %v10961_v32 }
 0x4f6   :  { %9439 = vmatmul.mubr.bf16.gmra.mrb[148].mxu0 %v15057_v27 }
 0x4f7   :  { %v15201_v61 = vadd.f32 %v10963_v43, %v8312_v17  ;;  %9446 = vmatprep.mubr.bf16.mxu0 %v15082_v31 }
 0x4f9   :  { %v10964_v5 = vpop.f32.mrb[220].mxu1 }
 0x4fa   :  { %v10965_v7 = vpop.f32.mrb[221].mxu1 }
 0x4fb   :  { %v10966_v59 = vadd.f32 %v10965_v7, %v10964_v5  ;;  %v10967_v52 = vpop.f32.mrb[222].mxu1 }
 0x4fc   :  { %v10968_v50 = vpop.f32.mrb[223].mxu1 }
 0x4fd   :  { %v15208_v54 = vadd.f32 %v10966_v59, %v8317_v40  ;;  %v10969_v8 = vadd.f32 %v10968_v50, %v10967_v52 }
 0x4fe   :  { %9447 = vmatmul.mubr.bf16.gmra.mrb[152].mxu0 %v15077_v42 }
 0x4ff   :  { %v15211_v27 = vadd.f32 %v10969_v8, %v8320_v4  ;;  %9454 = vmatprep.mubr.bf16.mxu0 %v15102_v46 }
 0x501   :  { %v10970_v31 = vpop.f32.mrb[224].mxu1 }
 0x502   :  { %v10971_v38 = vpop.f32.mrb[225].mxu1 }
 0x503   :  { %v10972_v24 = vadd.f32 %v10971_v38, %v10970_v31  ;;  %v10973_v25 = vpop.f32.mrb[226].mxu1 }
 0x504   :  { %v10974_v21 = vpop.f32.mrb[227].mxu1 }
 0x505   :  { %v15218_v44 = vadd.f32 %v10972_v24, %v8325_v0  ;;  %v10975_v20 = vadd.f32 %v10974_v21, %v10973_v25 }
 0x506   :  { %9455 = vmatmul.mubr.bf16.gmra.mrb[156].mxu0 %v15097_v23 }
 0x507   :  { %v15221_v42 = vadd.f32 %v10975_v20, %v8328_v12 }
 0x509   :  { %v10976_v30 = vpop.f32.mrb[228].mxu1 }
 0x50a   :  { %v10977_v46 = vpop.f32.mrb[229].mxu1 }
 0x50b   :  { %v10978_v39 = vadd.f32 %v10977_v46, %v10976_v30  ;;  %v10979_v18 = vpop.f32.mrb[230].mxu1 }
 0x50c   :  { %v10980_v56 = vpop.f32.mrb[231].mxu1 }
 0x50d   :  { %v15227_v33 = vadd.f32 %v10978_v39, %v8333_v34  ;;  %v10981_v16 = vadd.f32 %v10980_v56, %v10979_v18 }
 0x50f   :  { %v15229_v1 = vadd.f32 %v10981_v16, %v8336_v57 }
 0x511   :  { %v10982_v37 = vpop.f32.mrb[232].mxu1 }
 0x512   :  { %v10983_v23 = vpop.f32.mrb[233].mxu1 }
 0x513   :  { %v10984_v36 = vadd.f32 %v10983_v23, %v10982_v37  ;;  %v10985_v9 = vpop.f32.mrb[234].mxu1 }
 0x514   :  { %v10986_v10 = vpop.f32.mrb[235].mxu1 }
 0x515   :  { %v15235_v19 = vadd.f32 %v10984_v36, %v8341_v48  ;;  %v10987_v63 = vadd.f32 %v10986_v10, %v10985_v9 }
 0x517   :  { %v15237_v29 = vadd.f32 %v10987_v63, %v8344_v6 }
 0x519   :  { %v10988_v49 = vpop.f32.mrb[236].mxu1 }
 0x51a   :  { %v10989_v55 = vpop.f32.mrb[237].mxu1 }
 0x51b   :  { %v10990_v3 = vadd.f32 %v10989_v55, %v10988_v49  ;;  %v10991_v28 = vpop.f32.mrb[238].mxu1 }
 0x51c   :  { %v10992_v35 = vpop.f32.mrb[239].mxu1 }
 0x51d   :  { %v15243_v15 = vadd.f32 %v10990_v3, %v8349_v53  ;;  %v10993_v13 = vadd.f32 %v10992_v35, %v10991_v28 }
 0x51f   :  { %v15245_v41 = vadd.f32 %v10993_v13, %v8352_v2 }
 0x521   :  { %v11010_v32 = vpop.f32.mrb[240].mxu1 }
 0x522   :  { %v11011_v45 = vpop.f32.mrb[241].mxu1 }
 0x523   :  { %v11012_v17 = vadd.f32 %v11011_v45, %v11010_v32  ;;  %v11013_v43 = vpop.f32.mrb[242].mxu1 }
 0x524   :  { %v11014_v5 = vpop.f32.mrb[243].mxu1 }
 0x525   :  { %v11015_v7 = vadd.f32 %v11014_v5, %v11013_v43  ;;  %v15248_v40 = vadd.f32 %v11012_v17, %v15177_v26  ;;  %v13314_v5 = vld [vmem:[#allocation7] sm:$0xff] }
 0x527   :  { %v15251_v51 = vadd.f32 %v11015_v7, %v15181_v58  ;;  %v15706_v7 = vsub.s32 4, %v15700_v62 }
 0x529   :  { %v11016_v59 = vpop.f32.mrb[244].mxu1 }
 0x52a   :  { %v11017_v52 = vpop.f32.mrb[245].mxu1 }
 0x52b   :  { %v11018_v47 = vadd.f32 %v11017_v52, %v11016_v59  ;;  %v11019_v14 = vpop.f32.mrb[246].mxu1  ;;  %v15292_v59 = vrot.slane %v13314_v5, %v15706_v7 }
 0x52c   :  { %v11020_v50 = vpop.f32.mrb[247].mxu1 }
 0x52d   :  { %v11021_v4 = vadd.f32 %v11020_v50, %v11019_v14  ;;  %v8495_v8 = vadd.f32 %v11018_v47, %v15188_v22 }
 0x52f   :  { %v15255_v31 = vadd.f32 %v11021_v4, %v15191_v60 }
 0x531   :  { %v11022_v38 = vpop.f32.mrb[248].mxu1 }
 0x532   :  { %v11023_v0 = vpop.f32.mrb[249].mxu1 }
 0x533   :  { %v11024_v24 = vadd.f32 %v11023_v0, %v11022_v38  ;;  %v11025_v25 = vpop.f32.mrb[250].mxu1 }
 0x534   :  { %v11026_v26 = vpop.f32.mrb[251].mxu1 }
 0x535   :  { %v11027_v21 = vadd.f32 %v11026_v26, %v11025_v25  ;;  %v15258_v58 = vadd.f32 %v11024_v24, %v15198_v11 }
 0x537   :  { %v15261_v12 = vadd.f32 %v11027_v21, %v15201_v61 }
 0x539   :  { %v11028_v20 = vpop.f32.mrb[252].mxu1 }
 0x53a   :  { %v11029_v30 = vpop.f32.mrb[253].mxu1 }
 0x53b   :  { %v11030_v46 = vadd.f32 %v11029_v30, %v11028_v20  ;;  %v11031_v34 = vpop.f32.mrb[254].mxu1 }
 0x53c   :  { %v11032_v22 = vpop.f32.mrb[255].mxu1 }
 0x53d   :  { %v11033_v39 = vadd.f32 %v11032_v22, %v11031_v34  ;;  %v15264_v60 = vadd.f32 %v11030_v46, %v15208_v54 }
 0x53f   :  { %v15267_v18 = vadd.f32 %v11033_v39, %v15211_v27 }
 0x541   :  { %v11034_v56 = vpop.f32.mrb[0].mxu1 }
 0x542   :  { %v11035_v57 = vpop.f32.mrb[1].mxu1 }
 0x543   :  { %v11036_v16 = vadd.f32 %v11035_v57, %v11034_v56  ;;  %v11037_v11 = vpop.f32.mrb[2].mxu1 }
 0x544   :  { %v11038_v37 = vpop.f32.mrb[3].mxu1 }
 0x545   :  { %v11039_v23 = vadd.f32 %v11038_v37, %v11037_v11  ;;  %v15270_v61 = vadd.f32 %v11036_v16, %v15218_v44 }
 0x547   :  { %v15273_v48 = vadd.f32 %v11039_v23, %v15221_v42 }
 0x549   :  { %v11040_v36 = vpop.f32.mrb[4].mxu1 }
 0x54a   :  { %v11041_v9 = vpop.f32.mrb[5].mxu1 }
 0x54b   :  { %v11042_v10 = vadd.f32 %v11041_v9, %v11040_v36  ;;  %v11043_v54 = vpop.f32.mrb[6].mxu1 }
 0x54c   :  { %v11044_v6 = vpop.f32.mrb[7].mxu1 }
 0x54d   :  { %v11045_v63 = vadd.f32 %v11044_v6, %v11043_v54  ;;  %v15276_v27 = vadd.f32 %v11042_v10, %v15227_v33 }
 0x54f   :  { %v15279_v49 = vadd.f32 %v11045_v63, %v15229_v1 }
 0x551   :  { %v11046_v55 = vpop.f32.mrb[8].mxu1 }
 0x552   :  { %v11047_v53 = vpop.f32.mrb[9].mxu1 }
 0x553   :  { %v11048_v3 = vadd.f32 %v11047_v53, %v11046_v55  ;;  %v11049_v44 = vpop.f32.mrb[10].mxu1 }
 0x554   :  { %v11050_v28 = vpop.f32.mrb[11].mxu1 }
 0x555   :  { %v11051_v35 = vadd.f32 %v11050_v28, %v11049_v44  ;;  %v15282_v42 = vadd.f32 %v11048_v3, %v15235_v19  ;;  %v15707_v19 = vsub.s32 5, %v15700_v62 }
 0x557   :  { %v15285_v2 = vadd.f32 %v11051_v35, %v15237_v29  ;;  %v15296_v52 = vrot.slane %v13314_v5, %v15707_v19 }
 0x559   :  { %v11052_v13 = vpop.f32.mrb[12].mxu1 }
 0x55a   :  { %v11053_v32 = vpop.f32.mrb[13].mxu1 }
 0x55b   :  { %v11054_v45 = vadd.f32 %v11053_v32, %v11052_v13  ;;  %v11055_v33 = vpop.f32.mrb[14].mxu1 }
 0x55c   :  { %v11056_v17 = vpop.f32.mrb[15].mxu1 }
 0x55d   :  { %v11057_v43 = vadd.f32 %v11056_v17, %v11055_v33  ;;  %v15288_v1 = vadd.f32 %v11054_v45, %v15243_v15 }
 0x55f   :  { %v15299_v29 = vadd.f32 %v11057_v43, %v15245_v41 }
 0x561   :  { %v8179_v47 = vpop.f32.mrb[96].mxu0  ;;  %v11318_v14 = vpop.f32.mrb[16].mxu1 }
 0x562   :  { %v11524_v50 = vadd.f32 %v8179_v47, %v15292_v59  ;;  %v8592_v4 = vadd.f32 %v11318_v14, %v8495_v8  ;;  %v8181_v38 = vpop.f32.mrb[97].mxu0  ;;  %v8583_v15 = vpop.f32.mrb[17].mxu1 }
 0x563   :  { %v11525_v0 = vadd.f32 %v8181_v38, %v15296_v52  ;;  %v8584_v24 = vadd.f32 %v8583_v15, %v15248_v40  ;;  %v8183_v25 = vpop.f32.mrb[98].mxu0  ;;  %v11319_v26 = vpop.f32.mrb[18].mxu1 }
 0x564   :  { %v11526_v62 = vadd.f32 %v8183_v25, %v15292_v59  ;;  %v8595_v21 = vadd.f32 %v11319_v26, %v15255_v31  ;;  %v8185_v20 = vpop.f32.mrb[99].mxu0  ;;  %v8586_v41 = vpop.f32.mrb[19].mxu1  ;;  %v8650_v34 = vmax.f32 %v11524_v50, 0.0  ;;  %v8666_v8 = vmax.f32 %v8592_v4, 0.0 }
 0x565   :  { %v11527_v30 = vadd.f32 %v8185_v20, %v15296_v52  ;;  %v8587_v46 = vadd.f32 %v8586_v41, %v15251_v51  ;;  %v8651_v56 = vmax.f32 %v11525_v0, 0.0  ;;  %v8652_v57 = vmax.f32 %v8584_v24, 0.0 }
 0x566   :  { %v8657_v22 = vmax.f32 %v11526_v62, 0.0  ;;  %v8673_v39 = vmax.f32 %v8595_v21, 0.0 }
 0x567   :  { %v8658_v16 = vmax.f32 %v11527_v30, 0.0  ;;  %v8659_v40 = vmax.f32 %v8587_v46, 0.0 }
 0x568   :  { %v8762_v11 = vpack.c.bf16 %v8657_v22, %v8650_v34  ;;  %v8771_v37 = vpack.c.bf16 %v8673_v39, %v8666_v8 }
 0x569   :  { %v8763_v23 = vpack.c.bf16 %v8658_v16, %v8651_v56  ;;  %v8764_v36 = vpack.c.bf16 %v8659_v40, %v8652_v57  ;;  %v8189_v9 = vpop.f32.mrb[100].mxu0  ;;  %v11322_v31 = vpop.f32.mrb[20].mxu1 }
 0x56a   :  { %v11528_v10 = vadd.f32 %v8189_v9, %v15292_v59  ;;  %v8608_v54 = vadd.f32 %v11322_v31, %v15264_v60  ;;  %v8191_v6 = vpop.f32.mrb[101].mxu0  ;;  %v8599_v51 = vpop.f32.mrb[21].mxu1 }
 0x56b   :  { %v11529_v63 = vadd.f32 %v8191_v6, %v15296_v52  ;;  %v8600_v55 = vadd.f32 %v8599_v51, %v15258_v58  ;;  %v8193_v53 = vpop.f32.mrb[102].mxu0  ;;  %v11323_v3 = vpop.f32.mrb[22].mxu1  ;;  %9495 = vmatprep.mubr.bf16.mxu1 %v8763_v23  ;;  %11348 = vmatprep.mubr.bf16.mxu0 %v8764_v36 }
 0x56c   :  { %v11530_v44 = vadd.f32 %v8193_v53, %v15292_v59  ;;  %v8611_v28 = vadd.f32 %v11323_v3, %v15267_v18  ;;  %v8195_v35 = vpop.f32.mrb[103].mxu0  ;;  %v8602_v13 = vpop.f32.mrb[23].mxu1  ;;  %9496 = vmatmul.mubr.bf16.vlgmr.msra.gmra.mrb[64].mxu1 %v8762_v11  ;;  %11349 = vmatmul.mubr.bf16.vlgmr.msra.gmra.mrb[160].mxu0 %v8771_v37  ;;  %v8664_v45 = vmax.f32 %v11528_v10, 0.0  ;;  %v8694_v33 = vmax.f32 %v8608_v54, 0.0 }
 0x56d   :  { %v11531_v60 = vadd.f32 %v8195_v35, %v15296_v52  ;;  %v8603_v32 = vadd.f32 %v8602_v13, %v15261_v12  ;;  %v8665_v43 = vmax.f32 %v11529_v63, 0.0  ;;  %v8680_v5 = vmax.f32 %v8600_v55, 0.0 }
 0x56e   :  { %v8671_v17 = vmax.f32 %v11530_v44, 0.0  ;;  %v8701_v58 = vmax.f32 %v8611_v28, 0.0 }
 0x56f   :  { %v8672_v7 = vmax.f32 %v11531_v60, 0.0  ;;  %v8687_v19 = vmax.f32 %v8603_v32, 0.0 }
 0x570   :  { %v8769_v47 = vpack.c.bf16 %v8671_v17, %v8664_v45  ;;  %v8785_v14 = vpack.c.bf16 %v8701_v58, %v8694_v33 }
 0x571   :  { %v8770_v50 = vpack.c.bf16 %v8672_v7, %v8665_v43  ;;  %v8778_v18 = vpack.c.bf16 %v8687_v19, %v8680_v5  ;;  %v8199_v4 = vpop.f32.mrb[104].mxu0  ;;  %v11326_v38 = vpop.f32.mrb[24].mxu1 }
 0x572   :  { %v11532_v15 = vadd.f32 %v8199_v4, %v15292_v59  ;;  %v8624_v0 = vadd.f32 %v11326_v38, %v15276_v27  ;;  %v8201_v24 = vpop.f32.mrb[105].mxu0  ;;  %v8615_v12 = vpop.f32.mrb[25].mxu1 }
 0x573   :  { %v11533_v25 = vadd.f32 %v8201_v24, %v15296_v52  ;;  %v8616_v26 = vadd.f32 %v8615_v12, %v15270_v61  ;;  %v8203_v62 = vpop.f32.mrb[106].mxu0  ;;  %v11327_v21 = vpop.f32.mrb[26].mxu1  ;;  %9503 = vmatprep.mubr.bf16.mxu1 %v8770_v50  ;;  %11352 = vmatprep.mubr.bf16.mxu0 %v8778_v18 }
 0x574   :  { %v11534_v20 = vadd.f32 %v8203_v62, %v15292_v59  ;;  %v8627_v41 = vadd.f32 %v11327_v21, %v15279_v49  ;;  %v8205_v30 = vpop.f32.mrb[107].mxu0  ;;  %v8618_v46 = vpop.f32.mrb[27].mxu1  ;;  %9504 = vmatmul.mubr.bf16.gmra.mrb[68].mxu1 %v8769_v47  ;;  %11353 = vmatmul.mubr.bf16.gmra.mrb[164].mxu0 %v8785_v14  ;;  %v8678_v8 = vmax.f32 %v11532_v15, 0.0  ;;  %v8722_v22 = vmax.f32 %v8624_v0, 0.0 }
 0x575   :  { %v11535_v27 = vadd.f32 %v8205_v30, %v15296_v52  ;;  %v8619_v34 = vadd.f32 %v8618_v46, %v15273_v48  ;;  %v8679_v56 = vmax.f32 %v11533_v25, 0.0  ;;  %v8708_v57 = vmax.f32 %v8616_v26, 0.0 }
 0x576   :  { %v8685_v39 = vmax.f32 %v11534_v20, 0.0  ;;  %v8729_v61 = vmax.f32 %v8627_v41, 0.0 }
 0x577   :  { %v8686_v16 = vmax.f32 %v11535_v27, 0.0  ;;  %v8715_v40 = vmax.f32 %v8619_v34, 0.0 }
 0x578   :  { %v8776_v11 = vpack.c.bf16 %v8685_v39, %v8678_v8  ;;  %v8799_v37 = vpack.c.bf16 %v8729_v61, %v8722_v22 }
 0x579   :  { %v8777_v23 = vpack.c.bf16 %v8686_v16, %v8679_v56  ;;  %v8792_v49 = vpack.c.bf16 %v8715_v40, %v8708_v57  ;;  %v8209_v36 = vpop.f32.mrb[108].mxu0  ;;  %v11330_v9 = vpop.f32.mrb[28].mxu1 }
 0x57a   :  { %v11536_v31 = vadd.f32 %v8209_v36, %v15292_v59  ;;  %v8640_v10 = vadd.f32 %v11330_v9, %v15288_v1  ;;  %v8211_v54 = vpop.f32.mrb[109].mxu0  ;;  %v8631_v48 = vpop.f32.mrb[29].mxu1 }
 0x57b   :  { %v11537_v6 = vadd.f32 %v8211_v54, %v15296_v52  ;;  %v8632_v51 = vadd.f32 %v8631_v48, %v15282_v42  ;;  %v8213_v63 = vpop.f32.mrb[110].mxu0  ;;  %v11331_v55 = vpop.f32.mrb[30].mxu1  ;;  %9511 = vmatprep.mubr.bf16.mxu1 %v8777_v23  ;;  %11356 = vmatprep.mubr.bf16.mxu0 %v8792_v49 }
 0x57c   :  { %v11538_v53 = vadd.f32 %v8213_v63, %v15292_v59  ;;  %v8643_v3 = vadd.f32 %v11331_v55, %v15299_v29  ;;  %v8215_v44 = vpop.f32.mrb[111].mxu0  ;;  %v8634_v28 = vpop.f32.mrb[31].mxu1  ;;  %9512 = vmatmul.mubr.bf16.gmra.mrb[72].mxu1 %v8776_v11  ;;  %11357 = vmatmul.mubr.bf16.gmra.mrb[168].mxu0 %v8799_v37  ;;  %v8692_v13 = vmax.f32 %v11536_v31, 0.0  ;;  %v8750_v60 = vmax.f32 %v8640_v10, 0.0 }
 0x57d   :  { %v11539_v1 = vadd.f32 %v8215_v44, %v15296_v52  ;;  %v8635_v35 = vadd.f32 %v8634_v28, %v15285_v2  ;;  %v8693_v45 = vmax.f32 %v11537_v6, 0.0  ;;  %v8736_v33 = vmax.f32 %v8632_v51, 0.0 }
 0x57e   :  { %v8699_v32 = vmax.f32 %v11538_v53, 0.0  ;;  %v8757_v42 = vmax.f32 %v8643_v3, 0.0 }
 0x57f   :  { %v8700_v17 = vmax.f32 %v11539_v1, 0.0  ;;  %v8743_v58 = vmax.f32 %v8635_v35, 0.0 }
 0x580   :  { %v8783_v43 = vpack.c.bf16 %v8699_v32, %v8692_v13  ;;  %v8813_v5 = vpack.c.bf16 %v8757_v42, %v8750_v60 }
 0x581   :  { %v8784_v7 = vpack.c.bf16 %v8700_v17, %v8693_v45  ;;  %v8806_v29 = vpack.c.bf16 %v8743_v58, %v8736_v33  ;;  %v8219_v19 = vpop.f32.mrb[112].mxu0  ;;  %v11090_v47 = vpop.f32.mrb[32].mxu1 }
 0x582   :  { %v11540_v14 = vadd.f32 %v8219_v19, %v15292_v59  ;;  %v8221_v50 = vpop.f32.mrb[113].mxu0  ;;  %v11091_v18 = vpop.f32.mrb[33].mxu1 }
 0x583   :  { %v11541_v2 = vadd.f32 %v8221_v50, %v15296_v52  ;;  %v15334_v4 = vadd.f32 %v11091_v18, %v11090_v47  ;;  %v8223_v38 = vpop.f32.mrb[114].mxu0  ;;  %v11093_v15 = vpop.f32.mrb[34].mxu1  ;;  %9519 = vmatprep.mubr.bf16.mxu1 %v8784_v7  ;;  %11360 = vmatprep.mubr.bf16.mxu0 %v8806_v29 }
 0x584   :  { %v11542_v0 = vadd.f32 %v8223_v38, %v15292_v59  ;;  %v8225_v24 = vpop.f32.mrb[115].mxu0  ;;  %v11094_v12 = vpop.f32.mrb[35].mxu1  ;;  %9520 = vmatmul.mubr.bf16.gmra.mrb[76].mxu1 %v8783_v43  ;;  %11361 = vmatmul.mubr.bf16.gmra.mrb[172].mxu0 %v8813_v5  ;;  %v8706_v62 = vmax.f32 %v11540_v14, 0.0 }
 0x585   :  { %v11543_v25 = vadd.f32 %v8225_v24, %v15296_v52  ;;  %v15338_v26 = vadd.f32 %v11094_v12, %v11093_v15  ;;  %v8707_v20 = vmax.f32 %v11541_v2, 0.0 }
 0x586   :  { %v8713_v21 = vmax.f32 %v11542_v0, 0.0 }
 0x587   :  { %v8714_v41 = vmax.f32 %v11543_v25, 0.0 }
 0x588   :  { %v8790_v30 = vpack.c.bf16 %v8713_v21, %v8706_v62 }
 0x589   :  { %v8791_v46 = vpack.c.bf16 %v8714_v41, %v8707_v20  ;;  %v8229_v27 = vpop.f32.mrb[116].mxu0  ;;  %v11096_v34 = vpop.f32.mrb[36].mxu1 }
 0x58a   :  { %v11544_v8 = vadd.f32 %v8229_v27, %v15292_v59  ;;  %v8231_v22 = vpop.f32.mrb[117].mxu0  ;;  %v11097_v39 = vpop.f32.mrb[37].mxu1 }
 0x58b   :  { %v11545_v61 = vadd.f32 %v8231_v22, %v15296_v52  ;;  %v15342_v56 = vadd.f32 %v11097_v39, %v11096_v34  ;;  %v8233_v57 = vpop.f32.mrb[118].mxu0  ;;  %v11099_v16 = vpop.f32.mrb[38].mxu1  ;;  %9527 = vmatprep.mubr.bf16.mxu1 %v8791_v46 }
 0x58c   :  { %v11546_v40 = vadd.f32 %v8233_v57, %v15292_v59  ;;  %v8235_v11 = vpop.f32.mrb[119].mxu0  ;;  %v11100_v37 = vpop.f32.mrb[39].mxu1  ;;  %9528 = vmatmul.mubr.bf16.gmra.mrb[80].mxu1 %v8790_v30  ;;  %v8720_v36 = vmax.f32 %v11544_v8, 0.0  ;;  %v15364_v30 = vld [vmem:[#allocation10] ss:$0 sm:$0xff] }
 0x58d   :  { %v11547_v23 = vadd.f32 %v8235_v11, %v15296_v52  ;;  %v15346_v49 = vadd.f32 %v11100_v37, %v11099_v16  ;;  %v8721_v31 = vmax.f32 %v11545_v61, 0.0  ;;  %v9307_v37 = vadd.f32 %v15338_v26, %v15364_v30 }
 0x58e   :  { %v8727_v9 = vmax.f32 %v11546_v40, 0.0 }
 0x58f   :  { %v8728_v10 = vmax.f32 %v11547_v23, 0.0  ;;  %v9315_v26 = vadd.f32 %v15346_v49, %v15364_v30 }
 0x590   :  { %v8797_v54 = vpack.c.bf16 %v8727_v9, %v8720_v36 }
 0x591   :  { %v8798_v48 = vpack.c.bf16 %v8728_v10, %v8721_v31  ;;  %v8239_v6 = vpop.f32.mrb[120].mxu0  ;;  %v11102_v51 = vpop.f32.mrb[40].mxu1 }
 0x592   :  { %v11548_v63 = vadd.f32 %v8239_v6, %v15292_v59  ;;  %v8241_v55 = vpop.f32.mrb[121].mxu0  ;;  %v11103_v53 = vpop.f32.mrb[41].mxu1  ;;  %v9312_v6 = vadd.f32 %v15342_v56, %v15364_v30 }
 0x593   :  { %v11549_v3 = vadd.f32 %v8241_v55, %v15296_v52  ;;  %v15350_v44 = vadd.f32 %v11103_v53, %v11102_v51  ;;  %v8243_v28 = vpop.f32.mrb[122].mxu0  ;;  %v11105_v1 = vpop.f32.mrb[42].mxu1  ;;  %9535 = vmatprep.mubr.bf16.mxu1 %v8798_v48 }
 0x594   :  { %v11550_v35 = vadd.f32 %v8243_v28, %v15292_v59  ;;  %v8245_v13 = vpop.f32.mrb[123].mxu0  ;;  %v11106_v60 = vpop.f32.mrb[43].mxu1  ;;  %9536 = vmatmul.mubr.bf16.gmra.mrb[84].mxu1 %v8797_v54  ;;  %v8734_v45 = vmax.f32 %v11548_v63, 0.0 }
 0x595   :  { %v11551_v32 = vadd.f32 %v8245_v13, %v15296_v52  ;;  %v15354_v42 = vadd.f32 %v11106_v60, %v11105_v1  ;;  %v8735_v17 = vmax.f32 %v11549_v3, 0.0  ;;  %v9320_v56 = vadd.f32 %v15350_v44, %v15364_v30 }
 0x596   :  { %v8741_v33 = vmax.f32 %v11550_v35, 0.0 }
 0x597   :  { %v8742_v58 = vmax.f32 %v11551_v32, 0.0  ;;  %v9323_v49 = vadd.f32 %v15354_v42, %v15364_v30 }
 0x598   :  { %v8804_v43 = vpack.c.bf16 %v8741_v33, %v8734_v45 }
 0x599   :  { %v8805_v5 = vpack.c.bf16 %v8742_v58, %v8735_v17  ;;  %v8249_v7 = vpop.f32.mrb[124].mxu0  ;;  %v11108_v29 = vpop.f32.mrb[44].mxu1 }
 0x59a   :  { %v11552_v19 = vadd.f32 %v8249_v7, %v15292_v59  ;;  %v8251_v47 = vpop.f32.mrb[125].mxu0  ;;  %v11109_v14 = vpop.f32.mrb[45].mxu1 }
 0x59b   :  { %v11553_v50 = vadd.f32 %v8251_v47, %v15296_v52  ;;  %v15358_v18 = vadd.f32 %v11109_v14, %v11108_v29  ;;  %v8253_v2 = vpop.f32.mrb[126].mxu0  ;;  %v11111_v38 = vpop.f32.mrb[46].mxu1  ;;  %9543 = vmatprep.mubr.bf16.mxu1 %v8805_v5 }
 0x59c   :  { %v11554_v15 = vadd.f32 %v8253_v2, %v15292_v59  ;;  %v8255_v0 = vpop.f32.mrb[127].mxu0  ;;  %v11112_v24 = vpop.f32.mrb[47].mxu1  ;;  %9544 = vmatmul.mubr.bf16.gmra.mrb[88].mxu1 %v8804_v43  ;;  %v8748_v62 = vmax.f32 %v11552_v19, 0.0  ;;  %v9304_v59 = vadd.f32 %v15334_v4, %v15364_v30 }
 0x59d   :  { %v11555_v12 = vadd.f32 %v8255_v0, %v15296_v52  ;;  %v15362_v25 = vadd.f32 %v11112_v24, %v11111_v38  ;;  %v8749_v20 = vmax.f32 %v11553_v50, 0.0  ;;  %v9328_v44 = vadd.f32 %v15358_v18, %v15364_v30 }
 0x59e   :  { %v8755_v21 = vmax.f32 %v11554_v15, 0.0 }
 0x59f   :  { %v8756_v41 = vmax.f32 %v11555_v12, 0.0  ;;  %v9331_v42 = vadd.f32 %v15362_v25, %v15364_v30 }
 0x5a0   :  { %v8811_v46 = vpack.c.bf16 %v8755_v21, %v8748_v62 }
 0x5a1   :  { %v8812_v27 = vpack.c.bf16 %v8756_v41, %v8749_v20  ;;  %v11114_v34 = vpop.f32.mrb[48].mxu1  ;;  %v11154_v8 = vpop.f32.mrb[128].mxu0 }
 0x5a2   :  { %v11115_v22 = vpop.f32.mrb[49].mxu1  ;;  %v11155_v39 = vpop.f32.mrb[129].mxu0 }
 0x5a3   :  { %v15368_v61 = vadd.f32 %v11115_v22, %v11114_v34  ;;  %v11156_v52 = vadd.f32 %v11155_v39, %v11154_v8  ;;  %v11117_v57 = vpop.f32.mrb[50].mxu1  ;;  %v11157_v16 = vpop.f32.mrb[130].mxu0  ;;  %9551 = vmatprep.mubr.bf16.mxu1 %v8812_v27 }
 0x5a4   :  { %v11118_v40 = vpop.f32.mrb[51].mxu1  ;;  %v11158_v11 = vpop.f32.mrb[131].mxu0  ;;  %9552 = vmatmul.mubr.bf16.gmra.mrb[92].mxu1 %v8811_v46 }
 0x5a5   :  { %v15372_v23 = vadd.f32 %v11156_v52, %v9304_v59  ;;  %v11119_v36 = vadd.f32 %v11118_v40, %v11117_v57  ;;  %v11159_v9 = vadd.f32 %v11158_v11, %v11157_v16  ;;  %v9336_v18 = vadd.f32 %v15368_v61, %v15364_v30 }
 0x5a7   :  { %v15374_v31 = vadd.f32 %v11159_v9, %v9307_v37  ;;  %v9339_v40 = vadd.f32 %v11119_v36, %v15364_v30 }
 0x5a9   :  { %v11120_v10 = vpop.f32.mrb[52].mxu1  ;;  %v11160_v4 = vpop.f32.mrb[132].mxu0 }
 0x5aa   :  { %v11121_v54 = vpop.f32.mrb[53].mxu1  ;;  %v11161_v48 = vpop.f32.mrb[133].mxu0 }
 0x5ab   :  { %v11122_v51 = vadd.f32 %v11121_v54, %v11120_v10  ;;  %v11162_v63 = vadd.f32 %v11161_v48, %v11160_v4  ;;  %v11123_v55 = vpop.f32.mrb[54].mxu1  ;;  %v11163_v53 = vpop.f32.mrb[134].mxu0 }
 0x5ac   :  { %v11124_v3 = vpop.f32.mrb[55].mxu1  ;;  %v11164_v28 = vpop.f32.mrb[135].mxu0 }
 0x5ad   :  { %v15380_v1 = vadd.f32 %v11162_v63, %v9312_v6  ;;  %v11125_v35 = vadd.f32 %v11124_v3, %v11123_v55  ;;  %v11165_v13 = vadd.f32 %v11164_v28, %v11163_v53  ;;  %v9344_v4 = vadd.f32 %v11122_v51, %v15364_v30 }
 0x5af   :  { %v15382_v60 = vadd.f32 %v11165_v13, %v9315_v26  ;;  %v9347_v63 = vadd.f32 %v11125_v35, %v15364_v30 }
 0x5b1   :  { %v11126_v32 = vpop.f32.mrb[56].mxu1  ;;  %v11166_v45 = vpop.f32.mrb[136].mxu0 }
 0x5b2   :  { %v11127_v33 = vpop.f32.mrb[57].mxu1  ;;  %v11167_v17 = vpop.f32.mrb[137].mxu0 }
 0x5b3   :  { %v11128_v58 = vadd.f32 %v11127_v33, %v11126_v32  ;;  %v11168_v43 = vadd.f32 %v11167_v17, %v11166_v45  ;;  %v11129_v5 = vpop.f32.mrb[58].mxu1  ;;  %v11169_v7 = vpop.f32.mrb[138].mxu0 }
 0x5b4   :  { %v11130_v29 = vpop.f32.mrb[59].mxu1  ;;  %v11170_v19 = vpop.f32.mrb[139].mxu0 }
 0x5b5   :  { %v15388_v47 = vadd.f32 %v11168_v43, %v9320_v56  ;;  %v11131_v14 = vadd.f32 %v11130_v29, %v11129_v5  ;;  %v11171_v50 = vadd.f32 %v11170_v19, %v11169_v7  ;;  %v9352_v28 = vadd.f32 %v11128_v58, %v15364_v30 }
 0x5b7   :  { %v15390_v2 = vadd.f32 %v11171_v50, %v9323_v49  ;;  %v9355_v45 = vadd.f32 %v11131_v14, %v15364_v30 }
 0x5b9   :  { %v11132_v38 = vpop.f32.mrb[60].mxu1  ;;  %v11172_v15 = vpop.f32.mrb[140].mxu0 }
 0x5ba   :  { %v11133_v0 = vpop.f32.mrb[61].mxu1  ;;  %v11173_v24 = vpop.f32.mrb[141].mxu0 }
 0x5bb   :  { %v11134_v12 = vadd.f32 %v11133_v0, %v11132_v38  ;;  %v11174_v62 = vadd.f32 %v11173_v24, %v11172_v15  ;;  %v11135_v21 = vpop.f32.mrb[62].mxu1  ;;  %v11175_v20 = vpop.f32.mrb[142].mxu0 }
 0x5bc   :  { %v11136_v41 = vpop.f32.mrb[63].mxu1  ;;  %v11176_v46 = vpop.f32.mrb[143].mxu0 }
 0x5bd   :  { %v15396_v27 = vadd.f32 %v11174_v62, %v9328_v44  ;;  %v11137_v34 = vadd.f32 %v11136_v41, %v11135_v21  ;;  %v11177_v8 = vadd.f32 %v11176_v46, %v11175_v20  ;;  %v9360_v43 = vadd.f32 %v11134_v12, %v15364_v30 }
 0x5bf   :  { %v15398_v22 = vadd.f32 %v11177_v8, %v9331_v42  ;;  %v9363_v19 = vadd.f32 %v11137_v34, %v15364_v30 }
 0x5c1   :  { %v11178_v39 = vpop.f32.mrb[144].mxu0 }
 0x5c2   :  { %v11179_v59 = vpop.f32.mrb[145].mxu0 }
 0x5c3   :  { %v11180_v52 = vadd.f32 %v11179_v59, %v11178_v39  ;;  %v11181_v57 = vpop.f32.mrb[146].mxu0 }
 0x5c4   :  { %v11182_v16 = vpop.f32.mrb[147].mxu0 }
 0x5c5   :  { %v15403_v11 = vadd.f32 %v11180_v52, %v9336_v18  ;;  %v11183_v37 = vadd.f32 %v11182_v16, %v11181_v57 }
 0x5c7   :  { %v15405_v25 = vadd.f32 %v11183_v37, %v9339_v40 }
 0x5c9   :  { %v11184_v9 = vpop.f32.mrb[148].mxu0 }
 0x5ca   :  { %v11185_v10 = vpop.f32.mrb[149].mxu0 }
 0x5cb   :  { %v11186_v54 = vadd.f32 %v11185_v10, %v11184_v9  ;;  %v11187_v48 = vpop.f32.mrb[150].mxu0 }
 0x5cc   :  { %v11188_v6 = vpop.f32.mrb[151].mxu0 }
 0x5cd   :  { %v15409_v61 = vadd.f32 %v11186_v54, %v9344_v4  ;;  %v11189_v55 = vadd.f32 %v11188_v6, %v11187_v48 }
 0x5cf   :  { %v15411_v53 = vadd.f32 %v11189_v55, %v9347_v63 }
 0x5d1   :  { %v11190_v36 = vpop.f32.mrb[152].mxu0 }
 0x5d2   :  { %v11191_v3 = vpop.f32.mrb[153].mxu0 }
 0x5d3   :  { %v11192_v26 = vadd.f32 %v11191_v3, %v11190_v36  ;;  %v11193_v13 = vpop.f32.mrb[154].mxu0 }
 0x5d4   :  { %v11194_v32 = vpop.f32.mrb[155].mxu0 }
 0x5d5   :  { %v15415_v51 = vadd.f32 %v11192_v26, %v9352_v28  ;;  %v11195_v33 = vadd.f32 %v11194_v32, %v11193_v13 }
 0x5d7   :  { %v15417_v17 = vadd.f32 %v11195_v33, %v9355_v45 }
 0x5d9   :  { %v11196_v35 = vpop.f32.mrb[156].mxu0 }
 0x5da   :  { %v11197_v56 = vpop.f32.mrb[157].mxu0 }
 0x5db   :  { %v11198_v5 = vadd.f32 %v11197_v56, %v11196_v35  ;;  %v11199_v7 = vpop.f32.mrb[158].mxu0 }
 0x5dc   :  { %v11200_v29 = vpop.f32.mrb[159].mxu0 }
 0x5dd   :  { %v15421_v58 = vadd.f32 %v11198_v5, %v9360_v43  ;;  %v11201_v49 = vadd.f32 %v11200_v29, %v11199_v7 }
 0x5df   :  { %v15423_v50 = vadd.f32 %v11201_v49, %v9363_v19 }
 0x63f   :  { %v11218_v14 = vpop.f32.mrb[64].mxu1  ;;  %v11350_v38 = vpop.f32.mrb[160].mxu0 }
 0x640   :  { %v11219_v15 = vpop.f32.mrb[65].mxu1  ;;  %v9594_v0 = vpop.f32.mrb[161].mxu0 }
 0x641   :  { %v11220_v24 = vadd.f32 %v11219_v15, %v11218_v14  ;;  %v11221_v44 = vpop.f32.mrb[66].mxu1  ;;  %v11351_v62 = vpop.f32.mrb[162].mxu0 }
 0x642   :  { %v11222_v21 = vpop.f32.mrb[67].mxu1  ;;  %v9597_v20 = vpop.f32.mrb[163].mxu0 }
 0x643   :  { %v9498_v12 = vadd.f32 %v11220_v24, %v15372_v23  ;;  %v11223_v41 = vadd.f32 %v11222_v21, %v11221_v44 }
 0x645   :  { %v15426_v46 = vadd.f32 %v9594_v0, %v9498_v12  ;;  %v9501_v30 = vadd.f32 %v11223_v41, %v15374_v31 }
 0x647   :  { %v15429_v42 = vadd.f32 %v9597_v20, %v9501_v30  ;;  %v11224_v34 = vpop.f32.mrb[68].mxu1  ;;  %v11354_v8 = vpop.f32.mrb[164].mxu0  ;;  %9657 = vmax.xlane.f32.xlu0 %v15426_v46 }
 0x648   :  { %v11225_v39 = vpop.f32.mrb[69].mxu1  ;;  %v9610_v59 = vpop.f32.mrb[165].mxu0 }
 0x649   :  { %v11226_v18 = vadd.f32 %v11225_v39, %v11224_v34  ;;  %v11227_v52 = vpop.f32.mrb[70].mxu1  ;;  %v11355_v57 = vpop.f32.mrb[166].mxu0 }
 0x64a   :  { %v11228_v16 = vpop.f32.mrb[71].mxu1  ;;  %v9613_v40 = vpop.f32.mrb[167].mxu0 }
 0x64b   :  { %v9506_v23 = vadd.f32 %v11226_v18, %v15380_v1  ;;  %v11229_v37 = vadd.f32 %v11228_v16, %v11227_v52  ;;  %9659 = vmax.xlane.f32.xlu0 %v15429_v42 }
 0x64d   :  { %v9509_v31 = vadd.f32 %v11229_v37, %v15382_v60  ;;  %v15435_v9 = vadd.f32 %v11350_v38, %v9506_v23 }
 0x64f   :  { %v11230_v10 = vpop.f32.mrb[72].mxu1  ;;  %v11358_v4 = vpop.f32.mrb[168].mxu0  ;;  %9661 = vmax.xlane.f32.xlu1 %v15435_v9  ;;  %v15438_v54 = vadd.f32 %v11351_v62, %v9509_v31 }
 0x650   :  { %v11231_v48 = vpop.f32.mrb[73].mxu1  ;;  %v9626_v6 = vpop.f32.mrb[169].mxu0 }
 0x651   :  { %v11232_v63 = vadd.f32 %v11231_v48, %v11230_v10  ;;  %v11233_v55 = vpop.f32.mrb[74].mxu1  ;;  %v11359_v36 = vpop.f32.mrb[170].mxu0 }
 0x652   :  { %v11234_v3 = vpop.f32.mrb[75].mxu1  ;;  %v9629_v1 = vpop.f32.mrb[171].mxu0 }
 0x653   :  { %v9514_v28 = vadd.f32 %v11232_v63, %v15388_v47  ;;  %v11235_v26 = vadd.f32 %v11234_v3, %v11233_v55  ;;  %9663 = vmax.xlane.f32.xlu1 %v15438_v54 }
 0x655   :  { %v9517_v60 = vadd.f32 %v11235_v26, %v15390_v2  ;;  %v15443_v13 = vadd.f32 %v9610_v59, %v9514_v28 }
 0x657   :  { %v11236_v32 = vpop.f32.mrb[76].mxu1  ;;  %v11362_v45 = vpop.f32.mrb[172].mxu0  ;;  %9665 = vmax.xlane.f32.xlu0 %v15443_v13  ;;  %v15446_v33 = vadd.f32 %v9613_v40, %v9517_v60 }
 0x658   :  { %v11237_v35 = vpop.f32.mrb[77].mxu1  ;;  %v9642_v56 = vpop.f32.mrb[173].mxu0 }
 0x659   :  { %v11238_v43 = vadd.f32 %v11237_v35, %v11236_v32  ;;  %v11239_v5 = vpop.f32.mrb[78].mxu1  ;;  %v11363_v7 = vpop.f32.mrb[174].mxu0  ;;  %9667 = vmax.xlane.f32.xlu1 %v15446_v33 }
 0x65a   :  { %v11240_v47 = vpop.f32.mrb[79].mxu1  ;;  %v9645_v29 = vpop.f32.mrb[175].mxu0 }
 0x65b   :  { %v9522_v19 = vadd.f32 %v11238_v43, %v15396_v27  ;;  %v11241_v2 = vadd.f32 %v11240_v47, %v11239_v5 }
 0x65d   :  { %v9525_v49 = vadd.f32 %v11241_v2, %v15398_v22  ;;  %v15451_v14 = vadd.f32 %v11354_v8, %v9522_v19 }
 0x65f   :  { %v11242_v38 = vpop.f32.mrb[80].mxu1  ;;  %9669 = vmax.xlane.f32.xlu0 %v15451_v14  ;;  %v15454_v15 = vadd.f32 %v11355_v57, %v9525_v49 }
 0x660   :  { %v11243_v0 = vpop.f32.mrb[81].mxu1 }
 0x661   :  { %v11244_v24 = vadd.f32 %v11243_v0, %v11242_v38  ;;  %v11245_v44 = vpop.f32.mrb[82].mxu1  ;;  %9671 = vmax.xlane.f32.xlu1 %v15454_v15 }
 0x662   :  { %v11246_v62 = vpop.f32.mrb[83].mxu1 }
 0x663   :  { %v9530_v21 = vadd.f32 %v11244_v24, %v15403_v11  ;;  %v11247_v20 = vadd.f32 %v11246_v62, %v11245_v44 }
 0x665   :  { %v9533_v27 = vadd.f32 %v11247_v20, %v15405_v25  ;;  %v15459_v12 = vadd.f32 %v9626_v6, %v9530_v21 }
 0x667   :  { %v11248_v22 = vpop.f32.mrb[84].mxu1  ;;  %9673 = vmax.xlane.f32.xlu0 %v15459_v12  ;;  %v15462_v41 = vadd.f32 %v9629_v1, %v9533_v27 }
 0x668   :  { %v11249_v30 = vpop.f32.mrb[85].mxu1 }
 0x669   :  { %v11250_v34 = vadd.f32 %v11249_v30, %v11248_v22  ;;  %v11251_v8 = vpop.f32.mrb[86].mxu1  ;;  %9675 = vmax.xlane.f32.xlu1 %v15462_v41 }
 0x66a   :  { %v11252_v39 = vpop.f32.mrb[87].mxu1 }
 0x66b   :  { %v9538_v59 = vadd.f32 %v11250_v34, %v15409_v61  ;;  %v11253_v18 = vadd.f32 %v11252_v39, %v11251_v8 }
 0x66d   :  { %v9541_v11 = vadd.f32 %v11253_v18, %v15411_v53  ;;  %v15467_v52 = vadd.f32 %v11358_v4, %v9538_v59 }
 0x66f   :  { %v11254_v25 = vpop.f32.mrb[88].mxu1  ;;  %9677 = vmax.xlane.f32.xlu0 %v15467_v52  ;;  %v15470_v57 = vadd.f32 %v11359_v36, %v9541_v11 }
 0x670   :  { %v11255_v16 = vpop.f32.mrb[89].mxu1 }
 0x671   :  { %v11256_v40 = vadd.f32 %v11255_v16, %v11254_v25  ;;  %v11257_v23 = vpop.f32.mrb[90].mxu1  ;;  %9679 = vmax.xlane.f32.xlu1 %v15470_v57 }
 0x672   :  { %v11258_v37 = vpop.f32.mrb[91].mxu1 }
 0x673   :  { %v9546_v31 = vadd.f32 %v11256_v40, %v15415_v51  ;;  %v11259_v10 = vadd.f32 %v11258_v37, %v11257_v23 }
 0x675   :  { %v9549_v61 = vadd.f32 %v11259_v10, %v15417_v17  ;;  %v15475_v48 = vadd.f32 %v9642_v56, %v9546_v31 }
 0x677   :  { %v11260_v53 = vpop.f32.mrb[92].mxu1  ;;  %9681 = vmax.xlane.f32.xlu0 %v15475_v48  ;;  %v15478_v4 = vadd.f32 %v9645_v29, %v9549_v61 }
 0x678   :  { %v11261_v6 = vpop.f32.mrb[93].mxu1 }
 0x679   :  { %v11262_v63 = vadd.f32 %v11261_v6, %v11260_v53  ;;  %v11263_v55 = vpop.f32.mrb[94].mxu1  ;;  %9683 = vmax.xlane.f32.xlu1 %v15478_v4 }
 0x67a   :  { %v11264_v36 = vpop.f32.mrb[95].mxu1 }
 0x67b   :  { %v9554_v3 = vadd.f32 %v11262_v63, %v15421_v58  ;;  %v11265_v1 = vadd.f32 %v11264_v36, %v11263_v55 }
 0x67d   :  { %v9557_v51 = vadd.f32 %v11265_v1, %v15423_v50  ;;  %v15483_v28 = vadd.f32 %v11362_v45, %v9554_v3 }
 0x67f   :  { %9685 = vmax.xlane.f32.xlu0 %v15483_v28  ;;  %v15486_v17 = vadd.f32 %v11363_v7, %v9557_v51 }
 0x681   :  { %9687 = vmax.xlane.f32.xlu1 %v15486_v17 }
 0x6d4   :  { %v9658_v26 = vpop.xlane.xlu0 %9657 }
 0x6d5   :  { %v15490_v60 = vsub.f32 %v15426_v46, %v9658_v26 }
 0x6d7   :  { %v9705_v32 = vmul.f32 1.442695, %v15490_v60 }
 0x6d8   :  { %v9660_v35 = vpop.xlane.xlu0 %9659 }
 0x6d9   :  { %13249 = vpow2.f32 %v9705_v32  ;;  %v15494_v58 = vsub.f32 %v15429_v42, %v9660_v35 }
 0x6db   :  { %v9707_v50 = vmul.f32 1.442695, %v15494_v58 }
 0x6dc   :  { %v9662_v45 = vpop.xlane.xlu1 %9661 }
 0x6dd   :  { %13251 = vpow2.f32 %v9707_v50  ;;  %v15498_v56 = vsub.f32 %v15435_v9, %v9662_v45 }
 0x6df   :  { %v9709_v43 = vmul.f32 1.442695, %v15498_v56 }
 0x6e0   :  { %v9664_v5 = vpop.xlane.xlu1 %9663 }
 0x6e1   :  { %13253 = vpow2.f32 %v9709_v43  ;;  %v15502_v46 = vsub.f32 %v15438_v54, %v9664_v5 }
 0x6e3   :  { %v13250_v7 = vpop.eup %13249  ;;  %v9711_v47 = vmul.f32 1.442695, %v15502_v46 }
 0x6e4   :  { %9737 = vadd.xlane.f32.xlu0 %v13250_v7  ;;  %v9666_v42 = vpop.xlane.xlu0 %9665 }
 0x6e5   :  { %13255 = vpow2.f32 %v9711_v47  ;;  %v15506_v29 = vsub.f32 %v15443_v13, %v9666_v42 }
 0x6e6   :  { %v9668_v19 = vpop.xlane.xlu1 %9667 }
 0x6e7   :  { %v13252_v2 = vpop.eup %13251  ;;  %v9713_v9 = vmul.f32 1.442695, %v15506_v29  ;;  %v15510_v49 = vsub.f32 %v15446_v33, %v9668_v19 }
 0x6e8   :  { %9739 = vadd.xlane.f32.xlu1 %v13252_v2 }
 0x6e9   :  { %13257 = vpow2.f32 %v9713_v9  ;;  %v9715_v54 = vmul.f32 1.442695, %v15510_v49 }
 0x6eb   :  { %v13254_v38 = vpop.eup %13253  ;;  %13259 = vpow2.f32 %v9715_v54 }
 0x6ec   :  { %9741 = vadd.xlane.f32.xlu0 %v13254_v38  ;;  %v9670_v0 = vpop.xlane.xlu0 %9669 }
 0x6ed   :  { %v15514_v24 = vsub.f32 %v15451_v14, %v9670_v0 }
 0x6ee   :  { %v9672_v13 = vpop.xlane.xlu1 %9671 }
 0x6ef   :  { %v13256_v44 = vpop.eup %13255  ;;  %v9717_v62 = vmul.f32 1.442695, %v15514_v24  ;;  %v15518_v21 = vsub.f32 %v15454_v15, %v9672_v13 }
 0x6f0   :  { %9743 = vadd.xlane.f32.xlu1 %v13256_v44 }
 0x6f1   :  { %13261 = vpow2.f32 %v9717_v62  ;;  %v9719_v33 = vmul.f32 1.442695, %v15518_v21 }
 0x6f3   :  { %v13258_v20 = vpop.eup %13257  ;;  %13263 = vpow2.f32 %v9719_v33 }
 0x6f4   :  { %9745 = vadd.xlane.f32.xlu0 %v13258_v20  ;;  %v9674_v27 = vpop.xlane.xlu0 %9673 }
 0x6f5   :  { %v13260_v22 = vpop.eup %13259  ;;  %v15522_v30 = vsub.f32 %v15459_v12, %v9674_v27 }
 0x6f6   :  { %v9676_v14 = vpop.xlane.xlu1 %9675  ;;  %9747 = vadd.xlane.f32.xlu1 %v13260_v22 }
 0x6f7   :  { %v9721_v34 = vmul.f32 1.442695, %v15522_v30  ;;  %v15526_v8 = vsub.f32 %v15462_v41, %v9676_v14 }
 0x6f9   :  { %13265 = vpow2.f32 %v9721_v34  ;;  %v9723_v15 = vmul.f32 1.442695, %v15526_v8 }
 0x6fb   :  { %v13262_v39 = vpop.eup %13261  ;;  %13267 = vpow2.f32 %v9723_v15 }
 0x6fc   :  { %9749 = vadd.xlane.f32.xlu0 %v13262_v39  ;;  %v9678_v59 = vpop.xlane.xlu0 %9677 }
 0x6fd   :  { %v13264_v18 = vpop.eup %13263  ;;  %v15530_v11 = vsub.f32 %v15467_v52, %v9678_v59 }
 0x6fe   :  { %v9680_v12 = vpop.xlane.xlu1 %9679  ;;  %9751 = vadd.xlane.f32.xlu1 %v13264_v18 }
 0x6ff   :  { %v9725_v25 = vmul.f32 1.442695, %v15530_v11  ;;  %v15534_v16 = vsub.f32 %v15470_v57, %v9680_v12 }
 0x701   :  { %13269 = vpow2.f32 %v9725_v25  ;;  %v9727_v41 = vmul.f32 1.442695, %v15534_v16 }
 0x703   :  { %v13266_v40 = vpop.eup %13265  ;;  %13271 = vpow2.f32 %v9727_v41 }
 0x704   :  { %9753 = vadd.xlane.f32.xlu0 %v13266_v40  ;;  %v9682_v23 = vpop.xlane.xlu0 %9681 }
 0x705   :  { %v13268_v37 = vpop.eup %13267  ;;  %v15538_v31 = vsub.f32 %v15475_v48, %v9682_v23 }
 0x706   :  { %v9684_v52 = vpop.xlane.xlu1 %9683  ;;  %9755 = vadd.xlane.f32.xlu1 %v13268_v37 }
 0x707   :  { %v9729_v10 = vmul.f32 1.442695, %v15538_v31  ;;  %v15542_v61 = vsub.f32 %v15478_v4, %v9684_v52 }
 0x709   :  { %13273 = vpow2.f32 %v9729_v10  ;;  %v9731_v57 = vmul.f32 1.442695, %v15542_v61 }
 0x70b   :  { %v13270_v53 = vpop.eup %13269  ;;  %13275 = vpow2.f32 %v9731_v57 }
 0x70c   :  { %9757 = vadd.xlane.f32.xlu0 %v13270_v53  ;;  %v9686_v6 = vpop.xlane.xlu0 %9685 }
 0x70d   :  { %v13272_v63 = vpop.eup %13271  ;;  %v15546_v55 = vsub.f32 %v15483_v28, %v9686_v6 }
 0x70e   :  { %v9688_v48 = vpop.xlane.xlu1 %9687  ;;  %9759 = vadd.xlane.f32.xlu1 %v13272_v63 }
 0x70f   :  { %v9733_v36 = vmul.f32 1.442695, %v15546_v55  ;;  %v15550_v3 = vsub.f32 %v15486_v17, %v9688_v48 }
 0x711   :  { %13277 = vpow2.f32 %v9733_v36  ;;  %v9735_v4 = vmul.f32 1.442695, %v15550_v3 }
 0x713   :  { %v13274_v1 = vpop.eup %13273  ;;  %13279 = vpow2.f32 %v9735_v4 }
 0x714   :  { %9761 = vadd.xlane.f32.xlu0 %v13274_v1 }
 0x715   :  { %v13276_v51 = vpop.eup %13275 }
 0x716   :  { %9763 = vadd.xlane.f32.xlu1 %v13276_v51 }
 0x71b   :  { %v13278_v26 = vpop.eup %13277 }
 0x71c   :  { %9765 = vadd.xlane.f32.xlu0 %v13278_v26 }
 0x71d   :  { %v13280_v32 = vpop.eup %13279 }
 0x71e   :  { %9767 = vadd.xlane.f32.xlu1 %v13280_v32 }
 0x771   :  { %v9738_v28 = vpop.xlane.xlu0 %9737 }
 0x772   :  { %13281 = vlog2.f32 %v9738_v28 }
 0x775   :  { %v9740_v35 = vpop.xlane.xlu1 %9739 }
 0x776   :  { %13283 = vlog2.f32 %v9740_v35 }
 0x779   :  { %v9742_v50 = vpop.xlane.xlu0 %9741 }
 0x77a   :  { %13285 = vlog2.f32 %v9742_v50 }
 0x77c   :  { %v13282_v17 = vpop.eup %13281 }
 0x77d   :  { %v9770_v45 = vmul.f32 0.6931472, %v13282_v17  ;;  %v9744_v43 = vpop.xlane.xlu1 %9743 }
 0x77e   :  { %13287 = vlog2.f32 %v9744_v43 }
 0x77f   :  { %v9801_v5 = vsub.f32 %v15490_v60, %v9770_v45 }
 0x780   :  { %v13284_v7 = vpop.eup %13283 }
 0x781   :  { %9817 = vst [vmem:[%s15624_s7] sm:$0xff] %v9801_v5  ;;  %v9772_v47 = vmul.f32 0.6931472, %v13284_v7  ;;  %v9746_v42 = vpop.xlane.xlu0 %9745 }
 0x782   :  { %13289 = vlog2.f32 %v9746_v42 }
 0x783   :  { %v9802_v19 = vsub.f32 %v15494_v58, %v9772_v47  ;;  %v9748_v2 = vpop.xlane.xlu1 %9747 }
 0x784   :  { %v13286_v9 = vpop.eup %13285  ;;  %13291 = vlog2.f32 %v9748_v2 }
 0x785   :  { %9818 = vst [vmem:[%s15624_s7 + $0x8] sm:$0xff] %v9802_v19  ;;  %v9774_v54 = vmul.f32 0.6931472, %v13286_v9 }
 0x787   :  { %v9803_v60 = vsub.f32 %v15498_v56, %v9774_v54 }
 0x788   :  { %v13288_v38 = vpop.eup %13287 }
 0x789   :  { %9819 = vst [vmem:[%s15624_s7 + $0x10] sm:$0xff] %v9803_v60  ;;  %v9776_v0 = vmul.f32 0.6931472, %v13288_v38  ;;  %v9750_v13 = vpop.xlane.xlu0 %9749 }
 0x78a   :  { %13293 = vlog2.f32 %v9750_v13 }
 0x78b   :  { %v9804_v58 = vsub.f32 %v15502_v46, %v9776_v0  ;;  %v9752_v44 = vpop.xlane.xlu1 %9751 }
 0x78c   :  { %v13290_v62 = vpop.eup %13289  ;;  %13295 = vlog2.f32 %v9752_v44 }
 0x78d   :  { %9820 = vst [vmem:[%s15624_s7 + $0x18] sm:$0xff] %v9804_v58  ;;  %v9778_v33 = vmul.f32 0.6931472, %v13290_v62 }
 0x78e   :  { %v13292_v20 = vpop.eup %13291 }
 0x78f   :  { %v9805_v56 = vsub.f32 %v15506_v29, %v9778_v33  ;;  %v9780_v27 = vmul.f32 0.6931472, %v13292_v20 }
 0x791   :  { %9821 = vst [vmem:[%s15624_s7 + $0x20] sm:$0xff] %v9805_v56  ;;  %v9806_v22 = vsub.f32 %v15510_v49, %v9780_v27  ;;  %v9754_v14 = vpop.xlane.xlu0 %9753 }
 0x792   :  { %13297 = vlog2.f32 %v9754_v14 }
 0x793   :  { %9822 = vst [vmem:[%s15624_s7 + $0x28] sm:$0xff] %v9806_v22  ;;  %v9756_v46 = vpop.xlane.xlu1 %9755 }
 0x794   :  { %v13294_v34 = vpop.eup %13293  ;;  %13299 = vlog2.f32 %v9756_v46 }
 0x795   :  { %v9782_v15 = vmul.f32 0.6931472, %v13294_v34 }
 0x796   :  { %v13296_v39 = vpop.eup %13295 }
 0x797   :  { %v9807_v29 = vsub.f32 %v15514_v24, %v9782_v15  ;;  %v9784_v59 = vmul.f32 0.6931472, %v13296_v39 }
 0x799   :  { %9823 = vst [vmem:[%s15624_s7 + $0x30] sm:$0xff] %v9807_v29  ;;  %v9808_v49 = vsub.f32 %v15518_v21, %v9784_v59  ;;  %v9758_v18 = vpop.xlane.xlu0 %9757 }
 0x79a   :  { %13301 = vlog2.f32 %v9758_v18 }
 0x79b   :  { %9824 = vst [vmem:[%s15624_s7 + $0x38] sm:$0xff] %v9808_v49  ;;  %v9760_v12 = vpop.xlane.xlu1 %9759 }
 0x79c   :  { %v13298_v25 = vpop.eup %13297  ;;  %13303 = vlog2.f32 %v9760_v12 }
 0x79d   :  { %v9786_v41 = vmul.f32 0.6931472, %v13298_v25 }
 0x79e   :  { %v13300_v40 = vpop.eup %13299 }
 0x79f   :  { %v9809_v24 = vsub.f32 %v15522_v30, %v9786_v41  ;;  %v9788_v23 = vmul.f32 0.6931472, %v13300_v40 }
 0x7a1   :  { %9825 = vst [vmem:[%s15624_s7 + $0x40] sm:$0xff] %v9809_v24  ;;  %v9810_v21 = vsub.f32 %v15526_v8, %v9788_v23  ;;  %v9762_v37 = vpop.xlane.xlu0 %9761 }
 0x7a2   :  { %13305 = vlog2.f32 %v9762_v37 }
 0x7a3   :  { %9826 = vst [vmem:[%s15624_s7 + $0x48] sm:$0xff] %v9810_v21  ;;  %v9764_v52 = vpop.xlane.xlu1 %9763 }
 0x7a4   :  { %v13302_v10 = vpop.eup %13301  ;;  %13307 = vlog2.f32 %v9764_v52 }
 0x7a5   :  { %v9790_v57 = vmul.f32 0.6931472, %v13302_v10 }
 0x7a6   :  { %v13304_v53 = vpop.eup %13303 }
 0x7a7   :  { %v9811_v30 = vsub.f32 %v15530_v11, %v9790_v57  ;;  %v9792_v6 = vmul.f32 0.6931472, %v13304_v53 }
 0x7a9   :  { %9827 = vst [vmem:[%s15624_s7 + $0x50] sm:$0xff] %v9811_v30  ;;  %v9812_v8 = vsub.f32 %v15534_v16, %v9792_v6  ;;  %v9766_v63 = vpop.xlane.xlu0 %9765 }
 0x7aa   :  { %13309 = vlog2.f32 %v9766_v63 }
 0x7ab   :  { %9828 = vst [vmem:[%s15624_s7 + $0x58] sm:$0xff] %v9812_v8  ;;  %v9768_v48 = vpop.xlane.xlu1 %9767 }
 0x7ac   :  { %v13306_v36 = vpop.eup %13305  ;;  %13311 = vlog2.f32 %v9768_v48 }
 0x7ad   :  { %v9794_v4 = vmul.f32 0.6931472, %v13306_v36 }
 0x7ae   :  { %v13308_v1 = vpop.eup %13307 }
 0x7af   :  { %v9813_v11 = vsub.f32 %v15538_v31, %v9794_v4  ;;  %v9796_v51 = vmul.f32 0.6931472, %v13308_v1 }
 0x7b1   :  { %9829 = vst [vmem:[%s15624_s7 + $0x60] sm:$0xff] %v9813_v11  ;;  %v9814_v16 = vsub.f32 %v15542_v61, %v9796_v51 }
 0x7b3   :  { %9830 = vst [vmem:[%s15624_s7 + $0x68] sm:$0xff] %v9814_v16 }
 0x7b4   :  { %v13310_v26 = vpop.eup %13309 }
 0x7b5   :  { %v9798_v32 = vmul.f32 0.6931472, %v13310_v26 }
 0x7b6   :  { %v13312_v28 = vpop.eup %13311 }
 0x7b7   :  { %v9815_v35 = vsub.f32 %v15546_v55, %v9798_v32  ;;  %v9800_v50 = vmul.f32 0.6931472, %v13312_v28 }
 0x7b9   :  { %9831 = vst [vmem:[%s15624_s7 + $0x70] sm:$0xff] %v9815_v35  ;;  %v9816_v31 = vsub.f32 %v15550_v3, %v9800_v50 }
 0x7bb   :  { %9832 = vst [vmem:[%s15624_s7 + $0x78] sm:$0xff] %v9816_v31 }
 0x7bc   :  { %9837 = vsyncpa [#allocation3], 1 }
 0x7bd   :  { %9838 = vsyncpa [#allocation5], 1 }
 0x7be   :  { %9839 = vsyncpa [#allocation8], 1 }
 0x7bf   :  { %9840 = vsyncpa [#allocation11], 1 }

</bundles_post_ra>
